<compile_context>
chip_gen: v6e
topology: v6e:2x2x1
jax: 0.10.0
libtpu: 0.0.40
codegen_flags: <defaults>
</compile_context>

<pallas_src>
import numpy as np
import jax
import jax.numpy as jnp
from jax.experimental import pallas as pl
from jax.experimental.pallas import tpu as pltpu  # noqa: F401  (TPU backend)

H = 32               # dim_hidden
H2 = 2 * H
H3 = 3 * H
NUM_ROUNDS = 2
N = 24               # nodes in the synthetic circuit graph
NPAD = 32            # padded node count (sublane multiple of 8)
P = 8                # padded per-(level, gate-type) block rows (max group = 4)
NUM_PAIRS = 8
PAIRS_PAD = 8


# ------------------------------ fused kernel -------------------------------

def build_kernel(gid, num_rounds):
    """gid: host-side tuple of per-step weight-bank ids (0 = AND, 1 = OR)."""
    gid = tuple(int(g) for g in gid)
    num_steps = len(gid)

    def kernel(a_all_ref, gx_all_ref, sh_all_ref, sht_all_ref,   # step metadata
               x_ref, sel01_ref,                                 # node feats / rc selectors
               wc_sx_ref, bcs_ref, wcfh_ref, bcf_ref,            # GraphConv banks (2, ...)
               wih_s_ref, whh_s_ref, bih_s_ref, bhh_s_ref,       # GRU strc banks
               wih_f_ref, whh_f_ref, bih_f_ref, bhh_f_ref,       # GRU func banks
               wprob_ref, bprob_ref, wrc0_ref, wrc1_ref, brc_ref,  # readout weights
               hs_ref, hf_ref, prob_ref, isrc_ref):              # outputs
        x = x_ref[...]                                           # (NPAD, H)
        # combined state: columns [0:H] = hs, [H:2H] = hf (torch inits both to 1)
        hsf = jnp.ones((NPAD, H2), jnp.float32)

        def gru(msg, h, wih, whh, bih, bhh):
            # two fused 96-lane matmuls instead of six 32-lane ones
            gi = jnp.dot(msg, wih, preferred_element_type=jnp.float32) + bih   # (P, 3H)
            gh = jnp.dot(h, whh, preferred_element_type=jnp.float32) + bhh     # (P, 3H)
            r = jax.nn.sigmoid(gi[:, 0:H] + gh[:, 0:H])
            z = jax.nn.sigmoid(gi[:, H:H2] + gh[:, H:H2])
            n = jnp.tanh(gi[:, H2:H3] + r * gh[:, H2:H3])
            return (1.0 - z) * n + z * h

        # Fully static unrolled loops: no grid steps, no per-step DMA, weight
        # bank chosen with a compile-time index.
        for _ in range(num_rounds):
            for s in range(num_steps):
                g = gid[s]                                       # static bank select
                a = a_all_ref[s]                                 # (P, P) normalized adj [dst, src]
                gx = gx_all_ref[s]                               # (P, NPAD) gather x by ORIGINAL id
                sh = sh_all_ref[s]                               # (P, NPAD) gather hs/hf by BUG-local id
                sht = sht_all_ref[s]                             # (NPAD, P) scatter (transpose)

                x_blk = jnp.dot(gx, x, preferred_element_type=jnp.float32)   # (P, H)
                blk = jnp.dot(sh, hsf, preferred_element_type=jnp.float32)   # (P, 2H) pre-update
                hs_blk = blk[:, 0:H]
                hf_blk = blk[:, H:H2]

                # fused x-projection for strc conv + x-part of func conv (concat
                # in torch replaced by split weights)
                xw = jnp.dot(x_blk, wc_sx_ref[g],
                             preferred_element_type=jnp.float32)             # (P, 2H)
                msg_s = jnp.maximum(
                    jnp.dot(a, xw[:, 0:H], preferred_element_type=jnp.float32)
                    + bcs_ref[g], 0.0)
                xw_f = xw[:, H:H2] + jnp.dot(hs_blk, wcfh_ref[g],
                                             preferred_element_type=jnp.float32)
                msg_f = jnp.maximum(
                    jnp.dot(a, xw_f, preferred_element_type=jnp.float32)
                    + bcf_ref[g], 0.0)

                new_hs = gru(msg_s, hs_blk, wih_s_ref[g], whh_s_ref[g],
                             bih_s_ref[g], bhh_s_ref[g])
                new_hf = gru(msg_f, hf_blk, wih_f_ref[g], whh_f_ref[g],
                             bih_f_ref[g], bhh_f_ref[g])

                # single fused scatter of both states; untouched / padded rows
                # have all-zero columns in sht so they contribute exactly 0.
                delta = jnp.concatenate([new_hs, new_hf], axis=1) - blk       # (P, 2H)
                hsf = hsf + jnp.dot(sht, delta, preferred_element_type=jnp.float32)

        hs_full = hsf[:, 0:H]
        hf_full = hsf[:, H:H2]
        hs_ref[...] = hs_full
        hf_ref[...] = hf_full

        # fused readouts (sigmoid(Linear)) in the same invocation
        prob_ref[...] = jax.nn.sigmoid(
            jnp.sum(hf_full * wprob_ref[...], axis=-1, keepdims=True) + bprob_ref[...])
        rc = jnp.dot(sel01_ref[...], hs_full,
                     preferred_element_type=jnp.float32)          # (2*PAIRS_PAD, H)
        rc0 = rc[0:PAIRS_PAD, :]
        rc1 = rc[PAIRS_PAD:2 * PAIRS_PAD, :]
        isrc_ref[...] = jax.nn.sigmoid(
            jnp.sum(rc0 * wrc0_ref[...], axis=-1, keepdims=True)
            + jnp.sum(rc1 * wrc1_ref[...], axis=-1, keepdims=True)
            + brc_ref[...])

    return kernel


# --------------------------------- forward ----------------------------------

def make_forward(gid):
    kernel = build_kernel(gid, NUM_ROUNDS)

    @jax.jit
    def forward(A_all, Gx_all, Sh_all, ShT_all, x_pad, sel01, params):
        out_shape = (
            jax.ShapeDtypeStruct((NPAD, H), jnp.float32),         # hs
            jax.ShapeDtypeStruct((NPAD, H), jnp.float32),         # hf
            jax.ShapeDtypeStruct((NPAD, 1), jnp.float32),         # prob
            jax.ShapeDtypeStruct((PAIRS_PAD, 1), jnp.float32),    # is_rc
        )
        # Single invocation, no grid: every operand is a whole-array VMEM
        # resident (total working set well under 1 MB on v5e/v6e/v7x).
        hs_pad, hf_pad, prob_pad, isrc_pad = pl.pallas_call(
            kernel,
            out_shape=out_shape,
        )(A_all, Gx_all, Sh_all, ShT_all, x_pad, sel01,
          params['wc_sx'], params['bcs'], params['wcfh'], params['bcf'],
          params['wih_s'], params['whh_s'], params['bih_s'], params['bhh_s'],
          params['wih_f'], params['whh_f'], params['bih_f'], params['bhh_f'],
          params['wprob'], params['bprob'], params['wrc0'], params['wrc1'],
          params['brc'])
        return hs_pad[:N], hf_pad[:N], prob_pad[:N], isrc_pad[:NUM_PAIRS]

    return forward


# ----------------------- host-side graph preprocessing ----------------------
# Built ONCE (round-invariant): induced adjacency per (level, gate-type),
# normalized like DGL GraphConv norm='both' with degrees clamped >= 1, plus
# one-hot gather/scatter matrices.  TODO(synk): DGL subgraph bookkeeping itself
# has no Pallas equivalent; it stays as host NumPy preprocessing.

def build_step_metadata(forward_level, gate, edges):
    num_layers_f = int(forward_level.max()) + 1
    A_l, Gx_l, Sh_l, gid_l = [], [], [], []
    for level in range(1, num_layers_f):
        level_nodes = np.where(forward_level == level)[0]        # sorted, like DGL
        for bank, gtype in enumerate((1, 2)):                    # 0=AND, 1=OR
            sel = gate[level_nodes] == gtype
            n = int(sel.sum())
            if n == 0:
                continue
            assert n <= P
            gate_nodes = level_nodes[sel]                        # original ids ('x')
            local_ids = np.where(sel)[0]                         # BUG-compatible hs/hf ids
            assert len(set(local_ids.tolist())) == n             # strict one-hot scatter
            pos = {int(u): i for i, u in enumerate(gate_nodes)}
            A = np.zeros((n, n), np.float32)
            for (u, v) in edges:
                if u in pos and v in pos:
                    A[pos[v], pos[u]] += 1.0                     # [dst, src]
            out_deg = np.maximum(A.sum(axis=0), 1.0)
            in_deg = np.maximum(A.sum(axis=1), 1.0)
            A_norm = (in_deg ** -0.5)[:, None] * A * (out_deg ** -0.5)[None, :]
            A_pad = np.zeros((P, P), np.float32); A_pad[:n, :n] = A_norm
            Gx = np.zeros((P, NPAD), np.float32); Gx[np.arange(n), gate_nodes] = 1.0
            Sh = np.zeros((P, NPAD), np.float32); Sh[np.arange(n), local_ids] = 1.0
            A_l.append(A_pad); Gx_l.append(Gx); Sh_l.append(Sh); gid_l.append(bank)
    A_all = np.stack(A_l)
    Gx_all = np.stack(Gx_l)
    Sh_all = np.stack(Sh_l)
    ShT_all = np.ascontiguousarray(np.transpose(Sh_all, (0, 2, 1)))
    return A_all, Gx_all, Sh_all, ShT_all, tuple(gid_l)


# ------------------------- deterministic parameters -------------------------

def init_params(key):
    ks = jax.random.split(key, 16)
    s = 0.1

    def mat(k, a, b):
        return jax.random.normal(k, (a, b), jnp.float32) * s

    def conv(k, fin):
        k1, k2 = jax.random.split(k)
        return mat(k1, fin, H), mat(k2, 1, H)

    def gru(k):
        k1, k2, k3, k4 = jax.random.split(k, 4)
        # W_ih^T = [Wir|Wiz|Win], W_hh^T = [Whr|Whz|Whn], biases (1, 3H)
        return mat(k1, H, H3), mat(k2, H, H3), mat(k3, 1, H3), mat(k4, 1, H3)

    and_strc_w, and_strc_b = conv(ks[0], H)
    or_strc_w, or_strc_b = conv(ks[1], H)
    and_func_w, and_func_b = conv(ks[2], 2 * H)
    or_func_w, or_func_b = conv(ks[3], 2 * H)
    g_as, g_os, g_af, g_of = gru(ks[4]), gru(ks[5]), gru(ks[6]), gru(ks[7])

    return dict(
        # fused [W_conv_strc | W_conv_func(x part)] per bank  -> (2, H, 2H)
        wc_sx=jnp.stack([jnp.concatenate([and_strc_w, and_func_w[:H]], axis=1),
                         jnp.concatenate([or_strc_w, or_func_w[:H]], axis=1)]),
        bcs=jnp.stack([and_strc_b, or_strc_b]),            # (2, 1, H)
        wcfh=jnp.stack([and_func_w[H:], or_func_w[H:]]),   # (2, H, H)  concat hs part
        bcf=jnp.stack([and_func_b, or_func_b]),            # (2, 1, H)
        wih_s=jnp.stack([g_as[0], g_os[0]]),
        whh_s=jnp.stack([g_as[1], g_os[1]]),
        bih_s=jnp.stack([g_as[2], g_os[2]]),
        bhh_s=jnp.stack([g_as[3], g_os[3]]),
        wih_f=jnp.stack([g_af[0], g_of[0]]),
        whh_f=jnp.stack([g_af[1], g_of[1]]),
        bih_f=jnp.stack([g_af[2], g_of[2]]),
        bhh_f=jnp.stack([g_af[3], g_of[3]]),
        wprob=mat(ks[8], 1, H),
        bprob=mat(ks[9], 1, 1),
        wrc0=mat(ks[10], 1, H),
        wrc1=mat(ks[11], 1, H),
        brc=mat(ks[12], 1, 1),
    )


# ----------------------------------- main -----------------------------------

if __name__ == "__main__":
    key = jax.random.PRNGKey(0)
    kx, kp = jax.random.split(key)

    # synthetic circuit graph (deterministic)
    forward_level = np.array([0] * 8 + [1] * 8 + [2] * 4 + [3] * 4, np.int32)
    gate = np.array([0] * 8 + [1, 2] * 4 + [1, 1, 2, 2] + [1, 2, 1, 2], np.int32)
    edges = []
    for v in range(8, N):                        # cross-level fan-in
        preds = np.where(forward_level == forward_level[v] - 1)[0]
        edges.append((int(preds[v % len(preds)]), v))
        edges.append((int(preds[(v + 3) % len(preds)]), v))
    # intra-level same-gate edges so induced GraphConv subgraphs carry messages
    edges += [(8, 10), (10, 12), (12, 14), (9, 11), (11, 13), (13, 15),
              (16, 17), (18, 19), (20, 22), (21, 23)]

    A_all, Gx_all, Sh_all, ShT_all, gid = build_step_metadata(
        forward_level, gate, edges)

    x_feat = jax.random.normal(kx, (N, H), jnp.float32)
    x_pad = jnp.zeros((NPAD, H), jnp.float32).at[:N].set(x_feat)

    rc_pair_index = np.stack(
        [np.arange(NUM_PAIRS) % N,
         (np.arange(NUM_PAIRS) * 3 + 1) % N]).astype(np.int32)
    # stacked selectors: rows [0:8] pick hs[pair0], rows [8:16] pick hs[pair1]
    sel01 = np.zeros((2 * PAIRS_PAD, NPAD), np.float32)
    sel01[np.arange(NUM_PAIRS), rc_pair_index[0]] = 1.0
    sel01[PAIRS_PAD + np.arange(NUM_PAIRS), rc_pair_index[1]] = 1.0

    params = init_params(kp)
    forward = make_forward(gid)

    hs, hf, prob, is_rc = forward(
        jnp.asarray(A_all), jnp.asarray(Gx_all), jnp.asarray(Sh_all),
        jnp.asarray(ShT_all), x_pad, jnp.asarray(sel01), params)
    jax.block_until_ready((hs, hf, prob, is_rc))

    assert hs.shape == (N, H) and hf.shape == (N, H)
    assert prob.shape == (N, 1) and is_rc.shape == (NUM_PAIRS, 1)
    assert bool(jnp.all(jnp.isfinite(hs))) and bool(jnp.all(jnp.isfinite(hf)))
    assert bool(jnp.all((prob >= 0) & (prob <= 1)))
    assert bool(jnp.all((is_rc >= 0) & (is_rc <= 1)))
    print("KERNEL_OK")
</pallas_src>

<mosaic_0001>
module attributes {stable_mosaic.version = 11 : i64} {
  func.func @kernel(%arg0: memref<6x8x8xf32, #tpu.memory_space<vmem>>, %arg1: memref<6x8x32xf32, #tpu.memory_space<vmem>>, %arg2: memref<6x8x32xf32, #tpu.memory_space<vmem>>, %arg3: memref<6x32x8xf32, #tpu.memory_space<vmem>>, %arg4: memref<32x32xf32, #tpu.memory_space<vmem>>, %arg5: memref<16x32xf32, #tpu.memory_space<vmem>>, %arg6: memref<2x32x64xf32, #tpu.memory_space<vmem>>, %arg7: memref<2x1x32xf32, #tpu.memory_space<vmem>>, %arg8: memref<2x32x32xf32, #tpu.memory_space<vmem>>, %arg9: memref<2x1x32xf32, #tpu.memory_space<vmem>>, %arg10: memref<2x32x96xf32, #tpu.memory_space<vmem>>, %arg11: memref<2x32x96xf32, #tpu.memory_space<vmem>>, %arg12: memref<2x1x96xf32, #tpu.memory_space<vmem>>, %arg13: memref<2x1x96xf32, #tpu.memory_space<vmem>>, %arg14: memref<2x32x96xf32, #tpu.memory_space<vmem>>, %arg15: memref<2x32x96xf32, #tpu.memory_space<vmem>>, %arg16: memref<2x1x96xf32, #tpu.memory_space<vmem>>, %arg17: memref<2x1x96xf32, #tpu.memory_space<vmem>>, %arg18: memref<1x32xf32, #tpu.memory_space<vmem>>, %arg19: memref<1x1xf32, #tpu.memory_space<vmem>>, %arg20: memref<1x32xf32, #tpu.memory_space<vmem>>, %arg21: memref<1x32xf32, #tpu.memory_space<vmem>>, %arg22: memref<1x1xf32, #tpu.memory_space<vmem>>, %arg23: memref<32x32xf32, #tpu.memory_space<vmem>>, %arg24: memref<32x32xf32, #tpu.memory_space<vmem>>, %arg25: memref<32x1xf32, #tpu.memory_space<vmem>>, %arg26: memref<8x1xf32, #tpu.memory_space<vmem>>) attributes {dimension_semantics = [], scalar_prefetch = 0 : i64, scratch_operands = 0 : i64, tpu.core_type = #tpu.core_type<tc>} {
    %c0 = arith.constant 0 : index
    %c0_0 = arith.constant 0 : index
    %0 = vector.load %arg4[%c0, %c0_0] : memref<32x32xf32, #tpu.memory_space<vmem>>, vector<32x32xf32>
    %cst = arith.constant 1.000000e+00 : f32
    %1 = vector.broadcast %cst : f32 to vector<32x64xf32>
    %c0_1 = arith.constant 0 : index
    %c0_2 = arith.constant 0 : index
    %c0_3 = arith.constant 0 : index
    %2 = vector.load %arg0[%c0_1, %c0_2, %c0_3] : memref<6x8x8xf32, #tpu.memory_space<vmem>>, vector<1x8x8xf32>
    %3 = vector.shape_cast %2 : vector<1x8x8xf32> to vector<8x8xf32>
    %c0_4 = arith.constant 0 : index
    %c0_5 = arith.constant 0 : index
    %c0_6 = arith.constant 0 : index
    %4 = vector.load %arg1[%c0_4, %c0_5, %c0_6] : memref<6x8x32xf32, #tpu.memory_space<vmem>>, vector<1x8x32xf32>
    %5 = vector.shape_cast %4 : vector<1x8x32xf32> to vector<8x32xf32>
    %c0_7 = arith.constant 0 : index
    %c0_8 = arith.constant 0 : index
    %c0_9 = arith.constant 0 : index
    %6 = vector.load %arg2[%c0_7, %c0_8, %c0_9] : memref<6x8x32xf32, #tpu.memory_space<vmem>>, vector<1x8x32xf32>
    %7 = vector.shape_cast %6 : vector<1x8x32xf32> to vector<8x32xf32>
    %c0_10 = arith.constant 0 : index
    %c0_11 = arith.constant 0 : index
    %c0_12 = arith.constant 0 : index
    %8 = vector.load %arg3[%c0_10, %c0_11, %c0_12] : memref<6x32x8xf32, #tpu.memory_space<vmem>>, vector<1x32x8xf32>
    %9 = vector.shape_cast %8 : vector<1x32x8xf32> to vector<32x8xf32>
    %cst_13 = arith.constant dense<0.000000e+00> : vector<8x32xf32>
    %10 = tpu.matmul %5, %0, %cst_13 {dimension_numbers = #tpu.dot_dimension_numbers<[1], [0], [0], [1], [0, 0, 1, 1], [], []>} : vector<8x32xf32>, vector<32x32xf32>, vector<8x32xf32> -> vector<8x32xf32>
    %cst_14 = arith.constant dense<0.000000e+00> : vector<8x64xf32>
    %11 = tpu.matmul %7, %1, %cst_14 {dimension_numbers = #tpu.dot_dimension_numbers<[1], [0], [0], [1], [0, 0, 1, 1], [], []>} : vector<8x32xf32>, vector<32x64xf32>, vector<8x64xf32> -> vector<8x64xf32>
    %12 = vector.extract_strided_slice %11 {offsets = [0, 0], sizes = [8, 32], strides = [1, 1]} : vector<8x64xf32> to vector<8x32xf32>
    %13 = vector.extract_strided_slice %11 {offsets = [0, 32], sizes = [8, 32], strides = [1, 1]} : vector<8x64xf32> to vector<8x32xf32>
    %c0_15 = arith.constant 0 : index
    %c0_16 = arith.constant 0 : index
    %c0_17 = arith.constant 0 : index
    %14 = vector.load %arg6[%c0_15, %c0_16, %c0_17] : memref<2x32x64xf32, #tpu.memory_space<vmem>>, vector<1x32x64xf32>
    %15 = vector.shape_cast %14 : vector<1x32x64xf32> to vector<32x64xf32>
    %cst_18 = arith.constant dense<0.000000e+00> : vector<8x64xf32>
    %16 = tpu.matmul %10, %15, %cst_18 {dimension_numbers = #tpu.dot_dimension_numbers<[1], [0], [0], [1], [0, 0, 1, 1], [], []>} : vector<8x32xf32>, vector<32x64xf32>, vector<8x64xf32> -> vector<8x64xf32>
    %17 = vector.extract_strided_slice %16 {offsets = [0, 0], sizes = [8, 32], strides = [1, 1]} : vector<8x64xf32> to vector<8x32xf32>
    %cst_19 = arith.constant dense<0.000000e+00> : vector<8x32xf32>
    %18 = tpu.matmul %3, %17, %cst_19 {dimension_numbers = #tpu.dot_dimension_numbers<[1], [0], [0], [1], [0, 0, 1, 1], [], []>} : vector<8x8xf32>, vector<8x32xf32>, vector<8x32xf32> -> vector<8x32xf32>
    %c0_20 = arith.constant 0 : index
    %c0_21 = arith.constant 0 : index
    %c0_22 = arith.constant 0 : index
    %19 = vector.load %arg7[%c0_20, %c0_21, %c0_22] : memref<2x1x32xf32, #tpu.memory_space<vmem>>, vector<1x1x32xf32>
    %20 = vector.shape_cast %19 : vector<1x1x32xf32> to vector<1x32xf32>
    %21 = vector.broadcast %20 : vector<1x32xf32> to vector<8x32xf32>
    %22 = arith.addf %18, %21 : vector<8x32xf32>
    %cst_23 = arith.constant 0.000000e+00 : f32
    %23 = vector.broadcast %cst_23 : f32 to vector<8x32xf32>
    %24 = arith.maximumf %22, %23 : vector<8x32xf32>
    %25 = vector.extract_strided_slice %16 {offsets = [0, 32], sizes = [8, 32], strides = [1, 1]} : vector<8x64xf32> to vector<8x32xf32>
    %c0_24 = arith.constant 0 : index
    %c0_25 = arith.constant 0 : index
    %c0_26 = arith.constant 0 : index
    %26 = vector.load %arg8[%c0_24, %c0_25, %c0_26] : memref<2x32x32xf32, #tpu.memory_space<vmem>>, vector<1x32x32xf32>
    %27 = vector.shape_cast %26 : vector<1x32x32xf32> to vector<32x32xf32>
    %cst_27 = arith.constant dense<0.000000e+00> : vector<8x32xf32>
    %28 = tpu.matmul %12, %27, %cst_27 {dimension_numbers = #tpu.dot_dimension_numbers<[1], [0], [0], [1], [0, 0, 1, 1], [], []>} : vector<8x32xf32>, vector<32x32xf32>, vector<8x32xf32> -> vector<8x32xf32>
    %29 = arith.addf %25, %28 : vector<8x32xf32>
    %cst_28 = arith.constant dense<0.000000e+00> : vector<8x32xf32>
    %30 = tpu.matmul %3, %29, %cst_28 {dimension_numbers = #tpu.dot_dimension_numbers<[1], [0], [0], [1], [0, 0, 1, 1], [], []>} : vector<8x8xf32>, vector<8x32xf32>, vector<8x32xf32> -> vector<8x32xf32>
    %c0_29 = arith.constant 0 : index
    %c0_30 = arith.constant 0 : index
    %c0_31 = arith.constant 0 : index
    %31 = vector.load %arg9[%c0_29, %c0_30, %c0_31] : memref<2x1x32xf32, #tpu.memory_space<vmem>>, vector<1x1x32xf32>
    %32 = vector.shape_cast %31 : vector<1x1x32xf32> to vector<1x32xf32>
    %33 = vector.broadcast %32 : vector<1x32xf32> to vector<8x32xf32>
    %34 = arith.addf %30, %33 : vector<8x32xf32>
    %cst_32 = arith.constant 0.000000e+00 : f32
    %35 = vector.broadcast %cst_32 : f32 to vector<8x32xf32>
    %36 = arith.maximumf %34, %35 : vector<8x32xf32>
    %c0_33 = arith.constant 0 : index
    %c0_34 = arith.constant 0 : index
    %c0_35 = arith.constant 0 : index
    %37 = vector.load %arg10[%c0_33, %c0_34, %c0_35] : memref<2x32x96xf32, #tpu.memory_space<vmem>>, vector<1x32x96xf32>
    %38 = vector.shape_cast %37 : vector<1x32x96xf32> to vector<32x96xf32>
    %c0_36 = arith.constant 0 : index
    %c0_37 = arith.constant 0 : index
    %c0_38 = arith.constant 0 : index
    %39 = vector.load %arg11[%c0_36, %c0_37, %c0_38] : memref<2x32x96xf32, #tpu.memory_space<vmem>>, vector<1x32x96xf32>
    %40 = vector.shape_cast %39 : vector<1x32x96xf32> to vector<32x96xf32>
    %c0_39 = arith.constant 0 : index
    %c0_40 = arith.constant 0 : index
    %c0_41 = arith.constant 0 : index
    %41 = vector.load %arg12[%c0_39, %c0_40, %c0_41] : memref<2x1x96xf32, #tpu.memory_space<vmem>>, vector<1x1x96xf32>
    %42 = vector.shape_cast %41 : vector<1x1x96xf32> to vector<1x96xf32>
    %c0_42 = arith.constant 0 : index
    %c0_43 = arith.constant 0 : index
    %c0_44 = arith.constant 0 : index
    %43 = vector.load %arg13[%c0_42, %c0_43, %c0_44] : memref<2x1x96xf32, #tpu.memory_space<vmem>>, vector<1x1x96xf32>
    %44 = vector.shape_cast %43 : vector<1x1x96xf32> to vector<1x96xf32>
    %cst_45 = arith.constant dense<0.000000e+00> : vector<8x96xf32>
    %45 = tpu.matmul %24, %38, %cst_45 {dimension_numbers = #tpu.dot_dimension_numbers<[1], [0], [0], [1], [0, 0, 1, 1], [], []>} : vector<8x32xf32>, vector<32x96xf32>, vector<8x96xf32> -> vector<8x96xf32>
    %46 = vector.broadcast %42 : vector<1x96xf32> to vector<8x96xf32>
    %47 = arith.addf %45, %46 : vector<8x96xf32>
    %cst_46 = arith.constant dense<0.000000e+00> : vector<8x96xf32>
    %48 = tpu.matmul %12, %40, %cst_46 {dimension_numbers = #tpu.dot_dimension_numbers<[1], [0], [0], [1], [0, 0, 1, 1], [], []>} : vector<8x32xf32>, vector<32x96xf32>, vector<8x96xf32> -> vector<8x96xf32>
    %49 = vector.broadcast %44 : vector<1x96xf32> to vector<8x96xf32>
    %50 = arith.addf %48, %49 : vector<8x96xf32>
    %51 = vector.extract_strided_slice %47 {offsets = [0, 0], sizes = [8, 32], strides = [1, 1]} : vector<8x96xf32> to vector<8x32xf32>
    %52 = vector.extract_strided_slice %50 {offsets = [0, 0], sizes = [8, 32], strides = [1, 1]} : vector<8x96xf32> to vector<8x32xf32>
    %53 = arith.addf %51, %52 : vector<8x32xf32>
    %54 = arith.negf %53 : vector<8x32xf32>
    %55 = math.exp %54 : vector<8x32xf32>
    %cst_47 = arith.constant 1.000000e+00 : f32
    %56 = vector.broadcast %cst_47 : f32 to vector<8x32xf32>
    %57 = arith.addf %56, %55 : vector<8x32xf32>
    %58 = arith.divf %56, %57 : vector<8x32xf32>
    %59 = vector.extract_strided_slice %47 {offsets = [0, 32], sizes = [8, 32], strides = [1, 1]} : vector<8x96xf32> to vector<8x32xf32>
    %60 = vector.extract_strided_slice %50 {offsets = [0, 32], sizes = [8, 32], strides = [1, 1]} : vector<8x96xf32> to vector<8x32xf32>
    %61 = arith.addf %59, %60 : vector<8x32xf32>
    %62 = arith.negf %61 : vector<8x32xf32>
    %63 = math.exp %62 : vector<8x32xf32>
    %cst_48 = arith.constant 1.000000e+00 : f32
    %64 = vector.broadcast %cst_48 : f32 to vector<8x32xf32>
    %65 = arith.addf %64, %63 : vector<8x32xf32>
    %66 = arith.divf %64, %65 : vector<8x32xf32>
    %67 = vector.extract_strided_slice %47 {offsets = [0, 64], sizes = [8, 32], strides = [1, 1]} : vector<8x96xf32> to vector<8x32xf32>
    %68 = vector.extract_strided_slice %50 {offsets = [0, 64], sizes = [8, 32], strides = [1, 1]} : vector<8x96xf32> to vector<8x32xf32>
    %69 = arith.mulf %58, %68 : vector<8x32xf32>
    %70 = arith.addf %67, %69 : vector<8x32xf32>
    %71 = math.tanh %70 : vector<8x32xf32>
    %cst_49 = arith.constant 1.000000e+00 : f32
    %72 = vector.broadcast %cst_49 : f32 to vector<8x32xf32>
    %73 = arith.subf %72, %66 : vector<8x32xf32>
    %74 = arith.mulf %73, %71 : vector<8x32xf32>
    %75 = arith.mulf %66, %12 : vector<8x32xf32>
    %76 = arith.addf %74, %75 : vector<8x32xf32>
    %c0_50 = arith.constant 0 : index
    %c0_51 = arith.constant 0 : index
    %c0_52 = arith.constant 0 : index
    %77 = vector.load %arg14[%c0_50, %c0_51, %c0_52] : memref<2x32x96xf32, #tpu.memory_space<vmem>>, vector<1x32x96xf32>
    %78 = vector.shape_cast %77 : vector<1x32x96xf32> to vector<32x96xf32>
    %c0_53 = arith.constant 0 : index
    %c0_54 = arith.constant 0 : index
    %c0_55 = arith.constant 0 : index
    %79 = vector.load %arg15[%c0_53, %c0_54, %c0_55] : memref<2x32x96xf32, #tpu.memory_space<vmem>>, vector<1x32x96xf32>
    %80 = vector.shape_cast %79 : vector<1x32x96xf32> to vector<32x96xf32>
    %c0_56 = arith.constant 0 : index
    %c0_57 = arith.constant 0 : index
    %c0_58 = arith.constant 0 : index
    %81 = vector.load %arg16[%c0_56, %c0_57, %c0_58] : memref<2x1x96xf32, #tpu.memory_space<vmem>>, vector<1x1x96xf32>
    %82 = vector.shape_cast %81 : vector<1x1x96xf32> to vector<1x96xf32>
    %c0_59 = arith.constant 0 : index
    %c0_60 = arith.constant 0 : index
    %c0_61 = arith.constant 0 : index
    %83 = vector.load %arg17[%c0_59, %c0_60, %c0_61] : memref<2x1x96xf32, #tpu.memory_space<vmem>>, vector<1x1x96xf32>
    %84 = vector.shape_cast %83 : vector<1x1x96xf32> to vector<1x96xf32>
    %cst_62 = arith.constant dense<0.000000e+00> : vector<8x96xf32>
    %85 = tpu.matmul %36, %78, %cst_62 {dimension_numbers = #tpu.dot_dimension_numbers<[1], [0], [0], [1], [0, 0, 1, 1], [], []>} : vector<8x32xf32>, vector<32x96xf32>, vector<8x96xf32> -> vector<8x96xf32>
    %86 = vector.broadcast %82 : vector<1x96xf32> to vector<8x96xf32>
    %87 = arith.addf %85, %86 : vector<8x96xf32>
    %cst_63 = arith.constant dense<0.000000e+00> : vector<8x96xf32>
    %88 = tpu.matmul %13, %80, %cst_63 {dimension_numbers = #tpu.dot_dimension_numbers<[1], [0], [0], [1], [0, 0, 1, 1], [], []>} : vector<8x32xf32>, vector<32x96xf32>, vector<8x96xf32> -> vector<8x96xf32>
    %89 = vector.broadcast %84 : vector<1x96xf32> to vector<8x96xf32>
    %90 = arith.addf %88, %89 : vector<8x96xf32>
    %91 = vector.extract_strided_slice %87 {offsets = [0, 0], sizes = [8, 32], strides = [1, 1]} : vector<8x96xf32> to vector<8x32xf32>
    %92 = vector.extract_strided_slice %90 {offsets = [0, 0], sizes = [8, 32], strides = [1, 1]} : vector<8x96xf32> to vector<8x32xf32>
    %93 = arith.addf %91, %92 : vector<8x32xf32>
    %94 = arith.negf %93 : vector<8x32xf32>
    %95 = math.exp %94 : vector<8x32xf32>
    %cst_64 = arith.constant 1.000000e+00 : f32
    %96 = vector.broadcast %cst_64 : f32 to vector<8x32xf32>
    %97 = arith.addf %96, %95 : vector<8x32xf32>
    %98 = arith.divf %96, %97 : vector<8x32xf32>
    %99 = vector.extract_strided_slice %87 {offsets = [0, 32], sizes = [8, 32], strides = [1, 1]} : vector<8x96xf32> to vector<8x32xf32>
    %100 = vector.extract_strided_slice %90 {offsets = [0, 32], sizes = [8, 32], strides = [1, 1]} : vector<8x96xf32> to vector<8x32xf32>
    %101 = arith.addf %99, %100 : vector<8x32xf32>
    %102 = arith.negf %101 : vector<8x32xf32>
    %103 = math.exp %102 : vector<8x32xf32>
    %cst_65 = arith.constant 1.000000e+00 : f32
    %104 = vector.broadcast %cst_65 : f32 to vector<8x32xf32>
    %105 = arith.addf %104, %103 : vector<8x32xf32>
    %106 = arith.divf %104, %105 : vector<8x32xf32>
    %107 = vector.extract_strided_slice %87 {offsets = [0, 64], sizes = [8, 32], strides = [1, 1]} : vector<8x96xf32> to vector<8x32xf32>
    %108 = vector.extract_strided_slice %90 {offsets = [0, 64], sizes = [8, 32], strides = [1, 1]} : vector<8x96xf32> to vector<8x32xf32>
    %109 = arith.mulf %98, %108 : vector<8x32xf32>
    %110 = arith.addf %107, %109 : vector<8x32xf32>
    %111 = math.tanh %110 : vector<8x32xf32>
    %cst_66 = arith.constant 1.000000e+00 : f32
    %112 = vector.broadcast %cst_66 : f32 to vector<8x32xf32>
    %113 = arith.subf %112, %106 : vector<8x32xf32>
    %114 = arith.mulf %113, %111 : vector<8x32xf32>
    %115 = arith.mulf %106, %13 : vector<8x32xf32>
    %116 = arith.addf %114, %115 : vector<8x32xf32>
    %117 = tpu.concatenate %76, %116 in 1 : vector<8x32xf32>, vector<8x32xf32> -> vector<8x64xf32>
    %118 = arith.subf %117, %11 : vector<8x64xf32>
    %cst_67 = arith.constant dense<0.000000e+00> : vector<32x64xf32>
    %119 = tpu.matmul %9, %118, %cst_67 {dimension_numbers = #tpu.dot_dimension_numbers<[1], [0], [0], [1], [0, 0, 1, 1], [], []>} : vector<32x8xf32>, vector<8x64xf32>, vector<32x64xf32> -> vector<32x64xf32>
    %120 = arith.addf %1, %119 : vector<32x64xf32>
    %c1 = arith.constant 1 : index
    %c0_68 = arith.constant 0 : index
    %c0_69 = arith.constant 0 : index
    %121 = vector.load %arg0[%c1, %c0_68, %c0_69] : memref<6x8x8xf32, #tpu.memory_space<vmem>>, vector<1x8x8xf32>
    %122 = vector.shape_cast %121 : vector<1x8x8xf32> to vector<8x8xf32>
    %c1_70 = arith.constant 1 : index
    %c0_71 = arith.constant 0 : index
    %c0_72 = arith.constant 0 : index
    %123 = vector.load %arg1[%c1_70, %c0_71, %c0_72] : memref<6x8x32xf32, #tpu.memory_space<vmem>>, vector<1x8x32xf32>
    %124 = vector.shape_cast %123 : vector<1x8x32xf32> to vector<8x32xf32>
    %c1_73 = arith.constant 1 : index
    %c0_74 = arith.constant 0 : index
    %c0_75 = arith.constant 0 : index
    %125 = vector.load %arg2[%c1_73, %c0_74, %c0_75] : memref<6x8x32xf32, #tpu.memory_space<vmem>>, vector<1x8x32xf32>
    %126 = vector.shape_cast %125 : vector<1x8x32xf32> to vector<8x32xf32>
    %c1_76 = arith.constant 1 : index
    %c0_77 = arith.constant 0 : index
    %c0_78 = arith.constant 0 : index
    %127 = vector.load %arg3[%c1_76, %c0_77, %c0_78] : memref<6x32x8xf32, #tpu.memory_space<vmem>>, vector<1x32x8xf32>
    %128 = vector.shape_cast %127 : vector<1x32x8xf32> to vector<32x8xf32>
    %cst_79 = arith.constant dense<0.000000e+00> : vector<8x32xf32>
    %129 = tpu.matmul %124, %0, %cst_79 {dimension_numbers = #tpu.dot_dimension_numbers<[1], [0], [0], [1], [0, 0, 1, 1], [], []>} : vector<8x32xf32>, vector<32x32xf32>, vector<8x32xf32> -> vector<8x32xf32>
    %cst_80 = arith.constant dense<0.000000e+00> : vector<8x64xf32>
    %130 = tpu.matmul %126, %120, %cst_80 {dimension_numbers = #tpu.dot_dimension_numbers<[1], [0], [0], [1], [0, 0, 1, 1], [], []>} : vector<8x32xf32>, vector<32x64xf32>, vector<8x64xf32> -> vector<8x64xf32>
    %131 = vector.extract_strided_slice %130 {offsets = [0, 0], sizes = [8, 32], strides = [1, 1]} : vector<8x64xf32> to vector<8x32xf32>
    %132 = vector.extract_strided_slice %130 {offsets = [0, 32], sizes = [8, 32], strides = [1, 1]} : vector<8x64xf32> to vector<8x32xf32>
    %c1_81 = arith.constant 1 : index
    %c0_82 = arith.constant 0 : index
    %c0_83 = arith.constant 0 : index
    %133 = vector.load %arg6[%c1_81, %c0_82, %c0_83] : memref<2x32x64xf32, #tpu.memory_space<vmem>>, vector<1x32x64xf32>
    %134 = vector.shape_cast %133 : vector<1x32x64xf32> to vector<32x64xf32>
    %cst_84 = arith.constant dense<0.000000e+00> : vector<8x64xf32>
    %135 = tpu.matmul %129, %134, %cst_84 {dimension_numbers = #tpu.dot_dimension_numbers<[1], [0], [0], [1], [0, 0, 1, 1], [], []>} : vector<8x32xf32>, vector<32x64xf32>, vector<8x64xf32> -> vector<8x64xf32>
    %136 = vector.extract_strided_slice %135 {offsets = [0, 0], sizes = [8, 32], strides = [1, 1]} : vector<8x64xf32> to vector<8x32xf32>
    %cst_85 = arith.constant dense<0.000000e+00> : vector<8x32xf32>
    %137 = tpu.matmul %122, %136, %cst_85 {dimension_numbers = #tpu.dot_dimension_numbers<[1], [0], [0], [1], [0, 0, 1, 1], [], []>} : vector<8x8xf32>, vector<8x32xf32>, vector<8x32xf32> -> vector<8x32xf32>
    %c1_86 = arith.constant 1 : index
    %c0_87 = arith.constant 0 : index
    %c0_88 = arith.constant 0 : index
    %138 = vector.load %arg7[%c1_86, %c0_87, %c0_88] : memref<2x1x32xf32, #tpu.memory_space<vmem>>, vector<1x1x32xf32>
    %139 = vector.shape_cast %138 : vector<1x1x32xf32> to vector<1x32xf32>
    %140 = vector.broadcast %139 : vector<1x32xf32> to vector<8x32xf32>
    %141 = arith.addf %137, %140 : vector<8x32xf32>
    %cst_89 = arith.constant 0.000000e+00 : f32
    %142 = vector.broadcast %cst_89 : f32 to vector<8x32xf32>
    %143 = arith.maximumf %141, %142 : vector<8x32xf32>
    %144 = vector.extract_strided_slice %135 {offsets = [0, 32], sizes = [8, 32], strides = [1, 1]} : vector<8x64xf32> to vector<8x32xf32>
    %c1_90 = arith.constant 1 : index
    %c0_91 = arith.constant 0 : index
    %c0_92 = arith.constant 0 : index
    %145 = vector.load %arg8[%c1_90, %c0_91, %c0_92] : memref<2x32x32xf32, #tpu.memory_space<vmem>>, vector<1x32x32xf32>
    %146 = vector.shape_cast %145 : vector<1x32x32xf32> to vector<32x32xf32>
    %cst_93 = arith.constant dense<0.000000e+00> : vector<8x32xf32>
    %147 = tpu.matmul %131, %146, %cst_93 {dimension_numbers = #tpu.dot_dimension_numbers<[1], [0], [0], [1], [0, 0, 1, 1], [], []>} : vector<8x32xf32>, vector<32x32xf32>, vector<8x32xf32> -> vector<8x32xf32>
    %148 = arith.addf %144, %147 : vector<8x32xf32>
    %cst_94 = arith.constant dense<0.000000e+00> : vector<8x32xf32>
    %149 = tpu.matmul %122, %148, %cst_94 {dimension_numbers = #tpu.dot_dimension_numbers<[1], [0], [0], [1], [0, 0, 1, 1], [], []>} : vector<8x8xf32>, vector<8x32xf32>, vector<8x32xf32> -> vector<8x32xf32>
    %c1_95 = arith.constant 1 : index
    %c0_96 = arith.constant 0 : index
    %c0_97 = arith.constant 0 : index
    %150 = vector.load %arg9[%c1_95, %c0_96, %c0_97] : memref<2x1x32xf32, #tpu.memory_space<vmem>>, vector<1x1x32xf32>
    %151 = vector.shape_cast %150 : vector<1x1x32xf32> to vector<1x32xf32>
    %152 = vector.broadcast %151 : vector<1x32xf32> to vector<8x32xf32>
    %153 = arith.addf %149, %152 : vector<8x32xf32>
    %cst_98 = arith.constant 0.000000e+00 : f32
    %154 = vector.broadcast %cst_98 : f32 to vector<8x32xf32>
    %155 = arith.maximumf %153, %154 : vector<8x32xf32>
    %c1_99 = arith.constant 1 : index
    %c0_100 = arith.constant 0 : index
    %c0_101 = arith.constant 0 : index
    %156 = vector.load %arg10[%c1_99, %c0_100, %c0_101] : memref<2x32x96xf32, #tpu.memory_space<vmem>>, vector<1x32x96xf32>
    %157 = vector.shape_cast %156 : vector<1x32x96xf32> to vector<32x96xf32>
    %c1_102 = arith.constant 1 : index
    %c0_103 = arith.constant 0 : index
    %c0_104 = arith.constant 0 : index
    %158 = vector.load %arg11[%c1_102, %c0_103, %c0_104] : memref<2x32x96xf32, #tpu.memory_space<vmem>>, vector<1x32x96xf32>
    %159 = vector.shape_cast %158 : vector<1x32x96xf32> to vector<32x96xf32>
    %c1_105 = arith.constant 1 : index
    %c0_106 = arith.constant 0 : index
    %c0_107 = arith.constant 0 : index
    %160 = vector.load %arg12[%c1_105, %c0_106, %c0_107] : memref<2x1x96xf32, #tpu.memory_space<vmem>>, vector<1x1x96xf32>
    %161 = vector.shape_cast %160 : vector<1x1x96xf32> to vector<1x96xf32>
    %c1_108 = arith.constant 1 : index
    %c0_109 = arith.constant 0 : index
    %c0_110 = arith.constant 0 : index
    %162 = vector.load %arg13[%c1_108, %c0_109, %c0_110] : memref<2x1x96xf32, #tpu.memory_space<vmem>>, vector<1x1x96xf32>
    %163 = vector.shape_cast %162 : vector<1x1x96xf32> to vector<1x96xf32>
    %cst_111 = arith.constant dense<0.000000e+00> : vector<8x96xf32>
    %164 = tpu.matmul %143, %157, %cst_111 {dimension_numbers = #tpu.dot_dimension_numbers<[1], [0], [0], [1], [0, 0, 1, 1], [], []>} : vector<8x32xf32>, vector<32x96xf32>, vector<8x96xf32> -> vector<8x96xf32>
    %165 = vector.broadcast %161 : vector<1x96xf32> to vector<8x96xf32>
    %166 = arith.addf %164, %165 : vector<8x96xf32>
    %cst_112 = arith.constant dense<0.000000e+00> : vector<8x96xf32>
    %167 = tpu.matmul %131, %159, %cst_112 {dimension_numbers = #tpu.dot_dimension_numbers<[1], [0], [0], [1], [0, 0, 1, 1], [], []>} : vector<8x32xf32>, vector<32x96xf32>, vector<8x96xf32> -> vector<8x96xf32>
    %168 = vector.broadcast %163 : vector<1x96xf32> to vector<8x96xf32>
    %169 = arith.addf %167, %168 : vector<8x96xf32>
    %170 = vector.extract_strided_slice %166 {offsets = [0, 0], sizes = [8, 32], strides = [1, 1]} : vector<8x96xf32> to vector<8x32xf32>
    %171 = vector.extract_strided_slice %169 {offsets = [0, 0], sizes = [8, 32], strides = [1, 1]} : vector<8x96xf32> to vector<8x32xf32>
    %172 = arith.addf %170, %171 : vector<8x32xf32>
    %173 = arith.negf %172 : vector<8x32xf32>
    %174 = math.exp %173 : vector<8x32xf32>
    %cst_113 = arith.constant 1.000000e+00 : f32
    %175 = vector.broadcast %cst_113 : f32 to vector<8x32xf32>
    %176 = arith.addf %175, %174 : vector<8x32xf32>
    %177 = arith.divf %175, %176 : vector<8x32xf32>
    %178 = vector.extract_strided_slice %166 {offsets = [0, 32], sizes = [8, 32], strides = [1, 1]} : vector<8x96xf32> to vector<8x32xf32>
    %179 = vector.extract_strided_slice %169 {offsets = [0, 32], sizes = [8, 32], strides = [1, 1]} : vector<8x96xf32> to vector<8x32xf32>
    %180 = arith.addf %178, %179 : vector<8x32xf32>
    %181 = arith.negf %180 : vector<8x32xf32>
    %182 = math.exp %181 : vector<8x32xf32>
    %cst_114 = arith.constant 1.000000e+00 : f32
    %183 = vector.broadcast %cst_114 : f32 to vector<8x32xf32>
    %184 = arith.addf %183, %182 : vector<8x32xf32>
    %185 = arith.divf %183, %184 : vector<8x32xf32>
    %186 = vector.extract_strided_slice %166 {offsets = [0, 64], sizes = [8, 32], strides = [1, 1]} : vector<8x96xf32> to vector<8x32xf32>
    %187 = vector.extract_strided_slice %169 {offsets = [0, 64], sizes = [8, 32], strides = [1, 1]} : vector<8x96xf32> to vector<8x32xf32>
    %188 = arith.mulf %177, %187 : vector<8x32xf32>
    %189 = arith.addf %186, %188 : vector<8x32xf32>
    %190 = math.tanh %189 : vector<8x32xf32>
    %cst_115 = arith.constant 1.000000e+00 : f32
    %191 = vector.broadcast %cst_115 : f32 to vector<8x32xf32>
    %192 = arith.subf %191, %185 : vector<8x32xf32>
    %193 = arith.mulf %192, %190 : vector<8x32xf32>
    %194 = arith.mulf %185, %131 : vector<8x32xf32>
    %195 = arith.addf %193, %194 : vector<8x32xf32>
    %c1_116 = arith.constant 1 : index
    %c0_117 = arith.constant 0 : index
    %c0_118 = arith.constant 0 : index
    %196 = vector.load %arg14[%c1_116, %c0_117, %c0_118] : memref<2x32x96xf32, #tpu.memory_space<vmem>>, vector<1x32x96xf32>
    %197 = vector.shape_cast %196 : vector<1x32x96xf32> to vector<32x96xf32>
    %c1_119 = arith.constant 1 : index
    %c0_120 = arith.constant 0 : index
    %c0_121 = arith.constant 0 : index
    %198 = vector.load %arg15[%c1_119, %c0_120, %c0_121] : memref<2x32x96xf32, #tpu.memory_space<vmem>>, vector<1x32x96xf32>
    %199 = vector.shape_cast %198 : vector<1x32x96xf32> to vector<32x96xf32>
    %c1_122 = arith.constant 1 : index
    %c0_123 = arith.constant 0 : index
    %c0_124 = arith.constant 0 : index
    %200 = vector.load %arg16[%c1_122, %c0_123, %c0_124] : memref<2x1x96xf32, #tpu.memory_space<vmem>>, vector<1x1x96xf32>
    %201 = vector.shape_cast %200 : vector<1x1x96xf32> to vector<1x96xf32>
    %c1_125 = arith.constant 1 : index
    %c0_126 = arith.constant 0 : index
    %c0_127 = arith.constant 0 : index
    %202 = vector.load %arg17[%c1_125, %c0_126, %c0_127] : memref<2x1x96xf32, #tpu.memory_space<vmem>>, vector<1x1x96xf32>
    %203 = vector.shape_cast %202 : vector<1x1x96xf32> to vector<1x96xf32>
    %cst_128 = arith.constant dense<0.000000e+00> : vector<8x96xf32>
    %204 = tpu.matmul %155, %197, %cst_128 {dimension_numbers = #tpu.dot_dimension_numbers<[1], [0], [0], [1], [0, 0, 1, 1], [], []>} : vector<8x32xf32>, vector<32x96xf32>, vector<8x96xf32> -> vector<8x96xf32>
    %205 = vector.broadcast %201 : vector<1x96xf32> to vector<8x96xf32>
    %206 = arith.addf %204, %205 : vector<8x96xf32>
    %cst_129 = arith.constant dense<0.000000e+00> : vector<8x96xf32>
    %207 = tpu.matmul %132, %199, %cst_129 {dimension_numbers = #tpu.dot_dimension_numbers<[1], [0], [0], [1], [0, 0, 1, 1], [], []>} : vector<8x32xf32>, vector<32x96xf32>, vector<8x96xf32> -> vector<8x96xf32>
    %208 = vector.broadcast %203 : vector<1x96xf32> to vector<8x96xf32>
    %209 = arith.addf %207, %208 : vector<8x96xf32>
    %210 = vector.extract_strided_slice %206 {offsets = [0, 0], sizes = [8, 32], strides = [1, 1]} : vector<8x96xf32> to vector<8x32xf32>
    %211 = vector.extract_strided_slice %209 {offsets = [0, 0], sizes = [8, 32], strides = [1, 1]} : vector<8x96xf32> to vector<8x32xf32>
    %212 = arith.addf %210, %211 : vector<8x32xf32>
    %213 = arith.negf %212 : vector<8x32xf32>
    %214 = math.exp %213 : vector<8x32xf32>
    %cst_130 = arith.constant 1.000000e+00 : f32
    %215 = vector.broadcast %cst_130 : f32 to vector<8x32xf32>
    %216 = arith.addf %215, %214 : vector<8x32xf32>
    %217 = arith.divf %215, %216 : vector<8x32xf32>
    %218 = vector.extract_strided_slice %206 {offsets = [0, 32], sizes = [8, 32], strides = [1, 1]} : vector<8x96xf32> to vector<8x32xf32>
    %219 = vector.extract_strided_slice %209 {offsets = [0, 32], sizes = [8, 32], strides = [1, 1]} : vector<8x96xf32> to vector<8x32xf32>
    %220 = arith.addf %218, %219 : vector<8x32xf32>
    %221 = arith.negf %220 : vector<8x32xf32>
    %222 = math.exp %221 : vector<8x32xf32>
    %cst_131 = arith.constant 1.000000e+00 : f32
    %223 = vector.broadcast %cst_131 : f32 to vector<8x32xf32>
    %224 = arith.addf %223, %222 : vector<8x32xf32>
    %225 = arith.divf %223, %224 : vector<8x32xf32>
    %226 = vector.extract_strided_slice %206 {offsets = [0, 64], sizes = [8, 32], strides = [1, 1]} : vector<8x96xf32> to vector<8x32xf32>
    %227 = vector.extract_strided_slice %209 {offsets = [0, 64], sizes = [8, 32], strides = [1, 1]} : vector<8x96xf32> to vector<8x32xf32>
    %228 = arith.mulf %217, %227 : vector<8x32xf32>
    %229 = arith.addf %226, %228 : vector<8x32xf32>
    %230 = math.tanh %229 : vector<8x32xf32>
    %cst_132 = arith.constant 1.000000e+00 : f32
    %231 = vector.broadcast %cst_132 : f32 to vector<8x32xf32>
    %232 = arith.subf %231, %225 : vector<8x32xf32>
    %233 = arith.mulf %232, %230 : vector<8x32xf32>
    %234 = arith.mulf %225, %132 : vector<8x32xf32>
    %235 = arith.addf %233, %234 : vector<8x32xf32>
    %236 = tpu.concatenate %195, %235 in 1 : vector<8x32xf32>, vector<8x32xf32> -> vector<8x64xf32>
    %237 = arith.subf %236, %130 : vector<8x64xf32>
    %cst_133 = arith.constant dense<0.000000e+00> : vector<32x64xf32>
    %238 = tpu.matmul %128, %237, %cst_133 {dimension_numbers = #tpu.dot_dimension_numbers<[1], [0], [0], [1], [0, 0, 1, 1], [], []>} : vector<32x8xf32>, vector<8x64xf32>, vector<32x64xf32> -> vector<32x64xf32>
    %239 = arith.addf %120, %238 : vector<32x64xf32>
    %c2 = arith.constant 2 : index
    %c0_134 = arith.constant 0 : index
    %c0_135 = arith.constant 0 : index
    %240 = vector.load %arg0[%c2, %c0_134, %c0_135] : memref<6x8x8xf32, #tpu.memory_space<vmem>>, vector<1x8x8xf32>
    %241 = vector.shape_cast %240 : vector<1x8x8xf32> to vector<8x8xf32>
    %c2_136 = arith.constant 2 : index
    %c0_137 = arith.constant 0 : index
    %c0_138 = arith.constant 0 : index
    %242 = vector.load %arg1[%c2_136, %c0_137, %c0_138] : memref<6x8x32xf32, #tpu.memory_space<vmem>>, vector<1x8x32xf32>
    %243 = vector.shape_cast %242 : vector<1x8x32xf32> to vector<8x32xf32>
    %c2_139 = arith.constant 2 : index
    %c0_140 = arith.constant 0 : index
    %c0_141 = arith.constant 0 : index
    %244 = vector.load %arg2[%c2_139, %c0_140, %c0_141] : memref<6x8x32xf32, #tpu.memory_space<vmem>>, vector<1x8x32xf32>
    %245 = vector.shape_cast %244 : vector<1x8x32xf32> to vector<8x32xf32>
    %c2_142 = arith.constant 2 : index
    %c0_143 = arith.constant 0 : index
    %c0_144 = arith.constant 0 : index
    %246 = vector.load %arg3[%c2_142, %c0_143, %c0_144] : memref<6x32x8xf32, #tpu.memory_space<vmem>>, vector<1x32x8xf32>
    %247 = vector.shape_cast %246 : vector<1x32x8xf32> to vector<32x8xf32>
    %cst_145 = arith.constant dense<0.000000e+00> : vector<8x32xf32>
    %248 = tpu.matmul %243, %0, %cst_145 {dimension_numbers = #tpu.dot_dimension_numbers<[1], [0], [0], [1], [0, 0, 1, 1], [], []>} : vector<8x32xf32>, vector<32x32xf32>, vector<8x32xf32> -> vector<8x32xf32>
    %cst_146 = arith.constant dense<0.000000e+00> : vector<8x64xf32>
    %249 = tpu.matmul %245, %239, %cst_146 {dimension_numbers = #tpu.dot_dimension_numbers<[1], [0], [0], [1], [0, 0, 1, 1], [], []>} : vector<8x32xf32>, vector<32x64xf32>, vector<8x64xf32> -> vector<8x64xf32>
    %250 = vector.extract_strided_slice %249 {offsets = [0, 0], sizes = [8, 32], strides = [1, 1]} : vector<8x64xf32> to vector<8x32xf32>
    %251 = vector.extract_strided_slice %249 {offsets = [0, 32], sizes = [8, 32], strides = [1, 1]} : vector<8x64xf32> to vector<8x32xf32>
    %c0_147 = arith.constant 0 : index
    %c0_148 = arith.constant 0 : index
    %c0_149 = arith.constant 0 : index
    %252 = vector.load %arg6[%c0_147, %c0_148, %c0_149] : memref<2x32x64xf32, #tpu.memory_space<vmem>>, vector<1x32x64xf32>
    %253 = vector.shape_cast %252 : vector<1x32x64xf32> to vector<32x64xf32>
    %cst_150 = arith.constant dense<0.000000e+00> : vector<8x64xf32>
    %254 = tpu.matmul %248, %253, %cst_150 {dimension_numbers = #tpu.dot_dimension_numbers<[1], [0], [0], [1], [0, 0, 1, 1], [], []>} : vector<8x32xf32>, vector<32x64xf32>, vector<8x64xf32> -> vector<8x64xf32>
    %255 = vector.extract_strided_slice %254 {offsets = [0, 0], sizes = [8, 32], strides = [1, 1]} : vector<8x64xf32> to vector<8x32xf32>
    %cst_151 = arith.constant dense<0.000000e+00> : vector<8x32xf32>
    %256 = tpu.matmul %241, %255, %cst_151 {dimension_numbers = #tpu.dot_dimension_numbers<[1], [0], [0], [1], [0, 0, 1, 1], [], []>} : vector<8x8xf32>, vector<8x32xf32>, vector<8x32xf32> -> vector<8x32xf32>
    %c0_152 = arith.constant 0 : index
    %c0_153 = arith.constant 0 : index
    %c0_154 = arith.constant 0 : index
    %257 = vector.load %arg7[%c0_152, %c0_153, %c0_154] : memref<2x1x32xf32, #tpu.memory_space<vmem>>, vector<1x1x32xf32>
    %258 = vector.shape_cast %257 : vector<1x1x32xf32> to vector<1x32xf32>
    %259 = vector.broadcast %258 : vector<1x32xf32> to vector<8x32xf32>
    %260 = arith.addf %256, %259 : vector<8x32xf32>
    %cst_155 = arith.constant 0.000000e+00 : f32
    %261 = vector.broadcast %cst_155 : f32 to vector<8x32xf32>
    %262 = arith.maximumf %260, %261 : vector<8x32xf32>
    %263 = vector.extract_strided_slice %254 {offsets = [0, 32], sizes = [8, 32], strides = [1, 1]} : vector<8x64xf32> to vector<8x32xf32>
    %c0_156 = arith.constant 0 : index
    %c0_157 = arith.constant 0 : index
    %c0_158 = arith.constant 0 : index
    %264 = vector.load %arg8[%c0_156, %c0_157, %c0_158] : memref<2x32x32xf32, #tpu.memory_space<vmem>>, vector<1x32x32xf32>
    %265 = vector.shape_cast %264 : vector<1x32x32xf32> to vector<32x32xf32>
    %cst_159 = arith.constant dense<0.000000e+00> : vector<8x32xf32>
    %266 = tpu.matmul %250, %265, %cst_159 {dimension_numbers = #tpu.dot_dimension_numbers<[1], [0], [0], [1], [0, 0, 1, 1], [], []>} : vector<8x32xf32>, vector<32x32xf32>, vector<8x32xf32> -> vector<8x32xf32>
    %267 = arith.addf %263, %266 : vector<8x32xf32>
    %cst_160 = arith.constant dense<0.000000e+00> : vector<8x32xf32>
    %268 = tpu.matmul %241, %267, %cst_160 {dimension_numbers = #tpu.dot_dimension_numbers<[1], [0], [0], [1], [0, 0, 1, 1], [], []>} : vector<8x8xf32>, vector<8x32xf32>, vector<8x32xf32> -> vector<8x32xf32>
    %c0_161 = arith.constant 0 : index
    %c0_162 = arith.constant 0 : index
    %c0_163 = arith.constant 0 : index
    %269 = vector.load %arg9[%c0_161, %c0_162, %c0_163] : memref<2x1x32xf32, #tpu.memory_space<vmem>>, vector<1x1x32xf32>
    %270 = vector.shape_cast %269 : vector<1x1x32xf32> to vector<1x32xf32>
    %271 = vector.broadcast %270 : vector<1x32xf32> to vector<8x32xf32>
    %272 = arith.addf %268, %271 : vector<8x32xf32>
    %cst_164 = arith.constant 0.000000e+00 : f32
    %273 = vector.broadcast %cst_164 : f32 to vector<8x32xf32>
    %274 = arith.maximumf %272, %273 : vector<8x32xf32>
    %c0_165 = arith.constant 0 : index
    %c0_166 = arith.constant 0 : index
    %c0_167 = arith.constant 0 : index
    %275 = vector.load %arg10[%c0_165, %c0_166, %c0_167] : memref<2x32x96xf32, #tpu.memory_space<vmem>>, vector<1x32x96xf32>
    %276 = vector.shape_cast %275 : vector<1x32x96xf32> to vector<32x96xf32>
    %c0_168 = arith.constant 0 : index
    %c0_169 = arith.constant 0 : index
    %c0_170 = arith.constant 0 : index
    %277 = vector.load %arg11[%c0_168, %c0_169, %c0_170] : memref<2x32x96xf32, #tpu.memory_space<vmem>>, vector<1x32x96xf32>
    %278 = vector.shape_cast %277 : vector<1x32x96xf32> to vector<32x96xf32>
    %c0_171 = arith.constant 0 : index
    %c0_172 = arith.constant 0 : index
    %c0_173 = arith.constant 0 : index
    %279 = vector.load %arg12[%c0_171, %c0_172, %c0_173] : memref<2x1x96xf32, #tpu.memory_space<vmem>>, vector<1x1x96xf32>
    %280 = vector.shape_cast %279 : vector<1x1x96xf32> to vector<1x96xf32>
    %c0_174 = arith.constant 0 : index
    %c0_175 = arith.constant 0 : index
    %c0_176 = arith.constant 0 : index
    %281 = vector.load %arg13[%c0_174, %c0_175, %c0_176] : memref<2x1x96xf32, #tpu.memory_space<vmem>>, vector<1x1x96xf32>
    %282 = vector.shape_cast %281 : vector<1x1x96xf32> to vector<1x96xf32>
    %cst_177 = arith.constant dense<0.000000e+00> : vector<8x96xf32>
    %283 = tpu.matmul %262, %276, %cst_177 {dimension_numbers = #tpu.dot_dimension_numbers<[1], [0], [0], [1], [0, 0, 1, 1], [], []>} : vector<8x32xf32>, vector<32x96xf32>, vector<8x96xf32> -> vector<8x96xf32>
    %284 = vector.broadcast %280 : vector<1x96xf32> to vector<8x96xf32>
    %285 = arith.addf %283, %284 : vector<8x96xf32>
    %cst_178 = arith.constant dense<0.000000e+00> : vector<8x96xf32>
    %286 = tpu.matmul %250, %278, %cst_178 {dimension_numbers = #tpu.dot_dimension_numbers<[1], [0], [0], [1], [0, 0, 1, 1], [], []>} : vector<8x32xf32>, vector<32x96xf32>, vector<8x96xf32> -> vector<8x96xf32>
    %287 = vector.broadcast %282 : vector<1x96xf32> to vector<8x96xf32>
    %288 = arith.addf %286, %287 : vector<8x96xf32>
    %289 = vector.extract_strided_slice %285 {offsets = [0, 0], sizes = [8, 32], strides = [1, 1]} : vector<8x96xf32> to vector<8x32xf32>
    %290 = vector.extract_strided_slice %288 {offsets = [0, 0], sizes = [8, 32], strides = [1, 1]} : vector<8x96xf32> to vector<8x32xf32>
    %291 = arith.addf %289, %290 : vector<8x32xf32>
    %292 = arith.negf %291 : vector<8x32xf32>
    %293 = math.exp %292 : vector<8x32xf32>
    %cst_179 = arith.constant 1.000000e+00 : f32
    %294 = vector.broadcast %cst_179 : f32 to vector<8x32xf32>
    %295 = arith.addf %294, %293 : vector<8x32xf32>
    %296 = arith.divf %294, %295 : vector<8x32xf32>
    %297 = vector.extract_strided_slice %285 {offsets = [0, 32], sizes = [8, 32], strides = [1, 1]} : vector<8x96xf32> to vector<8x32xf32>
    %298 = vector.extract_strided_slice %288 {offsets = [0, 32], sizes = [8, 32], strides = [1, 1]} : vector<8x96xf32> to vector<8x32xf32>
    %299 = arith.addf %297, %298 : vector<8x32xf32>
    %300 = arith.negf %299 : vector<8x32xf32>
    %301 = math.exp %300 : vector<8x32xf32>
    %cst_180 = arith.constant 1.000000e+00 : f32
    %302 = vector.broadcast %cst_180 : f32 to vector<8x32xf32>
    %303 = arith.addf %302, %301 : vector<8x32xf32>
    %304 = arith.divf %302, %303 : vector<8x32xf32>
    %305 = vector.extract_strided_slice %285 {offsets = [0, 64], sizes = [8, 32], strides = [1, 1]} : vector<8x96xf32> to vector<8x32xf32>
    %306 = vector.extract_strided_slice %288 {offsets = [0, 64], sizes = [8, 32], strides = [1, 1]} : vector<8x96xf32> to vector<8x32xf32>
    %307 = arith.mulf %296, %306 : vector<8x32xf32>
    %308 = arith.addf %305, %307 : vector<8x32xf32>
    %309 = math.tanh %308 : vector<8x32xf32>
    %cst_181 = arith.constant 1.000000e+00 : f32
    %310 = vector.broadcast %cst_181 : f32 to vector<8x32xf32>
    %311 = arith.subf %310, %304 : vector<8x32xf32>
    %312 = arith.mulf %311, %309 : vector<8x32xf32>
    %313 = arith.mulf %304, %250 : vector<8x32xf32>
    %314 = arith.addf %312, %313 : vector<8x32xf32>
    %c0_182 = arith.constant 0 : index
    %c0_183 = arith.constant 0 : index
    %c0_184 = arith.constant 0 : index
    %315 = vector.load %arg14[%c0_182, %c0_183, %c0_184] : memref<2x32x96xf32, #tpu.memory_space<vmem>>, vector<1x32x96xf32>
    %316 = vector.shape_cast %315 : vector<1x32x96xf32> to vector<32x96xf32>
    %c0_185 = arith.constant 0 : index
    %c0_186 = arith.constant 0 : index
    %c0_187 = arith.constant 0 : index
    %317 = vector.load %arg15[%c0_185, %c0_186, %c0_187] : memref<2x32x96xf32, #tpu.memory_space<vmem>>, vector<1x32x96xf32>
    %318 = vector.shape_cast %317 : vector<1x32x96xf32> to vector<32x96xf32>
    %c0_188 = arith.constant 0 : index
    %c0_189 = arith.constant 0 : index
    %c0_190 = arith.constant 0 : index
    %319 = vector.load %arg16[%c0_188, %c0_189, %c0_190] : memref<2x1x96xf32, #tpu.memory_space<vmem>>, vector<1x1x96xf32>
    %320 = vector.shape_cast %319 : vector<1x1x96xf32> to vector<1x96xf32>
    %c0_191 = arith.constant 0 : index
    %c0_192 = arith.constant 0 : index
    %c0_193 = arith.constant 0 : index
    %321 = vector.load %arg17[%c0_191, %c0_192, %c0_193] : memref<2x1x96xf32, #tpu.memory_space<vmem>>, vector<1x1x96xf32>
    %322 = vector.shape_cast %321 : vector<1x1x96xf32> to vector<1x96xf32>
    %cst_194 = arith.constant dense<0.000000e+00> : vector<8x96xf32>
    %323 = tpu.matmul %274, %316, %cst_194 {dimension_numbers = #tpu.dot_dimension_numbers<[1], [0], [0], [1], [0, 0, 1, 1], [], []>} : vector<8x32xf32>, vector<32x96xf32>, vector<8x96xf32> -> vector<8x96xf32>
    %324 = vector.broadcast %320 : vector<1x96xf32> to vector<8x96xf32>
    %325 = arith.addf %323, %324 : vector<8x96xf32>
    %cst_195 = arith.constant dense<0.000000e+00> : vector<8x96xf32>
    %326 = tpu.matmul %251, %318, %cst_195 {dimension_numbers = #tpu.dot_dimension_numbers<[1], [0], [0], [1], [0, 0, 1, 1], [], []>} : vector<8x32xf32>, vector<32x96xf32>, vector<8x96xf32> -> vector<8x96xf32>
    %327 = vector.broadcast %322 : vector<1x96xf32> to vector<8x96xf32>
    %328 = arith.addf %326, %327 : vector<8x96xf32>
    %329 = vector.extract_strided_slice %325 {offsets = [0, 0], sizes = [8, 32], strides = [1, 1]} : vector<8x96xf32> to vector<8x32xf32>
    %330 = vector.extract_strided_slice %328 {offsets = [0, 0], sizes = [8, 32], strides = [1, 1]} : vector<8x96xf32> to vector<8x32xf32>
    %331 = arith.addf %329, %330 : vector<8x32xf32>
    %332 = arith.negf %331 : vector<8x32xf32>
    %333 = math.exp %332 : vector<8x32xf32>
    %cst_196 = arith.constant 1.000000e+00 : f32
    %334 = vector.broadcast %cst_196 : f32 to vector<8x32xf32>
    %335 = arith.addf %334, %333 : vector<8x32xf32>
    %336 = arith.divf %334, %335 : vector<8x32xf32>
    %337 = vector.extract_strided_slice %325 {offsets = [0, 32], sizes = [8, 32], strides = [1, 1]} : vector<8x96xf32> to vector<8x32xf32>
    %338 = vector.extract_strided_slice %328 {offsets = [0, 32], sizes = [8, 32], strides = [1, 1]} : vector<8x96xf32> to vector<8x32xf32>
    %339 = arith.addf %337, %338 : vector<8x32xf32>
    %340 = arith.negf %339 : vector<8x32xf32>
    %341 = math.exp %340 : vector<8x32xf32>
    %cst_197 = arith.constant 1.000000e+00 : f32
    %342 = vector.broadcast %cst_197 : f32 to vector<8x32xf32>
    %343 = arith.addf %342, %341 : vector<8x32xf32>
    %344 = arith.divf %342, %343 : vector<8x32xf32>
    %345 = vector.extract_strided_slice %325 {offsets = [0, 64], sizes = [8, 32], strides = [1, 1]} : vector<8x96xf32> to vector<8x32xf32>
    %346 = vector.extract_strided_slice %328 {offsets = [0, 64], sizes = [8, 32], strides = [1, 1]} : vector<8x96xf32> to vector<8x32xf32>
    %347 = arith.mulf %336, %346 : vector<8x32xf32>
    %348 = arith.addf %345, %347 : vector<8x32xf32>
    %349 = math.tanh %348 : vector<8x32xf32>
    %cst_198 = arith.constant 1.000000e+00 : f32
    %350 = vector.broadcast %cst_198 : f32 to vector<8x32xf32>
    %351 = arith.subf %350, %344 : vector<8x32xf32>
    %352 = arith.mulf %351, %349 : vector<8x32xf32>
    %353 = arith.mulf %344, %251 : vector<8x32xf32>
    %354 = arith.addf %352, %353 : vector<8x32xf32>
    %355 = tpu.concatenate %314, %354 in 1 : vector<8x32xf32>, vector<8x32xf32> -> vector<8x64xf32>
    %356 = arith.subf %355, %249 : vector<8x64xf32>
    %cst_199 = arith.constant dense<0.000000e+00> : vector<32x64xf32>
    %357 = tpu.matmul %247, %356, %cst_199 {dimension_numbers = #tpu.dot_dimension_numbers<[1], [0], [0], [1], [0, 0, 1, 1], [], []>} : vector<32x8xf32>, vector<8x64xf32>, vector<32x64xf32> -> vector<32x64xf32>
    %358 = arith.addf %239, %357 : vector<32x64xf32>
    %c3 = arith.constant 3 : index
    %c0_200 = arith.constant 0 : index
    %c0_201 = arith.constant 0 : index
    %359 = vector.load %arg0[%c3, %c0_200, %c0_201] : memref<6x8x8xf32, #tpu.memory_space<vmem>>, vector<1x8x8xf32>
    %360 = vector.shape_cast %359 : vector<1x8x8xf32> to vector<8x8xf32>
    %c3_202 = arith.constant 3 : index
    %c0_203 = arith.constant 0 : index
    %c0_204 = arith.constant 0 : index
    %361 = vector.load %arg1[%c3_202, %c0_203, %c0_204] : memref<6x8x32xf32, #tpu.memory_space<vmem>>, vector<1x8x32xf32>
    %362 = vector.shape_cast %361 : vector<1x8x32xf32> to vector<8x32xf32>
    %c3_205 = arith.constant 3 : index
    %c0_206 = arith.constant 0 : index
    %c0_207 = arith.constant 0 : index
    %363 = vector.load %arg2[%c3_205, %c0_206, %c0_207] : memref<6x8x32xf32, #tpu.memory_space<vmem>>, vector<1x8x32xf32>
    %364 = vector.shape_cast %363 : vector<1x8x32xf32> to vector<8x32xf32>
    %c3_208 = arith.constant 3 : index
    %c0_209 = arith.constant 0 : index
    %c0_210 = arith.constant 0 : index
    %365 = vector.load %arg3[%c3_208, %c0_209, %c0_210] : memref<6x32x8xf32, #tpu.memory_space<vmem>>, vector<1x32x8xf32>
    %366 = vector.shape_cast %365 : vector<1x32x8xf32> to vector<32x8xf32>
    %cst_211 = arith.constant dense<0.000000e+00> : vector<8x32xf32>
    %367 = tpu.matmul %362, %0, %cst_211 {dimension_numbers = #tpu.dot_dimension_numbers<[1], [0], [0], [1], [0, 0, 1, 1], [], []>} : vector<8x32xf32>, vector<32x32xf32>, vector<8x32xf32> -> vector<8x32xf32>
    %cst_212 = arith.constant dense<0.000000e+00> : vector<8x64xf32>
    %368 = tpu.matmul %364, %358, %cst_212 {dimension_numbers = #tpu.dot_dimension_numbers<[1], [0], [0], [1], [0, 0, 1, 1], [], []>} : vector<8x32xf32>, vector<32x64xf32>, vector<8x64xf32> -> vector<8x64xf32>
    %369 = vector.extract_strided_slice %368 {offsets = [0, 0], sizes = [8, 32], strides = [1, 1]} : vector<8x64xf32> to vector<8x32xf32>
    %370 = vector.extract_strided_slice %368 {offsets = [0, 32], sizes = [8, 32], strides = [1, 1]} : vector<8x64xf32> to vector<8x32xf32>
    %c1_213 = arith.constant 1 : index
    %c0_214 = arith.constant 0 : index
    %c0_215 = arith.constant 0 : index
    %371 = vector.load %arg6[%c1_213, %c0_214, %c0_215] : memref<2x32x64xf32, #tpu.memory_space<vmem>>, vector<1x32x64xf32>
    %372 = vector.shape_cast %371 : vector<1x32x64xf32> to vector<32x64xf32>
    %cst_216 = arith.constant dense<0.000000e+00> : vector<8x64xf32>
    %373 = tpu.matmul %367, %372, %cst_216 {dimension_numbers = #tpu.dot_dimension_numbers<[1], [0], [0], [1], [0, 0, 1, 1], [], []>} : vector<8x32xf32>, vector<32x64xf32>, vector<8x64xf32> -> vector<8x64xf32>
    %374 = vector.extract_strided_slice %373 {offsets = [0, 0], sizes = [8, 32], strides = [1, 1]} : vector<8x64xf32> to vector<8x32xf32>
    %cst_217 = arith.constant dense<0.000000e+00> : vector<8x32xf32>
    %375 = tpu.matmul %360, %374, %cst_217 {dimension_numbers = #tpu.dot_dimension_numbers<[1], [0], [0], [1], [0, 0, 1, 1], [], []>} : vector<8x8xf32>, vector<8x32xf32>, vector<8x32xf32> -> vector<8x32xf32>
    %c1_218 = arith.constant 1 : index
    %c0_219 = arith.constant 0 : index
    %c0_220 = arith.constant 0 : index
    %376 = vector.load %arg7[%c1_218, %c0_219, %c0_220] : memref<2x1x32xf32, #tpu.memory_space<vmem>>, vector<1x1x32xf32>
    %377 = vector.shape_cast %376 : vector<1x1x32xf32> to vector<1x32xf32>
    %378 = vector.broadcast %377 : vector<1x32xf32> to vector<8x32xf32>
    %379 = arith.addf %375, %378 : vector<8x32xf32>
    %cst_221 = arith.constant 0.000000e+00 : f32
    %380 = vector.broadcast %cst_221 : f32 to vector<8x32xf32>
    %381 = arith.maximumf %379, %380 : vector<8x32xf32>
    %382 = vector.extract_strided_slice %373 {offsets = [0, 32], sizes = [8, 32], strides = [1, 1]} : vector<8x64xf32> to vector<8x32xf32>
    %c1_222 = arith.constant 1 : index
    %c0_223 = arith.constant 0 : index
    %c0_224 = arith.constant 0 : index
    %383 = vector.load %arg8[%c1_222, %c0_223, %c0_224] : memref<2x32x32xf32, #tpu.memory_space<vmem>>, vector<1x32x32xf32>
    %384 = vector.shape_cast %383 : vector<1x32x32xf32> to vector<32x32xf32>
    %cst_225 = arith.constant dense<0.000000e+00> : vector<8x32xf32>
    %385 = tpu.matmul %369, %384, %cst_225 {dimension_numbers = #tpu.dot_dimension_numbers<[1], [0], [0], [1], [0, 0, 1, 1], [], []>} : vector<8x32xf32>, vector<32x32xf32>, vector<8x32xf32> -> vector<8x32xf32>
    %386 = arith.addf %382, %385 : vector<8x32xf32>
    %cst_226 = arith.constant dense<0.000000e+00> : vector<8x32xf32>
    %387 = tpu.matmul %360, %386, %cst_226 {dimension_numbers = #tpu.dot_dimension_numbers<[1], [0], [0], [1], [0, 0, 1, 1], [], []>} : vector<8x8xf32>, vector<8x32xf32>, vector<8x32xf32> -> vector<8x32xf32>
    %c1_227 = arith.constant 1 : index
    %c0_228 = arith.constant 0 : index
    %c0_229 = arith.constant 0 : index
    %388 = vector.load %arg9[%c1_227, %c0_228, %c0_229] : memref<2x1x32xf32, #tpu.memory_space<vmem>>, vector<1x1x32xf32>
    %389 = vector.shape_cast %388 : vector<1x1x32xf32> to vector<1x32xf32>
    %390 = vector.broadcast %389 : vector<1x32xf32> to vector<8x32xf32>
    %391 = arith.addf %387, %390 : vector<8x32xf32>
    %cst_230 = arith.constant 0.000000e+00 : f32
    %392 = vector.broadcast %cst_230 : f32 to vector<8x32xf32>
    %393 = arith.maximumf %391, %392 : vector<8x32xf32>
    %c1_231 = arith.constant 1 : index
    %c0_232 = arith.constant 0 : index
    %c0_233 = arith.constant 0 : index
    %394 = vector.load %arg10[%c1_231, %c0_232, %c0_233] : memref<2x32x96xf32, #tpu.memory_space<vmem>>, vector<1x32x96xf32>
    %395 = vector.shape_cast %394 : vector<1x32x96xf32> to vector<32x96xf32>
    %c1_234 = arith.constant 1 : index
    %c0_235 = arith.constant 0 : index
    %c0_236 = arith.constant 0 : index
    %396 = vector.load %arg11[%c1_234, %c0_235, %c0_236] : memref<2x32x96xf32, #tpu.memory_space<vmem>>, vector<1x32x96xf32>
    %397 = vector.shape_cast %396 : vector<1x32x96xf32> to vector<32x96xf32>
    %c1_237 = arith.constant 1 : index
    %c0_238 = arith.constant 0 : index
    %c0_239 = arith.constant 0 : index
    %398 = vector.load %arg12[%c1_237, %c0_238, %c0_239] : memref<2x1x96xf32, #tpu.memory_space<vmem>>, vector<1x1x96xf32>
    %399 = vector.shape_cast %398 : vector<1x1x96xf32> to vector<1x96xf32>
    %c1_240 = arith.constant 1 : index
    %c0_241 = arith.constant 0 : index
    %c0_242 = arith.constant 0 : index
    %400 = vector.load %arg13[%c1_240, %c0_241, %c0_242] : memref<2x1x96xf32, #tpu.memory_space<vmem>>, vector<1x1x96xf32>
    %401 = vector.shape_cast %400 : vector<1x1x96xf32> to vector<1x96xf32>
    %cst_243 = arith.constant dense<0.000000e+00> : vector<8x96xf32>
    %402 = tpu.matmul %381, %395, %cst_243 {dimension_numbers = #tpu.dot_dimension_numbers<[1], [0], [0], [1], [0, 0, 1, 1], [], []>} : vector<8x32xf32>, vector<32x96xf32>, vector<8x96xf32> -> vector<8x96xf32>
    %403 = vector.broadcast %399 : vector<1x96xf32> to vector<8x96xf32>
    %404 = arith.addf %402, %403 : vector<8x96xf32>
    %cst_244 = arith.constant dense<0.000000e+00> : vector<8x96xf32>
    %405 = tpu.matmul %369, %397, %cst_244 {dimension_numbers = #tpu.dot_dimension_numbers<[1], [0], [0], [1], [0, 0, 1, 1], [], []>} : vector<8x32xf32>, vector<32x96xf32>, vector<8x96xf32> -> vector<8x96xf32>
    %406 = vector.broadcast %401 : vector<1x96xf32> to vector<8x96xf32>
    %407 = arith.addf %405, %406 : vector<8x96xf32>
    %408 = vector.extract_strided_slice %404 {offsets = [0, 0], sizes = [8, 32], strides = [1, 1]} : vector<8x96xf32> to vector<8x32xf32>
    %409 = vector.extract_strided_slice %407 {offsets = [0, 0], sizes = [8, 32], strides = [1, 1]} : vector<8x96xf32> to vector<8x32xf32>
    %410 = arith.addf %408, %409 : vector<8x32xf32>
    %411 = arith.negf %410 : vector<8x32xf32>
    %412 = math.exp %411 : vector<8x32xf32>
    %cst_245 = arith.constant 1.000000e+00 : f32
    %413 = vector.broadcast %cst_245 : f32 to vector<8x32xf32>
    %414 = arith.addf %413, %412 : vector<8x32xf32>
    %415 = arith.divf %413, %414 : vector<8x32xf32>
    %416 = vector.extract_strided_slice %404 {offsets = [0, 32], sizes = [8, 32], strides = [1, 1]} : vector<8x96xf32> to vector<8x32xf32>
    %417 = vector.extract_strided_slice %407 {offsets = [0, 32], sizes = [8, 32], strides = [1, 1]} : vector<8x96xf32> to vector<8x32xf32>
    %418 = arith.addf %416, %417 : vector<8x32xf32>
    %419 = arith.negf %418 : vector<8x32xf32>
    %420 = math.exp %419 : vector<8x32xf32>
    %cst_246 = arith.constant 1.000000e+00 : f32
    %421 = vector.broadcast %cst_246 : f32 to vector<8x32xf32>
    %422 = arith.addf %421, %420 : vector<8x32xf32>
    %423 = arith.divf %421, %422 : vector<8x32xf32>
    %424 = vector.extract_strided_slice %404 {offsets = [0, 64], sizes = [8, 32], strides = [1, 1]} : vector<8x96xf32> to vector<8x32xf32>
    %425 = vector.extract_strided_slice %407 {offsets = [0, 64], sizes = [8, 32], strides = [1, 1]} : vector<8x96xf32> to vector<8x32xf32>
    %426 = arith.mulf %415, %425 : vector<8x32xf32>
    %427 = arith.addf %424, %426 : vector<8x32xf32>
    %428 = math.tanh %427 : vector<8x32xf32>
    %cst_247 = arith.constant 1.000000e+00 : f32
    %429 = vector.broadcast %cst_247 : f32 to vector<8x32xf32>
    %430 = arith.subf %429, %423 : vector<8x32xf32>
    %431 = arith.mulf %430, %428 : vector<8x32xf32>
    %432 = arith.mulf %423, %369 : vector<8x32xf32>
    %433 = arith.addf %431, %432 : vector<8x32xf32>
    %c1_248 = arith.constant 1 : index
    %c0_249 = arith.constant 0 : index
    %c0_250 = arith.constant 0 : index
    %434 = vector.load %arg14[%c1_248, %c0_249, %c0_250] : memref<2x32x96xf32, #tpu.memory_space<vmem>>, vector<1x32x96xf32>
    %435 = vector.shape_cast %434 : vector<1x32x96xf32> to vector<32x96xf32>
    %c1_251 = arith.constant 1 : index
    %c0_252 = arith.constant 0 : index
    %c0_253 = arith.constant 0 : index
    %436 = vector.load %arg15[%c1_251, %c0_252, %c0_253] : memref<2x32x96xf32, #tpu.memory_space<vmem>>, vector<1x32x96xf32>
    %437 = vector.shape_cast %436 : vector<1x32x96xf32> to vector<32x96xf32>
    %c1_254 = arith.constant 1 : index
    %c0_255 = arith.constant 0 : index
    %c0_256 = arith.constant 0 : index
    %438 = vector.load %arg16[%c1_254, %c0_255, %c0_256] : memref<2x1x96xf32, #tpu.memory_space<vmem>>, vector<1x1x96xf32>
    %439 = vector.shape_cast %438 : vector<1x1x96xf32> to vector<1x96xf32>
    %c1_257 = arith.constant 1 : index
    %c0_258 = arith.constant 0 : index
    %c0_259 = arith.constant 0 : index
    %440 = vector.load %arg17[%c1_257, %c0_258, %c0_259] : memref<2x1x96xf32, #tpu.memory_space<vmem>>, vector<1x1x96xf32>
    %441 = vector.shape_cast %440 : vector<1x1x96xf32> to vector<1x96xf32>
    %cst_260 = arith.constant dense<0.000000e+00> : vector<8x96xf32>
    %442 = tpu.matmul %393, %435, %cst_260 {dimension_numbers = #tpu.dot_dimension_numbers<[1], [0], [0], [1], [0, 0, 1, 1], [], []>} : vector<8x32xf32>, vector<32x96xf32>, vector<8x96xf32> -> vector<8x96xf32>
    %443 = vector.broadcast %439 : vector<1x96xf32> to vector<8x96xf32>
    %444 = arith.addf %442, %443 : vector<8x96xf32>
    %cst_261 = arith.constant dense<0.000000e+00> : vector<8x96xf32>
    %445 = tpu.matmul %370, %437, %cst_261 {dimension_numbers = #tpu.dot_dimension_numbers<[1], [0], [0], [1], [0, 0, 1, 1], [], []>} : vector<8x32xf32>, vector<32x96xf32>, vector<8x96xf32> -> vector<8x96xf32>
    %446 = vector.broadcast %441 : vector<1x96xf32> to vector<8x96xf32>
    %447 = arith.addf %445, %446 : vector<8x96xf32>
    %448 = vector.extract_strided_slice %444 {offsets = [0, 0], sizes = [8, 32], strides = [1, 1]} : vector<8x96xf32> to vector<8x32xf32>
    %449 = vector.extract_strided_slice %447 {offsets = [0, 0], sizes = [8, 32], strides = [1, 1]} : vector<8x96xf32> to vector<8x32xf32>
    %450 = arith.addf %448, %449 : vector<8x32xf32>
    %451 = arith.negf %450 : vector<8x32xf32>
    %452 = math.exp %451 : vector<8x32xf32>
    %cst_262 = arith.constant 1.000000e+00 : f32
    %453 = vector.broadcast %cst_262 : f32 to vector<8x32xf32>
    %454 = arith.addf %453, %452 : vector<8x32xf32>
    %455 = arith.divf %453, %454 : vector<8x32xf32>
    %456 = vector.extract_strided_slice %444 {offsets = [0, 32], sizes = [8, 32], strides = [1, 1]} : vector<8x96xf32> to vector<8x32xf32>
    %457 = vector.extract_strided_slice %447 {offsets = [0, 32], sizes = [8, 32], strides = [1, 1]} : vector<8x96xf32> to vector<8x32xf32>
    %458 = arith.addf %456, %457 : vector<8x32xf32>
    %459 = arith.negf %458 : vector<8x32xf32>
    %460 = math.exp %459 : vector<8x32xf32>
    %cst_263 = arith.constant 1.000000e+00 : f32
    %461 = vector.broadcast %cst_263 : f32 to vector<8x32xf32>
    %462 = arith.addf %461, %460 : vector<8x32xf32>
    %463 = arith.divf %461, %462 : vector<8x32xf32>
    %464 = vector.extract_strided_slice %444 {offsets = [0, 64], sizes = [8, 32], strides = [1, 1]} : vector<8x96xf32> to vector<8x32xf32>
    %465 = vector.extract_strided_slice %447 {offsets = [0, 64], sizes = [8, 32], strides = [1, 1]} : vector<8x96xf32> to vector<8x32xf32>
    %466 = arith.mulf %455, %465 : vector<8x32xf32>
    %467 = arith.addf %464, %466 : vector<8x32xf32>
    %468 = math.tanh %467 : vector<8x32xf32>
    %cst_264 = arith.constant 1.000000e+00 : f32
    %469 = vector.broadcast %cst_264 : f32 to vector<8x32xf32>
    %470 = arith.subf %469, %463 : vector<8x32xf32>
    %471 = arith.mulf %470, %468 : vector<8x32xf32>
    %472 = arith.mulf %463, %370 : vector<8x32xf32>
    %473 = arith.addf %471, %472 : vector<8x32xf32>
    %474 = tpu.concatenate %433, %473 in 1 : vector<8x32xf32>, vector<8x32xf32> -> vector<8x64xf32>
    %475 = arith.subf %474, %368 : vector<8x64xf32>
    %cst_265 = arith.constant dense<0.000000e+00> : vector<32x64xf32>
    %476 = tpu.matmul %366, %475, %cst_265 {dimension_numbers = #tpu.dot_dimension_numbers<[1], [0], [0], [1], [0, 0, 1, 1], [], []>} : vector<32x8xf32>, vector<8x64xf32>, vector<32x64xf32> -> vector<32x64xf32>
    %477 = arith.addf %358, %476 : vector<32x64xf32>
    %c4 = arith.constant 4 : index
    %c0_266 = arith.constant 0 : index
    %c0_267 = arith.constant 0 : index
    %478 = vector.load %arg0[%c4, %c0_266, %c0_267] : memref<6x8x8xf32, #tpu.memory_space<vmem>>, vector<1x8x8xf32>
    %479 = vector.shape_cast %478 : vector<1x8x8xf32> to vector<8x8xf32>
    %c4_268 = arith.constant 4 : index
    %c0_269 = arith.constant 0 : index
    %c0_270 = arith.constant 0 : index
    %480 = vector.load %arg1[%c4_268, %c0_269, %c0_270] : memref<6x8x32xf32, #tpu.memory_space<vmem>>, vector<1x8x32xf32>
    %481 = vector.shape_cast %480 : vector<1x8x32xf32> to vector<8x32xf32>
    %c4_271 = arith.constant 4 : index
    %c0_272 = arith.constant 0 : index
    %c0_273 = arith.constant 0 : index
    %482 = vector.load %arg2[%c4_271, %c0_272, %c0_273] : memref<6x8x32xf32, #tpu.memory_space<vmem>>, vector<1x8x32xf32>
    %483 = vector.shape_cast %482 : vector<1x8x32xf32> to vector<8x32xf32>
    %c4_274 = arith.constant 4 : index
    %c0_275 = arith.constant 0 : index
    %c0_276 = arith.constant 0 : index
    %484 = vector.load %arg3[%c4_274, %c0_275, %c0_276] : memref<6x32x8xf32, #tpu.memory_space<vmem>>, vector<1x32x8xf32>
    %485 = vector.shape_cast %484 : vector<1x32x8xf32> to vector<32x8xf32>
    %cst_277 = arith.constant dense<0.000000e+00> : vector<8x32xf32>
    %486 = tpu.matmul %481, %0, %cst_277 {dimension_numbers = #tpu.dot_dimension_numbers<[1], [0], [0], [1], [0, 0, 1, 1], [], []>} : vector<8x32xf32>, vector<32x32xf32>, vector<8x32xf32> -> vector<8x32xf32>
    %cst_278 = arith.constant dense<0.000000e+00> : vector<8x64xf32>
    %487 = tpu.matmul %483, %477, %cst_278 {dimension_numbers = #tpu.dot_dimension_numbers<[1], [0], [0], [1], [0, 0, 1, 1], [], []>} : vector<8x32xf32>, vector<32x64xf32>, vector<8x64xf32> -> vector<8x64xf32>
    %488 = vector.extract_strided_slice %487 {offsets = [0, 0], sizes = [8, 32], strides = [1, 1]} : vector<8x64xf32> to vector<8x32xf32>
    %489 = vector.extract_strided_slice %487 {offsets = [0, 32], sizes = [8, 32], strides = [1, 1]} : vector<8x64xf32> to vector<8x32xf32>
    %c0_279 = arith.constant 0 : index
    %c0_280 = arith.constant 0 : index
    %c0_281 = arith.constant 0 : index
    %490 = vector.load %arg6[%c0_279, %c0_280, %c0_281] : memref<2x32x64xf32, #tpu.memory_space<vmem>>, vector<1x32x64xf32>
    %491 = vector.shape_cast %490 : vector<1x32x64xf32> to vector<32x64xf32>
    %cst_282 = arith.constant dense<0.000000e+00> : vector<8x64xf32>
    %492 = tpu.matmul %486, %491, %cst_282 {dimension_numbers = #tpu.dot_dimension_numbers<[1], [0], [0], [1], [0, 0, 1, 1], [], []>} : vector<8x32xf32>, vector<32x64xf32>, vector<8x64xf32> -> vector<8x64xf32>
    %493 = vector.extract_strided_slice %492 {offsets = [0, 0], sizes = [8, 32], strides = [1, 1]} : vector<8x64xf32> to vector<8x32xf32>
    %cst_283 = arith.constant dense<0.000000e+00> : vector<8x32xf32>
    %494 = tpu.matmul %479, %493, %cst_283 {dimension_numbers = #tpu.dot_dimension_numbers<[1], [0], [0], [1], [0, 0, 1, 1], [], []>} : vector<8x8xf32>, vector<8x32xf32>, vector<8x32xf32> -> vector<8x32xf32>
    %c0_284 = arith.constant 0 : index
    %c0_285 = arith.constant 0 : index
    %c0_286 = arith.constant 0 : index
    %495 = vector.load %arg7[%c0_284, %c0_285, %c0_286] : memref<2x1x32xf32, #tpu.memory_space<vmem>>, vector<1x1x32xf32>
    %496 = vector.shape_cast %495 : vector<1x1x32xf32> to vector<1x32xf32>
    %497 = vector.broadcast %496 : vector<1x32xf32> to vector<8x32xf32>
    %498 = arith.addf %494, %497 : vector<8x32xf32>
    %cst_287 = arith.constant 0.000000e+00 : f32
    %499 = vector.broadcast %cst_287 : f32 to vector<8x32xf32>
    %500 = arith.maximumf %498, %499 : vector<8x32xf32>
    %501 = vector.extract_strided_slice %492 {offsets = [0, 32], sizes = [8, 32], strides = [1, 1]} : vector<8x64xf32> to vector<8x32xf32>
    %c0_288 = arith.constant 0 : index
    %c0_289 = arith.constant 0 : index
    %c0_290 = arith.constant 0 : index
    %502 = vector.load %arg8[%c0_288, %c0_289, %c0_290] : memref<2x32x32xf32, #tpu.memory_space<vmem>>, vector<1x32x32xf32>
    %503 = vector.shape_cast %502 : vector<1x32x32xf32> to vector<32x32xf32>
    %cst_291 = arith.constant dense<0.000000e+00> : vector<8x32xf32>
    %504 = tpu.matmul %488, %503, %cst_291 {dimension_numbers = #tpu.dot_dimension_numbers<[1], [0], [0], [1], [0, 0, 1, 1], [], []>} : vector<8x32xf32>, vector<32x32xf32>, vector<8x32xf32> -> vector<8x32xf32>
    %505 = arith.addf %501, %504 : vector<8x32xf32>
    %cst_292 = arith.constant dense<0.000000e+00> : vector<8x32xf32>
    %506 = tpu.matmul %479, %505, %cst_292 {dimension_numbers = #tpu.dot_dimension_numbers<[1], [0], [0], [1], [0, 0, 1, 1], [], []>} : vector<8x8xf32>, vector<8x32xf32>, vector<8x32xf32> -> vector<8x32xf32>
    %c0_293 = arith.constant 0 : index
    %c0_294 = arith.constant 0 : index
    %c0_295 = arith.constant 0 : index
    %507 = vector.load %arg9[%c0_293, %c0_294, %c0_295] : memref<2x1x32xf32, #tpu.memory_space<vmem>>, vector<1x1x32xf32>
    %508 = vector.shape_cast %507 : vector<1x1x32xf32> to vector<1x32xf32>
    %509 = vector.broadcast %508 : vector<1x32xf32> to vector<8x32xf32>
    %510 = arith.addf %506, %509 : vector<8x32xf32>
    %cst_296 = arith.constant 0.000000e+00 : f32
    %511 = vector.broadcast %cst_296 : f32 to vector<8x32xf32>
    %512 = arith.maximumf %510, %511 : vector<8x32xf32>
    %c0_297 = arith.constant 0 : index
    %c0_298 = arith.constant 0 : index
    %c0_299 = arith.constant 0 : index
    %513 = vector.load %arg10[%c0_297, %c0_298, %c0_299] : memref<2x32x96xf32, #tpu.memory_space<vmem>>, vector<1x32x96xf32>
    %514 = vector.shape_cast %513 : vector<1x32x96xf32> to vector<32x96xf32>
    %c0_300 = arith.constant 0 : index
    %c0_301 = arith.constant 0 : index
    %c0_302 = arith.constant 0 : index
    %515 = vector.load %arg11[%c0_300, %c0_301, %c0_302] : memref<2x32x96xf32, #tpu.memory_space<vmem>>, vector<1x32x96xf32>
    %516 = vector.shape_cast %515 : vector<1x32x96xf32> to vector<32x96xf32>
    %c0_303 = arith.constant 0 : index
    %c0_304 = arith.constant 0 : index
    %c0_305 = arith.constant 0 : index
    %517 = vector.load %arg12[%c0_303, %c0_304, %c0_305] : memref<2x1x96xf32, #tpu.memory_space<vmem>>, vector<1x1x96xf32>
    %518 = vector.shape_cast %517 : vector<1x1x96xf32> to vector<1x96xf32>
    %c0_306 = arith.constant 0 : index
    %c0_307 = arith.constant 0 : index
    %c0_308 = arith.constant 0 : index
    %519 = vector.load %arg13[%c0_306, %c0_307, %c0_308] : memref<2x1x96xf32, #tpu.memory_space<vmem>>, vector<1x1x96xf32>
    %520 = vector.shape_cast %519 : vector<1x1x96xf32> to vector<1x96xf32>
    %cst_309 = arith.constant dense<0.000000e+00> : vector<8x96xf32>
    %521 = tpu.matmul %500, %514, %cst_309 {dimension_numbers = #tpu.dot_dimension_numbers<[1], [0], [0], [1], [0, 0, 1, 1], [], []>} : vector<8x32xf32>, vector<32x96xf32>, vector<8x96xf32> -> vector<8x96xf32>
    %522 = vector.broadcast %518 : vector<1x96xf32> to vector<8x96xf32>
    %523 = arith.addf %521, %522 : vector<8x96xf32>
    %cst_310 = arith.constant dense<0.000000e+00> : vector<8x96xf32>
    %524 = tpu.matmul %488, %516, %cst_310 {dimension_numbers = #tpu.dot_dimension_numbers<[1], [0], [0], [1], [0, 0, 1, 1], [], []>} : vector<8x32xf32>, vector<32x96xf32>, vector<8x96xf32> -> vector<8x96xf32>
    %525 = vector.broadcast %520 : vector<1x96xf32> to vector<8x96xf32>
    %526 = arith.addf %524, %525 : vector<8x96xf32>
    %527 = vector.extract_strided_slice %523 {offsets = [0, 0], sizes = [8, 32], strides = [1, 1]} : vector<8x96xf32> to vector<8x32xf32>
    %528 = vector.extract_strided_slice %526 {offsets = [0, 0], sizes = [8, 32], strides = [1, 1]} : vector<8x96xf32> to vector<8x32xf32>
    %529 = arith.addf %527, %528 : vector<8x32xf32>
    %530 = arith.negf %529 : vector<8x32xf32>
    %531 = math.exp %530 : vector<8x32xf32>
    %cst_311 = arith.constant 1.000000e+00 : f32
    %532 = vector.broadcast %cst_311 : f32 to vector<8x32xf32>
    %533 = arith.addf %532, %531 : vector<8x32xf32>
    %534 = arith.divf %532, %533 : vector<8x32xf32>
    %535 = vector.extract_strided_slice %523 {offsets = [0, 32], sizes = [8, 32], strides = [1, 1]} : vector<8x96xf32> to vector<8x32xf32>
    %536 = vector.extract_strided_slice %526 {offsets = [0, 32], sizes = [8, 32], strides = [1, 1]} : vector<8x96xf32> to vector<8x32xf32>
    %537 = arith.addf %535, %536 : vector<8x32xf32>
    %538 = arith.negf %537 : vector<8x32xf32>
    %539 = math.exp %538 : vector<8x32xf32>
    %cst_312 = arith.constant 1.000000e+00 : f32
    %540 = vector.broadcast %cst_312 : f32 to vector<8x32xf32>
    %541 = arith.addf %540, %539 : vector<8x32xf32>
    %542 = arith.divf %540, %541 : vector<8x32xf32>
    %543 = vector.extract_strided_slice %523 {offsets = [0, 64], sizes = [8, 32], strides = [1, 1]} : vector<8x96xf32> to vector<8x32xf32>
    %544 = vector.extract_strided_slice %526 {offsets = [0, 64], sizes = [8, 32], strides = [1, 1]} : vector<8x96xf32> to vector<8x32xf32>
    %545 = arith.mulf %534, %544 : vector<8x32xf32>
    %546 = arith.addf %543, %545 : vector<8x32xf32>
    %547 = math.tanh %546 : vector<8x32xf32>
    %cst_313 = arith.constant 1.000000e+00 : f32
    %548 = vector.broadcast %cst_313 : f32 to vector<8x32xf32>
    %549 = arith.subf %548, %542 : vector<8x32xf32>
    %550 = arith.mulf %549, %547 : vector<8x32xf32>
    %551 = arith.mulf %542, %488 : vector<8x32xf32>
    %552 = arith.addf %550, %551 : vector<8x32xf32>
    %c0_314 = arith.constant 0 : index
    %c0_315 = arith.constant 0 : index
    %c0_316 = arith.constant 0 : index
    %553 = vector.load %arg14[%c0_314, %c0_315, %c0_316] : memref<2x32x96xf32, #tpu.memory_space<vmem>>, vector<1x32x96xf32>
    %554 = vector.shape_cast %553 : vector<1x32x96xf32> to vector<32x96xf32>
    %c0_317 = arith.constant 0 : index
    %c0_318 = arith.constant 0 : index
    %c0_319 = arith.constant 0 : index
    %555 = vector.load %arg15[%c0_317, %c0_318, %c0_319] : memref<2x32x96xf32, #tpu.memory_space<vmem>>, vector<1x32x96xf32>
    %556 = vector.shape_cast %555 : vector<1x32x96xf32> to vector<32x96xf32>
    %c0_320 = arith.constant 0 : index
    %c0_321 = arith.constant 0 : index
    %c0_322 = arith.constant 0 : index
    %557 = vector.load %arg16[%c0_320, %c0_321, %c0_322] : memref<2x1x96xf32, #tpu.memory_space<vmem>>, vector<1x1x96xf32>
    %558 = vector.shape_cast %557 : vector<1x1x96xf32> to vector<1x96xf32>
    %c0_323 = arith.constant 0 : index
    %c0_324 = arith.constant 0 : index
    %c0_325 = arith.constant 0 : index
    %559 = vector.load %arg17[%c0_323, %c0_324, %c0_325] : memref<2x1x96xf32, #tpu.memory_space<vmem>>, vector<1x1x96xf32>
    %560 = vector.shape_cast %559 : vector<1x1x96xf32> to vector<1x96xf32>
    %cst_326 = arith.constant dense<0.000000e+00> : vector<8x96xf32>
    %561 = tpu.matmul %512, %554, %cst_326 {dimension_numbers = #tpu.dot_dimension_numbers<[1], [0], [0], [1], [0, 0, 1, 1], [], []>} : vector<8x32xf32>, vector<32x96xf32>, vector<8x96xf32> -> vector<8x96xf32>
    %562 = vector.broadcast %558 : vector<1x96xf32> to vector<8x96xf32>
    %563 = arith.addf %561, %562 : vector<8x96xf32>
    %cst_327 = arith.constant dense<0.000000e+00> : vector<8x96xf32>
    %564 = tpu.matmul %489, %556, %cst_327 {dimension_numbers = #tpu.dot_dimension_numbers<[1], [0], [0], [1], [0, 0, 1, 1], [], []>} : vector<8x32xf32>, vector<32x96xf32>, vector<8x96xf32> -> vector<8x96xf32>
    %565 = vector.broadcast %560 : vector<1x96xf32> to vector<8x96xf32>
    %566 = arith.addf %564, %565 : vector<8x96xf32>
    %567 = vector.extract_strided_slice %563 {offsets = [0, 0], sizes = [8, 32], strides = [1, 1]} : vector<8x96xf32> to vector<8x32xf32>
    %568 = vector.extract_strided_slice %566 {offsets = [0, 0], sizes = [8, 32], strides = [1, 1]} : vector<8x96xf32> to vector<8x32xf32>
    %569 = arith.addf %567, %568 : vector<8x32xf32>
    %570 = arith.negf %569 : vector<8x32xf32>
    %571 = math.exp %570 : vector<8x32xf32>
    %cst_328 = arith.constant 1.000000e+00 : f32
    %572 = vector.broadcast %cst_328 : f32 to vector<8x32xf32>
    %573 = arith.addf %572, %571 : vector<8x32xf32>
    %574 = arith.divf %572, %573 : vector<8x32xf32>
    %575 = vector.extract_strided_slice %563 {offsets = [0, 32], sizes = [8, 32], strides = [1, 1]} : vector<8x96xf32> to vector<8x32xf32>
    %576 = vector.extract_strided_slice %566 {offsets = [0, 32], sizes = [8, 32], strides = [1, 1]} : vector<8x96xf32> to vector<8x32xf32>
    %577 = arith.addf %575, %576 : vector<8x32xf32>
    %578 = arith.negf %577 : vector<8x32xf32>
    %579 = math.exp %578 : vector<8x32xf32>
    %cst_329 = arith.constant 1.000000e+00 : f32
    %580 = vector.broadcast %cst_329 : f32 to vector<8x32xf32>
    %581 = arith.addf %580, %579 : vector<8x32xf32>
    %582 = arith.divf %580, %581 : vector<8x32xf32>
    %583 = vector.extract_strided_slice %563 {offsets = [0, 64], sizes = [8, 32], strides = [1, 1]} : vector<8x96xf32> to vector<8x32xf32>
    %584 = vector.extract_strided_slice %566 {offsets = [0, 64], sizes = [8, 32], strides = [1, 1]} : vector<8x96xf32> to vector<8x32xf32>
    %585 = arith.mulf %574, %584 : vector<8x32xf32>
    %586 = arith.addf %583, %585 : vector<8x32xf32>
    %587 = math.tanh %586 : vector<8x32xf32>
    %cst_330 = arith.constant 1.000000e+00 : f32
    %588 = vector.broadcast %cst_330 : f32 to vector<8x32xf32>
    %589 = arith.subf %588, %582 : vector<8x32xf32>
    %590 = arith.mulf %589, %587 : vector<8x32xf32>
    %591 = arith.mulf %582, %489 : vector<8x32xf32>
    %592 = arith.addf %590, %591 : vector<8x32xf32>
    %593 = tpu.concatenate %552, %592 in 1 : vector<8x32xf32>, vector<8x32xf32> -> vector<8x64xf32>
    %594 = arith.subf %593, %487 : vector<8x64xf32>
    %cst_331 = arith.constant dense<0.000000e+00> : vector<32x64xf32>
    %595 = tpu.matmul %485, %594, %cst_331 {dimension_numbers = #tpu.dot_dimension_numbers<[1], [0], [0], [1], [0, 0, 1, 1], [], []>} : vector<32x8xf32>, vector<8x64xf32>, vector<32x64xf32> -> vector<32x64xf32>
    %596 = arith.addf %477, %595 : vector<32x64xf32>
    %c5 = arith.constant 5 : index
    %c0_332 = arith.constant 0 : index
    %c0_333 = arith.constant 0 : index
    %597 = vector.load %arg0[%c5, %c0_332, %c0_333] : memref<6x8x8xf32, #tpu.memory_space<vmem>>, vector<1x8x8xf32>
    %598 = vector.shape_cast %597 : vector<1x8x8xf32> to vector<8x8xf32>
    %c5_334 = arith.constant 5 : index
    %c0_335 = arith.constant 0 : index
    %c0_336 = arith.constant 0 : index
    %599 = vector.load %arg1[%c5_334, %c0_335, %c0_336] : memref<6x8x32xf32, #tpu.memory_space<vmem>>, vector<1x8x32xf32>
    %600 = vector.shape_cast %599 : vector<1x8x32xf32> to vector<8x32xf32>
    %c5_337 = arith.constant 5 : index
    %c0_338 = arith.constant 0 : index
    %c0_339 = arith.constant 0 : index
    %601 = vector.load %arg2[%c5_337, %c0_338, %c0_339] : memref<6x8x32xf32, #tpu.memory_space<vmem>>, vector<1x8x32xf32>
    %602 = vector.shape_cast %601 : vector<1x8x32xf32> to vector<8x32xf32>
    %c5_340 = arith.constant 5 : index
    %c0_341 = arith.constant 0 : index
    %c0_342 = arith.constant 0 : index
    %603 = vector.load %arg3[%c5_340, %c0_341, %c0_342] : memref<6x32x8xf32, #tpu.memory_space<vmem>>, vector<1x32x8xf32>
    %604 = vector.shape_cast %603 : vector<1x32x8xf32> to vector<32x8xf32>
    %cst_343 = arith.constant dense<0.000000e+00> : vector<8x32xf32>
    %605 = tpu.matmul %600, %0, %cst_343 {dimension_numbers = #tpu.dot_dimension_numbers<[1], [0], [0], [1], [0, 0, 1, 1], [], []>} : vector<8x32xf32>, vector<32x32xf32>, vector<8x32xf32> -> vector<8x32xf32>
    %cst_344 = arith.constant dense<0.000000e+00> : vector<8x64xf32>
    %606 = tpu.matmul %602, %596, %cst_344 {dimension_numbers = #tpu.dot_dimension_numbers<[1], [0], [0], [1], [0, 0, 1, 1], [], []>} : vector<8x32xf32>, vector<32x64xf32>, vector<8x64xf32> -> vector<8x64xf32>
    %607 = vector.extract_strided_slice %606 {offsets = [0, 0], sizes = [8, 32], strides = [1, 1]} : vector<8x64xf32> to vector<8x32xf32>
    %608 = vector.extract_strided_slice %606 {offsets = [0, 32], sizes = [8, 32], strides = [1, 1]} : vector<8x64xf32> to vector<8x32xf32>
    %c1_345 = arith.constant 1 : index
    %c0_346 = arith.constant 0 : index
    %c0_347 = arith.constant 0 : index
    %609 = vector.load %arg6[%c1_345, %c0_346, %c0_347] : memref<2x32x64xf32, #tpu.memory_space<vmem>>, vector<1x32x64xf32>
    %610 = vector.shape_cast %609 : vector<1x32x64xf32> to vector<32x64xf32>
    %cst_348 = arith.constant dense<0.000000e+00> : vector<8x64xf32>
    %611 = tpu.matmul %605, %610, %cst_348 {dimension_numbers = #tpu.dot_dimension_numbers<[1], [0], [0], [1], [0, 0, 1, 1], [], []>} : vector<8x32xf32>, vector<32x64xf32>, vector<8x64xf32> -> vector<8x64xf32>
    %612 = vector.extract_strided_slice %611 {offsets = [0, 0], sizes = [8, 32], strides = [1, 1]} : vector<8x64xf32> to vector<8x32xf32>
    %cst_349 = arith.constant dense<0.000000e+00> : vector<8x32xf32>
    %613 = tpu.matmul %598, %612, %cst_349 {dimension_numbers = #tpu.dot_dimension_numbers<[1], [0], [0], [1], [0, 0, 1, 1], [], []>} : vector<8x8xf32>, vector<8x32xf32>, vector<8x32xf32> -> vector<8x32xf32>
    %c1_350 = arith.constant 1 : index
    %c0_351 = arith.constant 0 : index
    %c0_352 = arith.constant 0 : index
    %614 = vector.load %arg7[%c1_350, %c0_351, %c0_352] : memref<2x1x32xf32, #tpu.memory_space<vmem>>, vector<1x1x32xf32>
    %615 = vector.shape_cast %614 : vector<1x1x32xf32> to vector<1x32xf32>
    %616 = vector.broadcast %615 : vector<1x32xf32> to vector<8x32xf32>
    %617 = arith.addf %613, %616 : vector<8x32xf32>
    %cst_353 = arith.constant 0.000000e+00 : f32
    %618 = vector.broadcast %cst_353 : f32 to vector<8x32xf32>
    %619 = arith.maximumf %617, %618 : vector<8x32xf32>
    %620 = vector.extract_strided_slice %611 {offsets = [0, 32], sizes = [8, 32], strides = [1, 1]} : vector<8x64xf32> to vector<8x32xf32>
    %c1_354 = arith.constant 1 : index
    %c0_355 = arith.constant 0 : index
    %c0_356 = arith.constant 0 : index
    %621 = vector.load %arg8[%c1_354, %c0_355, %c0_356] : memref<2x32x32xf32, #tpu.memory_space<vmem>>, vector<1x32x32xf32>
    %622 = vector.shape_cast %621 : vector<1x32x32xf32> to vector<32x32xf32>
    %cst_357 = arith.constant dense<0.000000e+00> : vector<8x32xf32>
    %623 = tpu.matmul %607, %622, %cst_357 {dimension_numbers = #tpu.dot_dimension_numbers<[1], [0], [0], [1], [0, 0, 1, 1], [], []>} : vector<8x32xf32>, vector<32x32xf32>, vector<8x32xf32> -> vector<8x32xf32>
    %624 = arith.addf %620, %623 : vector<8x32xf32>
    %cst_358 = arith.constant dense<0.000000e+00> : vector<8x32xf32>
    %625 = tpu.matmul %598, %624, %cst_358 {dimension_numbers = #tpu.dot_dimension_numbers<[1], [0], [0], [1], [0, 0, 1, 1], [], []>} : vector<8x8xf32>, vector<8x32xf32>, vector<8x32xf32> -> vector<8x32xf32>
    %c1_359 = arith.constant 1 : index
    %c0_360 = arith.constant 0 : index
    %c0_361 = arith.constant 0 : index
    %626 = vector.load %arg9[%c1_359, %c0_360, %c0_361] : memref<2x1x32xf32, #tpu.memory_space<vmem>>, vector<1x1x32xf32>
    %627 = vector.shape_cast %626 : vector<1x1x32xf32> to vector<1x32xf32>
    %628 = vector.broadcast %627 : vector<1x32xf32> to vector<8x32xf32>
    %629 = arith.addf %625, %628 : vector<8x32xf32>
    %cst_362 = arith.constant 0.000000e+00 : f32
    %630 = vector.broadcast %cst_362 : f32 to vector<8x32xf32>
    %631 = arith.maximumf %629, %630 : vector<8x32xf32>
    %c1_363 = arith.constant 1 : index
    %c0_364 = arith.constant 0 : index
    %c0_365 = arith.constant 0 : index
    %632 = vector.load %arg10[%c1_363, %c0_364, %c0_365] : memref<2x32x96xf32, #tpu.memory_space<vmem>>, vector<1x32x96xf32>
    %633 = vector.shape_cast %632 : vector<1x32x96xf32> to vector<32x96xf32>
    %c1_366 = arith.constant 1 : index
    %c0_367 = arith.constant 0 : index
    %c0_368 = arith.constant 0 : index
    %634 = vector.load %arg11[%c1_366, %c0_367, %c0_368] : memref<2x32x96xf32, #tpu.memory_space<vmem>>, vector<1x32x96xf32>
    %635 = vector.shape_cast %634 : vector<1x32x96xf32> to vector<32x96xf32>
    %c1_369 = arith.constant 1 : index
    %c0_370 = arith.constant 0 : index
    %c0_371 = arith.constant 0 : index
    %636 = vector.load %arg12[%c1_369, %c0_370, %c0_371] : memref<2x1x96xf32, #tpu.memory_space<vmem>>, vector<1x1x96xf32>
    %637 = vector.shape_cast %636 : vector<1x1x96xf32> to vector<1x96xf32>
    %c1_372 = arith.constant 1 : index
    %c0_373 = arith.constant 0 : index
    %c0_374 = arith.constant 0 : index
    %638 = vector.load %arg13[%c1_372, %c0_373, %c0_374] : memref<2x1x96xf32, #tpu.memory_space<vmem>>, vector<1x1x96xf32>
    %639 = vector.shape_cast %638 : vector<1x1x96xf32> to vector<1x96xf32>
    %cst_375 = arith.constant dense<0.000000e+00> : vector<8x96xf32>
    %640 = tpu.matmul %619, %633, %cst_375 {dimension_numbers = #tpu.dot_dimension_numbers<[1], [0], [0], [1], [0, 0, 1, 1], [], []>} : vector<8x32xf32>, vector<32x96xf32>, vector<8x96xf32> -> vector<8x96xf32>
    %641 = vector.broadcast %637 : vector<1x96xf32> to vector<8x96xf32>
    %642 = arith.addf %640, %641 : vector<8x96xf32>
    %cst_376 = arith.constant dense<0.000000e+00> : vector<8x96xf32>
    %643 = tpu.matmul %607, %635, %cst_376 {dimension_numbers = #tpu.dot_dimension_numbers<[1], [0], [0], [1], [0, 0, 1, 1], [], []>} : vector<8x32xf32>, vector<32x96xf32>, vector<8x96xf32> -> vector<8x96xf32>
    %644 = vector.broadcast %639 : vector<1x96xf32> to vector<8x96xf32>
    %645 = arith.addf %643, %644 : vector<8x96xf32>
    %646 = vector.extract_strided_slice %642 {offsets = [0, 0], sizes = [8, 32], strides = [1, 1]} : vector<8x96xf32> to vector<8x32xf32>
    %647 = vector.extract_strided_slice %645 {offsets = [0, 0], sizes = [8, 32], strides = [1, 1]} : vector<8x96xf32> to vector<8x32xf32>
    %648 = arith.addf %646, %647 : vector<8x32xf32>
    %649 = arith.negf %648 : vector<8x32xf32>
    %650 = math.exp %649 : vector<8x32xf32>
    %cst_377 = arith.constant 1.000000e+00 : f32
    %651 = vector.broadcast %cst_377 : f32 to vector<8x32xf32>
    %652 = arith.addf %651, %650 : vector<8x32xf32>
    %653 = arith.divf %651, %652 : vector<8x32xf32>
    %654 = vector.extract_strided_slice %642 {offsets = [0, 32], sizes = [8, 32], strides = [1, 1]} : vector<8x96xf32> to vector<8x32xf32>
    %655 = vector.extract_strided_slice %645 {offsets = [0, 32], sizes = [8, 32], strides = [1, 1]} : vector<8x96xf32> to vector<8x32xf32>
    %656 = arith.addf %654, %655 : vector<8x32xf32>
    %657 = arith.negf %656 : vector<8x32xf32>
    %658 = math.exp %657 : vector<8x32xf32>
    %cst_378 = arith.constant 1.000000e+00 : f32
    %659 = vector.broadcast %cst_378 : f32 to vector<8x32xf32>
    %660 = arith.addf %659, %658 : vector<8x32xf32>
    %661 = arith.divf %659, %660 : vector<8x32xf32>
    %662 = vector.extract_strided_slice %642 {offsets = [0, 64], sizes = [8, 32], strides = [1, 1]} : vector<8x96xf32> to vector<8x32xf32>
    %663 = vector.extract_strided_slice %645 {offsets = [0, 64], sizes = [8, 32], strides = [1, 1]} : vector<8x96xf32> to vector<8x32xf32>
    %664 = arith.mulf %653, %663 : vector<8x32xf32>
    %665 = arith.addf %662, %664 : vector<8x32xf32>
    %666 = math.tanh %665 : vector<8x32xf32>
    %cst_379 = arith.constant 1.000000e+00 : f32
    %667 = vector.broadcast %cst_379 : f32 to vector<8x32xf32>
    %668 = arith.subf %667, %661 : vector<8x32xf32>
    %669 = arith.mulf %668, %666 : vector<8x32xf32>
    %670 = arith.mulf %661, %607 : vector<8x32xf32>
    %671 = arith.addf %669, %670 : vector<8x32xf32>
    %c1_380 = arith.constant 1 : index
    %c0_381 = arith.constant 0 : index
    %c0_382 = arith.constant 0 : index
    %672 = vector.load %arg14[%c1_380, %c0_381, %c0_382] : memref<2x32x96xf32, #tpu.memory_space<vmem>>, vector<1x32x96xf32>
    %673 = vector.shape_cast %672 : vector<1x32x96xf32> to vector<32x96xf32>
    %c1_383 = arith.constant 1 : index
    %c0_384 = arith.constant 0 : index
    %c0_385 = arith.constant 0 : index
    %674 = vector.load %arg15[%c1_383, %c0_384, %c0_385] : memref<2x32x96xf32, #tpu.memory_space<vmem>>, vector<1x32x96xf32>
    %675 = vector.shape_cast %674 : vector<1x32x96xf32> to vector<32x96xf32>
    %c1_386 = arith.constant 1 : index
    %c0_387 = arith.constant 0 : index
    %c0_388 = arith.constant 0 : index
    %676 = vector.load %arg16[%c1_386, %c0_387, %c0_388] : memref<2x1x96xf32, #tpu.memory_space<vmem>>, vector<1x1x96xf32>
    %677 = vector.shape_cast %676 : vector<1x1x96xf32> to vector<1x96xf32>
    %c1_389 = arith.constant 1 : index
    %c0_390 = arith.constant 0 : index
    %c0_391 = arith.constant 0 : index
    %678 = vector.load %arg17[%c1_389, %c0_390, %c0_391] : memref<2x1x96xf32, #tpu.memory_space<vmem>>, vector<1x1x96xf32>
    %679 = vector.shape_cast %678 : vector<1x1x96xf32> to vector<1x96xf32>
    %cst_392 = arith.constant dense<0.000000e+00> : vector<8x96xf32>
    %680 = tpu.matmul %631, %673, %cst_392 {dimension_numbers = #tpu.dot_dimension_numbers<[1], [0], [0], [1], [0, 0, 1, 1], [], []>} : vector<8x32xf32>, vector<32x96xf32>, vector<8x96xf32> -> vector<8x96xf32>
    %681 = vector.broadcast %677 : vector<1x96xf32> to vector<8x96xf32>
    %682 = arith.addf %680, %681 : vector<8x96xf32>
    %cst_393 = arith.constant dense<0.000000e+00> : vector<8x96xf32>
    %683 = tpu.matmul %608, %675, %cst_393 {dimension_numbers = #tpu.dot_dimension_numbers<[1], [0], [0], [1], [0, 0, 1, 1], [], []>} : vector<8x32xf32>, vector<32x96xf32>, vector<8x96xf32> -> vector<8x96xf32>
    %684 = vector.broadcast %679 : vector<1x96xf32> to vector<8x96xf32>
    %685 = arith.addf %683, %684 : vector<8x96xf32>
    %686 = vector.extract_strided_slice %682 {offsets = [0, 0], sizes = [8, 32], strides = [1, 1]} : vector<8x96xf32> to vector<8x32xf32>
    %687 = vector.extract_strided_slice %685 {offsets = [0, 0], sizes = [8, 32], strides = [1, 1]} : vector<8x96xf32> to vector<8x32xf32>
    %688 = arith.addf %686, %687 : vector<8x32xf32>
    %689 = arith.negf %688 : vector<8x32xf32>
    %690 = math.exp %689 : vector<8x32xf32>
    %cst_394 = arith.constant 1.000000e+00 : f32
    %691 = vector.broadcast %cst_394 : f32 to vector<8x32xf32>
    %692 = arith.addf %691, %690 : vector<8x32xf32>
    %693 = arith.divf %691, %692 : vector<8x32xf32>
    %694 = vector.extract_strided_slice %682 {offsets = [0, 32], sizes = [8, 32], strides = [1, 1]} : vector<8x96xf32> to vector<8x32xf32>
    %695 = vector.extract_strided_slice %685 {offsets = [0, 32], sizes = [8, 32], strides = [1, 1]} : vector<8x96xf32> to vector<8x32xf32>
    %696 = arith.addf %694, %695 : vector<8x32xf32>
    %697 = arith.negf %696 : vector<8x32xf32>
    %698 = math.exp %697 : vector<8x32xf32>
    %cst_395 = arith.constant 1.000000e+00 : f32
    %699 = vector.broadcast %cst_395 : f32 to vector<8x32xf32>
    %700 = arith.addf %699, %698 : vector<8x32xf32>
    %701 = arith.divf %699, %700 : vector<8x32xf32>
    %702 = vector.extract_strided_slice %682 {offsets = [0, 64], sizes = [8, 32], strides = [1, 1]} : vector<8x96xf32> to vector<8x32xf32>
    %703 = vector.extract_strided_slice %685 {offsets = [0, 64], sizes = [8, 32], strides = [1, 1]} : vector<8x96xf32> to vector<8x32xf32>
    %704 = arith.mulf %693, %703 : vector<8x32xf32>
    %705 = arith.addf %702, %704 : vector<8x32xf32>
    %706 = math.tanh %705 : vector<8x32xf32>
    %cst_396 = arith.constant 1.000000e+00 : f32
    %707 = vector.broadcast %cst_396 : f32 to vector<8x32xf32>
    %708 = arith.subf %707, %701 : vector<8x32xf32>
    %709 = arith.mulf %708, %706 : vector<8x32xf32>
    %710 = arith.mulf %701, %608 : vector<8x32xf32>
    %711 = arith.addf %709, %710 : vector<8x32xf32>
    %712 = tpu.concatenate %671, %711 in 1 : vector<8x32xf32>, vector<8x32xf32> -> vector<8x64xf32>
    %713 = arith.subf %712, %606 : vector<8x64xf32>
    %cst_397 = arith.constant dense<0.000000e+00> : vector<32x64xf32>
    %714 = tpu.matmul %604, %713, %cst_397 {dimension_numbers = #tpu.dot_dimension_numbers<[1], [0], [0], [1], [0, 0, 1, 1], [], []>} : vector<32x8xf32>, vector<8x64xf32>, vector<32x64xf32> -> vector<32x64xf32>
    %715 = arith.addf %596, %714 : vector<32x64xf32>
    %c0_398 = arith.constant 0 : index
    %c0_399 = arith.constant 0 : index
    %c0_400 = arith.constant 0 : index
    %716 = vector.load %arg0[%c0_398, %c0_399, %c0_400] : memref<6x8x8xf32, #tpu.memory_space<vmem>>, vector<1x8x8xf32>
    %717 = vector.shape_cast %716 : vector<1x8x8xf32> to vector<8x8xf32>
    %c0_401 = arith.constant 0 : index
    %c0_402 = arith.constant 0 : index
    %c0_403 = arith.constant 0 : index
    %718 = vector.load %arg1[%c0_401, %c0_402, %c0_403] : memref<6x8x32xf32, #tpu.memory_space<vmem>>, vector<1x8x32xf32>
    %719 = vector.shape_cast %718 : vector<1x8x32xf32> to vector<8x32xf32>
    %c0_404 = arith.constant 0 : index
    %c0_405 = arith.constant 0 : index
    %c0_406 = arith.constant 0 : index
    %720 = vector.load %arg2[%c0_404, %c0_405, %c0_406] : memref<6x8x32xf32, #tpu.memory_space<vmem>>, vector<1x8x32xf32>
    %721 = vector.shape_cast %720 : vector<1x8x32xf32> to vector<8x32xf32>
    %c0_407 = arith.constant 0 : index
    %c0_408 = arith.constant 0 : index
    %c0_409 = arith.constant 0 : index
    %722 = vector.load %arg3[%c0_407, %c0_408, %c0_409] : memref<6x32x8xf32, #tpu.memory_space<vmem>>, vector<1x32x8xf32>
    %723 = vector.shape_cast %722 : vector<1x32x8xf32> to vector<32x8xf32>
    %cst_410 = arith.constant dense<0.000000e+00> : vector<8x32xf32>
    %724 = tpu.matmul %719, %0, %cst_410 {dimension_numbers = #tpu.dot_dimension_numbers<[1], [0], [0], [1], [0, 0, 1, 1], [], []>} : vector<8x32xf32>, vector<32x32xf32>, vector<8x32xf32> -> vector<8x32xf32>
    %cst_411 = arith.constant dense<0.000000e+00> : vector<8x64xf32>
    %725 = tpu.matmul %721, %715, %cst_411 {dimension_numbers = #tpu.dot_dimension_numbers<[1], [0], [0], [1], [0, 0, 1, 1], [], []>} : vector<8x32xf32>, vector<32x64xf32>, vector<8x64xf32> -> vector<8x64xf32>
    %726 = vector.extract_strided_slice %725 {offsets = [0, 0], sizes = [8, 32], strides = [1, 1]} : vector<8x64xf32> to vector<8x32xf32>
    %727 = vector.extract_strided_slice %725 {offsets = [0, 32], sizes = [8, 32], strides = [1, 1]} : vector<8x64xf32> to vector<8x32xf32>
    %c0_412 = arith.constant 0 : index
    %c0_413 = arith.constant 0 : index
    %c0_414 = arith.constant 0 : index
    %728 = vector.load %arg6[%c0_412, %c0_413, %c0_414] : memref<2x32x64xf32, #tpu.memory_space<vmem>>, vector<1x32x64xf32>
    %729 = vector.shape_cast %728 : vector<1x32x64xf32> to vector<32x64xf32>
    %cst_415 = arith.constant dense<0.000000e+00> : vector<8x64xf32>
    %730 = tpu.matmul %724, %729, %cst_415 {dimension_numbers = #tpu.dot_dimension_numbers<[1], [0], [0], [1], [0, 0, 1, 1], [], []>} : vector<8x32xf32>, vector<32x64xf32>, vector<8x64xf32> -> vector<8x64xf32>
    %731 = vector.extract_strided_slice %730 {offsets = [0, 0], sizes = [8, 32], strides = [1, 1]} : vector<8x64xf32> to vector<8x32xf32>
    %cst_416 = arith.constant dense<0.000000e+00> : vector<8x32xf32>
    %732 = tpu.matmul %717, %731, %cst_416 {dimension_numbers = #tpu.dot_dimension_numbers<[1], [0], [0], [1], [0, 0, 1, 1], [], []>} : vector<8x8xf32>, vector<8x32xf32>, vector<8x32xf32> -> vector<8x32xf32>
    %c0_417 = arith.constant 0 : index
    %c0_418 = arith.constant 0 : index
    %c0_419 = arith.constant 0 : index
    %733 = vector.load %arg7[%c0_417, %c0_418, %c0_419] : memref<2x1x32xf32, #tpu.memory_space<vmem>>, vector<1x1x32xf32>
    %734 = vector.shape_cast %733 : vector<1x1x32xf32> to vector<1x32xf32>
    %735 = vector.broadcast %734 : vector<1x32xf32> to vector<8x32xf32>
    %736 = arith.addf %732, %735 : vector<8x32xf32>
    %cst_420 = arith.constant 0.000000e+00 : f32
    %737 = vector.broadcast %cst_420 : f32 to vector<8x32xf32>
    %738 = arith.maximumf %736, %737 : vector<8x32xf32>
    %739 = vector.extract_strided_slice %730 {offsets = [0, 32], sizes = [8, 32], strides = [1, 1]} : vector<8x64xf32> to vector<8x32xf32>
    %c0_421 = arith.constant 0 : index
    %c0_422 = arith.constant 0 : index
    %c0_423 = arith.constant 0 : index
    %740 = vector.load %arg8[%c0_421, %c0_422, %c0_423] : memref<2x32x32xf32, #tpu.memory_space<vmem>>, vector<1x32x32xf32>
    %741 = vector.shape_cast %740 : vector<1x32x32xf32> to vector<32x32xf32>
    %cst_424 = arith.constant dense<0.000000e+00> : vector<8x32xf32>
    %742 = tpu.matmul %726, %741, %cst_424 {dimension_numbers = #tpu.dot_dimension_numbers<[1], [0], [0], [1], [0, 0, 1, 1], [], []>} : vector<8x32xf32>, vector<32x32xf32>, vector<8x32xf32> -> vector<8x32xf32>
    %743 = arith.addf %739, %742 : vector<8x32xf32>
    %cst_425 = arith.constant dense<0.000000e+00> : vector<8x32xf32>
    %744 = tpu.matmul %717, %743, %cst_425 {dimension_numbers = #tpu.dot_dimension_numbers<[1], [0], [0], [1], [0, 0, 1, 1], [], []>} : vector<8x8xf32>, vector<8x32xf32>, vector<8x32xf32> -> vector<8x32xf32>
    %c0_426 = arith.constant 0 : index
    %c0_427 = arith.constant 0 : index
    %c0_428 = arith.constant 0 : index
    %745 = vector.load %arg9[%c0_426, %c0_427, %c0_428] : memref<2x1x32xf32, #tpu.memory_space<vmem>>, vector<1x1x32xf32>
    %746 = vector.shape_cast %745 : vector<1x1x32xf32> to vector<1x32xf32>
    %747 = vector.broadcast %746 : vector<1x32xf32> to vector<8x32xf32>
    %748 = arith.addf %744, %747 : vector<8x32xf32>
    %cst_429 = arith.constant 0.000000e+00 : f32
    %749 = vector.broadcast %cst_429 : f32 to vector<8x32xf32>
    %750 = arith.maximumf %748, %749 : vector<8x32xf32>
    %c0_430 = arith.constant 0 : index
    %c0_431 = arith.constant 0 : index
    %c0_432 = arith.constant 0 : index
    %751 = vector.load %arg10[%c0_430, %c0_431, %c0_432] : memref<2x32x96xf32, #tpu.memory_space<vmem>>, vector<1x32x96xf32>
    %752 = vector.shape_cast %751 : vector<1x32x96xf32> to vector<32x96xf32>
    %c0_433 = arith.constant 0 : index
    %c0_434 = arith.constant 0 : index
    %c0_435 = arith.constant 0 : index
    %753 = vector.load %arg11[%c0_433, %c0_434, %c0_435] : memref<2x32x96xf32, #tpu.memory_space<vmem>>, vector<1x32x96xf32>
    %754 = vector.shape_cast %753 : vector<1x32x96xf32> to vector<32x96xf32>
    %c0_436 = arith.constant 0 : index
    %c0_437 = arith.constant 0 : index
    %c0_438 = arith.constant 0 : index
    %755 = vector.load %arg12[%c0_436, %c0_437, %c0_438] : memref<2x1x96xf32, #tpu.memory_space<vmem>>, vector<1x1x96xf32>
    %756 = vector.shape_cast %755 : vector<1x1x96xf32> to vector<1x96xf32>
    %c0_439 = arith.constant 0 : index
    %c0_440 = arith.constant 0 : index
    %c0_441 = arith.constant 0 : index
    %757 = vector.load %arg13[%c0_439, %c0_440, %c0_441] : memref<2x1x96xf32, #tpu.memory_space<vmem>>, vector<1x1x96xf32>
    %758 = vector.shape_cast %757 : vector<1x1x96xf32> to vector<1x96xf32>
    %cst_442 = arith.constant dense<0.000000e+00> : vector<8x96xf32>
    %759 = tpu.matmul %738, %752, %cst_442 {dimension_numbers = #tpu.dot_dimension_numbers<[1], [0], [0], [1], [0, 0, 1, 1], [], []>} : vector<8x32xf32>, vector<32x96xf32>, vector<8x96xf32> -> vector<8x96xf32>
    %760 = vector.broadcast %756 : vector<1x96xf32> to vector<8x96xf32>
    %761 = arith.addf %759, %760 : vector<8x96xf32>
    %cst_443 = arith.constant dense<0.000000e+00> : vector<8x96xf32>
    %762 = tpu.matmul %726, %754, %cst_443 {dimension_numbers = #tpu.dot_dimension_numbers<[1], [0], [0], [1], [0, 0, 1, 1], [], []>} : vector<8x32xf32>, vector<32x96xf32>, vector<8x96xf32> -> vector<8x96xf32>
    %763 = vector.broadcast %758 : vector<1x96xf32> to vector<8x96xf32>
    %764 = arith.addf %762, %763 : vector<8x96xf32>
    %765 = vector.extract_strided_slice %761 {offsets = [0, 0], sizes = [8, 32], strides = [1, 1]} : vector<8x96xf32> to vector<8x32xf32>
    %766 = vector.extract_strided_slice %764 {offsets = [0, 0], sizes = [8, 32], strides = [1, 1]} : vector<8x96xf32> to vector<8x32xf32>
    %767 = arith.addf %765, %766 : vector<8x32xf32>
    %768 = arith.negf %767 : vector<8x32xf32>
    %769 = math.exp %768 : vector<8x32xf32>
    %cst_444 = arith.constant 1.000000e+00 : f32
    %770 = vector.broadcast %cst_444 : f32 to vector<8x32xf32>
    %771 = arith.addf %770, %769 : vector<8x32xf32>
    %772 = arith.divf %770, %771 : vector<8x32xf32>
    %773 = vector.extract_strided_slice %761 {offsets = [0, 32], sizes = [8, 32], strides = [1, 1]} : vector<8x96xf32> to vector<8x32xf32>
    %774 = vector.extract_strided_slice %764 {offsets = [0, 32], sizes = [8, 32], strides = [1, 1]} : vector<8x96xf32> to vector<8x32xf32>
    %775 = arith.addf %773, %774 : vector<8x32xf32>
    %776 = arith.negf %775 : vector<8x32xf32>
    %777 = math.exp %776 : vector<8x32xf32>
    %cst_445 = arith.constant 1.000000e+00 : f32
    %778 = vector.broadcast %cst_445 : f32 to vector<8x32xf32>
    %779 = arith.addf %778, %777 : vector<8x32xf32>
    %780 = arith.divf %778, %779 : vector<8x32xf32>
    %781 = vector.extract_strided_slice %761 {offsets = [0, 64], sizes = [8, 32], strides = [1, 1]} : vector<8x96xf32> to vector<8x32xf32>
    %782 = vector.extract_strided_slice %764 {offsets = [0, 64], sizes = [8, 32], strides = [1, 1]} : vector<8x96xf32> to vector<8x32xf32>
    %783 = arith.mulf %772, %782 : vector<8x32xf32>
    %784 = arith.addf %781, %783 : vector<8x32xf32>
    %785 = math.tanh %784 : vector<8x32xf32>
    %cst_446 = arith.constant 1.000000e+00 : f32
    %786 = vector.broadcast %cst_446 : f32 to vector<8x32xf32>
    %787 = arith.subf %786, %780 : vector<8x32xf32>
    %788 = arith.mulf %787, %785 : vector<8x32xf32>
    %789 = arith.mulf %780, %726 : vector<8x32xf32>
    %790 = arith.addf %788, %789 : vector<8x32xf32>
    %c0_447 = arith.constant 0 : index
    %c0_448 = arith.constant 0 : index
    %c0_449 = arith.constant 0 : index
    %791 = vector.load %arg14[%c0_447, %c0_448, %c0_449] : memref<2x32x96xf32, #tpu.memory_space<vmem>>, vector<1x32x96xf32>
    %792 = vector.shape_cast %791 : vector<1x32x96xf32> to vector<32x96xf32>
    %c0_450 = arith.constant 0 : index
    %c0_451 = arith.constant 0 : index
    %c0_452 = arith.constant 0 : index
    %793 = vector.load %arg15[%c0_450, %c0_451, %c0_452] : memref<2x32x96xf32, #tpu.memory_space<vmem>>, vector<1x32x96xf32>
    %794 = vector.shape_cast %793 : vector<1x32x96xf32> to vector<32x96xf32>
    %c0_453 = arith.constant 0 : index
    %c0_454 = arith.constant 0 : index
    %c0_455 = arith.constant 0 : index
    %795 = vector.load %arg16[%c0_453, %c0_454, %c0_455] : memref<2x1x96xf32, #tpu.memory_space<vmem>>, vector<1x1x96xf32>
    %796 = vector.shape_cast %795 : vector<1x1x96xf32> to vector<1x96xf32>
    %c0_456 = arith.constant 0 : index
    %c0_457 = arith.constant 0 : index
    %c0_458 = arith.constant 0 : index
    %797 = vector.load %arg17[%c0_456, %c0_457, %c0_458] : memref<2x1x96xf32, #tpu.memory_space<vmem>>, vector<1x1x96xf32>
    %798 = vector.shape_cast %797 : vector<1x1x96xf32> to vector<1x96xf32>
    %cst_459 = arith.constant dense<0.000000e+00> : vector<8x96xf32>
    %799 = tpu.matmul %750, %792, %cst_459 {dimension_numbers = #tpu.dot_dimension_numbers<[1], [0], [0], [1], [0, 0, 1, 1], [], []>} : vector<8x32xf32>, vector<32x96xf32>, vector<8x96xf32> -> vector<8x96xf32>
    %800 = vector.broadcast %796 : vector<1x96xf32> to vector<8x96xf32>
    %801 = arith.addf %799, %800 : vector<8x96xf32>
    %cst_460 = arith.constant dense<0.000000e+00> : vector<8x96xf32>
    %802 = tpu.matmul %727, %794, %cst_460 {dimension_numbers = #tpu.dot_dimension_numbers<[1], [0], [0], [1], [0, 0, 1, 1], [], []>} : vector<8x32xf32>, vector<32x96xf32>, vector<8x96xf32> -> vector<8x96xf32>
    %803 = vector.broadcast %798 : vector<1x96xf32> to vector<8x96xf32>
    %804 = arith.addf %802, %803 : vector<8x96xf32>
    %805 = vector.extract_strided_slice %801 {offsets = [0, 0], sizes = [8, 32], strides = [1, 1]} : vector<8x96xf32> to vector<8x32xf32>
    %806 = vector.extract_strided_slice %804 {offsets = [0, 0], sizes = [8, 32], strides = [1, 1]} : vector<8x96xf32> to vector<8x32xf32>
    %807 = arith.addf %805, %806 : vector<8x32xf32>
    %808 = arith.negf %807 : vector<8x32xf32>
    %809 = math.exp %808 : vector<8x32xf32>
    %cst_461 = arith.constant 1.000000e+00 : f32
    %810 = vector.broadcast %cst_461 : f32 to vector<8x32xf32>
    %811 = arith.addf %810, %809 : vector<8x32xf32>
    %812 = arith.divf %810, %811 : vector<8x32xf32>
    %813 = vector.extract_strided_slice %801 {offsets = [0, 32], sizes = [8, 32], strides = [1, 1]} : vector<8x96xf32> to vector<8x32xf32>
    %814 = vector.extract_strided_slice %804 {offsets = [0, 32], sizes = [8, 32], strides = [1, 1]} : vector<8x96xf32> to vector<8x32xf32>
    %815 = arith.addf %813, %814 : vector<8x32xf32>
    %816 = arith.negf %815 : vector<8x32xf32>
    %817 = math.exp %816 : vector<8x32xf32>
    %cst_462 = arith.constant 1.000000e+00 : f32
    %818 = vector.broadcast %cst_462 : f32 to vector<8x32xf32>
    %819 = arith.addf %818, %817 : vector<8x32xf32>
    %820 = arith.divf %818, %819 : vector<8x32xf32>
    %821 = vector.extract_strided_slice %801 {offsets = [0, 64], sizes = [8, 32], strides = [1, 1]} : vector<8x96xf32> to vector<8x32xf32>
    %822 = vector.extract_strided_slice %804 {offsets = [0, 64], sizes = [8, 32], strides = [1, 1]} : vector<8x96xf32> to vector<8x32xf32>
    %823 = arith.mulf %812, %822 : vector<8x32xf32>
    %824 = arith.addf %821, %823 : vector<8x32xf32>
    %825 = math.tanh %824 : vector<8x32xf32>
    %cst_463 = arith.constant 1.000000e+00 : f32
    %826 = vector.broadcast %cst_463 : f32 to vector<8x32xf32>
    %827 = arith.subf %826, %820 : vector<8x32xf32>
    %828 = arith.mulf %827, %825 : vector<8x32xf32>
    %829 = arith.mulf %820, %727 : vector<8x32xf32>
    %830 = arith.addf %828, %829 : vector<8x32xf32>
    %831 = tpu.concatenate %790, %830 in 1 : vector<8x32xf32>, vector<8x32xf32> -> vector<8x64xf32>
    %832 = arith.subf %831, %725 : vector<8x64xf32>
    %cst_464 = arith.constant dense<0.000000e+00> : vector<32x64xf32>
    %833 = tpu.matmul %723, %832, %cst_464 {dimension_numbers = #tpu.dot_dimension_numbers<[1], [0], [0], [1], [0, 0, 1, 1], [], []>} : vector<32x8xf32>, vector<8x64xf32>, vector<32x64xf32> -> vector<32x64xf32>
    %834 = arith.addf %715, %833 : vector<32x64xf32>
    %c1_465 = arith.constant 1 : index
    %c0_466 = arith.constant 0 : index
    %c0_467 = arith.constant 0 : index
    %835 = vector.load %arg0[%c1_465, %c0_466, %c0_467] : memref<6x8x8xf32, #tpu.memory_space<vmem>>, vector<1x8x8xf32>
    %836 = vector.shape_cast %835 : vector<1x8x8xf32> to vector<8x8xf32>
    %c1_468 = arith.constant 1 : index
    %c0_469 = arith.constant 0 : index
    %c0_470 = arith.constant 0 : index
    %837 = vector.load %arg1[%c1_468, %c0_469, %c0_470] : memref<6x8x32xf32, #tpu.memory_space<vmem>>, vector<1x8x32xf32>
    %838 = vector.shape_cast %837 : vector<1x8x32xf32> to vector<8x32xf32>
    %c1_471 = arith.constant 1 : index
    %c0_472 = arith.constant 0 : index
    %c0_473 = arith.constant 0 : index
    %839 = vector.load %arg2[%c1_471, %c0_472, %c0_473] : memref<6x8x32xf32, #tpu.memory_space<vmem>>, vector<1x8x32xf32>
    %840 = vector.shape_cast %839 : vector<1x8x32xf32> to vector<8x32xf32>
    %c1_474 = arith.constant 1 : index
    %c0_475 = arith.constant 0 : index
    %c0_476 = arith.constant 0 : index
    %841 = vector.load %arg3[%c1_474, %c0_475, %c0_476] : memref<6x32x8xf32, #tpu.memory_space<vmem>>, vector<1x32x8xf32>
    %842 = vector.shape_cast %841 : vector<1x32x8xf32> to vector<32x8xf32>
    %cst_477 = arith.constant dense<0.000000e+00> : vector<8x32xf32>
    %843 = tpu.matmul %838, %0, %cst_477 {dimension_numbers = #tpu.dot_dimension_numbers<[1], [0], [0], [1], [0, 0, 1, 1], [], []>} : vector<8x32xf32>, vector<32x32xf32>, vector<8x32xf32> -> vector<8x32xf32>
    %cst_478 = arith.constant dense<0.000000e+00> : vector<8x64xf32>
    %844 = tpu.matmul %840, %834, %cst_478 {dimension_numbers = #tpu.dot_dimension_numbers<[1], [0], [0], [1], [0, 0, 1, 1], [], []>} : vector<8x32xf32>, vector<32x64xf32>, vector<8x64xf32> -> vector<8x64xf32>
    %845 = vector.extract_strided_slice %844 {offsets = [0, 0], sizes = [8, 32], strides = [1, 1]} : vector<8x64xf32> to vector<8x32xf32>
    %846 = vector.extract_strided_slice %844 {offsets = [0, 32], sizes = [8, 32], strides = [1, 1]} : vector<8x64xf32> to vector<8x32xf32>
    %c1_479 = arith.constant 1 : index
    %c0_480 = arith.constant 0 : index
    %c0_481 = arith.constant 0 : index
    %847 = vector.load %arg6[%c1_479, %c0_480, %c0_481] : memref<2x32x64xf32, #tpu.memory_space<vmem>>, vector<1x32x64xf32>
    %848 = vector.shape_cast %847 : vector<1x32x64xf32> to vector<32x64xf32>
    %cst_482 = arith.constant dense<0.000000e+00> : vector<8x64xf32>
    %849 = tpu.matmul %843, %848, %cst_482 {dimension_numbers = #tpu.dot_dimension_numbers<[1], [0], [0], [1], [0, 0, 1, 1], [], []>} : vector<8x32xf32>, vector<32x64xf32>, vector<8x64xf32> -> vector<8x64xf32>
    %850 = vector.extract_strided_slice %849 {offsets = [0, 0], sizes = [8, 32], strides = [1, 1]} : vector<8x64xf32> to vector<8x32xf32>
    %cst_483 = arith.constant dense<0.000000e+00> : vector<8x32xf32>
    %851 = tpu.matmul %836, %850, %cst_483 {dimension_numbers = #tpu.dot_dimension_numbers<[1], [0], [0], [1], [0, 0, 1, 1], [], []>} : vector<8x8xf32>, vector<8x32xf32>, vector<8x32xf32> -> vector<8x32xf32>
    %c1_484 = arith.constant 1 : index
    %c0_485 = arith.constant 0 : index
    %c0_486 = arith.constant 0 : index
    %852 = vector.load %arg7[%c1_484, %c0_485, %c0_486] : memref<2x1x32xf32, #tpu.memory_space<vmem>>, vector<1x1x32xf32>
    %853 = vector.shape_cast %852 : vector<1x1x32xf32> to vector<1x32xf32>
    %854 = vector.broadcast %853 : vector<1x32xf32> to vector<8x32xf32>
    %855 = arith.addf %851, %854 : vector<8x32xf32>
    %cst_487 = arith.constant 0.000000e+00 : f32
    %856 = vector.broadcast %cst_487 : f32 to vector<8x32xf32>
    %857 = arith.maximumf %855, %856 : vector<8x32xf32>
    %858 = vector.extract_strided_slice %849 {offsets = [0, 32], sizes = [8, 32], strides = [1, 1]} : vector<8x64xf32> to vector<8x32xf32>
    %c1_488 = arith.constant 1 : index
    %c0_489 = arith.constant 0 : index
    %c0_490 = arith.constant 0 : index
    %859 = vector.load %arg8[%c1_488, %c0_489, %c0_490] : memref<2x32x32xf32, #tpu.memory_space<vmem>>, vector<1x32x32xf32>
    %860 = vector.shape_cast %859 : vector<1x32x32xf32> to vector<32x32xf32>
    %cst_491 = arith.constant dense<0.000000e+00> : vector<8x32xf32>
    %861 = tpu.matmul %845, %860, %cst_491 {dimension_numbers = #tpu.dot_dimension_numbers<[1], [0], [0], [1], [0, 0, 1, 1], [], []>} : vector<8x32xf32>, vector<32x32xf32>, vector<8x32xf32> -> vector<8x32xf32>
    %862 = arith.addf %858, %861 : vector<8x32xf32>
    %cst_492 = arith.constant dense<0.000000e+00> : vector<8x32xf32>
    %863 = tpu.matmul %836, %862, %cst_492 {dimension_numbers = #tpu.dot_dimension_numbers<[1], [0], [0], [1], [0, 0, 1, 1], [], []>} : vector<8x8xf32>, vector<8x32xf32>, vector<8x32xf32> -> vector<8x32xf32>
    %c1_493 = arith.constant 1 : index
    %c0_494 = arith.constant 0 : index
    %c0_495 = arith.constant 0 : index
    %864 = vector.load %arg9[%c1_493, %c0_494, %c0_495] : memref<2x1x32xf32, #tpu.memory_space<vmem>>, vector<1x1x32xf32>
    %865 = vector.shape_cast %864 : vector<1x1x32xf32> to vector<1x32xf32>
    %866 = vector.broadcast %865 : vector<1x32xf32> to vector<8x32xf32>
    %867 = arith.addf %863, %866 : vector<8x32xf32>
    %cst_496 = arith.constant 0.000000e+00 : f32
    %868 = vector.broadcast %cst_496 : f32 to vector<8x32xf32>
    %869 = arith.maximumf %867, %868 : vector<8x32xf32>
    %c1_497 = arith.constant 1 : index
    %c0_498 = arith.constant 0 : index
    %c0_499 = arith.constant 0 : index
    %870 = vector.load %arg10[%c1_497, %c0_498, %c0_499] : memref<2x32x96xf32, #tpu.memory_space<vmem>>, vector<1x32x96xf32>
    %871 = vector.shape_cast %870 : vector<1x32x96xf32> to vector<32x96xf32>
    %c1_500 = arith.constant 1 : index
    %c0_501 = arith.constant 0 : index
    %c0_502 = arith.constant 0 : index
    %872 = vector.load %arg11[%c1_500, %c0_501, %c0_502] : memref<2x32x96xf32, #tpu.memory_space<vmem>>, vector<1x32x96xf32>
    %873 = vector.shape_cast %872 : vector<1x32x96xf32> to vector<32x96xf32>
    %c1_503 = arith.constant 1 : index
    %c0_504 = arith.constant 0 : index
    %c0_505 = arith.constant 0 : index
    %874 = vector.load %arg12[%c1_503, %c0_504, %c0_505] : memref<2x1x96xf32, #tpu.memory_space<vmem>>, vector<1x1x96xf32>
    %875 = vector.shape_cast %874 : vector<1x1x96xf32> to vector<1x96xf32>
    %c1_506 = arith.constant 1 : index
    %c0_507 = arith.constant 0 : index
    %c0_508 = arith.constant 0 : index
    %876 = vector.load %arg13[%c1_506, %c0_507, %c0_508] : memref<2x1x96xf32, #tpu.memory_space<vmem>>, vector<1x1x96xf32>
    %877 = vector.shape_cast %876 : vector<1x1x96xf32> to vector<1x96xf32>
    %cst_509 = arith.constant dense<0.000000e+00> : vector<8x96xf32>
    %878 = tpu.matmul %857, %871, %cst_509 {dimension_numbers = #tpu.dot_dimension_numbers<[1], [0], [0], [1], [0, 0, 1, 1], [], []>} : vector<8x32xf32>, vector<32x96xf32>, vector<8x96xf32> -> vector<8x96xf32>
    %879 = vector.broadcast %875 : vector<1x96xf32> to vector<8x96xf32>
    %880 = arith.addf %878, %879 : vector<8x96xf32>
    %cst_510 = arith.constant dense<0.000000e+00> : vector<8x96xf32>
    %881 = tpu.matmul %845, %873, %cst_510 {dimension_numbers = #tpu.dot_dimension_numbers<[1], [0], [0], [1], [0, 0, 1, 1], [], []>} : vector<8x32xf32>, vector<32x96xf32>, vector<8x96xf32> -> vector<8x96xf32>
    %882 = vector.broadcast %877 : vector<1x96xf32> to vector<8x96xf32>
    %883 = arith.addf %881, %882 : vector<8x96xf32>
    %884 = vector.extract_strided_slice %880 {offsets = [0, 0], sizes = [8, 32], strides = [1, 1]} : vector<8x96xf32> to vector<8x32xf32>
    %885 = vector.extract_strided_slice %883 {offsets = [0, 0], sizes = [8, 32], strides = [1, 1]} : vector<8x96xf32> to vector<8x32xf32>
    %886 = arith.addf %884, %885 : vector<8x32xf32>
    %887 = arith.negf %886 : vector<8x32xf32>
    %888 = math.exp %887 : vector<8x32xf32>
    %cst_511 = arith.constant 1.000000e+00 : f32
    %889 = vector.broadcast %cst_511 : f32 to vector<8x32xf32>
    %890 = arith.addf %889, %888 : vector<8x32xf32>
    %891 = arith.divf %889, %890 : vector<8x32xf32>
    %892 = vector.extract_strided_slice %880 {offsets = [0, 32], sizes = [8, 32], strides = [1, 1]} : vector<8x96xf32> to vector<8x32xf32>
    %893 = vector.extract_strided_slice %883 {offsets = [0, 32], sizes = [8, 32], strides = [1, 1]} : vector<8x96xf32> to vector<8x32xf32>
    %894 = arith.addf %892, %893 : vector<8x32xf32>
    %895 = arith.negf %894 : vector<8x32xf32>
    %896 = math.exp %895 : vector<8x32xf32>
    %cst_512 = arith.constant 1.000000e+00 : f32
    %897 = vector.broadcast %cst_512 : f32 to vector<8x32xf32>
    %898 = arith.addf %897, %896 : vector<8x32xf32>
    %899 = arith.divf %897, %898 : vector<8x32xf32>
    %900 = vector.extract_strided_slice %880 {offsets = [0, 64], sizes = [8, 32], strides = [1, 1]} : vector<8x96xf32> to vector<8x32xf32>
    %901 = vector.extract_strided_slice %883 {offsets = [0, 64], sizes = [8, 32], strides = [1, 1]} : vector<8x96xf32> to vector<8x32xf32>
    %902 = arith.mulf %891, %901 : vector<8x32xf32>
    %903 = arith.addf %900, %902 : vector<8x32xf32>
    %904 = math.tanh %903 : vector<8x32xf32>
    %cst_513 = arith.constant 1.000000e+00 : f32
    %905 = vector.broadcast %cst_513 : f32 to vector<8x32xf32>
    %906 = arith.subf %905, %899 : vector<8x32xf32>
    %907 = arith.mulf %906, %904 : vector<8x32xf32>
    %908 = arith.mulf %899, %845 : vector<8x32xf32>
    %909 = arith.addf %907, %908 : vector<8x32xf32>
    %c1_514 = arith.constant 1 : index
    %c0_515 = arith.constant 0 : index
    %c0_516 = arith.constant 0 : index
    %910 = vector.load %arg14[%c1_514, %c0_515, %c0_516] : memref<2x32x96xf32, #tpu.memory_space<vmem>>, vector<1x32x96xf32>
    %911 = vector.shape_cast %910 : vector<1x32x96xf32> to vector<32x96xf32>
    %c1_517 = arith.constant 1 : index
    %c0_518 = arith.constant 0 : index
    %c0_519 = arith.constant 0 : index
    %912 = vector.load %arg15[%c1_517, %c0_518, %c0_519] : memref<2x32x96xf32, #tpu.memory_space<vmem>>, vector<1x32x96xf32>
    %913 = vector.shape_cast %912 : vector<1x32x96xf32> to vector<32x96xf32>
    %c1_520 = arith.constant 1 : index
    %c0_521 = arith.constant 0 : index
    %c0_522 = arith.constant 0 : index
    %914 = vector.load %arg16[%c1_520, %c0_521, %c0_522] : memref<2x1x96xf32, #tpu.memory_space<vmem>>, vector<1x1x96xf32>
    %915 = vector.shape_cast %914 : vector<1x1x96xf32> to vector<1x96xf32>
    %c1_523 = arith.constant 1 : index
    %c0_524 = arith.constant 0 : index
    %c0_525 = arith.constant 0 : index
    %916 = vector.load %arg17[%c1_523, %c0_524, %c0_525] : memref<2x1x96xf32, #tpu.memory_space<vmem>>, vector<1x1x96xf32>
    %917 = vector.shape_cast %916 : vector<1x1x96xf32> to vector<1x96xf32>
    %cst_526 = arith.constant dense<0.000000e+00> : vector<8x96xf32>
    %918 = tpu.matmul %869, %911, %cst_526 {dimension_numbers = #tpu.dot_dimension_numbers<[1], [0], [0], [1], [0, 0, 1, 1], [], []>} : vector<8x32xf32>, vector<32x96xf32>, vector<8x96xf32> -> vector<8x96xf32>
    %919 = vector.broadcast %915 : vector<1x96xf32> to vector<8x96xf32>
    %920 = arith.addf %918, %919 : vector<8x96xf32>
    %cst_527 = arith.constant dense<0.000000e+00> : vector<8x96xf32>
    %921 = tpu.matmul %846, %913, %cst_527 {dimension_numbers = #tpu.dot_dimension_numbers<[1], [0], [0], [1], [0, 0, 1, 1], [], []>} : vector<8x32xf32>, vector<32x96xf32>, vector<8x96xf32> -> vector<8x96xf32>
    %922 = vector.broadcast %917 : vector<1x96xf32> to vector<8x96xf32>
    %923 = arith.addf %921, %922 : vector<8x96xf32>
    %924 = vector.extract_strided_slice %920 {offsets = [0, 0], sizes = [8, 32], strides = [1, 1]} : vector<8x96xf32> to vector<8x32xf32>
    %925 = vector.extract_strided_slice %923 {offsets = [0, 0], sizes = [8, 32], strides = [1, 1]} : vector<8x96xf32> to vector<8x32xf32>
    %926 = arith.addf %924, %925 : vector<8x32xf32>
    %927 = arith.negf %926 : vector<8x32xf32>
    %928 = math.exp %927 : vector<8x32xf32>
    %cst_528 = arith.constant 1.000000e+00 : f32
    %929 = vector.broadcast %cst_528 : f32 to vector<8x32xf32>
    %930 = arith.addf %929, %928 : vector<8x32xf32>
    %931 = arith.divf %929, %930 : vector<8x32xf32>
    %932 = vector.extract_strided_slice %920 {offsets = [0, 32], sizes = [8, 32], strides = [1, 1]} : vector<8x96xf32> to vector<8x32xf32>
    %933 = vector.extract_strided_slice %923 {offsets = [0, 32], sizes = [8, 32], strides = [1, 1]} : vector<8x96xf32> to vector<8x32xf32>
    %934 = arith.addf %932, %933 : vector<8x32xf32>
    %935 = arith.negf %934 : vector<8x32xf32>
    %936 = math.exp %935 : vector<8x32xf32>
    %cst_529 = arith.constant 1.000000e+00 : f32
    %937 = vector.broadcast %cst_529 : f32 to vector<8x32xf32>
    %938 = arith.addf %937, %936 : vector<8x32xf32>
    %939 = arith.divf %937, %938 : vector<8x32xf32>
    %940 = vector.extract_strided_slice %920 {offsets = [0, 64], sizes = [8, 32], strides = [1, 1]} : vector<8x96xf32> to vector<8x32xf32>
    %941 = vector.extract_strided_slice %923 {offsets = [0, 64], sizes = [8, 32], strides = [1, 1]} : vector<8x96xf32> to vector<8x32xf32>
    %942 = arith.mulf %931, %941 : vector<8x32xf32>
    %943 = arith.addf %940, %942 : vector<8x32xf32>
    %944 = math.tanh %943 : vector<8x32xf32>
    %cst_530 = arith.constant 1.000000e+00 : f32
    %945 = vector.broadcast %cst_530 : f32 to vector<8x32xf32>
    %946 = arith.subf %945, %939 : vector<8x32xf32>
    %947 = arith.mulf %946, %944 : vector<8x32xf32>
    %948 = arith.mulf %939, %846 : vector<8x32xf32>
    %949 = arith.addf %947, %948 : vector<8x32xf32>
    %950 = tpu.concatenate %909, %949 in 1 : vector<8x32xf32>, vector<8x32xf32> -> vector<8x64xf32>
    %951 = arith.subf %950, %844 : vector<8x64xf32>
    %cst_531 = arith.constant dense<0.000000e+00> : vector<32x64xf32>
    %952 = tpu.matmul %842, %951, %cst_531 {dimension_numbers = #tpu.dot_dimension_numbers<[1], [0], [0], [1], [0, 0, 1, 1], [], []>} : vector<32x8xf32>, vector<8x64xf32>, vector<32x64xf32> -> vector<32x64xf32>
    %953 = arith.addf %834, %952 : vector<32x64xf32>
    %c2_532 = arith.constant 2 : index
    %c0_533 = arith.constant 0 : index
    %c0_534 = arith.constant 0 : index
    %954 = vector.load %arg0[%c2_532, %c0_533, %c0_534] : memref<6x8x8xf32, #tpu.memory_space<vmem>>, vector<1x8x8xf32>
    %955 = vector.shape_cast %954 : vector<1x8x8xf32> to vector<8x8xf32>
    %c2_535 = arith.constant 2 : index
    %c0_536 = arith.constant 0 : index
    %c0_537 = arith.constant 0 : index
    %956 = vector.load %arg1[%c2_535, %c0_536, %c0_537] : memref<6x8x32xf32, #tpu.memory_space<vmem>>, vector<1x8x32xf32>
    %957 = vector.shape_cast %956 : vector<1x8x32xf32> to vector<8x32xf32>
    %c2_538 = arith.constant 2 : index
    %c0_539 = arith.constant 0 : index
    %c0_540 = arith.constant 0 : index
    %958 = vector.load %arg2[%c2_538, %c0_539, %c0_540] : memref<6x8x32xf32, #tpu.memory_space<vmem>>, vector<1x8x32xf32>
    %959 = vector.shape_cast %958 : vector<1x8x32xf32> to vector<8x32xf32>
    %c2_541 = arith.constant 2 : index
    %c0_542 = arith.constant 0 : index
    %c0_543 = arith.constant 0 : index
    %960 = vector.load %arg3[%c2_541, %c0_542, %c0_543] : memref<6x32x8xf32, #tpu.memory_space<vmem>>, vector<1x32x8xf32>
    %961 = vector.shape_cast %960 : vector<1x32x8xf32> to vector<32x8xf32>
    %cst_544 = arith.constant dense<0.000000e+00> : vector<8x32xf32>
    %962 = tpu.matmul %957, %0, %cst_544 {dimension_numbers = #tpu.dot_dimension_numbers<[1], [0], [0], [1], [0, 0, 1, 1], [], []>} : vector<8x32xf32>, vector<32x32xf32>, vector<8x32xf32> -> vector<8x32xf32>
    %cst_545 = arith.constant dense<0.000000e+00> : vector<8x64xf32>
    %963 = tpu.matmul %959, %953, %cst_545 {dimension_numbers = #tpu.dot_dimension_numbers<[1], [0], [0], [1], [0, 0, 1, 1], [], []>} : vector<8x32xf32>, vector<32x64xf32>, vector<8x64xf32> -> vector<8x64xf32>
    %964 = vector.extract_strided_slice %963 {offsets = [0, 0], sizes = [8, 32], strides = [1, 1]} : vector<8x64xf32> to vector<8x32xf32>
    %965 = vector.extract_strided_slice %963 {offsets = [0, 32], sizes = [8, 32], strides = [1, 1]} : vector<8x64xf32> to vector<8x32xf32>
    %c0_546 = arith.constant 0 : index
    %c0_547 = arith.constant 0 : index
    %c0_548 = arith.constant 0 : index
    %966 = vector.load %arg6[%c0_546, %c0_547, %c0_548] : memref<2x32x64xf32, #tpu.memory_space<vmem>>, vector<1x32x64xf32>
    %967 = vector.shape_cast %966 : vector<1x32x64xf32> to vector<32x64xf32>
    %cst_549 = arith.constant dense<0.000000e+00> : vector<8x64xf32>
    %968 = tpu.matmul %962, %967, %cst_549 {dimension_numbers = #tpu.dot_dimension_numbers<[1], [0], [0], [1], [0, 0, 1, 1], [], []>} : vector<8x32xf32>, vector<32x64xf32>, vector<8x64xf32> -> vector<8x64xf32>
    %969 = vector.extract_strided_slice %968 {offsets = [0, 0], sizes = [8, 32], strides = [1, 1]} : vector<8x64xf32> to vector<8x32xf32>
    %cst_550 = arith.constant dense<0.000000e+00> : vector<8x32xf32>
    %970 = tpu.matmul %955, %969, %cst_550 {dimension_numbers = #tpu.dot_dimension_numbers<[1], [0], [0], [1], [0, 0, 1, 1], [], []>} : vector<8x8xf32>, vector<8x32xf32>, vector<8x32xf32> -> vector<8x32xf32>
    %c0_551 = arith.constant 0 : index
    %c0_552 = arith.constant 0 : index
    %c0_553 = arith.constant 0 : index
    %971 = vector.load %arg7[%c0_551, %c0_552, %c0_553] : memref<2x1x32xf32, #tpu.memory_space<vmem>>, vector<1x1x32xf32>
    %972 = vector.shape_cast %971 : vector<1x1x32xf32> to vector<1x32xf32>
    %973 = vector.broadcast %972 : vector<1x32xf32> to vector<8x32xf32>
    %974 = arith.addf %970, %973 : vector<8x32xf32>
    %cst_554 = arith.constant 0.000000e+00 : f32
    %975 = vector.broadcast %cst_554 : f32 to vector<8x32xf32>
    %976 = arith.maximumf %974, %975 : vector<8x32xf32>
    %977 = vector.extract_strided_slice %968 {offsets = [0, 32], sizes = [8, 32], strides = [1, 1]} : vector<8x64xf32> to vector<8x32xf32>
    %c0_555 = arith.constant 0 : index
    %c0_556 = arith.constant 0 : index
    %c0_557 = arith.constant 0 : index
    %978 = vector.load %arg8[%c0_555, %c0_556, %c0_557] : memref<2x32x32xf32, #tpu.memory_space<vmem>>, vector<1x32x32xf32>
    %979 = vector.shape_cast %978 : vector<1x32x32xf32> to vector<32x32xf32>
    %cst_558 = arith.constant dense<0.000000e+00> : vector<8x32xf32>
    %980 = tpu.matmul %964, %979, %cst_558 {dimension_numbers = #tpu.dot_dimension_numbers<[1], [0], [0], [1], [0, 0, 1, 1], [], []>} : vector<8x32xf32>, vector<32x32xf32>, vector<8x32xf32> -> vector<8x32xf32>
    %981 = arith.addf %977, %980 : vector<8x32xf32>
    %cst_559 = arith.constant dense<0.000000e+00> : vector<8x32xf32>
    %982 = tpu.matmul %955, %981, %cst_559 {dimension_numbers = #tpu.dot_dimension_numbers<[1], [0], [0], [1], [0, 0, 1, 1], [], []>} : vector<8x8xf32>, vector<8x32xf32>, vector<8x32xf32> -> vector<8x32xf32>
    %c0_560 = arith.constant 0 : index
    %c0_561 = arith.constant 0 : index
    %c0_562 = arith.constant 0 : index
    %983 = vector.load %arg9[%c0_560, %c0_561, %c0_562] : memref<2x1x32xf32, #tpu.memory_space<vmem>>, vector<1x1x32xf32>
    %984 = vector.shape_cast %983 : vector<1x1x32xf32> to vector<1x32xf32>
    %985 = vector.broadcast %984 : vector<1x32xf32> to vector<8x32xf32>
    %986 = arith.addf %982, %985 : vector<8x32xf32>
    %cst_563 = arith.constant 0.000000e+00 : f32
    %987 = vector.broadcast %cst_563 : f32 to vector<8x32xf32>
    %988 = arith.maximumf %986, %987 : vector<8x32xf32>
    %c0_564 = arith.constant 0 : index
    %c0_565 = arith.constant 0 : index
    %c0_566 = arith.constant 0 : index
    %989 = vector.load %arg10[%c0_564, %c0_565, %c0_566] : memref<2x32x96xf32, #tpu.memory_space<vmem>>, vector<1x32x96xf32>
    %990 = vector.shape_cast %989 : vector<1x32x96xf32> to vector<32x96xf32>
    %c0_567 = arith.constant 0 : index
    %c0_568 = arith.constant 0 : index
    %c0_569 = arith.constant 0 : index
    %991 = vector.load %arg11[%c0_567, %c0_568, %c0_569] : memref<2x32x96xf32, #tpu.memory_space<vmem>>, vector<1x32x96xf32>
    %992 = vector.shape_cast %991 : vector<1x32x96xf32> to vector<32x96xf32>
    %c0_570 = arith.constant 0 : index
    %c0_571 = arith.constant 0 : index
    %c0_572 = arith.constant 0 : index
    %993 = vector.load %arg12[%c0_570, %c0_571, %c0_572] : memref<2x1x96xf32, #tpu.memory_space<vmem>>, vector<1x1x96xf32>
    %994 = vector.shape_cast %993 : vector<1x1x96xf32> to vector<1x96xf32>
    %c0_573 = arith.constant 0 : index
    %c0_574 = arith.constant 0 : index
    %c0_575 = arith.constant 0 : index
    %995 = vector.load %arg13[%c0_573, %c0_574, %c0_575] : memref<2x1x96xf32, #tpu.memory_space<vmem>>, vector<1x1x96xf32>
    %996 = vector.shape_cast %995 : vector<1x1x96xf32> to vector<1x96xf32>
    %cst_576 = arith.constant dense<0.000000e+00> : vector<8x96xf32>
    %997 = tpu.matmul %976, %990, %cst_576 {dimension_numbers = #tpu.dot_dimension_numbers<[1], [0], [0], [1], [0, 0, 1, 1], [], []>} : vector<8x32xf32>, vector<32x96xf32>, vector<8x96xf32> -> vector<8x96xf32>
    %998 = vector.broadcast %994 : vector<1x96xf32> to vector<8x96xf32>
    %999 = arith.addf %997, %998 : vector<8x96xf32>
    %cst_577 = arith.constant dense<0.000000e+00> : vector<8x96xf32>
    %1000 = tpu.matmul %964, %992, %cst_577 {dimension_numbers = #tpu.dot_dimension_numbers<[1], [0], [0], [1], [0, 0, 1, 1], [], []>} : vector<8x32xf32>, vector<32x96xf32>, vector<8x96xf32> -> vector<8x96xf32>
    %1001 = vector.broadcast %996 : vector<1x96xf32> to vector<8x96xf32>
    %1002 = arith.addf %1000, %1001 : vector<8x96xf32>
    %1003 = vector.extract_strided_slice %999 {offsets = [0, 0], sizes = [8, 32], strides = [1, 1]} : vector<8x96xf32> to vector<8x32xf32>
    %1004 = vector.extract_strided_slice %1002 {offsets = [0, 0], sizes = [8, 32], strides = [1, 1]} : vector<8x96xf32> to vector<8x32xf32>
    %1005 = arith.addf %1003, %1004 : vector<8x32xf32>
    %1006 = arith.negf %1005 : vector<8x32xf32>
    %1007 = math.exp %1006 : vector<8x32xf32>
    %cst_578 = arith.constant 1.000000e+00 : f32
    %1008 = vector.broadcast %cst_578 : f32 to vector<8x32xf32>
    %1009 = arith.addf %1008, %1007 : vector<8x32xf32>
    %1010 = arith.divf %1008, %1009 : vector<8x32xf32>
    %1011 = vector.extract_strided_slice %999 {offsets = [0, 32], sizes = [8, 32], strides = [1, 1]} : vector<8x96xf32> to vector<8x32xf32>
    %1012 = vector.extract_strided_slice %1002 {offsets = [0, 32], sizes = [8, 32], strides = [1, 1]} : vector<8x96xf32> to vector<8x32xf32>
    %1013 = arith.addf %1011, %1012 : vector<8x32xf32>
    %1014 = arith.negf %1013 : vector<8x32xf32>
    %1015 = math.exp %1014 : vector<8x32xf32>
    %cst_579 = arith.constant 1.000000e+00 : f32
    %1016 = vector.broadcast %cst_579 : f32 to vector<8x32xf32>
    %1017 = arith.addf %1016, %1015 : vector<8x32xf32>
    %1018 = arith.divf %1016, %1017 : vector<8x32xf32>
    %1019 = vector.extract_strided_slice %999 {offsets = [0, 64], sizes = [8, 32], strides = [1, 1]} : vector<8x96xf32> to vector<8x32xf32>
    %1020 = vector.extract_strided_slice %1002 {offsets = [0, 64], sizes = [8, 32], strides = [1, 1]} : vector<8x96xf32> to vector<8x32xf32>
    %1021 = arith.mulf %1010, %1020 : vector<8x32xf32>
    %1022 = arith.addf %1019, %1021 : vector<8x32xf32>
    %1023 = math.tanh %1022 : vector<8x32xf32>
    %cst_580 = arith.constant 1.000000e+00 : f32
    %1024 = vector.broadcast %cst_580 : f32 to vector<8x32xf32>
    %1025 = arith.subf %1024, %1018 : vector<8x32xf32>
    %1026 = arith.mulf %1025, %1023 : vector<8x32xf32>
    %1027 = arith.mulf %1018, %964 : vector<8x32xf32>
    %1028 = arith.addf %1026, %1027 : vector<8x32xf32>
    %c0_581 = arith.constant 0 : index
    %c0_582 = arith.constant 0 : index
    %c0_583 = arith.constant 0 : index
    %1029 = vector.load %arg14[%c0_581, %c0_582, %c0_583] : memref<2x32x96xf32, #tpu.memory_space<vmem>>, vector<1x32x96xf32>
    %1030 = vector.shape_cast %1029 : vector<1x32x96xf32> to vector<32x96xf32>
    %c0_584 = arith.constant 0 : index
    %c0_585 = arith.constant 0 : index
    %c0_586 = arith.constant 0 : index
    %1031 = vector.load %arg15[%c0_584, %c0_585, %c0_586] : memref<2x32x96xf32, #tpu.memory_space<vmem>>, vector<1x32x96xf32>
    %1032 = vector.shape_cast %1031 : vector<1x32x96xf32> to vector<32x96xf32>
    %c0_587 = arith.constant 0 : index
    %c0_588 = arith.constant 0 : index
    %c0_589 = arith.constant 0 : index
    %1033 = vector.load %arg16[%c0_587, %c0_588, %c0_589] : memref<2x1x96xf32, #tpu.memory_space<vmem>>, vector<1x1x96xf32>
    %1034 = vector.shape_cast %1033 : vector<1x1x96xf32> to vector<1x96xf32>
    %c0_590 = arith.constant 0 : index
    %c0_591 = arith.constant 0 : index
    %c0_592 = arith.constant 0 : index
    %1035 = vector.load %arg17[%c0_590, %c0_591, %c0_592] : memref<2x1x96xf32, #tpu.memory_space<vmem>>, vector<1x1x96xf32>
    %1036 = vector.shape_cast %1035 : vector<1x1x96xf32> to vector<1x96xf32>
    %cst_593 = arith.constant dense<0.000000e+00> : vector<8x96xf32>
    %1037 = tpu.matmul %988, %1030, %cst_593 {dimension_numbers = #tpu.dot_dimension_numbers<[1], [0], [0], [1], [0, 0, 1, 1], [], []>} : vector<8x32xf32>, vector<32x96xf32>, vector<8x96xf32> -> vector<8x96xf32>
    %1038 = vector.broadcast %1034 : vector<1x96xf32> to vector<8x96xf32>
    %1039 = arith.addf %1037, %1038 : vector<8x96xf32>
    %cst_594 = arith.constant dense<0.000000e+00> : vector<8x96xf32>
    %1040 = tpu.matmul %965, %1032, %cst_594 {dimension_numbers = #tpu.dot_dimension_numbers<[1], [0], [0], [1], [0, 0, 1, 1], [], []>} : vector<8x32xf32>, vector<32x96xf32>, vector<8x96xf32> -> vector<8x96xf32>
    %1041 = vector.broadcast %1036 : vector<1x96xf32> to vector<8x96xf32>
    %1042 = arith.addf %1040, %1041 : vector<8x96xf32>
    %1043 = vector.extract_strided_slice %1039 {offsets = [0, 0], sizes = [8, 32], strides = [1, 1]} : vector<8x96xf32> to vector<8x32xf32>
    %1044 = vector.extract_strided_slice %1042 {offsets = [0, 0], sizes = [8, 32], strides = [1, 1]} : vector<8x96xf32> to vector<8x32xf32>
    %1045 = arith.addf %1043, %1044 : vector<8x32xf32>
    %1046 = arith.negf %1045 : vector<8x32xf32>
    %1047 = math.exp %1046 : vector<8x32xf32>
    %cst_595 = arith.constant 1.000000e+00 : f32
    %1048 = vector.broadcast %cst_595 : f32 to vector<8x32xf32>
    %1049 = arith.addf %1048, %1047 : vector<8x32xf32>
    %1050 = arith.divf %1048, %1049 : vector<8x32xf32>
    %1051 = vector.extract_strided_slice %1039 {offsets = [0, 32], sizes = [8, 32], strides = [1, 1]} : vector<8x96xf32> to vector<8x32xf32>
    %1052 = vector.extract_strided_slice %1042 {offsets = [0, 32], sizes = [8, 32], strides = [1, 1]} : vector<8x96xf32> to vector<8x32xf32>
    %1053 = arith.addf %1051, %1052 : vector<8x32xf32>
    %1054 = arith.negf %1053 : vector<8x32xf32>
    %1055 = math.exp %1054 : vector<8x32xf32>
    %cst_596 = arith.constant 1.000000e+00 : f32
    %1056 = vector.broadcast %cst_596 : f32 to vector<8x32xf32>
    %1057 = arith.addf %1056, %1055 : vector<8x32xf32>
    %1058 = arith.divf %1056, %1057 : vector<8x32xf32>
    %1059 = vector.extract_strided_slice %1039 {offsets = [0, 64], sizes = [8, 32], strides = [1, 1]} : vector<8x96xf32> to vector<8x32xf32>
    %1060 = vector.extract_strided_slice %1042 {offsets = [0, 64], sizes = [8, 32], strides = [1, 1]} : vector<8x96xf32> to vector<8x32xf32>
    %1061 = arith.mulf %1050, %1060 : vector<8x32xf32>
    %1062 = arith.addf %1059, %1061 : vector<8x32xf32>
    %1063 = math.tanh %1062 : vector<8x32xf32>
    %cst_597 = arith.constant 1.000000e+00 : f32
    %1064 = vector.broadcast %cst_597 : f32 to vector<8x32xf32>
    %1065 = arith.subf %1064, %1058 : vector<8x32xf32>
    %1066 = arith.mulf %1065, %1063 : vector<8x32xf32>
    %1067 = arith.mulf %1058, %965 : vector<8x32xf32>
    %1068 = arith.addf %1066, %1067 : vector<8x32xf32>
    %1069 = tpu.concatenate %1028, %1068 in 1 : vector<8x32xf32>, vector<8x32xf32> -> vector<8x64xf32>
    %1070 = arith.subf %1069, %963 : vector<8x64xf32>
    %cst_598 = arith.constant dense<0.000000e+00> : vector<32x64xf32>
    %1071 = tpu.matmul %961, %1070, %cst_598 {dimension_numbers = #tpu.dot_dimension_numbers<[1], [0], [0], [1], [0, 0, 1, 1], [], []>} : vector<32x8xf32>, vector<8x64xf32>, vector<32x64xf32> -> vector<32x64xf32>
    %1072 = arith.addf %953, %1071 : vector<32x64xf32>
    %c3_599 = arith.constant 3 : index
    %c0_600 = arith.constant 0 : index
    %c0_601 = arith.constant 0 : index
    %1073 = vector.load %arg0[%c3_599, %c0_600, %c0_601] : memref<6x8x8xf32, #tpu.memory_space<vmem>>, vector<1x8x8xf32>
    %1074 = vector.shape_cast %1073 : vector<1x8x8xf32> to vector<8x8xf32>
    %c3_602 = arith.constant 3 : index
    %c0_603 = arith.constant 0 : index
    %c0_604 = arith.constant 0 : index
    %1075 = vector.load %arg1[%c3_602, %c0_603, %c0_604] : memref<6x8x32xf32, #tpu.memory_space<vmem>>, vector<1x8x32xf32>
    %1076 = vector.shape_cast %1075 : vector<1x8x32xf32> to vector<8x32xf32>
    %c3_605 = arith.constant 3 : index
    %c0_606 = arith.constant 0 : index
    %c0_607 = arith.constant 0 : index
    %1077 = vector.load %arg2[%c3_605, %c0_606, %c0_607] : memref<6x8x32xf32, #tpu.memory_space<vmem>>, vector<1x8x32xf32>
    %1078 = vector.shape_cast %1077 : vector<1x8x32xf32> to vector<8x32xf32>
    %c3_608 = arith.constant 3 : index
    %c0_609 = arith.constant 0 : index
    %c0_610 = arith.constant 0 : index
    %1079 = vector.load %arg3[%c3_608, %c0_609, %c0_610] : memref<6x32x8xf32, #tpu.memory_space<vmem>>, vector<1x32x8xf32>
    %1080 = vector.shape_cast %1079 : vector<1x32x8xf32> to vector<32x8xf32>
    %cst_611 = arith.constant dense<0.000000e+00> : vector<8x32xf32>
    %1081 = tpu.matmul %1076, %0, %cst_611 {dimension_numbers = #tpu.dot_dimension_numbers<[1], [0], [0], [1], [0, 0, 1, 1], [], []>} : vector<8x32xf32>, vector<32x32xf32>, vector<8x32xf32> -> vector<8x32xf32>
    %cst_612 = arith.constant dense<0.000000e+00> : vector<8x64xf32>
    %1082 = tpu.matmul %1078, %1072, %cst_612 {dimension_numbers = #tpu.dot_dimension_numbers<[1], [0], [0], [1], [0, 0, 1, 1], [], []>} : vector<8x32xf32>, vector<32x64xf32>, vector<8x64xf32> -> vector<8x64xf32>
    %1083 = vector.extract_strided_slice %1082 {offsets = [0, 0], sizes = [8, 32], strides = [1, 1]} : vector<8x64xf32> to vector<8x32xf32>
    %1084 = vector.extract_strided_slice %1082 {offsets = [0, 32], sizes = [8, 32], strides = [1, 1]} : vector<8x64xf32> to vector<8x32xf32>
    %c1_613 = arith.constant 1 : index
    %c0_614 = arith.constant 0 : index
    %c0_615 = arith.constant 0 : index
    %1085 = vector.load %arg6[%c1_613, %c0_614, %c0_615] : memref<2x32x64xf32, #tpu.memory_space<vmem>>, vector<1x32x64xf32>
    %1086 = vector.shape_cast %1085 : vector<1x32x64xf32> to vector<32x64xf32>
    %cst_616 = arith.constant dense<0.000000e+00> : vector<8x64xf32>
    %1087 = tpu.matmul %1081, %1086, %cst_616 {dimension_numbers = #tpu.dot_dimension_numbers<[1], [0], [0], [1], [0, 0, 1, 1], [], []>} : vector<8x32xf32>, vector<32x64xf32>, vector<8x64xf32> -> vector<8x64xf32>
    %1088 = vector.extract_strided_slice %1087 {offsets = [0, 0], sizes = [8, 32], strides = [1, 1]} : vector<8x64xf32> to vector<8x32xf32>
    %cst_617 = arith.constant dense<0.000000e+00> : vector<8x32xf32>
    %1089 = tpu.matmul %1074, %1088, %cst_617 {dimension_numbers = #tpu.dot_dimension_numbers<[1], [0], [0], [1], [0, 0, 1, 1], [], []>} : vector<8x8xf32>, vector<8x32xf32>, vector<8x32xf32> -> vector<8x32xf32>
    %c1_618 = arith.constant 1 : index
    %c0_619 = arith.constant 0 : index
    %c0_620 = arith.constant 0 : index
    %1090 = vector.load %arg7[%c1_618, %c0_619, %c0_620] : memref<2x1x32xf32, #tpu.memory_space<vmem>>, vector<1x1x32xf32>
    %1091 = vector.shape_cast %1090 : vector<1x1x32xf32> to vector<1x32xf32>
    %1092 = vector.broadcast %1091 : vector<1x32xf32> to vector<8x32xf32>
    %1093 = arith.addf %1089, %1092 : vector<8x32xf32>
    %cst_621 = arith.constant 0.000000e+00 : f32
    %1094 = vector.broadcast %cst_621 : f32 to vector<8x32xf32>
    %1095 = arith.maximumf %1093, %1094 : vector<8x32xf32>
    %1096 = vector.extract_strided_slice %1087 {offsets = [0, 32], sizes = [8, 32], strides = [1, 1]} : vector<8x64xf32> to vector<8x32xf32>
    %c1_622 = arith.constant 1 : index
    %c0_623 = arith.constant 0 : index
    %c0_624 = arith.constant 0 : index
    %1097 = vector.load %arg8[%c1_622, %c0_623, %c0_624] : memref<2x32x32xf32, #tpu.memory_space<vmem>>, vector<1x32x32xf32>
    %1098 = vector.shape_cast %1097 : vector<1x32x32xf32> to vector<32x32xf32>
    %cst_625 = arith.constant dense<0.000000e+00> : vector<8x32xf32>
    %1099 = tpu.matmul %1083, %1098, %cst_625 {dimension_numbers = #tpu.dot_dimension_numbers<[1], [0], [0], [1], [0, 0, 1, 1], [], []>} : vector<8x32xf32>, vector<32x32xf32>, vector<8x32xf32> -> vector<8x32xf32>
    %1100 = arith.addf %1096, %1099 : vector<8x32xf32>
    %cst_626 = arith.constant dense<0.000000e+00> : vector<8x32xf32>
    %1101 = tpu.matmul %1074, %1100, %cst_626 {dimension_numbers = #tpu.dot_dimension_numbers<[1], [0], [0], [1], [0, 0, 1, 1], [], []>} : vector<8x8xf32>, vector<8x32xf32>, vector<8x32xf32> -> vector<8x32xf32>
    %c1_627 = arith.constant 1 : index
    %c0_628 = arith.constant 0 : index
    %c0_629 = arith.constant 0 : index
    %1102 = vector.load %arg9[%c1_627, %c0_628, %c0_629] : memref<2x1x32xf32, #tpu.memory_space<vmem>>, vector<1x1x32xf32>
    %1103 = vector.shape_cast %1102 : vector<1x1x32xf32> to vector<1x32xf32>
    %1104 = vector.broadcast %1103 : vector<1x32xf32> to vector<8x32xf32>
    %1105 = arith.addf %1101, %1104 : vector<8x32xf32>
    %cst_630 = arith.constant 0.000000e+00 : f32
    %1106 = vector.broadcast %cst_630 : f32 to vector<8x32xf32>
    %1107 = arith.maximumf %1105, %1106 : vector<8x32xf32>
    %c1_631 = arith.constant 1 : index
    %c0_632 = arith.constant 0 : index
    %c0_633 = arith.constant 0 : index
    %1108 = vector.load %arg10[%c1_631, %c0_632, %c0_633] : memref<2x32x96xf32, #tpu.memory_space<vmem>>, vector<1x32x96xf32>
    %1109 = vector.shape_cast %1108 : vector<1x32x96xf32> to vector<32x96xf32>
    %c1_634 = arith.constant 1 : index
    %c0_635 = arith.constant 0 : index
    %c0_636 = arith.constant 0 : index
    %1110 = vector.load %arg11[%c1_634, %c0_635, %c0_636] : memref<2x32x96xf32, #tpu.memory_space<vmem>>, vector<1x32x96xf32>
    %1111 = vector.shape_cast %1110 : vector<1x32x96xf32> to vector<32x96xf32>
    %c1_637 = arith.constant 1 : index
    %c0_638 = arith.constant 0 : index
    %c0_639 = arith.constant 0 : index
    %1112 = vector.load %arg12[%c1_637, %c0_638, %c0_639] : memref<2x1x96xf32, #tpu.memory_space<vmem>>, vector<1x1x96xf32>
    %1113 = vector.shape_cast %1112 : vector<1x1x96xf32> to vector<1x96xf32>
    %c1_640 = arith.constant 1 : index
    %c0_641 = arith.constant 0 : index
    %c0_642 = arith.constant 0 : index
    %1114 = vector.load %arg13[%c1_640, %c0_641, %c0_642] : memref<2x1x96xf32, #tpu.memory_space<vmem>>, vector<1x1x96xf32>
    %1115 = vector.shape_cast %1114 : vector<1x1x96xf32> to vector<1x96xf32>
    %cst_643 = arith.constant dense<0.000000e+00> : vector<8x96xf32>
    %1116 = tpu.matmul %1095, %1109, %cst_643 {dimension_numbers = #tpu.dot_dimension_numbers<[1], [0], [0], [1], [0, 0, 1, 1], [], []>} : vector<8x32xf32>, vector<32x96xf32>, vector<8x96xf32> -> vector<8x96xf32>
    %1117 = vector.broadcast %1113 : vector<1x96xf32> to vector<8x96xf32>
    %1118 = arith.addf %1116, %1117 : vector<8x96xf32>
    %cst_644 = arith.constant dense<0.000000e+00> : vector<8x96xf32>
    %1119 = tpu.matmul %1083, %1111, %cst_644 {dimension_numbers = #tpu.dot_dimension_numbers<[1], [0], [0], [1], [0, 0, 1, 1], [], []>} : vector<8x32xf32>, vector<32x96xf32>, vector<8x96xf32> -> vector<8x96xf32>
    %1120 = vector.broadcast %1115 : vector<1x96xf32> to vector<8x96xf32>
    %1121 = arith.addf %1119, %1120 : vector<8x96xf32>
    %1122 = vector.extract_strided_slice %1118 {offsets = [0, 0], sizes = [8, 32], strides = [1, 1]} : vector<8x96xf32> to vector<8x32xf32>
    %1123 = vector.extract_strided_slice %1121 {offsets = [0, 0], sizes = [8, 32], strides = [1, 1]} : vector<8x96xf32> to vector<8x32xf32>
    %1124 = arith.addf %1122, %1123 : vector<8x32xf32>
    %1125 = arith.negf %1124 : vector<8x32xf32>
    %1126 = math.exp %1125 : vector<8x32xf32>
    %cst_645 = arith.constant 1.000000e+00 : f32
    %1127 = vector.broadcast %cst_645 : f32 to vector<8x32xf32>
    %1128 = arith.addf %1127, %1126 : vector<8x32xf32>
    %1129 = arith.divf %1127, %1128 : vector<8x32xf32>
    %1130 = vector.extract_strided_slice %1118 {offsets = [0, 32], sizes = [8, 32], strides = [1, 1]} : vector<8x96xf32> to vector<8x32xf32>
    %1131 = vector.extract_strided_slice %1121 {offsets = [0, 32], sizes = [8, 32], strides = [1, 1]} : vector<8x96xf32> to vector<8x32xf32>
    %1132 = arith.addf %1130, %1131 : vector<8x32xf32>
    %1133 = arith.negf %1132 : vector<8x32xf32>
    %1134 = math.exp %1133 : vector<8x32xf32>
    %cst_646 = arith.constant 1.000000e+00 : f32
    %1135 = vector.broadcast %cst_646 : f32 to vector<8x32xf32>
    %1136 = arith.addf %1135, %1134 : vector<8x32xf32>
    %1137 = arith.divf %1135, %1136 : vector<8x32xf32>
    %1138 = vector.extract_strided_slice %1118 {offsets = [0, 64], sizes = [8, 32], strides = [1, 1]} : vector<8x96xf32> to vector<8x32xf32>
    %1139 = vector.extract_strided_slice %1121 {offsets = [0, 64], sizes = [8, 32], strides = [1, 1]} : vector<8x96xf32> to vector<8x32xf32>
    %1140 = arith.mulf %1129, %1139 : vector<8x32xf32>
    %1141 = arith.addf %1138, %1140 : vector<8x32xf32>
    %1142 = math.tanh %1141 : vector<8x32xf32>
    %cst_647 = arith.constant 1.000000e+00 : f32
    %1143 = vector.broadcast %cst_647 : f32 to vector<8x32xf32>
    %1144 = arith.subf %1143, %1137 : vector<8x32xf32>
    %1145 = arith.mulf %1144, %1142 : vector<8x32xf32>
    %1146 = arith.mulf %1137, %1083 : vector<8x32xf32>
    %1147 = arith.addf %1145, %1146 : vector<8x32xf32>
    %c1_648 = arith.constant 1 : index
    %c0_649 = arith.constant 0 : index
    %c0_650 = arith.constant 0 : index
    %1148 = vector.load %arg14[%c1_648, %c0_649, %c0_650] : memref<2x32x96xf32, #tpu.memory_space<vmem>>, vector<1x32x96xf32>
    %1149 = vector.shape_cast %1148 : vector<1x32x96xf32> to vector<32x96xf32>
    %c1_651 = arith.constant 1 : index
    %c0_652 = arith.constant 0 : index
    %c0_653 = arith.constant 0 : index
    %1150 = vector.load %arg15[%c1_651, %c0_652, %c0_653] : memref<2x32x96xf32, #tpu.memory_space<vmem>>, vector<1x32x96xf32>
    %1151 = vector.shape_cast %1150 : vector<1x32x96xf32> to vector<32x96xf32>
    %c1_654 = arith.constant 1 : index
    %c0_655 = arith.constant 0 : index
    %c0_656 = arith.constant 0 : index
    %1152 = vector.load %arg16[%c1_654, %c0_655, %c0_656] : memref<2x1x96xf32, #tpu.memory_space<vmem>>, vector<1x1x96xf32>
    %1153 = vector.shape_cast %1152 : vector<1x1x96xf32> to vector<1x96xf32>
    %c1_657 = arith.constant 1 : index
    %c0_658 = arith.constant 0 : index
    %c0_659 = arith.constant 0 : index
    %1154 = vector.load %arg17[%c1_657, %c0_658, %c0_659] : memref<2x1x96xf32, #tpu.memory_space<vmem>>, vector<1x1x96xf32>
    %1155 = vector.shape_cast %1154 : vector<1x1x96xf32> to vector<1x96xf32>
    %cst_660 = arith.constant dense<0.000000e+00> : vector<8x96xf32>
    %1156 = tpu.matmul %1107, %1149, %cst_660 {dimension_numbers = #tpu.dot_dimension_numbers<[1], [0], [0], [1], [0, 0, 1, 1], [], []>} : vector<8x32xf32>, vector<32x96xf32>, vector<8x96xf32> -> vector<8x96xf32>
    %1157 = vector.broadcast %1153 : vector<1x96xf32> to vector<8x96xf32>
    %1158 = arith.addf %1156, %1157 : vector<8x96xf32>
    %cst_661 = arith.constant dense<0.000000e+00> : vector<8x96xf32>
    %1159 = tpu.matmul %1084, %1151, %cst_661 {dimension_numbers = #tpu.dot_dimension_numbers<[1], [0], [0], [1], [0, 0, 1, 1], [], []>} : vector<8x32xf32>, vector<32x96xf32>, vector<8x96xf32> -> vector<8x96xf32>
    %1160 = vector.broadcast %1155 : vector<1x96xf32> to vector<8x96xf32>
    %1161 = arith.addf %1159, %1160 : vector<8x96xf32>
    %1162 = vector.extract_strided_slice %1158 {offsets = [0, 0], sizes = [8, 32], strides = [1, 1]} : vector<8x96xf32> to vector<8x32xf32>
    %1163 = vector.extract_strided_slice %1161 {offsets = [0, 0], sizes = [8, 32], strides = [1, 1]} : vector<8x96xf32> to vector<8x32xf32>
    %1164 = arith.addf %1162, %1163 : vector<8x32xf32>
    %1165 = arith.negf %1164 : vector<8x32xf32>
    %1166 = math.exp %1165 : vector<8x32xf32>
    %cst_662 = arith.constant 1.000000e+00 : f32
    %1167 = vector.broadcast %cst_662 : f32 to vector<8x32xf32>
    %1168 = arith.addf %1167, %1166 : vector<8x32xf32>
    %1169 = arith.divf %1167, %1168 : vector<8x32xf32>
    %1170 = vector.extract_strided_slice %1158 {offsets = [0, 32], sizes = [8, 32], strides = [1, 1]} : vector<8x96xf32> to vector<8x32xf32>
    %1171 = vector.extract_strided_slice %1161 {offsets = [0, 32], sizes = [8, 32], strides = [1, 1]} : vector<8x96xf32> to vector<8x32xf32>
    %1172 = arith.addf %1170, %1171 : vector<8x32xf32>
    %1173 = arith.negf %1172 : vector<8x32xf32>
    %1174 = math.exp %1173 : vector<8x32xf32>
    %cst_663 = arith.constant 1.000000e+00 : f32
    %1175 = vector.broadcast %cst_663 : f32 to vector<8x32xf32>
    %1176 = arith.addf %1175, %1174 : vector<8x32xf32>
    %1177 = arith.divf %1175, %1176 : vector<8x32xf32>
    %1178 = vector.extract_strided_slice %1158 {offsets = [0, 64], sizes = [8, 32], strides = [1, 1]} : vector<8x96xf32> to vector<8x32xf32>
    %1179 = vector.extract_strided_slice %1161 {offsets = [0, 64], sizes = [8, 32], strides = [1, 1]} : vector<8x96xf32> to vector<8x32xf32>
    %1180 = arith.mulf %1169, %1179 : vector<8x32xf32>
    %1181 = arith.addf %1178, %1180 : vector<8x32xf32>
    %1182 = math.tanh %1181 : vector<8x32xf32>
    %cst_664 = arith.constant 1.000000e+00 : f32
    %1183 = vector.broadcast %cst_664 : f32 to vector<8x32xf32>
    %1184 = arith.subf %1183, %1177 : vector<8x32xf32>
    %1185 = arith.mulf %1184, %1182 : vector<8x32xf32>
    %1186 = arith.mulf %1177, %1084 : vector<8x32xf32>
    %1187 = arith.addf %1185, %1186 : vector<8x32xf32>
    %1188 = tpu.concatenate %1147, %1187 in 1 : vector<8x32xf32>, vector<8x32xf32> -> vector<8x64xf32>
    %1189 = arith.subf %1188, %1082 : vector<8x64xf32>
    %cst_665 = arith.constant dense<0.000000e+00> : vector<32x64xf32>
    %1190 = tpu.matmul %1080, %1189, %cst_665 {dimension_numbers = #tpu.dot_dimension_numbers<[1], [0], [0], [1], [0, 0, 1, 1], [], []>} : vector<32x8xf32>, vector<8x64xf32>, vector<32x64xf32> -> vector<32x64xf32>
    %1191 = arith.addf %1072, %1190 : vector<32x64xf32>
    %c4_666 = arith.constant 4 : index
    %c0_667 = arith.constant 0 : index
    %c0_668 = arith.constant 0 : index
    %1192 = vector.load %arg0[%c4_666, %c0_667, %c0_668] : memref<6x8x8xf32, #tpu.memory_space<vmem>>, vector<1x8x8xf32>
    %1193 = vector.shape_cast %1192 : vector<1x8x8xf32> to vector<8x8xf32>
    %c4_669 = arith.constant 4 : index
    %c0_670 = arith.constant 0 : index
    %c0_671 = arith.constant 0 : index
    %1194 = vector.load %arg1[%c4_669, %c0_670, %c0_671] : memref<6x8x32xf32, #tpu.memory_space<vmem>>, vector<1x8x32xf32>
    %1195 = vector.shape_cast %1194 : vector<1x8x32xf32> to vector<8x32xf32>
    %c4_672 = arith.constant 4 : index
    %c0_673 = arith.constant 0 : index
    %c0_674 = arith.constant 0 : index
    %1196 = vector.load %arg2[%c4_672, %c0_673, %c0_674] : memref<6x8x32xf32, #tpu.memory_space<vmem>>, vector<1x8x32xf32>
    %1197 = vector.shape_cast %1196 : vector<1x8x32xf32> to vector<8x32xf32>
    %c4_675 = arith.constant 4 : index
    %c0_676 = arith.constant 0 : index
    %c0_677 = arith.constant 0 : index
    %1198 = vector.load %arg3[%c4_675, %c0_676, %c0_677] : memref<6x32x8xf32, #tpu.memory_space<vmem>>, vector<1x32x8xf32>
    %1199 = vector.shape_cast %1198 : vector<1x32x8xf32> to vector<32x8xf32>
    %cst_678 = arith.constant dense<0.000000e+00> : vector<8x32xf32>
    %1200 = tpu.matmul %1195, %0, %cst_678 {dimension_numbers = #tpu.dot_dimension_numbers<[1], [0], [0], [1], [0, 0, 1, 1], [], []>} : vector<8x32xf32>, vector<32x32xf32>, vector<8x32xf32> -> vector<8x32xf32>
    %cst_679 = arith.constant dense<0.000000e+00> : vector<8x64xf32>
    %1201 = tpu.matmul %1197, %1191, %cst_679 {dimension_numbers = #tpu.dot_dimension_numbers<[1], [0], [0], [1], [0, 0, 1, 1], [], []>} : vector<8x32xf32>, vector<32x64xf32>, vector<8x64xf32> -> vector<8x64xf32>
    %1202 = vector.extract_strided_slice %1201 {offsets = [0, 0], sizes = [8, 32], strides = [1, 1]} : vector<8x64xf32> to vector<8x32xf32>
    %1203 = vector.extract_strided_slice %1201 {offsets = [0, 32], sizes = [8, 32], strides = [1, 1]} : vector<8x64xf32> to vector<8x32xf32>
    %c0_680 = arith.constant 0 : index
    %c0_681 = arith.constant 0 : index
    %c0_682 = arith.constant 0 : index
    %1204 = vector.load %arg6[%c0_680, %c0_681, %c0_682] : memref<2x32x64xf32, #tpu.memory_space<vmem>>, vector<1x32x64xf32>
    %1205 = vector.shape_cast %1204 : vector<1x32x64xf32> to vector<32x64xf32>
    %cst_683 = arith.constant dense<0.000000e+00> : vector<8x64xf32>
    %1206 = tpu.matmul %1200, %1205, %cst_683 {dimension_numbers = #tpu.dot_dimension_numbers<[1], [0], [0], [1], [0, 0, 1, 1], [], []>} : vector<8x32xf32>, vector<32x64xf32>, vector<8x64xf32> -> vector<8x64xf32>
    %1207 = vector.extract_strided_slice %1206 {offsets = [0, 0], sizes = [8, 32], strides = [1, 1]} : vector<8x64xf32> to vector<8x32xf32>
    %cst_684 = arith.constant dense<0.000000e+00> : vector<8x32xf32>
    %1208 = tpu.matmul %1193, %1207, %cst_684 {dimension_numbers = #tpu.dot_dimension_numbers<[1], [0], [0], [1], [0, 0, 1, 1], [], []>} : vector<8x8xf32>, vector<8x32xf32>, vector<8x32xf32> -> vector<8x32xf32>
    %c0_685 = arith.constant 0 : index
    %c0_686 = arith.constant 0 : index
    %c0_687 = arith.constant 0 : index
    %1209 = vector.load %arg7[%c0_685, %c0_686, %c0_687] : memref<2x1x32xf32, #tpu.memory_space<vmem>>, vector<1x1x32xf32>
    %1210 = vector.shape_cast %1209 : vector<1x1x32xf32> to vector<1x32xf32>
    %1211 = vector.broadcast %1210 : vector<1x32xf32> to vector<8x32xf32>
    %1212 = arith.addf %1208, %1211 : vector<8x32xf32>
    %cst_688 = arith.constant 0.000000e+00 : f32
    %1213 = vector.broadcast %cst_688 : f32 to vector<8x32xf32>
    %1214 = arith.maximumf %1212, %1213 : vector<8x32xf32>
    %1215 = vector.extract_strided_slice %1206 {offsets = [0, 32], sizes = [8, 32], strides = [1, 1]} : vector<8x64xf32> to vector<8x32xf32>
    %c0_689 = arith.constant 0 : index
    %c0_690 = arith.constant 0 : index
    %c0_691 = arith.constant 0 : index
    %1216 = vector.load %arg8[%c0_689, %c0_690, %c0_691] : memref<2x32x32xf32, #tpu.memory_space<vmem>>, vector<1x32x32xf32>
    %1217 = vector.shape_cast %1216 : vector<1x32x32xf32> to vector<32x32xf32>
    %cst_692 = arith.constant dense<0.000000e+00> : vector<8x32xf32>
    %1218 = tpu.matmul %1202, %1217, %cst_692 {dimension_numbers = #tpu.dot_dimension_numbers<[1], [0], [0], [1], [0, 0, 1, 1], [], []>} : vector<8x32xf32>, vector<32x32xf32>, vector<8x32xf32> -> vector<8x32xf32>
    %1219 = arith.addf %1215, %1218 : vector<8x32xf32>
    %cst_693 = arith.constant dense<0.000000e+00> : vector<8x32xf32>
    %1220 = tpu.matmul %1193, %1219, %cst_693 {dimension_numbers = #tpu.dot_dimension_numbers<[1], [0], [0], [1], [0, 0, 1, 1], [], []>} : vector<8x8xf32>, vector<8x32xf32>, vector<8x32xf32> -> vector<8x32xf32>
    %c0_694 = arith.constant 0 : index
    %c0_695 = arith.constant 0 : index
    %c0_696 = arith.constant 0 : index
    %1221 = vector.load %arg9[%c0_694, %c0_695, %c0_696] : memref<2x1x32xf32, #tpu.memory_space<vmem>>, vector<1x1x32xf32>
    %1222 = vector.shape_cast %1221 : vector<1x1x32xf32> to vector<1x32xf32>
    %1223 = vector.broadcast %1222 : vector<1x32xf32> to vector<8x32xf32>
    %1224 = arith.addf %1220, %1223 : vector<8x32xf32>
    %cst_697 = arith.constant 0.000000e+00 : f32
    %1225 = vector.broadcast %cst_697 : f32 to vector<8x32xf32>
    %1226 = arith.maximumf %1224, %1225 : vector<8x32xf32>
    %c0_698 = arith.constant 0 : index
    %c0_699 = arith.constant 0 : index
    %c0_700 = arith.constant 0 : index
    %1227 = vector.load %arg10[%c0_698, %c0_699, %c0_700] : memref<2x32x96xf32, #tpu.memory_space<vmem>>, vector<1x32x96xf32>
    %1228 = vector.shape_cast %1227 : vector<1x32x96xf32> to vector<32x96xf32>
    %c0_701 = arith.constant 0 : index
    %c0_702 = arith.constant 0 : index
    %c0_703 = arith.constant 0 : index
    %1229 = vector.load %arg11[%c0_701, %c0_702, %c0_703] : memref<2x32x96xf32, #tpu.memory_space<vmem>>, vector<1x32x96xf32>
    %1230 = vector.shape_cast %1229 : vector<1x32x96xf32> to vector<32x96xf32>
    %c0_704 = arith.constant 0 : index
    %c0_705 = arith.constant 0 : index
    %c0_706 = arith.constant 0 : index
    %1231 = vector.load %arg12[%c0_704, %c0_705, %c0_706] : memref<2x1x96xf32, #tpu.memory_space<vmem>>, vector<1x1x96xf32>
    %1232 = vector.shape_cast %1231 : vector<1x1x96xf32> to vector<1x96xf32>
    %c0_707 = arith.constant 0 : index
    %c0_708 = arith.constant 0 : index
    %c0_709 = arith.constant 0 : index
    %1233 = vector.load %arg13[%c0_707, %c0_708, %c0_709] : memref<2x1x96xf32, #tpu.memory_space<vmem>>, vector<1x1x96xf32>
    %1234 = vector.shape_cast %1233 : vector<1x1x96xf32> to vector<1x96xf32>
    %cst_710 = arith.constant dense<0.000000e+00> : vector<8x96xf32>
    %1235 = tpu.matmul %1214, %1228, %cst_710 {dimension_numbers = #tpu.dot_dimension_numbers<[1], [0], [0], [1], [0, 0, 1, 1], [], []>} : vector<8x32xf32>, vector<32x96xf32>, vector<8x96xf32> -> vector<8x96xf32>
    %1236 = vector.broadcast %1232 : vector<1x96xf32> to vector<8x96xf32>
    %1237 = arith.addf %1235, %1236 : vector<8x96xf32>
    %cst_711 = arith.constant dense<0.000000e+00> : vector<8x96xf32>
    %1238 = tpu.matmul %1202, %1230, %cst_711 {dimension_numbers = #tpu.dot_dimension_numbers<[1], [0], [0], [1], [0, 0, 1, 1], [], []>} : vector<8x32xf32>, vector<32x96xf32>, vector<8x96xf32> -> vector<8x96xf32>
    %1239 = vector.broadcast %1234 : vector<1x96xf32> to vector<8x96xf32>
    %1240 = arith.addf %1238, %1239 : vector<8x96xf32>
    %1241 = vector.extract_strided_slice %1237 {offsets = [0, 0], sizes = [8, 32], strides = [1, 1]} : vector<8x96xf32> to vector<8x32xf32>
    %1242 = vector.extract_strided_slice %1240 {offsets = [0, 0], sizes = [8, 32], strides = [1, 1]} : vector<8x96xf32> to vector<8x32xf32>
    %1243 = arith.addf %1241, %1242 : vector<8x32xf32>
    %1244 = arith.negf %1243 : vector<8x32xf32>
    %1245 = math.exp %1244 : vector<8x32xf32>
    %cst_712 = arith.constant 1.000000e+00 : f32
    %1246 = vector.broadcast %cst_712 : f32 to vector<8x32xf32>
    %1247 = arith.addf %1246, %1245 : vector<8x32xf32>
    %1248 = arith.divf %1246, %1247 : vector<8x32xf32>
    %1249 = vector.extract_strided_slice %1237 {offsets = [0, 32], sizes = [8, 32], strides = [1, 1]} : vector<8x96xf32> to vector<8x32xf32>
    %1250 = vector.extract_strided_slice %1240 {offsets = [0, 32], sizes = [8, 32], strides = [1, 1]} : vector<8x96xf32> to vector<8x32xf32>
    %1251 = arith.addf %1249, %1250 : vector<8x32xf32>
    %1252 = arith.negf %1251 : vector<8x32xf32>
    %1253 = math.exp %1252 : vector<8x32xf32>
    %cst_713 = arith.constant 1.000000e+00 : f32
    %1254 = vector.broadcast %cst_713 : f32 to vector<8x32xf32>
    %1255 = arith.addf %1254, %1253 : vector<8x32xf32>
    %1256 = arith.divf %1254, %1255 : vector<8x32xf32>
    %1257 = vector.extract_strided_slice %1237 {offsets = [0, 64], sizes = [8, 32], strides = [1, 1]} : vector<8x96xf32> to vector<8x32xf32>
    %1258 = vector.extract_strided_slice %1240 {offsets = [0, 64], sizes = [8, 32], strides = [1, 1]} : vector<8x96xf32> to vector<8x32xf32>
    %1259 = arith.mulf %1248, %1258 : vector<8x32xf32>
    %1260 = arith.addf %1257, %1259 : vector<8x32xf32>
    %1261 = math.tanh %1260 : vector<8x32xf32>
    %cst_714 = arith.constant 1.000000e+00 : f32
    %1262 = vector.broadcast %cst_714 : f32 to vector<8x32xf32>
    %1263 = arith.subf %1262, %1256 : vector<8x32xf32>
    %1264 = arith.mulf %1263, %1261 : vector<8x32xf32>
    %1265 = arith.mulf %1256, %1202 : vector<8x32xf32>
    %1266 = arith.addf %1264, %1265 : vector<8x32xf32>
    %c0_715 = arith.constant 0 : index
    %c0_716 = arith.constant 0 : index
    %c0_717 = arith.constant 0 : index
    %1267 = vector.load %arg14[%c0_715, %c0_716, %c0_717] : memref<2x32x96xf32, #tpu.memory_space<vmem>>, vector<1x32x96xf32>
    %1268 = vector.shape_cast %1267 : vector<1x32x96xf32> to vector<32x96xf32>
    %c0_718 = arith.constant 0 : index
    %c0_719 = arith.constant 0 : index
    %c0_720 = arith.constant 0 : index
    %1269 = vector.load %arg15[%c0_718, %c0_719, %c0_720] : memref<2x32x96xf32, #tpu.memory_space<vmem>>, vector<1x32x96xf32>
    %1270 = vector.shape_cast %1269 : vector<1x32x96xf32> to vector<32x96xf32>
    %c0_721 = arith.constant 0 : index
    %c0_722 = arith.constant 0 : index
    %c0_723 = arith.constant 0 : index
    %1271 = vector.load %arg16[%c0_721, %c0_722, %c0_723] : memref<2x1x96xf32, #tpu.memory_space<vmem>>, vector<1x1x96xf32>
    %1272 = vector.shape_cast %1271 : vector<1x1x96xf32> to vector<1x96xf32>
    %c0_724 = arith.constant 0 : index
    %c0_725 = arith.constant 0 : index
    %c0_726 = arith.constant 0 : index
    %1273 = vector.load %arg17[%c0_724, %c0_725, %c0_726] : memref<2x1x96xf32, #tpu.memory_space<vmem>>, vector<1x1x96xf32>
    %1274 = vector.shape_cast %1273 : vector<1x1x96xf32> to vector<1x96xf32>
    %cst_727 = arith.constant dense<0.000000e+00> : vector<8x96xf32>
    %1275 = tpu.matmul %1226, %1268, %cst_727 {dimension_numbers = #tpu.dot_dimension_numbers<[1], [0], [0], [1], [0, 0, 1, 1], [], []>} : vector<8x32xf32>, vector<32x96xf32>, vector<8x96xf32> -> vector<8x96xf32>
    %1276 = vector.broadcast %1272 : vector<1x96xf32> to vector<8x96xf32>
    %1277 = arith.addf %1275, %1276 : vector<8x96xf32>
    %cst_728 = arith.constant dense<0.000000e+00> : vector<8x96xf32>
    %1278 = tpu.matmul %1203, %1270, %cst_728 {dimension_numbers = #tpu.dot_dimension_numbers<[1], [0], [0], [1], [0, 0, 1, 1], [], []>} : vector<8x32xf32>, vector<32x96xf32>, vector<8x96xf32> -> vector<8x96xf32>
    %1279 = vector.broadcast %1274 : vector<1x96xf32> to vector<8x96xf32>
    %1280 = arith.addf %1278, %1279 : vector<8x96xf32>
    %1281 = vector.extract_strided_slice %1277 {offsets = [0, 0], sizes = [8, 32], strides = [1, 1]} : vector<8x96xf32> to vector<8x32xf32>
    %1282 = vector.extract_strided_slice %1280 {offsets = [0, 0], sizes = [8, 32], strides = [1, 1]} : vector<8x96xf32> to vector<8x32xf32>
    %1283 = arith.addf %1281, %1282 : vector<8x32xf32>
    %1284 = arith.negf %1283 : vector<8x32xf32>
    %1285 = math.exp %1284 : vector<8x32xf32>
    %cst_729 = arith.constant 1.000000e+00 : f32
    %1286 = vector.broadcast %cst_729 : f32 to vector<8x32xf32>
    %1287 = arith.addf %1286, %1285 : vector<8x32xf32>
    %1288 = arith.divf %1286, %1287 : vector<8x32xf32>
    %1289 = vector.extract_strided_slice %1277 {offsets = [0, 32], sizes = [8, 32], strides = [1, 1]} : vector<8x96xf32> to vector<8x32xf32>
    %1290 = vector.extract_strided_slice %1280 {offsets = [0, 32], sizes = [8, 32], strides = [1, 1]} : vector<8x96xf32> to vector<8x32xf32>
    %1291 = arith.addf %1289, %1290 : vector<8x32xf32>
    %1292 = arith.negf %1291 : vector<8x32xf32>
    %1293 = math.exp %1292 : vector<8x32xf32>
    %cst_730 = arith.constant 1.000000e+00 : f32
    %1294 = vector.broadcast %cst_730 : f32 to vector<8x32xf32>
    %1295 = arith.addf %1294, %1293 : vector<8x32xf32>
    %1296 = arith.divf %1294, %1295 : vector<8x32xf32>
    %1297 = vector.extract_strided_slice %1277 {offsets = [0, 64], sizes = [8, 32], strides = [1, 1]} : vector<8x96xf32> to vector<8x32xf32>
    %1298 = vector.extract_strided_slice %1280 {offsets = [0, 64], sizes = [8, 32], strides = [1, 1]} : vector<8x96xf32> to vector<8x32xf32>
    %1299 = arith.mulf %1288, %1298 : vector<8x32xf32>
    %1300 = arith.addf %1297, %1299 : vector<8x32xf32>
    %1301 = math.tanh %1300 : vector<8x32xf32>
    %cst_731 = arith.constant 1.000000e+00 : f32
    %1302 = vector.broadcast %cst_731 : f32 to vector<8x32xf32>
    %1303 = arith.subf %1302, %1296 : vector<8x32xf32>
    %1304 = arith.mulf %1303, %1301 : vector<8x32xf32>
    %1305 = arith.mulf %1296, %1203 : vector<8x32xf32>
    %1306 = arith.addf %1304, %1305 : vector<8x32xf32>
    %1307 = tpu.concatenate %1266, %1306 in 1 : vector<8x32xf32>, vector<8x32xf32> -> vector<8x64xf32>
    %1308 = arith.subf %1307, %1201 : vector<8x64xf32>
    %cst_732 = arith.constant dense<0.000000e+00> : vector<32x64xf32>
    %1309 = tpu.matmul %1199, %1308, %cst_732 {dimension_numbers = #tpu.dot_dimension_numbers<[1], [0], [0], [1], [0, 0, 1, 1], [], []>} : vector<32x8xf32>, vector<8x64xf32>, vector<32x64xf32> -> vector<32x64xf32>
    %1310 = arith.addf %1191, %1309 : vector<32x64xf32>
    %c5_733 = arith.constant 5 : index
    %c0_734 = arith.constant 0 : index
    %c0_735 = arith.constant 0 : index
    %1311 = vector.load %arg0[%c5_733, %c0_734, %c0_735] : memref<6x8x8xf32, #tpu.memory_space<vmem>>, vector<1x8x8xf32>
    %1312 = vector.shape_cast %1311 : vector<1x8x8xf32> to vector<8x8xf32>
    %c5_736 = arith.constant 5 : index
    %c0_737 = arith.constant 0 : index
    %c0_738 = arith.constant 0 : index
    %1313 = vector.load %arg1[%c5_736, %c0_737, %c0_738] : memref<6x8x32xf32, #tpu.memory_space<vmem>>, vector<1x8x32xf32>
    %1314 = vector.shape_cast %1313 : vector<1x8x32xf32> to vector<8x32xf32>
    %c5_739 = arith.constant 5 : index
    %c0_740 = arith.constant 0 : index
    %c0_741 = arith.constant 0 : index
    %1315 = vector.load %arg2[%c5_739, %c0_740, %c0_741] : memref<6x8x32xf32, #tpu.memory_space<vmem>>, vector<1x8x32xf32>
    %1316 = vector.shape_cast %1315 : vector<1x8x32xf32> to vector<8x32xf32>
    %c5_742 = arith.constant 5 : index
    %c0_743 = arith.constant 0 : index
    %c0_744 = arith.constant 0 : index
    %1317 = vector.load %arg3[%c5_742, %c0_743, %c0_744] : memref<6x32x8xf32, #tpu.memory_space<vmem>>, vector<1x32x8xf32>
    %1318 = vector.shape_cast %1317 : vector<1x32x8xf32> to vector<32x8xf32>
    %cst_745 = arith.constant dense<0.000000e+00> : vector<8x32xf32>
    %1319 = tpu.matmul %1314, %0, %cst_745 {dimension_numbers = #tpu.dot_dimension_numbers<[1], [0], [0], [1], [0, 0, 1, 1], [], []>} : vector<8x32xf32>, vector<32x32xf32>, vector<8x32xf32> -> vector<8x32xf32>
    %cst_746 = arith.constant dense<0.000000e+00> : vector<8x64xf32>
    %1320 = tpu.matmul %1316, %1310, %cst_746 {dimension_numbers = #tpu.dot_dimension_numbers<[1], [0], [0], [1], [0, 0, 1, 1], [], []>} : vector<8x32xf32>, vector<32x64xf32>, vector<8x64xf32> -> vector<8x64xf32>
    %1321 = vector.extract_strided_slice %1320 {offsets = [0, 0], sizes = [8, 32], strides = [1, 1]} : vector<8x64xf32> to vector<8x32xf32>
    %1322 = vector.extract_strided_slice %1320 {offsets = [0, 32], sizes = [8, 32], strides = [1, 1]} : vector<8x64xf32> to vector<8x32xf32>
    %c1_747 = arith.constant 1 : index
    %c0_748 = arith.constant 0 : index
    %c0_749 = arith.constant 0 : index
    %1323 = vector.load %arg6[%c1_747, %c0_748, %c0_749] : memref<2x32x64xf32, #tpu.memory_space<vmem>>, vector<1x32x64xf32>
    %1324 = vector.shape_cast %1323 : vector<1x32x64xf32> to vector<32x64xf32>
    %cst_750 = arith.constant dense<0.000000e+00> : vector<8x64xf32>
    %1325 = tpu.matmul %1319, %1324, %cst_750 {dimension_numbers = #tpu.dot_dimension_numbers<[1], [0], [0], [1], [0, 0, 1, 1], [], []>} : vector<8x32xf32>, vector<32x64xf32>, vector<8x64xf32> -> vector<8x64xf32>
    %1326 = vector.extract_strided_slice %1325 {offsets = [0, 0], sizes = [8, 32], strides = [1, 1]} : vector<8x64xf32> to vector<8x32xf32>
    %cst_751 = arith.constant dense<0.000000e+00> : vector<8x32xf32>
    %1327 = tpu.matmul %1312, %1326, %cst_751 {dimension_numbers = #tpu.dot_dimension_numbers<[1], [0], [0], [1], [0, 0, 1, 1], [], []>} : vector<8x8xf32>, vector<8x32xf32>, vector<8x32xf32> -> vector<8x32xf32>
    %c1_752 = arith.constant 1 : index
    %c0_753 = arith.constant 0 : index
    %c0_754 = arith.constant 0 : index
    %1328 = vector.load %arg7[%c1_752, %c0_753, %c0_754] : memref<2x1x32xf32, #tpu.memory_space<vmem>>, vector<1x1x32xf32>
    %1329 = vector.shape_cast %1328 : vector<1x1x32xf32> to vector<1x32xf32>
    %1330 = vector.broadcast %1329 : vector<1x32xf32> to vector<8x32xf32>
    %1331 = arith.addf %1327, %1330 : vector<8x32xf32>
    %cst_755 = arith.constant 0.000000e+00 : f32
    %1332 = vector.broadcast %cst_755 : f32 to vector<8x32xf32>
    %1333 = arith.maximumf %1331, %1332 : vector<8x32xf32>
    %1334 = vector.extract_strided_slice %1325 {offsets = [0, 32], sizes = [8, 32], strides = [1, 1]} : vector<8x64xf32> to vector<8x32xf32>
    %c1_756 = arith.constant 1 : index
    %c0_757 = arith.constant 0 : index
    %c0_758 = arith.constant 0 : index
    %1335 = vector.load %arg8[%c1_756, %c0_757, %c0_758] : memref<2x32x32xf32, #tpu.memory_space<vmem>>, vector<1x32x32xf32>
    %1336 = vector.shape_cast %1335 : vector<1x32x32xf32> to vector<32x32xf32>
    %cst_759 = arith.constant dense<0.000000e+00> : vector<8x32xf32>
    %1337 = tpu.matmul %1321, %1336, %cst_759 {dimension_numbers = #tpu.dot_dimension_numbers<[1], [0], [0], [1], [0, 0, 1, 1], [], []>} : vector<8x32xf32>, vector<32x32xf32>, vector<8x32xf32> -> vector<8x32xf32>
    %1338 = arith.addf %1334, %1337 : vector<8x32xf32>
    %cst_760 = arith.constant dense<0.000000e+00> : vector<8x32xf32>
    %1339 = tpu.matmul %1312, %1338, %cst_760 {dimension_numbers = #tpu.dot_dimension_numbers<[1], [0], [0], [1], [0, 0, 1, 1], [], []>} : vector<8x8xf32>, vector<8x32xf32>, vector<8x32xf32> -> vector<8x32xf32>
    %c1_761 = arith.constant 1 : index
    %c0_762 = arith.constant 0 : index
    %c0_763 = arith.constant 0 : index
    %1340 = vector.load %arg9[%c1_761, %c0_762, %c0_763] : memref<2x1x32xf32, #tpu.memory_space<vmem>>, vector<1x1x32xf32>
    %1341 = vector.shape_cast %1340 : vector<1x1x32xf32> to vector<1x32xf32>
    %1342 = vector.broadcast %1341 : vector<1x32xf32> to vector<8x32xf32>
    %1343 = arith.addf %1339, %1342 : vector<8x32xf32>
    %cst_764 = arith.constant 0.000000e+00 : f32
    %1344 = vector.broadcast %cst_764 : f32 to vector<8x32xf32>
    %1345 = arith.maximumf %1343, %1344 : vector<8x32xf32>
    %c1_765 = arith.constant 1 : index
    %c0_766 = arith.constant 0 : index
    %c0_767 = arith.constant 0 : index
    %1346 = vector.load %arg10[%c1_765, %c0_766, %c0_767] : memref<2x32x96xf32, #tpu.memory_space<vmem>>, vector<1x32x96xf32>
    %1347 = vector.shape_cast %1346 : vector<1x32x96xf32> to vector<32x96xf32>
    %c1_768 = arith.constant 1 : index
    %c0_769 = arith.constant 0 : index
    %c0_770 = arith.constant 0 : index
    %1348 = vector.load %arg11[%c1_768, %c0_769, %c0_770] : memref<2x32x96xf32, #tpu.memory_space<vmem>>, vector<1x32x96xf32>
    %1349 = vector.shape_cast %1348 : vector<1x32x96xf32> to vector<32x96xf32>
    %c1_771 = arith.constant 1 : index
    %c0_772 = arith.constant 0 : index
    %c0_773 = arith.constant 0 : index
    %1350 = vector.load %arg12[%c1_771, %c0_772, %c0_773] : memref<2x1x96xf32, #tpu.memory_space<vmem>>, vector<1x1x96xf32>
    %1351 = vector.shape_cast %1350 : vector<1x1x96xf32> to vector<1x96xf32>
    %c1_774 = arith.constant 1 : index
    %c0_775 = arith.constant 0 : index
    %c0_776 = arith.constant 0 : index
    %1352 = vector.load %arg13[%c1_774, %c0_775, %c0_776] : memref<2x1x96xf32, #tpu.memory_space<vmem>>, vector<1x1x96xf32>
    %1353 = vector.shape_cast %1352 : vector<1x1x96xf32> to vector<1x96xf32>
    %cst_777 = arith.constant dense<0.000000e+00> : vector<8x96xf32>
    %1354 = tpu.matmul %1333, %1347, %cst_777 {dimension_numbers = #tpu.dot_dimension_numbers<[1], [0], [0], [1], [0, 0, 1, 1], [], []>} : vector<8x32xf32>, vector<32x96xf32>, vector<8x96xf32> -> vector<8x96xf32>
    %1355 = vector.broadcast %1351 : vector<1x96xf32> to vector<8x96xf32>
    %1356 = arith.addf %1354, %1355 : vector<8x96xf32>
    %cst_778 = arith.constant dense<0.000000e+00> : vector<8x96xf32>
    %1357 = tpu.matmul %1321, %1349, %cst_778 {dimension_numbers = #tpu.dot_dimension_numbers<[1], [0], [0], [1], [0, 0, 1, 1], [], []>} : vector<8x32xf32>, vector<32x96xf32>, vector<8x96xf32> -> vector<8x96xf32>
    %1358 = vector.broadcast %1353 : vector<1x96xf32> to vector<8x96xf32>
    %1359 = arith.addf %1357, %1358 : vector<8x96xf32>
    %1360 = vector.extract_strided_slice %1356 {offsets = [0, 0], sizes = [8, 32], strides = [1, 1]} : vector<8x96xf32> to vector<8x32xf32>
    %1361 = vector.extract_strided_slice %1359 {offsets = [0, 0], sizes = [8, 32], strides = [1, 1]} : vector<8x96xf32> to vector<8x32xf32>
    %1362 = arith.addf %1360, %1361 : vector<8x32xf32>
    %1363 = arith.negf %1362 : vector<8x32xf32>
    %1364 = math.exp %1363 : vector<8x32xf32>
    %cst_779 = arith.constant 1.000000e+00 : f32
    %1365 = vector.broadcast %cst_779 : f32 to vector<8x32xf32>
    %1366 = arith.addf %1365, %1364 : vector<8x32xf32>
    %1367 = arith.divf %1365, %1366 : vector<8x32xf32>
    %1368 = vector.extract_strided_slice %1356 {offsets = [0, 32], sizes = [8, 32], strides = [1, 1]} : vector<8x96xf32> to vector<8x32xf32>
    %1369 = vector.extract_strided_slice %1359 {offsets = [0, 32], sizes = [8, 32], strides = [1, 1]} : vector<8x96xf32> to vector<8x32xf32>
    %1370 = arith.addf %1368, %1369 : vector<8x32xf32>
    %1371 = arith.negf %1370 : vector<8x32xf32>
    %1372 = math.exp %1371 : vector<8x32xf32>
    %cst_780 = arith.constant 1.000000e+00 : f32
    %1373 = vector.broadcast %cst_780 : f32 to vector<8x32xf32>
    %1374 = arith.addf %1373, %1372 : vector<8x32xf32>
    %1375 = arith.divf %1373, %1374 : vector<8x32xf32>
    %1376 = vector.extract_strided_slice %1356 {offsets = [0, 64], sizes = [8, 32], strides = [1, 1]} : vector<8x96xf32> to vector<8x32xf32>
    %1377 = vector.extract_strided_slice %1359 {offsets = [0, 64], sizes = [8, 32], strides = [1, 1]} : vector<8x96xf32> to vector<8x32xf32>
    %1378 = arith.mulf %1367, %1377 : vector<8x32xf32>
    %1379 = arith.addf %1376, %1378 : vector<8x32xf32>
    %1380 = math.tanh %1379 : vector<8x32xf32>
    %cst_781 = arith.constant 1.000000e+00 : f32
    %1381 = vector.broadcast %cst_781 : f32 to vector<8x32xf32>
    %1382 = arith.subf %1381, %1375 : vector<8x32xf32>
    %1383 = arith.mulf %1382, %1380 : vector<8x32xf32>
    %1384 = arith.mulf %1375, %1321 : vector<8x32xf32>
    %1385 = arith.addf %1383, %1384 : vector<8x32xf32>
    %c1_782 = arith.constant 1 : index
    %c0_783 = arith.constant 0 : index
    %c0_784 = arith.constant 0 : index
    %1386 = vector.load %arg14[%c1_782, %c0_783, %c0_784] : memref<2x32x96xf32, #tpu.memory_space<vmem>>, vector<1x32x96xf32>
    %1387 = vector.shape_cast %1386 : vector<1x32x96xf32> to vector<32x96xf32>
    %c1_785 = arith.constant 1 : index
    %c0_786 = arith.constant 0 : index
    %c0_787 = arith.constant 0 : index
    %1388 = vector.load %arg15[%c1_785, %c0_786, %c0_787] : memref<2x32x96xf32, #tpu.memory_space<vmem>>, vector<1x32x96xf32>
    %1389 = vector.shape_cast %1388 : vector<1x32x96xf32> to vector<32x96xf32>
    %c1_788 = arith.constant 1 : index
    %c0_789 = arith.constant 0 : index
    %c0_790 = arith.constant 0 : index
    %1390 = vector.load %arg16[%c1_788, %c0_789, %c0_790] : memref<2x1x96xf32, #tpu.memory_space<vmem>>, vector<1x1x96xf32>
    %1391 = vector.shape_cast %1390 : vector<1x1x96xf32> to vector<1x96xf32>
    %c1_791 = arith.constant 1 : index
    %c0_792 = arith.constant 0 : index
    %c0_793 = arith.constant 0 : index
    %1392 = vector.load %arg17[%c1_791, %c0_792, %c0_793] : memref<2x1x96xf32, #tpu.memory_space<vmem>>, vector<1x1x96xf32>
    %1393 = vector.shape_cast %1392 : vector<1x1x96xf32> to vector<1x96xf32>
    %cst_794 = arith.constant dense<0.000000e+00> : vector<8x96xf32>
    %1394 = tpu.matmul %1345, %1387, %cst_794 {dimension_numbers = #tpu.dot_dimension_numbers<[1], [0], [0], [1], [0, 0, 1, 1], [], []>} : vector<8x32xf32>, vector<32x96xf32>, vector<8x96xf32> -> vector<8x96xf32>
    %1395 = vector.broadcast %1391 : vector<1x96xf32> to vector<8x96xf32>
    %1396 = arith.addf %1394, %1395 : vector<8x96xf32>
    %cst_795 = arith.constant dense<0.000000e+00> : vector<8x96xf32>
    %1397 = tpu.matmul %1322, %1389, %cst_795 {dimension_numbers = #tpu.dot_dimension_numbers<[1], [0], [0], [1], [0, 0, 1, 1], [], []>} : vector<8x32xf32>, vector<32x96xf32>, vector<8x96xf32> -> vector<8x96xf32>
    %1398 = vector.broadcast %1393 : vector<1x96xf32> to vector<8x96xf32>
    %1399 = arith.addf %1397, %1398 : vector<8x96xf32>
    %1400 = vector.extract_strided_slice %1396 {offsets = [0, 0], sizes = [8, 32], strides = [1, 1]} : vector<8x96xf32> to vector<8x32xf32>
    %1401 = vector.extract_strided_slice %1399 {offsets = [0, 0], sizes = [8, 32], strides = [1, 1]} : vector<8x96xf32> to vector<8x32xf32>
    %1402 = arith.addf %1400, %1401 : vector<8x32xf32>
    %1403 = arith.negf %1402 : vector<8x32xf32>
    %1404 = math.exp %1403 : vector<8x32xf32>
    %cst_796 = arith.constant 1.000000e+00 : f32
    %1405 = vector.broadcast %cst_796 : f32 to vector<8x32xf32>
    %1406 = arith.addf %1405, %1404 : vector<8x32xf32>
    %1407 = arith.divf %1405, %1406 : vector<8x32xf32>
    %1408 = vector.extract_strided_slice %1396 {offsets = [0, 32], sizes = [8, 32], strides = [1, 1]} : vector<8x96xf32> to vector<8x32xf32>
    %1409 = vector.extract_strided_slice %1399 {offsets = [0, 32], sizes = [8, 32], strides = [1, 1]} : vector<8x96xf32> to vector<8x32xf32>
    %1410 = arith.addf %1408, %1409 : vector<8x32xf32>
    %1411 = arith.negf %1410 : vector<8x32xf32>
    %1412 = math.exp %1411 : vector<8x32xf32>
    %cst_797 = arith.constant 1.000000e+00 : f32
    %1413 = vector.broadcast %cst_797 : f32 to vector<8x32xf32>
    %1414 = arith.addf %1413, %1412 : vector<8x32xf32>
    %1415 = arith.divf %1413, %1414 : vector<8x32xf32>
    %1416 = vector.extract_strided_slice %1396 {offsets = [0, 64], sizes = [8, 32], strides = [1, 1]} : vector<8x96xf32> to vector<8x32xf32>
    %1417 = vector.extract_strided_slice %1399 {offsets = [0, 64], sizes = [8, 32], strides = [1, 1]} : vector<8x96xf32> to vector<8x32xf32>
    %1418 = arith.mulf %1407, %1417 : vector<8x32xf32>
    %1419 = arith.addf %1416, %1418 : vector<8x32xf32>
    %1420 = math.tanh %1419 : vector<8x32xf32>
    %cst_798 = arith.constant 1.000000e+00 : f32
    %1421 = vector.broadcast %cst_798 : f32 to vector<8x32xf32>
    %1422 = arith.subf %1421, %1415 : vector<8x32xf32>
    %1423 = arith.mulf %1422, %1420 : vector<8x32xf32>
    %1424 = arith.mulf %1415, %1322 : vector<8x32xf32>
    %1425 = arith.addf %1423, %1424 : vector<8x32xf32>
    %1426 = tpu.concatenate %1385, %1425 in 1 : vector<8x32xf32>, vector<8x32xf32> -> vector<8x64xf32>
    %1427 = arith.subf %1426, %1320 : vector<8x64xf32>
    %cst_799 = arith.constant dense<0.000000e+00> : vector<32x64xf32>
    %1428 = tpu.matmul %1318, %1427, %cst_799 {dimension_numbers = #tpu.dot_dimension_numbers<[1], [0], [0], [1], [0, 0, 1, 1], [], []>} : vector<32x8xf32>, vector<8x64xf32>, vector<32x64xf32> -> vector<32x64xf32>
    %1429 = arith.addf %1310, %1428 : vector<32x64xf32>
    %1430 = vector.extract_strided_slice %1429 {offsets = [0, 0], sizes = [32, 32], strides = [1, 1]} : vector<32x64xf32> to vector<32x32xf32>
    %1431 = vector.extract_strided_slice %1429 {offsets = [0, 32], sizes = [32, 32], strides = [1, 1]} : vector<32x64xf32> to vector<32x32xf32>
    %c0_800 = arith.constant 0 : index
    %c0_801 = arith.constant 0 : index
    %1432 = vector.load %arg23[%c0_800, %c0_801] : memref<32x32xf32, #tpu.memory_space<vmem>>, vector<32x32xf32>
    tpu.vector_store %arg23[%c0_800, %c0_801], %1430 {strides = array<i32>} : memref<32x32xf32, #tpu.memory_space<vmem>>, vector<32x32xf32>,
    %c0_802 = arith.constant 0 : index
    %c0_803 = arith.constant 0 : index
    %1433 = vector.load %arg24[%c0_802, %c0_803] : memref<32x32xf32, #tpu.memory_space<vmem>>, vector<32x32xf32>
    tpu.vector_store %arg24[%c0_802, %c0_803], %1431 {strides = array<i32>} : memref<32x32xf32, #tpu.memory_space<vmem>>, vector<32x32xf32>,
    %c0_804 = arith.constant 0 : index
    %c0_805 = arith.constant 0 : index
    %1434 = vector.load %arg18[%c0_804, %c0_805] : memref<1x32xf32, #tpu.memory_space<vmem>>, vector<1x32xf32>
    %1435 = vector.broadcast %1434 : vector<1x32xf32> to vector<32x32xf32>
    %1436 = arith.mulf %1431, %1435 : vector<32x32xf32>
    %cst_806 = arith.constant dense<0.000000e+00> : vector<32xf32>
    %1437 = vector.multi_reduction <add>, %1436, %cst_806 [1] : vector<32x32xf32> to vector<32xf32>
    %1438 = vector.shape_cast %1437 : vector<32xf32> to vector<32x1xf32>
    %c0_807 = arith.constant 0 : index
    %c0_808 = arith.constant 0 : index
    %1439 = vector.load %arg19[%c0_807, %c0_808] : memref<1x1xf32, #tpu.memory_space<vmem>>, vector<1x1xf32>
    %1440 = vector.broadcast %1439 : vector<1x1xf32> to vector<32x1xf32>
    %1441 = arith.addf %1438, %1440 : vector<32x1xf32>
    %1442 = arith.negf %1441 : vector<32x1xf32>
    %1443 = math.exp %1442 : vector<32x1xf32>
    %cst_809 = arith.constant 1.000000e+00 : f32
    %1444 = vector.broadcast %cst_809 : f32 to vector<32x1xf32>
    %1445 = arith.addf %1444, %1443 : vector<32x1xf32>
    %1446 = arith.divf %1444, %1445 : vector<32x1xf32>
    %c0_810 = arith.constant 0 : index
    %c0_811 = arith.constant 0 : index
    %1447 = vector.load %arg25[%c0_810, %c0_811] : memref<32x1xf32, #tpu.memory_space<vmem>>, vector<32x1xf32>
    tpu.vector_store %arg25[%c0_810, %c0_811], %1446 {strides = array<i32>} : memref<32x1xf32, #tpu.memory_space<vmem>>, vector<32x1xf32>,
    %c0_812 = arith.constant 0 : index
    %c0_813 = arith.constant 0 : index
    %1448 = vector.load %arg5[%c0_812, %c0_813] : memref<16x32xf32, #tpu.memory_space<vmem>>, vector<16x32xf32>
    %cst_814 = arith.constant dense<0.000000e+00> : vector<16x32xf32>
    %1449 = tpu.matmul %1448, %1430, %cst_814 {dimension_numbers = #tpu.dot_dimension_numbers<[1], [0], [0], [1], [0, 0, 1, 1], [], []>} : vector<16x32xf32>, vector<32x32xf32>, vector<16x32xf32> -> vector<16x32xf32>
    %1450 = vector.extract_strided_slice %1449 {offsets = [0, 0], sizes = [8, 32], strides = [1, 1]} : vector<16x32xf32> to vector<8x32xf32>
    %1451 = vector.extract_strided_slice %1449 {offsets = [8, 0], sizes = [8, 32], strides = [1, 1]} : vector<16x32xf32> to vector<8x32xf32>
    %c0_815 = arith.constant 0 : index
    %c0_816 = arith.constant 0 : index
    %1452 = vector.load %arg20[%c0_815, %c0_816] : memref<1x32xf32, #tpu.memory_space<vmem>>, vector<1x32xf32>
    %1453 = vector.broadcast %1452 : vector<1x32xf32> to vector<8x32xf32>
    %1454 = arith.mulf %1450, %1453 : vector<8x32xf32>
    %cst_817 = arith.constant dense<0.000000e+00> : vector<8xf32>
    %1455 = vector.multi_reduction <add>, %1454, %cst_817 [1] : vector<8x32xf32> to vector<8xf32>
    %1456 = vector.shape_cast %1455 : vector<8xf32> to vector<8x1xf32>
    %c0_818 = arith.constant 0 : index
    %c0_819 = arith.constant 0 : index
    %1457 = vector.load %arg21[%c0_818, %c0_819] : memref<1x32xf32, #tpu.memory_space<vmem>>, vector<1x32xf32>
    %1458 = vector.broadcast %1457 : vector<1x32xf32> to vector<8x32xf32>
    %1459 = arith.mulf %1451, %1458 : vector<8x32xf32>
    %cst_820 = arith.constant dense<0.000000e+00> : vector<8xf32>
    %1460 = vector.multi_reduction <add>, %1459, %cst_820 [1] : vector<8x32xf32> to vector<8xf32>
    %1461 = vector.shape_cast %1460 : vector<8xf32> to vector<8x1xf32>
    %1462 = arith.addf %1456, %1461 : vector<8x1xf32>
    %c0_821 = arith.constant 0 : index
    %c0_822 = arith.constant 0 : index
    %1463 = vector.load %arg22[%c0_821, %c0_822] : memref<1x1xf32, #tpu.memory_space<vmem>>, vector<1x1xf32>
    %1464 = vector.broadcast %1463 : vector<1x1xf32> to vector<8x1xf32>
    %1465 = arith.addf %1462, %1464 : vector<8x1xf32>
    %1466 = arith.negf %1465 : vector<8x1xf32>
    %1467 = math.exp %1466 : vector<8x1xf32>
    %cst_823 = arith.constant 1.000000e+00 : f32
    %1468 = vector.broadcast %cst_823 : f32 to vector<8x1xf32>
    %1469 = arith.addf %1468, %1467 : vector<8x1xf32>
    %1470 = arith.divf %1468, %1469 : vector<8x1xf32>
    %c0_824 = arith.constant 0 : index
    %c0_825 = arith.constant 0 : index
    %1471 = vector.load %arg26[%c0_824, %c0_825] : memref<8x1xf32, #tpu.memory_space<vmem>>, vector<8x1xf32>
    tpu.vector_store %arg26[%c0_824, %c0_825], %1470 {strides = array<i32>} : memref<8x1xf32, #tpu.memory_space<vmem>>, vector<8x1xf32>,
    return
  }
}

</mosaic_0001>

<bundles_post_ra>
// kernel: forward.1
= control target key start
LH: loop header
LB: loop body
LE: loop exit
PB: predicated region body
PF: predicated region fallthrough
CT: control target
= control target key end

     0   :  { %s14400_s0 = inlined_call_operand.hbm [shape: f32[6,8,8], index: 0, kind: input, shape index: {}]   ;;  %s14401_s1 = inlined_call_operand.hbm [shape: f32[6,8,32], index: 1, kind: input, shape index: {}]   ;;  %s14402_s2 = inlined_call_operand.hbm [shape: f32[6,8,32], index: 2, kind: input, shape index: {}]   ;;  %s14403_s3 = inlined_call_operand.vmem [shape: f32[6,32,8], index: 3, kind: input, shape index: {}]   ;;  %s14404_s4 = inlined_call_operand.hbm [shape: f32[32,32], index: 4, kind: input, shape index: {}]   ;;  %s14405_s5 = inlined_call_operand.hbm [shape: f32[16,32], index: 5, kind: input, shape index: {}]   ;;  %s14406_s6 = inlined_call_operand.vmem [shape: f32[2,32,64], index: 6, kind: input, shape index: {}]   ;;  %s14407_s7 = inlined_call_operand.vmem [shape: f32[2,1,32], index: 7, kind: input, shape index: {}]   ;;  %s14408_s8 = inlined_call_operand.vmem [shape: f32[2,32,32], index: 8, kind: input, shape index: {}]   ;;  %s14409_s9 = inlined_call_operand.hbm [shape: f32[2,1,32], index: 9, kind: input, shape index: {}]   ;;  %s14410_s10 = inlined_call_operand.vmem [shape: f32[2,32,96], index: 10, kind: input, shape index: {}]   ;;  %s14411_s11 = inlined_call_operand.vmem [shape: f32[2,32,96], index: 11, kind: input, shape index: {}]   ;;  %s14412_s12 = inlined_call_operand.vmem [shape: f32[2,1,96], index: 12, kind: input, shape index: {}]   ;;  %s14413_s13 = inlined_call_operand.hbm [shape: f32[2,1,96], index: 13, kind: input, shape index: {}]   ;;  %s14414_s14 = inlined_call_operand.hbm [shape: f32[2,32,96], index: 14, kind: input, shape index: {}]   ;;  %s14415_s15 = inlined_call_operand.hbm [shape: f32[2,32,96], index: 15, kind: input, shape index: {}]   ;;  %s14416_s16 = inlined_call_operand.vmem [shape: f32[2,1,96], index: 16, kind: input, shape index: {}]   ;;  %s14417_s17 = inlined_call_operand.hbm [shape: f32[2,1,96], index: 17, kind: input, shape index: {}]   ;;  %s14418_s18 = inlined_call_operand.vmem [shape: f32[1,32], index: 18, kind: input, shape index: {}]   ;;  %s14419_s19 = inlined_call_operand.<no memory space> [shape: f32[1,1], index: 19, kind: input, shape index: {}]   ;;  %s14420_s20 = inlined_call_operand.vmem [shape: f32[1,32], index: 20, kind: input, shape index: {}]   ;;  %s14421_s21 = inlined_call_operand.vmem [shape: f32[1,32], index: 21, kind: input, shape index: {}]   ;;  %s14422_s23 = inlined_call_operand.vmem [shape: f32[32,32], index: 23, kind: output, shape index: {0}]   ;;  %s14423_s24 = inlined_call_operand.vmem [shape: f32[32,32], index: 24, kind: output, shape index: {1}]   ;;  %s14424_s25 = inlined_call_operand.vmem [shape: f32[32,1], index: 25, kind: output, shape index: {2}]   ;;  %s14425_s26 = inlined_call_operand.vmem [shape: f32[8,1], index: 26, kind: output, shape index: {3}]   ;;  %s14426_s22 = inlined_call_operand.<no memory space> [shape: f32[1,1], index: 22, kind: input, shape index: {}]  }
   0x1   :  { %14466 = sst [smem:[#allocation48_spill]] %s14400_s0  ;;  %v32_v0 = vstv %s14419_s19  ;;  %v34_v1 = vstv %s14426_s22 }
   0x2   :  { %14467 = sst [smem:[#allocation49_spill]] %s14401_s1  ;;  %33 = vst [vmem:[#allocation2] sm:$0x1] %v32_v0  ;;  %35 = vst [vmem:[#allocation3] sm:$0x1] %v34_v1 }
   0x3   :  { %14468 = sst [smem:[#allocation50_spill]] %s14402_s2 }
   0x4   :  { %14469 = sst [smem:[#allocation51_spill]] %s14403_s3 }
   0x5   :  { %14470 = sst [smem:[#allocation52_spill]] %s14404_s4 }
   0x6   :  { %14471 = sst [smem:[#allocation53_spill]] %s14405_s5 }
   0x7   :  { %14472 = sst [smem:[#allocation54_spill]] %s14406_s6 }
   0x8   :  { %14473 = sst [smem:[#allocation55_spill]] %s14407_s7 }
   0x9   :  { %14474 = sst [smem:[#allocation56_spill]] %s14408_s8 }
   0xa   :  { %14475 = sst [smem:[#allocation57_spill]] %s14409_s9 }
   0xb   :  { %14476 = sst [smem:[#allocation58_spill]] %s14410_s10 }
   0xc   :  { %36 = vsyncpa [#allocation5], 0 }
   0xd   :  { %37 = vsyncpa [#allocation7], 0 }
   0xe   :  { %38 = vsyncpa [#allocation10], 0 }
   0xf   :  { %39 = vsyncpa [#allocation13], 0 }
  0x10   :  { %40 = vsyncpa [#allocation16], 0 }
  0x11   :  { %41 = vsyncpa [#allocation19], 0  ;;  %s11916_s8 = smov [#allocation6]   ;;  %s11917_s29 = smov [#allocation9]  }
  0x12   :  { %s59_s4 = sshll.u32 %s11916_s8, 4  ;;  %s85_s0 = sshll.u32 %s11917_s29, 4  ;;  %s60_s4 = int_to_ptr.vmem [resolvable:$true] %s59_s4  ;;  %s86_s0 = int_to_ptr.vmem [resolvable:$true] %s85_s0 }
  0x13   :  { %s11712_s9 = scalar_lea.vmem %s60_s4, 768  ;;  %p11717_p1 = scmp.lt.s32.totalorder %s60_s4, %s60_s4 }
  0x14   :  { %p11713_p0 = scmp.ne.s32.totalorder %s60_s4, %s11712_s9  ;;  %p11718_p2 = scmp.lt.s32.totalorder %s11712_s9, %s11712_s9 }
  0x16   :  { %p11719_p3 = por %p11718_p2, %p11717_p1 }
  0x18   :  { %p11720_p4 = pnand %p11719_p3, %p11713_p0 }
  0x1a   :  { %11723 = shalt.err (!%p11720_p4)
}
  0x1b   :  { %s11918_s19 = smov 128   ;;  %s11919_s22 = smov 8  }
  0x1c   :  { %s14477_s5 = sld [smem:[#allocation49_spill]]  ;;  %s11732_s10 = scalar_lea.vmem %s86_s0, 512 }
  0x1d   :  { %p11733_p5 = scmp.ne.s32.totalorder %s86_s0, %s11732_s10  ;;  %p11737_p6 = scmp.lt.s32.totalorder %s86_s0, %s86_s0 }
  0x1e   :  { %p11738_p7 = scmp.lt.s32.totalorder %s11732_s10, %s11732_s10 }
  0x20   :  { %p11739_p8 = por %p11738_p7, %p11737_p6 }
  0x22   :  { %65 = dma.hbm_to_vmem [thread:$0]  %s14477_s5, 768, %s60_s4, [#allocation7], %s11918_s19, %s11918_s19, %s11919_s22  }
  0x23   :  { %p11740_p9 = pnand %p11739_p8, %p11733_p5 }
  0x25   :  { %11743 = shalt.err (!%p11740_p9)
}
  0x26   :  { %s14478_s27 = sld [smem:[#allocation52_spill]]  ;;  %s11920_s3 = smov [#allocation12]  }
  0x27   :  { %s115_s7 = sshll.u32 %s11920_s3, 4  ;;  %s116_s7 = int_to_ptr.vmem [resolvable:$true] %s115_s7 }
  0x28   :  { %s11752_s28 = scalar_lea.vmem %s116_s7, 32  ;;  %p11757_p11 = scmp.lt.s32.totalorder %s116_s7, %s116_s7 }
  0x29   :  { %p11753_p10 = scmp.ne.s32.totalorder %s116_s7, %s11752_s28  ;;  %p11758_p12 = scmp.lt.s32.totalorder %s11752_s28, %s11752_s28 }
  0x2b   :  { %p11759_p13 = por %p11758_p12, %p11757_p11 }
  0x2c   :  { %91 = dma.hbm_to_vmem [thread:$0]  %s14478_s27, 512, %s86_s0, [#allocation10], %s11918_s19, %s11918_s19, %s11919_s22  }
  0x2d   :  { %p11760_p0 = pnand %p11759_p13, %p11753_p10 }
  0x2f   :  { %11763 = shalt.err (!%p11760_p0)
}
  0x30   :  { %s11921_s8 = smov 16   ;;  %s11922_s4 = smov 1  }
  0x31   :  { %s14479_s30 = sld [smem:[#allocation57_spill]]  ;;  %s11923_s0 = smov [#allocation15]  }
  0x32   :  { %s145_s2 = sshll.u32 %s11923_s0, 4  ;;  %s11924_s5 = smov [#allocation4]   ;;  %s146_s2 = int_to_ptr.vmem [resolvable:$true] %s145_s2 }
  0x33   :  { %s47_s10 = sshll.u32 %s11924_s5, 4  ;;  %s11772_s6 = scalar_lea.vmem %s146_s2, 1024  ;;  %s48_s10 = int_to_ptr.vmem [resolvable:$true] %s47_s10 }
  0x34   :  { %p11773_p1 = scmp.ne.s32.totalorder %s146_s2, %s11772_s6  ;;  %p11777_p2 = scmp.lt.s32.totalorder %s146_s2, %s146_s2 }
  0x35   :  { %p11778_p3 = scmp.lt.s32.totalorder %s11772_s6, %s11772_s6 }
  0x37   :  { %121 = dma.hbm_to_vmem [thread:$0]  %s14479_s30, 32, %s116_s7, [#allocation13], %s11921_s8, %s11921_s8, %s11922_s4  }
  0x38   :  { %p11779_p4 = por %p11778_p3, %p11777_p2 }
  0x3a   :  { %p11780_p5 = pnand %p11779_p4, %p11773_p1 }
  0x3c   :  { %11783 = shalt.err (!%p11780_p5)
}
  0x3d   :  { %151 = dma.hbm_to_vmem [thread:$0]  %s14414_s14, 1024, %s146_s2, [#allocation16], %s11918_s19, %s11918_s19, %s11919_s22  }
  0x3e   :  { %s11792_s3 = scalar_lea.vmem %s48_s10, 768  ;;  %p11797_p7 = scmp.lt.s32.totalorder %s48_s10, %s48_s10 }
  0x3f   :  { %p11793_p6 = scmp.ne.s32.totalorder %s48_s10, %s11792_s3  ;;  %p11798_p8 = scmp.lt.s32.totalorder %s11792_s3, %s11792_s3 }
  0x41   :  { %p11799_p9 = por %p11798_p8, %p11797_p7 }
  0x43   :  { %p11800_p10 = pnand %p11799_p9, %p11793_p6 }
  0x45   :  { %11803 = shalt.err (!%p11800_p10)
}
  0x46   :  { %s14480_s29 = sld [smem:[#allocation48_spill]]  ;;  %s11925_s9 = smov [#allocation8]  }
  0x47   :  { %s71_s30 = sshll.u32 %s11925_s9, 4  ;;  %s11926_s0 = smov [#allocation11]   ;;  %s72_s30 = int_to_ptr.vmem [resolvable:$true] %s71_s30 }
  0x48   :  { %s97_s14 = sshll.u32 %s11926_s0, 4  ;;  %s11812_s2 = scalar_lea.vmem %s72_s30, 768  ;;  %s98_s14 = int_to_ptr.vmem [resolvable:$true] %s97_s14 }
  0x49   :  { %p11813_p11 = scmp.ne.s32.totalorder %s72_s30, %s11812_s2  ;;  %p11817_p12 = scmp.lt.s32.totalorder %s72_s30, %s72_s30 }
  0x4a   :  { %p11818_p13 = scmp.lt.s32.totalorder %s11812_s2, %s11812_s2 }
  0x4c   :  { %53 = dma.hbm_to_vmem [thread:$0]  %s14480_s29, 768, %s48_s10, [#allocation5], %s11918_s19, %s11918_s19, %s11919_s22  }
  0x4d   :  { %p11819_p0 = por %p11818_p13, %p11817_p12 }
  0x4f   :  { %p11820_p1 = pnand %p11819_p0, %p11813_p11 }
  0x51   :  { %11823 = shalt.err (!%p11820_p1)
}
  0x52   :  { %s14481_s1 = sld [smem:[#allocation50_spill]]  ;;  %s11832_s10 = scalar_lea.vmem %s98_s14, 256 }
  0x53   :  { %p11833_p2 = scmp.ne.s32.totalorder %s98_s14, %s11832_s10  ;;  %p11837_p3 = scmp.lt.s32.totalorder %s98_s14, %s98_s14 }
  0x54   :  { %p11838_p4 = scmp.lt.s32.totalorder %s11832_s10, %s11832_s10 }
  0x56   :  { %p11839_p5 = por %p11838_p4, %p11837_p3 }
  0x58   :  { %77 = dma.hbm_to_vmem [thread:$0]  %s14481_s1, 768, %s72_s30, [#allocation7], %s11918_s19, %s11918_s19, %s11919_s22  }
  0x59   :  { %p11840_p6 = pnand %p11839_p5, %p11833_p2 }
  0x5b   :  { %11843 = shalt.err (!%p11840_p6)
}
  0x5c   :  { %s14482_s7 = sld [smem:[#allocation53_spill]]  ;;  %s11927_s28 = smov [#allocation14]  }
  0x5d   :  { %s133_s29 = sshll.u32 %s11927_s28, 4  ;;  %s11928_s9 = smov [#allocation17]   ;;  %s134_s29 = int_to_ptr.vmem [resolvable:$true] %s133_s29 }
  0x5e   :  { %s157_s30 = sshll.u32 %s11928_s9, 4  ;;  %s11852_s0 = scalar_lea.vmem %s134_s29, 32  ;;  %s158_s30 = int_to_ptr.vmem [resolvable:$true] %s157_s30 }
  0x5f   :  { %p11853_p7 = scmp.ne.s32.totalorder %s134_s29, %s11852_s0  ;;  %p11857_p8 = scmp.lt.s32.totalorder %s134_s29, %s134_s29 }
  0x60   :  { %p11858_p9 = scmp.lt.s32.totalorder %s11852_s0, %s11852_s0 }
  0x62   :  { %103 = dma.hbm_to_vmem [thread:$0]  %s14482_s7, 256, %s98_s14, [#allocation10], %s11918_s19, %s11918_s19, %s11919_s22  }
  0x63   :  { %p11859_p10 = por %p11858_p9, %p11857_p8 }
  0x65   :  { %p11860_p11 = pnand %p11859_p10, %p11853_p7 }
  0x67   :  { %11863 = shalt.err (!%p11860_p11)
}
  0x68   :  { %139 = dma.hbm_to_vmem [thread:$0]  %s14413_s13, 32, %s134_s29, [#allocation13], %s11921_s8, %s11921_s8, %s11922_s4  }
  0x69   :  { %s11872_s14 = scalar_lea.vmem %s158_s30, 1024  ;;  %p11877_p13 = scmp.lt.s32.totalorder %s158_s30, %s158_s30 }
  0x6a   :  { %p11873_p12 = scmp.ne.s32.totalorder %s158_s30, %s11872_s14  ;;  %p11878_p0 = scmp.lt.s32.totalorder %s11872_s14, %s11872_s14 }
  0x6c   :  { %p11879_p1 = por %p11878_p0, %p11877_p13 }
  0x6e   :  { %p11880_p2 = pnand %p11879_p1, %p11873_p12 }
  0x70   :  { %11883 = shalt.err (!%p11880_p2)
}
  0x71   :  { %163 = dma.hbm_to_vmem [thread:$0]  %s14415_s15, 1024, %s158_s30, [#allocation16], %s11918_s19, %s11918_s19, %s11919_s22  }
  0x72   :  { %s11929_s10 = smov [#allocation18]  }
  0x73   :  { %s171_s27 = sshll.u32 %s11929_s10, 4  ;;  %s172_s27 = int_to_ptr.vmem [resolvable:$true] %s171_s27 }
  0x74   :  { %s11892_s3 = scalar_lea.vmem %s172_s27, 32  ;;  %p11897_p4 = scmp.lt.s32.totalorder %s172_s27, %s172_s27 }
  0x75   :  { %p11893_p3 = scmp.ne.s32.totalorder %s172_s27, %s11892_s3  ;;  %p11898_p5 = scmp.lt.s32.totalorder %s11892_s3, %s11892_s3 }
  0x77   :  { %p11899_p6 = por %p11898_p5, %p11897_p4 }
  0x79   :  { %p11900_p7 = pnand %p11899_p6, %p11893_p3 }
  0x7b   :  { %11903 = shalt.err (!%p11900_p7)
}
  0x7c   :  { %177 = dma.hbm_to_vmem [thread:$0]  %s14417_s17, 32, %s172_s27, [#allocation19], %s11921_s8, %s11921_s8, %s11922_s4  }
  0x7d   :  { %11904 = dma.done.wait [#allocation5], 768  }
  0x7e   :  { %11905 = vsyncadd [#allocation5], 4294966528 }
  0x7f   :  { %11906 = dma.done.wait [#allocation7], 1536  }
  0x80   :  { %11907 = vsyncadd [#allocation7], 4294965760 }
  0x81   :  { %11908 = dma.done.wait [#allocation10], 768  }
  0x82   :  { %11909 = vsyncadd [#allocation10], 4294966528 }
  0x83   :  { %11910 = dma.done.wait [#allocation13], 64  }
  0x84   :  { %11911 = vsyncadd [#allocation13], 4294967232 }
  0x85   :  { %11912 = dma.done.wait [#allocation16], 2048  }
  0x86   :  { %11913 = vsyncadd [#allocation16], 4294965248 }
  0x87   :  { %11914 = dma.done.wait [#allocation19], 32  }
  0x88   :  { %11915 = vsyncadd [#allocation19], 4294967264  ;;  %v14444_v2 = vmov 0.0   ;;  %vm11931_vm0 = vmmov 0   ;;  %v12143_v3 = vld [vmem:[#allocation9 + $0x18] sm:$0xff]  ;;  %v12145_v4 = vld [vmem:[#allocation9 + $0x10] sm:$0xff] }
  0x89   :  { %10325 = vmatprep.subr.mxu0 %v14444_v2  ;;  %10333 = vmatprep.mubr.msk.f32.mxu0 %vm11931_vm0, %v14444_v2  ;;  %v12149_v5 = vld [vmem:[#allocation9 + $0x8] sm:$0xff]  ;;  %v12153_v6 = vld [vmem:[#allocation9] sm:$0xff]  ;;  %vm229_vm1 = vcmask 261120   ;;  %s14483_s19 = sld [smem:[#allocation54_spill]]  ;;  %v11932_v12 = vmov 1.0   ;;  %v224_v13 = vld [vmem:[#allocation8] sm:$0xff] }
  0x8a   :  { %10336 = vmatprep.subr.mxu1 %v14444_v2  ;;  %10344 = vmatprep.mubr.msk.f32.mxu1 %vm11931_vm0, %v14444_v2  ;;  %v223_v7 = vld [vmem:[#allocation6] sm:$0xff]  ;;  %s11933_s30 = smov 96   ;;  %s14484_s5 = sld [smem:[#allocation58_spill]]  ;;  %v222_v19 = vld [vmem:[#allocation4] sm:$0xff]  ;;  %vm460_vm2 = vcmask 64512   ;;  %vm9454_vm3 = vcmask 7168  }
  0x8b   :  { %10326 = vmatpush3.msra.mxu0 %v12143_v3  ;;  %10337 = vmatpush3.msra.mxu1 %v11932_v12  ;;  %s14486_s1 = sld [smem:[#allocation56_spill]]  ;;  %s11934_s14 = smov 32   ;;  %v12283_v38 = vld [vmem:[#allocation15 + $0x18] sm:$0xff]  ;;  %v12299_v43 = vld [vmem:[%s14411_s11 + $0x10] sm:$0xff]  ;;  %v12308_v44 = vld [vmem:[%s14411_s11 + $0x8] sm:$0xff] }
  0x8c   :  { %10327 = vmatprep.subr.mxu0 %v14444_v2  ;;  %10338 = vmatprep.subr.mxu1 %v14444_v2  ;;  %s14487_s2 = sld [smem:[#allocation55_spill]]  ;;  %v12292_v42 = vld [vmem:[%s14411_s11 + $0x18] sm:$0xff]  ;;  %v12315_v45 = vld [vmem:[%s14411_s11] sm:$0xff]  ;;  %v12331_v48 = vld [vmem:[#allocation17 + $0x8] sm:$0xff]  ;;  %s11935_s22 = smov 64  }
  0x8d   :  { %10328 = vmatpush3.msra.mxu0 %v12145_v4  ;;  %10339 = vmatpush3.msra.mxu1 %v11932_v12  ;;  %v12319_v46 = vld [vmem:[#allocation17 + $0x18] sm:$0xff]  ;;  %v12325_v47 = vld [vmem:[#allocation17 + $0x10] sm:$0xff]  ;;  %v12335_v49 = vld [vmem:[#allocation17] sm:$0xff]  ;;  %s14489_s6 = sld [smem:[#allocation51_spill]] }
  0x8e   :  { %10329 = vmatprep.subr.mxu0 %v14444_v2  ;;  %10340 = vmatprep.subr.mxu1 %v14444_v2  ;;  %v12352_v51 = vld [vmem:[#allocation15 + $0x10] sm:$0xff]  ;;  %v12356_v52 = vld [vmem:[#allocation15 + $0x8] sm:$0xff]  ;;  %v12360_v53 = vld [vmem:[#allocation15] sm:$0xff] }
  0x8f   :  { %10330 = vmatpush3.msra.mxu0 %v12149_v5  ;;  %v12160_v8 = vld [vmem:[%s14483_s19 + $0x18] sm:$0xff]  ;;  %v12168_v9 = vld [vmem:[%s14483_s19 + $0x10] sm:$0xff]  ;;  %v12177_v10 = vld [vmem:[%s14483_s19 + $0x8] sm:$0xff]  ;;  %10341 = vmatpush3.msra.mxu1 %v11932_v12 }
  0x90   :  { %10331 = vmatprep.subr.mxu0 %v14444_v2  ;;  %v12186_v11 = vld [vmem:[%s14483_s19] sm:$0xff]  ;;  %10342 = vmatprep.subr.mxu1 %v14444_v2  ;;  %v12207_v18 = vld [vmem:[%s14484_s5 + $0x18] sm:$0xff]  ;;  %v12253_v26 = vld [vmem:[%s14484_s5 + $0x10] sm:$0xff] }
  0x91   :  { %10332 = vmatpush3.msra.mxu0 %v12153_v6  ;;  %10343 = vmatpush3.msra.mxu1 %v11932_v12  ;;  %v12216_v21 = vld [vmem:[%s14486_s1 + $0x18] sm:$0xff]  ;;  %v12224_v23 = vld [vmem:[%s14486_s1 + $0x10] sm:$0xff]  ;;  %v12233_v24 = vld [vmem:[%s14486_s1 + $0x8] sm:$0xff] }
  0x92   :  { %10334 = vmatmul.mubr.msk.f32.vlgmr.msra.gmra.mxu0 %vm229_vm1, %v223_v7  ;;  %10347 = vmatprep.subr.mxu0 %v14444_v2  ;;  %v12240_v25 = vld [vmem:[%s14486_s1] sm:$0xff]  ;;  %v12260_v27 = vld [vmem:[%s14484_s5 + $0x8] sm:$0xff] }
  0x93   :  { %10348 = vmatpush3.msra.mxu0 %v12160_v8  ;;  %10355 = vmatprep.mubr.msk.f32.mxu0 %vm11931_vm0, %v14444_v2  ;;  %v12267_v28 = vld [vmem:[%s14484_s5] sm:$0xff] }
  0x94   :  { %10349 = vmatprep.subr.mxu0 %v14444_v2  ;;  %10345 = vmatmul.mubr.msk.f32.vlgmr.msra.gmra.mxu1 %vm229_vm1, %v224_v13  ;;  %v12274_v29 = vld [vmem:[%s14487_s2] ss:$0 sm:$0xff]  ;;  %v12363_v54 = vld [vmem:[#allocation12] ss:$0 sm:$0xff]  ;;  %v12367_v59 = vld [vmem:[#allocation14] ss:$0 sm:$0xff] }
  0x95   :  { %10350 = vmatpush3.msra.mxu0 %v12168_v9  ;;  %10358 = vmatprep.subr.mxu1 %v14444_v2  ;;  %v12371_v63 = vld [vmem:[#allocation18] ss:$0 sm:$0xff]  ;;  %v12378_v12 = vld [vmem:[%s14412_s12] ss:$0 sm:$0xff] }
  0x96   :  { %10351 = vmatprep.subr.mxu0 %v14444_v2  ;;  %10360 = vmatprep.mubr.msk.f32.mxu1 %vm11931_vm0, %v14444_v2 }
  0x97   :  { %10352 = vmatpush3.msra.mxu0 %v12177_v10 }
  0x98   :  { %10353 = vmatprep.subr.mxu0 %v14444_v2 }
  0x99   :  { %10354 = vmatpush3.msra.mxu0 %v12186_v11 }
  0x9a   :  { %10379 = vmatprep.subr.mxu0 %v14444_v2 }
 0x152   :  { %v299_v14 = vpop.f32.mrf.mxu0 }
 0x153   :  { %10356 = vmatmul.mubr.msk.f32.vlgmr.msra.gmra.mxu0 %vm229_vm1, %v299_v14 }
 0x154   :  { %v10335_v15 = vpop.f32.mrf.mxu0  ;;  %10387 = vmatprep.mubr.msk.f32.mxu0 %vm11931_vm0, %v14444_v2  ;;  %v12200_v16 = vpop.f32.mrf.mxu1  ;;  %10380 = vmatpush3.msra.mxu0 %v12207_v18 }
 0x155   :  { %988 = vrot.lane.b32.xlu1 %v12200_v16, %s11933_s30  ;;  %10381 = vmatprep.subr.mxu0 %v14444_v2 }
 0x156   :  { %v10346_v17 = vpop.f32.mrf.mxu1  ;;  %10382 = vmatpush3.msra.mxu0 %v12253_v26 }
 0x157   :  { %10383 = vmatprep.subr.mxu0 %v14444_v2 }
 0x158   :  { %10384 = vmatpush3.msra.mxu0 %v12260_v27 }
 0x159   :  { %10385 = vmatprep.subr.mxu0 %v14444_v2 }
 0x15a   :  { %10386 = vmatpush3.msra.mxu0 %v12267_v28 }
 0x15b   :  { %10401 = vmatprep.subr.mxu0 %v14444_v2 }
 0x1c7   :  { %v989_v50 = vpop.permute.xlu1 %988 }
 0x213   :  { %v12211_v20 = vpop.f32.mrf.mxu0 }
 0x214   :  { %14485 = vst [vmem:[#allocation26_spill] sm:$0xff] %v12211_v20  ;;  %10359 = vmatpush3.msra.mxu1 %v12211_v20 }
 0x215   :  { %v10357_v22 = vpop.f32.mrf.mxu0  ;;  %10361 = vmatmul.mubr.msk.f32.vlgmr.msra.gmra.mxu1 %vm460_vm2, %v222_v19  ;;  %10363 = vmatprep.subr.mxu1 %v14444_v2 }
 0x216   :  { %10364 = vmatpush3.msra.mxu1 %v12216_v21  ;;  %10371 = vmatprep.mubr.msk.f32.mxu1 %vm11931_vm0, %v14444_v2 }
 0x217   :  { %10365 = vmatprep.subr.mxu1 %v14444_v2 }
 0x218   :  { %10366 = vmatpush3.msra.mxu1 %v12224_v23 }
 0x219   :  { %10367 = vmatprep.subr.mxu1 %v14444_v2 }
 0x21a   :  { %10368 = vmatpush3.msra.mxu1 %v12233_v24 }
 0x21b   :  { %10369 = vmatprep.subr.mxu1 %v14444_v2 }
 0x21c   :  { %10370 = vmatpush3.msra.mxu1 %v12240_v25 }
 0x21d   :  { %10372 = vmatmul.mubr.msk.f32.vlgmr.msra.gmra.mxu1 %vm229_vm1, %v12200_v16  ;;  %10374 = vmatprep.subr.mxu1 %v14444_v2 }
 0x21e   :  { %10376 = vmatprep.mubr.msk.f32.mxu1 %vm11931_vm0, %v14444_v2 }
 0x2d5   :  { %v530_v30 = vpop.f32.mrf.mxu1 }
 0x2d6   :  { %v531_v31 = vadd.f32 %v12274_v29, %v530_v30 }
 0x2d7   :  { %v10362_v32 = vpop.f32.mrf.mxu1 }
 0x2d8   :  { %v534_v33 = vmax.f32 %v531_v31, 0.0  ;;  %v12389_v32 = vld [vmem:[%s14416_s16] ss:$0 sm:$0xff] }
 0x2da   :  { %10388 = vmatmul.mubr.msk.f32.vlgmr.msra.gmra.mxu0 %vm229_vm1, %v534_v33 }
 0x2db   :  { %10409 = vmatprep.mubr.msk.f32.mxu0 %vm11931_vm0, %v14444_v2  ;;  %10402 = vmatpush3.msra.mxu0 %v12283_v38 }
 0x2dc   :  { %10403 = vmatprep.subr.mxu0 %v14444_v2 }
 0x2dd   :  { %v608_v34 = vpop.f32.mrf.mxu1  ;;  %10404 = vmatpush3.msra.mxu0 %v12352_v51 }
 0x2de   :  { %613 = vrot.lane.b32.xlu0 %v608_v34, %s11934_s14  ;;  %10405 = vmatprep.subr.mxu0 %v14444_v2 }
 0x2df   :  { %v10373_v35 = vpop.f32.mrf.mxu1  ;;  %10406 = vmatpush3.msra.mxu0 %v12356_v52 }
 0x2e0   :  { %10407 = vmatprep.subr.mxu0 %v14444_v2 }
 0x2e1   :  { %10408 = vmatpush3.msra.mxu0 %v12360_v53 }
 0x350   :  { %v614_v36 = vpop.permute.xlu0 %613 }
 0x351   :  { %v616_v37 = vadd.f32 %v614_v36, %v12211_v20 }
 0x353   :  { %625 = vrot.lane.b32.xlu0 %v616_v37, %s11933_s30 }
 0x39a   :  { %v12287_v39 = vpop.f32.mrf.mxu0 }
 0x39b   :  { %v12382_v13 = vadd.f32 %v12378_v12, %v12287_v39 }
 0x39c   :  { %v10389_v40 = vpop.f32.mrf.mxu0 }
 0x39d   :  { %14488 = vst [vmem:[#allocation27_spill] sm:$0xff] %v12382_v13 }
 0x3c5   :  { %v626_v41 = vpop.permute.xlu0 %625 }
 0x3c6   :  { %10375 = vmatpush3.msra.mxu1 %v626_v41 }
 0x3c7   :  { %10377 = vmatmul.mubr.msk.f32.vlgmr.msra.gmra.mxu1 %vm460_vm2, %v222_v19  ;;  %10390 = vmatprep.subr.mxu1 %v14444_v2 }
 0x3c8   :  { %10391 = vmatpush3.msra.mxu1 %v12292_v42  ;;  %10398 = vmatprep.mubr.msk.f32.mxu1 %vm11931_vm0, %v14444_v2 }
 0x3c9   :  { %10392 = vmatprep.subr.mxu1 %v14444_v2 }
 0x3ca   :  { %10393 = vmatpush3.msra.mxu1 %v12299_v43 }
 0x3cb   :  { %10394 = vmatprep.subr.mxu1 %v14444_v2 }
 0x3cc   :  { %10395 = vmatpush3.msra.mxu1 %v12308_v44 }
 0x3cd   :  { %10396 = vmatprep.subr.mxu1 %v14444_v2 }
 0x3ce   :  { %10397 = vmatpush3.msra.mxu1 %v12315_v45 }
 0x3cf   :  { %10399 = vmatmul.mubr.msk.f32.vlgmr.msra.gmra.mxu1 %vm229_vm1, %v12200_v16  ;;  %10412 = vmatprep.subr.mxu1 %v14444_v2 }
 0x3d0   :  { %10413 = vmatpush3.msra.mxu1 %v12319_v46  ;;  %10420 = vmatprep.mubr.msk.f32.mxu1 %vm11931_vm0, %v14444_v2 }
 0x3d1   :  { %10414 = vmatprep.subr.mxu1 %v14444_v2 }
 0x3d2   :  { %10415 = vmatpush3.msra.mxu1 %v12325_v47 }
 0x3d3   :  { %10416 = vmatprep.subr.mxu1 %v14444_v2 }
 0x3d4   :  { %10417 = vmatpush3.msra.mxu1 %v12331_v48 }
 0x3d5   :  { %10418 = vmatprep.subr.mxu1 %v14444_v2 }
 0x3d6   :  { %10419 = vmatpush3.msra.mxu1 %v12335_v49 }
 0x3d7   :  { %10421 = vmatmul.mubr.msk.f32.vlgmr.msra.gmra.mxu1 %vm229_vm1, %v989_v50  ;;  %10431 = vmatprep.subr.mxu1 %v14444_v2 }
 0x3d8   :  { %10432 = vmatpush3.msra.mxu1 %v12143_v3  ;;  %10439 = vmatprep.mubr.msk.f32.mxu1 %vm11931_vm0, %v14444_v2 }
 0x3d9   :  { %10433 = vmatprep.subr.mxu1 %v14444_v2 }
 0x3da   :  { %10434 = vmatpush3.msra.mxu1 %v12145_v4 }
 0x3db   :  { %10435 = vmatprep.subr.mxu1 %v14444_v2 }
 0x3dc   :  { %10436 = vmatpush3.msra.mxu1 %v12149_v5 }
 0x3dd   :  { %10437 = vmatprep.subr.mxu1 %v14444_v2 }
 0x3de   :  { %10438 = vmatpush3.msra.mxu1 %v12153_v6 }
 0x3df   :  { %10453 = vmatprep.subr.mxu1 %v14444_v2 }
 0x487   :  { %v694_v55 = vpop.f32.mrf.mxu1 }
 0x488   :  { %v695_v56 = vadd.f32 %v12363_v54, %v694_v55 }
 0x489   :  { %v10378_v57 = vpop.f32.mrf.mxu1 }
 0x48a   :  { %v698_v58 = vmax.f32 %v695_v56, 0.0 }
 0x48c   :  { %10410 = vmatmul.mubr.msk.f32.vlgmr.msra.gmra.mxu0 %vm229_vm1, %v698_v58 }
 0x48f   :  { %v860_v60 = vpop.f32.mrf.mxu1 }
 0x490   :  { %v861_v61 = vadd.f32 %v12367_v59, %v860_v60 }
 0x491   :  { %v10400_v62 = vpop.f32.mrf.mxu1 }
 0x492   :  { %872 = vrot.lane.b32.xlu1 %v861_v61, %s11935_s22  ;;  %v864_v14 = vadd.f32 %v861_v61, %v12382_v13 }
 0x494   :  { %v9614_v15 = vmul.f32 -1.442695, %v864_v14 }
 0x496   :  { %11400 = vpow2.f32 %v9614_v15 }
 0x497   :  { %v1058_v0 = vpop.f32.mrf.mxu1 }
 0x498   :  { %v1059_v1 = vadd.f32 %v12371_v63, %v1058_v0  ;;  %v225_v0 = vld [vmem:[%s14489_s6] sm:$0xff] }
 0x499   :  { %v10422_v7 = vpop.f32.mrf.mxu1  ;;  %10425 = vmatprep.mubr.msk.f32.mxu0 %vm460_vm2, %v225_v0 }
 0x49a   :  { %1070 = vrot.lane.b32.xlu0 %v1059_v1, %s11935_s22 }
 0x4a3   :  { %v11401_v17 = vpop.eup %11400 }
 0x4a4   :  { %v868_v19 = vadd.f32 1.0, %v11401_v17 }
 0x4a6   :  { %11402 = vrcp.f32 %v868_v19 }
 0x4b3   :  { %v11403_v22 = vpop.eup %11402 }
 0x4b4   :  { %v882_v14 = vsub.f32 1.0, %v11403_v22 }
 0x504   :  { %v873_v30 = vpop.permute.xlu1 %872 }
 0x505   :  { %v875_v31 = vmul.f32 %v11403_v22, %v873_v30  ;;  %v12408_v30 = vld [vmem:[%s14483_s19 + $0x38] sm:$0xff] }
 0x507   :  { %877 = vrot.lane.b32.xlu1 %v875_v31, %s11935_s22  ;;  %v12413_v31 = vld [vmem:[%s14483_s19 + $0x30] sm:$0xff] }
 0x50c   :  { %v1071_v50 = vpop.permute.xlu0 %1070 }
 0x54c   :  { %v978_v33 = vpop.f32.mrf.mxu0 }
 0x54d   :  { %v979_v34 = vadd.f32 %v12389_v32, %v978_v33 }
 0x54e   :  { %v10411_v35 = vpop.f32.mrf.mxu0 }
 0x54f   :  { %v1062_v36 = vadd.f32 %v1059_v1, %v979_v34  ;;  %v1194_v1 = vld [vmem:[#allocation6 + $0x8] sm:$0xff] }
 0x550   :  { %10440 = vmatmul.mubr.msk.f32.vlgmr.msra.gmra.mxu1 %vm229_vm1, %v1194_v1 }
 0x551   :  { %v9619_v37 = vmul.f32 -1.442695, %v1062_v36  ;;  %10461 = vmatprep.mubr.msk.f32.mxu1 %vm11931_vm0, %v14444_v2  ;;  %10454 = vmatpush3.msra.mxu1 %v12408_v30 }
 0x552   :  { %10455 = vmatprep.subr.mxu1 %v14444_v2 }
 0x553   :  { %11404 = vpow2.f32 %v9619_v37  ;;  %10456 = vmatpush3.msra.mxu1 %v12413_v31 }
 0x554   :  { %10457 = vmatprep.subr.mxu1 %v14444_v2 }
 0x560   :  { %v11405_v39 = vpop.eup %11404 }
 0x561   :  { %v1066_v40 = vadd.f32 1.0, %v11405_v39 }
 0x563   :  { %11406 = vrcp.f32 %v1066_v40 }
 0x570   :  { %v11407_v41 = vpop.eup %11406 }
 0x571   :  { %v1073_v55 = vmul.f32 %v11407_v41, %v1071_v50  ;;  %v1086_v36 = vmul.f32 %v11407_v41, %v12200_v16 }
 0x573   :  { %1075 = vrot.lane.b32.xlu0 %v1073_v55, %s11935_s22  ;;  %v226_v55 = vld [vmem:[%s14489_s6 + $0x8] sm:$0xff] }
 0x577   :  { %888 = vrot.lane.b32.xlu0 %v12200_v16, %s11934_s14 }
 0x579   :  { %v878_v56 = vpop.permute.xlu1 %877 }
 0x57a   :  { %v880_v57 = vadd.f32 %v878_v56, %v12382_v13  ;;  %v227_v56 = vld [vmem:[%s14489_s6 + $0x10] sm:$0xff] }
 0x57c   :  { %11408 = vtanh.f32 %v880_v57  ;;  %v12448_v57 = vld [vmem:[%s14483_s19 + $0x20] sm:$0xff] }
 0x589   :  { %v11409_v58 = vpop.eup %11408 }
 0x58a   :  { %884 = vrot.lane.b32.xlu1 %v11409_v58, %s11933_s30 }
 0x5e5   :  { %v1076_v60 = vpop.permute.xlu0 %1075 }
 0x5e6   :  { %v1078_v61 = vadd.f32 %v1076_v60, %v979_v34  ;;  %v1080_v34 = vsub.f32 1.0, %v11407_v41  ;;  %v12441_v41 = vld [vmem:[%s14483_s19 + $0x28] sm:$0xff] }
 0x5e7   :  { %10458 = vmatpush3.msra.mxu1 %v12441_v41 }
 0x5e8   :  { %11410 = vtanh.f32 %v1078_v61  ;;  %10459 = vmatprep.subr.mxu1 %v14444_v2 }
 0x5e9   :  { %v889_v7 = vpop.permute.xlu0 %888  ;;  %10460 = vmatpush3.msra.mxu1 %v12448_v57 }
 0x5ea   :  { %v891_v17 = vmul.f32 %v11403_v22, %v889_v7  ;;  %10480 = vmatprep.subr.mxu1 %v14444_v2 }
 0x5f5   :  { %v11411_v62 = vpop.eup %11410 }
 0x5f6   :  { %1082 = vrot.lane.b32.xlu1 %v11411_v62, %s11933_s30 }
 0x5fc   :  { %v885_v15 = vpop.permute.xlu1 %884 }
 0x5fd   :  { %v887_v19 = vmul.f32 %v885_v15, %v882_v14 }
 0x5ff   :  { %v892_v33 = vadd.f32 %v891_v17, %v887_v19  ;;  %v1196_v19 = vld [vmem:[#allocation8 + $0x8] sm:$0xff] }
 0x601   :  { %1089 = vrot.lane.b32.xlu0 %v892_v33, %s11933_s30  ;;  %v12474_v33 = vld [vmem:[#allocation4 + $0x8] sm:$0xff] }
 0x610   :  { %v1271_v58 = vpop.f32.mrf.mxu1 }
 0x611   :  { %10462 = vmatmul.mubr.msk.f32.vlgmr.msra.gmra.mxu1 %vm229_vm1, %v1271_v58  ;;  %v12540_v58 = vld [vmem:[%s14411_s11 + $0x20] sm:$0xff] }
 0x612   :  { %v10441_v60 = vpop.f32.mrf.mxu1  ;;  %10482 = vmatprep.mubr.msk.f32.mxu1 %vm11931_vm0, %v14444_v2 }
 0x668   :  { %v1083_v22 = vpop.permute.xlu1 %1082 }
 0x669   :  { %v1085_v35 = vmul.f32 %v1083_v22, %v1080_v34  ;;  %v12481_v34 = vld [vmem:[%s14486_s1 + $0x38] sm:$0xff] }
 0x66b   :  { %v1087_v37 = vadd.f32 %v1086_v36, %v1085_v35  ;;  %v12490_v36 = vld [vmem:[%s14486_s1 + $0x30] sm:$0xff] }
 0x673   :  { %v1090_v39 = vpop.permute.xlu0 %1089 }
 0x674   :  { %v1092_v40 = vsel %vm229_vm1, %v1090_v39, %v1087_v37  ;;  %v12499_v37 = vld [vmem:[%s14486_s1 + $0x28] sm:$0xff]  ;;  %v12506_v39 = vld [vmem:[%s14486_s1 + $0x20] sm:$0xff] }
 0x675   :  { %v1093_v50 = vsub.f32 %v1092_v40, %v12200_v16  ;;  %v228_v16 = vld [vmem:[%s14489_s6 + $0x18] sm:$0xff] }
 0x676   :  { %v12515_v40 = vld [vmem:[%s14411_s11 + $0x38] sm:$0xff] }
 0x677   :  { %10423 = vmatprep.subr.mxu0 %v1093_v50 }
 0x678   :  { %10424 = vmatpush3.msra.mxu0 %v1093_v50 }
 0x679   :  { %10426 = vmatmul.mubr.msk.f32.vlgmr.msra.gmra.mxu0 %vm460_vm2, %v226_v55  ;;  %10442 = vmatprep.subr.mxu0 %v14444_v2  ;;  %v12524_v55 = vld [vmem:[%s14411_s11 + $0x30] sm:$0xff] }
 0x67a   :  { %10428 = vmatprep.mubr.msk.f32.mxu0 %vm460_vm2, %v227_v56 }
 0x67d   :  { %10429 = vmatmul.mubr.msk.f32.gmra.mxu0 %vm460_vm2, %v228_v16  ;;  %v12533_v16 = vld [vmem:[%s14411_s11 + $0x28] sm:$0xff] }
 0x67e   :  { %10450 = vmatprep.mubr.msk.f32.mxu0 %vm11931_vm0, %v14444_v2 }
 0x6d1   :  { %v12476_v22 = vpop.f32.mrf.mxu1 }
 0x6d2   :  { %14490 = vst [vmem:[#allocation28_spill] sm:$0xff] %v12476_v22 }
 0x6d3   :  { %v10463_v35 = vpop.f32.mrf.mxu1 }
 0x739   :  { %v10427_v61 = vpop.f32.mrf.mxu0 }
 0x73a   :  { %v12461_v15 = vadd.f32 1.0, %v10427_v61 }
 0x73b   :  { %v1172_v62 = vpop.f32.mrf.mxu0 }
 0x73c   :  { %v12465_v17 = vadd.f32 1.0, %v1172_v62  ;;  %v12550_v62 = vld [vmem:[#allocation17 + $0x38] sm:$0xff] }
 0x73d   :  { %v10430_v0 = vpop.f32.mrf.mxu0  ;;  %14491 = vst [vmem:[#allocation29_spill] sm:$0xff] %v12550_v62 }
 0x73e   :  { %v12455_v1 = vadd.f32 1.0, %v10430_v0  ;;  %v12552_v0 = vld [vmem:[#allocation17 + $0x30] sm:$0xff] }
 0x73f   :  { %v1182_v7 = vpop.f32.mrf.mxu0  ;;  %14492 = vst [vmem:[#allocation30_spill] sm:$0xff] %v12552_v0 }
 0x740   :  { %v12457_v14 = vadd.f32 1.0, %v1182_v7  ;;  %10443 = vmatpush3.msra.mxu0 %v12455_v1  ;;  %v12558_v7 = vld [vmem:[#allocation17 + $0x28] sm:$0xff] }
 0x741   :  { %10444 = vmatprep.subr.mxu0 %v14444_v2  ;;  %14493 = vst [vmem:[#allocation31_spill] sm:$0xff] %v12558_v7 }
 0x742   :  { %10445 = vmatpush3.msra.mxu0 %v12457_v14 }
 0x743   :  { %10446 = vmatprep.subr.mxu0 %v14444_v2 }
 0x744   :  { %10447 = vmatpush3.msra.mxu0 %v12461_v15 }
 0x745   :  { %10448 = vmatprep.subr.mxu0 %v14444_v2 }
 0x746   :  { %10449 = vmatpush3.msra.mxu0 %v12465_v17 }
 0x747   :  { %10451 = vmatmul.mubr.msk.f32.vlgmr.msra.gmra.mxu0 %vm229_vm1, %v1196_v19  ;;  %10464 = vmatprep.subr.mxu0 %v14444_v2  ;;  %v12562_v19 = vld [vmem:[#allocation17 + $0x20] sm:$0xff] }
 0x748   :  { %10466 = vmatprep.mubr.msk.f32.mxu0 %vm11931_vm0, %v14444_v2  ;;  %10465 = vmatpush3.msra.mxu0 %v12476_v22  ;;  %14494 = vst [vmem:[#allocation32_spill] sm:$0xff] %v12562_v19 }
 0x749   :  { %10469 = vmatprep.subr.mxu0 %v14444_v2 }
 0x74b   :  { %10467 = vmatmul.mubr.msk.f32.vlgmr.msra.gmra.mxu0 %vm460_vm2, %v12474_v33 }
 0x74c   :  { %10470 = vmatpush3.msra.mxu0 %v12481_v34  ;;  %10477 = vmatprep.mubr.msk.f32.mxu0 %vm11931_vm0, %v14444_v2 }
 0x74d   :  { %10471 = vmatprep.subr.mxu0 %v14444_v2 }
 0x74e   :  { %10472 = vmatpush3.msra.mxu0 %v12490_v36 }
 0x74f   :  { %10473 = vmatprep.subr.mxu0 %v14444_v2 }
 0x750   :  { %10474 = vmatpush3.msra.mxu0 %v12499_v37 }
 0x751   :  { %10475 = vmatprep.subr.mxu0 %v14444_v2 }
 0x752   :  { %10476 = vmatpush3.msra.mxu0 %v12506_v39 }
 0x753   :  { %10496 = vmatprep.subr.mxu0 %v14444_v2 }
 0x807   :  { %v12517_v50 = vpop.f32.mrf.mxu0 }
 0x808   :  { %10478 = vmatmul.mubr.msk.f32.vlgmr.msra.gmra.mxu0 %vm229_vm1, %v12517_v50 }
 0x809   :  { %10497 = vmatpush3.msra.mxu0 %v12515_v40  ;;  %v10452_v56 = vpop.f32.mrf.mxu0  ;;  %10504 = vmatprep.mubr.msk.f32.mxu0 %vm11931_vm0, %v14444_v2 }
 0x80a   :  { %10498 = vmatprep.subr.mxu0 %v14444_v2 }
 0x80b   :  { %10499 = vmatpush3.msra.mxu0 %v12524_v55  ;;  %v1503_v60 = vpop.f32.mrf.mxu0 }
 0x80c   :  { %10500 = vmatprep.subr.mxu0 %v14444_v2 }
 0x80d   :  { %10501 = vmatpush3.msra.mxu0 %v12533_v16  ;;  %v10468_v61 = vpop.f32.mrf.mxu0 }
 0x80e   :  { %10502 = vmatprep.subr.mxu0 %v14444_v2 }
 0x80f   :  { %10503 = vmatpush3.msra.mxu0 %v12540_v58 }
 0x810   :  { %10505 = vmatmul.mubr.msk.f32.vlgmr.msra.gmra.mxu0 %vm229_vm1, %v12517_v50  ;;  %10518 = vmatprep.subr.mxu0 %v14444_v2 }
 0x811   :  { %10526 = vmatprep.mubr.msk.f32.mxu0 %vm11931_vm0, %v14444_v2  ;;  %10519 = vmatpush3.msra.mxu0 %v12550_v62 }
 0x812   :  { %10520 = vmatprep.subr.mxu0 %v14444_v2 }
 0x813   :  { %10521 = vmatpush3.msra.mxu0 %v12552_v0  ;;  %v12570_v0 = vld [vmem:[#allocation14 + $0x1] ss:$0 sm:$0xff] }
 0x814   :  { %10522 = vmatprep.subr.mxu0 %v14444_v2  ;;  %14495 = vst [vmem:[#allocation33_spill] sm:$0xff] %v12570_v0 }
 0x815   :  { %10523 = vmatpush3.msra.mxu0 %v12558_v7 }
 0x816   :  { %10524 = vmatprep.subr.mxu0 %v14444_v2 }
 0x817   :  { %10525 = vmatpush3.msra.mxu0 %v12562_v19 }
 0x818   :  { %10537 = vmatprep.subr.mxu0 %v14444_v2 }
 0x8c8   :  { %v1582_v35 = vpop.f32.mrf.mxu0 }
 0x8c9   :  { %1587 = vrot.lane.b32.xlu1 %v1582_v35, %s11934_s14  ;;  %v12636_v35 = vld [vmem:[#allocation15 + $0x28] sm:$0xff] }
 0x8ca   :  { %v10479_v56 = vpop.f32.mrf.mxu0  ;;  %14503 = vst [vmem:[#allocation41_spill] sm:$0xff] %v12636_v35 }
 0x8cb   :  { %v12639_v56 = vld [vmem:[#allocation15 + $0x20] sm:$0xff] }
 0x8cc   :  { %14504 = vst [vmem:[#allocation42_spill] sm:$0xff] %v12639_v56 }
 0x8cd   :  { %1971 = vrot.lane.b32.xlu1 %v12517_v50, %s11933_s30 }
 0x8d0   :  { %v1839_v61 = vpop.f32.mrf.mxu0 }
 0x8d1   :  { %v1840_v19 = vadd.f32 %v12570_v0, %v1839_v61  ;;  %v12643_v61 = vld [vmem:[#allocation18 + $0x1] ss:$0 sm:$0xff] }
 0x8d2   :  { %v10506_v13 = vpop.f32.mrf.mxu0  ;;  %14505 = vst [vmem:[#allocation43_spill] sm:$0xff] %v12643_v61 }
 0x8d3   :  { %v12612_v13 = vld [vmem:[%s14484_s5 + $0x28] sm:$0xff] }
 0x8d4   :  { %14499 = vst [vmem:[#allocation37_spill] sm:$0xff] %v12612_v13 }
 0x93b   :  { %v1588_v20 = vpop.permute.xlu1 %1587 }
 0x93c   :  { %v1590_v7 = vadd.f32 %v1588_v20, %v12476_v22  ;;  %v12589_v20 = vld [vmem:[%s14484_s5 + $0x38] sm:$0xff]  ;;  %v12647_v22 = vld [vmem:[#allocation12 + $0x1] ss:$0 sm:$0xff] }
 0x93d   :  { %14496 = vst [vmem:[#allocation34_spill] sm:$0xff] %v12589_v20  ;;  %14506 = vst [vmem:[#allocation44_spill] sm:$0xff] %v12647_v22 }
 0x93e   :  { %1600 = vrot.lane.b32.xlu0 %v1590_v7, %s11933_s30  ;;  %v12632_v7 = vld [vmem:[#allocation15 + $0x30] sm:$0xff] }
 0x93f   :  { %v1972_v62 = vpop.permute.xlu1 %1971  ;;  %14502 = vst [vmem:[#allocation40_spill] sm:$0xff] %v12632_v7 }
 0x940   :  { %10527 = vmatmul.mubr.msk.f32.vlgmr.msra.gmra.mxu0 %vm229_vm1, %v1972_v62 }
 0x941   :  { %10538 = vmatpush3.msra.mxu0 %v12143_v3  ;;  %10545 = vmatprep.mubr.msk.f32.mxu0 %vm11931_vm0, %v14444_v2 }
 0x942   :  { %1851 = vrot.lane.b32.xlu0 %v1840_v19, %s11935_s22  ;;  %10539 = vmatprep.subr.mxu0 %v14444_v2 }
 0x943   :  { %10540 = vmatpush3.msra.mxu0 %v12145_v4  ;;  %v12594_v4 = vld [vmem:[%s14487_s2 + $0x1] ss:$0 sm:$0xff] }
 0x944   :  { %10541 = vmatprep.subr.mxu0 %v14444_v2  ;;  %14497 = vst [vmem:[#allocation35_spill] sm:$0xff] %v12594_v4 }
 0x945   :  { %10542 = vmatpush3.msra.mxu0 %v12149_v5  ;;  %v12602_v5 = vld [vmem:[%s14484_s5 + $0x30] sm:$0xff] }
 0x946   :  { %10543 = vmatprep.subr.mxu0 %v14444_v2  ;;  %14498 = vst [vmem:[#allocation36_spill] sm:$0xff] %v12602_v5 }
 0x947   :  { %10544 = vmatpush3.msra.mxu0 %v12153_v6  ;;  %v1504_v6 = vadd.f32 %v12594_v4, %v1503_v60  ;;  %v12623_v60 = vld [vmem:[#allocation15 + $0x38] sm:$0xff] }
 0x948   :  { %10559 = vmatprep.subr.mxu0 %v14444_v2  ;;  %14501 = vst [vmem:[#allocation39_spill] sm:$0xff] %v12623_v60 }
 0x949   :  { %v1507_v62 = vmax.f32 %v1504_v6, 0.0 }
 0x9b0   :  { %v1601_v3 = vpop.permute.xlu0 %1600 }
 0x9b1   :  { %10481 = vmatpush3.msra.mxu1 %v1601_v3 }
 0x9b2   :  { %10483 = vmatmul.mubr.msk.f32.vlgmr.msra.gmra.mxu1 %vm460_vm2, %v12474_v33  ;;  %10485 = vmatprep.subr.mxu1 %v14444_v2  ;;  %v12619_v33 = vld [vmem:[%s14484_s5 + $0x20] sm:$0xff] }
 0x9b3   :  { %10486 = vmatpush3.msra.mxu1 %v12589_v20  ;;  %10493 = vmatprep.mubr.msk.f32.mxu1 %vm11931_vm0, %v14444_v2  ;;  %14500 = vst [vmem:[#allocation38_spill] sm:$0xff] %v12619_v33 }
 0x9b4   :  { %10487 = vmatprep.subr.mxu1 %v14444_v2 }
 0x9b5   :  { %10488 = vmatpush3.msra.mxu1 %v12602_v5 }
 0x9b6   :  { %10489 = vmatprep.subr.mxu1 %v14444_v2 }
 0x9b7   :  { %10490 = vmatpush3.msra.mxu1 %v12612_v13 }
 0x9b8   :  { %10491 = vmatprep.subr.mxu1 %v14444_v2 }
 0x9b9   :  { %10492 = vmatpush3.msra.mxu1 %v12619_v33 }
 0x9ba   :  { %10494 = vmatmul.mubr.msk.f32.vlgmr.msra.gmra.mxu1 %vm229_vm1, %v1507_v62  ;;  %10507 = vmatprep.subr.mxu1 %v14444_v2 }
 0x9bb   :  { %10508 = vmatpush3.msra.mxu1 %v12623_v60  ;;  %10515 = vmatprep.mubr.msk.f32.mxu1 %vm11931_vm0, %v14444_v2 }
 0x9bc   :  { %10509 = vmatprep.subr.mxu1 %v14444_v2 }
 0x9bd   :  { %10510 = vmatpush3.msra.mxu1 %v12632_v7 }
 0x9be   :  { %10511 = vmatprep.subr.mxu1 %v14444_v2 }
 0x9bf   :  { %10512 = vmatpush3.msra.mxu1 %v12636_v35 }
 0x9c0   :  { %10513 = vmatprep.subr.mxu1 %v14444_v2  ;;  %v12654_v2 = vld [vmem:[%s14412_s12 + $0x1] ss:$0 sm:$0xff] }
 0x9c1   :  { %10514 = vmatpush3.msra.mxu1 %v12639_v56  ;;  %14507 = vst [vmem:[#allocation45_spill] sm:$0xff] %v12654_v2 }
 0xa00   :  { %v2041_v3 = vpop.f32.mrf.mxu0 }
 0xa01   :  { %v2042_v6 = vadd.f32 %v12643_v61, %v2041_v3 }
 0xa02   :  { %v10528_v62 = vpop.f32.mrf.mxu0 }
 0xa03   :  { %2053 = vrot.lane.b32.xlu1 %v2042_v6, %s11935_s22 }
 0xa72   :  { %v1669_v7 = vpop.f32.mrf.mxu1 }
 0xa73   :  { %v1670_v60 = vadd.f32 %v12647_v22, %v1669_v7 }
 0xa74   :  { %v10484_v35 = vpop.f32.mrf.mxu1 }
 0xa75   :  { %v1673_v33 = vmax.f32 %v1670_v60, 0.0  ;;  %v1852_v35 = vpop.permute.xlu0 %1851 }
 0xa77   :  { %10516 = vmatmul.mubr.msk.f32.vlgmr.msra.gmra.mxu1 %vm229_vm1, %v1673_v33 }
 0xa7a   :  { %v1763_v56 = vpop.f32.mrf.mxu1 }
 0xa7b   :  { %v12657_v3 = vadd.f32 %v12654_v2, %v1763_v56 }
 0xa7c   :  { %v10495_v62 = vpop.f32.mrf.mxu1 }
 0xa7d   :  { %14508 = vst [vmem:[#allocation46_spill] sm:$0xff] %v12657_v3  ;;  %v1843_v61 = vadd.f32 %v1840_v19, %v12657_v3  ;;  %v12666_v19 = vld [vmem:[%s14416_s16 + $0x1] ss:$0 sm:$0xff] }
 0xa7f   :  { %v9658_v13 = vmul.f32 -1.442695, %v1843_v61 }
 0xa81   :  { %11412 = vpow2.f32 %v9658_v13 }
 0xa8e   :  { %v11413_v5 = vpop.eup %11412 }
 0xa8f   :  { %v1847_v7 = vadd.f32 1.0, %v11413_v5 }
 0xa91   :  { %11414 = vrcp.f32 %v1847_v7 }
 0xa9e   :  { %v11415_v60 = vpop.eup %11414 }
 0xa9f   :  { %v1854_v33 = vmul.f32 %v11415_v60, %v1852_v35  ;;  %v1861_v0 = vsub.f32 1.0, %v11415_v60 }
 0xaa1   :  { %1856 = vrot.lane.b32.xlu0 %v1854_v33, %s11935_s22 }
 0xb13   :  { %v1857_v22 = vpop.permute.xlu0 %1856 }
 0xb14   :  { %v1859_v4 = vadd.f32 %v1857_v22, %v12657_v3 }
 0xb16   :  { %11416 = vtanh.f32 %v1859_v4  ;;  %v2054_v4 = vpop.permute.xlu1 %2053 }
 0xb23   :  { %v11417_v20 = vpop.eup %11416 }
 0xb24   :  { %1863 = vrot.lane.b32.xlu0 %v11417_v20, %s11933_s30 }
 0xb37   :  { %v1961_v13 = vpop.f32.mrf.mxu1 }
 0xb38   :  { %v1962_v5 = vadd.f32 %v12666_v19, %v1961_v13 }
 0xb39   :  { %v10517_v56 = vpop.f32.mrf.mxu1 }
 0xb3a   :  { %v2045_v61 = vadd.f32 %v2042_v6, %v1962_v5 }
 0xb3c   :  { %v9664_v62 = vmul.f32 -1.442695, %v2045_v61 }
 0xb3e   :  { %11418 = vpow2.f32 %v9664_v62  ;;  %v9624_v62 = vld [vmem:[%s14489_s6 + $0x20] sm:$0xff] }
 0xb3f   :  { %10531 = vmatprep.mubr.msk.f32.mxu1 %vm460_vm2, %v9624_v62 }
 0xb4b   :  { %v11419_v7 = vpop.eup %11418 }
 0xb4c   :  { %v2049_v35 = vadd.f32 1.0, %v11419_v7  ;;  %v2181_v7 = vld [vmem:[#allocation6 + $0x10] sm:$0xff] }
 0xb4d   :  { %10546 = vmatmul.mubr.msk.f32.vlgmr.msra.gmra.mxu0 %vm229_vm1, %v2181_v7 }
 0xb4e   :  { %11420 = vrcp.f32 %v2049_v35  ;;  %10560 = vmatpush3.msra.mxu0 %v12160_v8 }
 0xb5b   :  { %v11421_v22 = vpop.eup %11420 }
 0xb5c   :  { %v2056_v33 = vmul.f32 %v11421_v22, %v2054_v4 }
 0xb5e   :  { %2058 = vrot.lane.b32.xlu1 %v2056_v33, %s11935_s22 }
 0xb62   :  { %1867 = vrot.lane.b32.xlu1 %v12517_v50, %s11934_s14 }
 0xb96   :  { %v1864_v2 = vpop.permute.xlu0 %1863 }
 0xb97   :  { %v1866_v6 = vmul.f32 %v1864_v2, %v1861_v0  ;;  %v2063_v2 = vsub.f32 1.0, %v11421_v22  ;;  %v2069_v0 = vmul.f32 %v11421_v22, %v12517_v50 }
 0xbd0   :  { %v2059_v20 = vpop.permute.xlu1 %2058 }
 0xbd1   :  { %v2061_v3 = vadd.f32 %v2059_v20, %v1962_v5  ;;  %v14509_v5 = vmov 0.0  }
 0xbd2   :  { %10567 = vmatprep.mubr.msk.f32.mxu0 %vm11931_vm0, %v14509_v5  ;;  %10561 = vmatprep.subr.mxu0 %v14509_v5 }
 0xbd3   :  { %11422 = vtanh.f32 %v2061_v3  ;;  %10562 = vmatpush3.msra.mxu0 %v12168_v9 }
 0xbd4   :  { %v1868_v13 = vpop.permute.xlu1 %1867  ;;  %10563 = vmatprep.subr.mxu0 %v14509_v5 }
 0xbd5   :  { %v1870_v56 = vmul.f32 %v11415_v60, %v1868_v13  ;;  %10564 = vmatpush3.msra.mxu0 %v12177_v10  ;;  %v9625_v10 = vld [vmem:[%s14489_s6 + $0x28] sm:$0xff] }
 0xbd6   :  { %10565 = vmatprep.subr.mxu0 %v14509_v5 }
 0xbd7   :  { %v1871_v61 = vadd.f32 %v1870_v56, %v1866_v6  ;;  %10566 = vmatpush3.msra.mxu0 %v12186_v11  ;;  %v9626_v11 = vld [vmem:[%s14489_s6 + $0x30] sm:$0xff] }
 0xbd8   :  { %10586 = vmatprep.subr.mxu0 %v14509_v5 }
 0xbd9   :  { %2072 = vrot.lane.b32.xlu1 %v1871_v61, %s11933_s30 }
 0xbe0   :  { %v11423_v3 = vpop.eup %11422 }
 0xbe1   :  { %2065 = vrot.lane.b32.xlu0 %v11423_v3, %s11933_s30 }
 0xc0d   :  { %v2258_v22 = vpop.f32.mrf.mxu0 }
 0xc0e   :  { %10568 = vmatmul.mubr.msk.f32.vlgmr.msra.gmra.mxu0 %vm229_vm1, %v2258_v22 }
 0xc0f   :  { %v10547_v20 = vpop.f32.mrf.mxu0  ;;  %10588 = vmatprep.mubr.msk.f32.mxu0 %vm11931_vm0, %v14509_v5 }
 0xc4b   :  { %v2073_v4 = vpop.permute.xlu1 %2072 }
 0xc53   :  { %v2066_v8 = vpop.permute.xlu0 %2065 }
 0xc54   :  { %v2068_v60 = vmul.f32 %v2066_v8, %v2063_v2 }
 0xc56   :  { %v2070_v35 = vadd.f32 %v2069_v0, %v2068_v60  ;;  %v12791_v0 = vld [vmem:[#allocation9 + $0x10] sm:$0xff]  ;;  %v12799_v60 = vld [vmem:[#allocation9] sm:$0xff] }
 0xc58   :  { %v2075_v33 = vsel %vm229_vm1, %v2073_v4, %v2070_v35 }
 0xc59   :  { %v2076_v9 = vsub.f32 %v2075_v33, %v12517_v50  ;;  %v9627_v50 = vld [vmem:[%s14489_s6 + $0x38] sm:$0xff] }
 0xc5b   :  { %10529 = vmatprep.subr.mxu1 %v2076_v9 }
 0xc5c   :  { %10530 = vmatpush3.msra.mxu1 %v2076_v9 }
 0xc5d   :  { %10532 = vmatmul.mubr.msk.f32.vlgmr.msra.gmra.mxu1 %vm460_vm2, %v9625_v10  ;;  %10548 = vmatprep.subr.mxu1 %v14509_v5 }
 0xc5e   :  { %10534 = vmatprep.mubr.msk.f32.mxu1 %vm460_vm2, %v9626_v11 }
 0xc61   :  { %10535 = vmatmul.mubr.msk.f32.gmra.mxu1 %vm460_vm2, %v9627_v50 }
 0xc62   :  { %10556 = vmatprep.mubr.msk.f32.mxu1 %vm11931_vm0, %v14509_v5 }
 0xd1d   :  { %v10533_v13 = vpop.f32.mrf.mxu1 }
 0xd1e   :  { %v12719_v3 = vadd.f32 %v10533_v13, %v12461_v15  ;;  %v12735_v15 = vpop.f32.mrf.mxu0 }
 0xd1f   :  { %v2155_v6 = vpop.f32.mrf.mxu1 }
 0xd20   :  { %v12724_v2 = vadd.f32 %v2155_v6, %v12465_v17  ;;  %v10569_v17 = vpop.f32.mrf.mxu0 }
 0xd21   :  { %v10536_v56 = vpop.f32.mrf.mxu1 }
 0xd22   :  { %v12711_v61 = vadd.f32 %v10536_v56, %v12455_v1  ;;  %v2183_v1 = vld [vmem:[#allocation8 + $0x10] sm:$0xff] }
 0xd23   :  { %v2165_v62 = vpop.f32.mrf.mxu1 }
 0xd24   :  { %v12714_v7 = vadd.f32 %v2165_v62, %v12457_v14  ;;  %10549 = vmatpush3.msra.mxu1 %v12711_v61  ;;  %v12733_v14 = vld [vmem:[#allocation4 + $0x10] sm:$0xff] }
 0xd25   :  { %10550 = vmatprep.subr.mxu1 %v14509_v5 }
 0xd26   :  { %10551 = vmatpush3.msra.mxu1 %v12714_v7 }
 0xd27   :  { %10552 = vmatprep.subr.mxu1 %v14509_v5 }
 0xd28   :  { %10553 = vmatpush3.msra.mxu1 %v12719_v3 }
 0xd29   :  { %10554 = vmatprep.subr.mxu1 %v14509_v5 }
 0xd2a   :  { %10555 = vmatpush3.msra.mxu1 %v12724_v2 }
 0xd2b   :  { %10557 = vmatmul.mubr.msk.f32.vlgmr.msra.gmra.mxu1 %vm229_vm1, %v2183_v1  ;;  %10570 = vmatprep.subr.mxu1 %v14509_v5 }
 0xd2c   :  { %10572 = vmatprep.mubr.msk.f32.mxu1 %vm11931_vm0, %v14509_v5  ;;  %10571 = vmatpush3.msra.mxu1 %v12735_v15 }
 0xd2d   :  { %10575 = vmatprep.subr.mxu1 %v14509_v5 }
 0xd2f   :  { %10573 = vmatmul.mubr.msk.f32.vlgmr.msra.gmra.mxu1 %vm460_vm2, %v12733_v14 }
 0xd30   :  { %10576 = vmatpush3.msra.mxu1 %v12216_v21  ;;  %10583 = vmatprep.mubr.msk.f32.mxu1 %vm11931_vm0, %v14509_v5 }
 0xd31   :  { %10577 = vmatprep.subr.mxu1 %v14509_v5 }
 0xd32   :  { %10578 = vmatpush3.msra.mxu1 %v12224_v23 }
 0xd33   :  { %10579 = vmatprep.subr.mxu1 %v14509_v5 }
 0xd34   :  { %10580 = vmatpush3.msra.mxu1 %v12233_v24 }
 0xd35   :  { %10581 = vmatprep.subr.mxu1 %v14509_v5 }
 0xd36   :  { %10582 = vmatpush3.msra.mxu1 %v12240_v25 }
 0xd37   :  { %10602 = vmatprep.subr.mxu1 %v14509_v5 }
 0xdeb   :  { %v12751_v8 = vpop.f32.mrf.mxu1 }
 0xdec   :  { %10584 = vmatmul.mubr.msk.f32.vlgmr.msra.gmra.mxu1 %vm229_vm1, %v12751_v8 }
 0xded   :  { %10603 = vmatpush3.msra.mxu1 %v12292_v42  ;;  %v10558_v21 = vpop.f32.mrf.mxu1  ;;  %10610 = vmatprep.mubr.msk.f32.mxu1 %vm11931_vm0, %v14509_v5 }
 0xdee   :  { %10604 = vmatprep.subr.mxu1 %v14509_v5 }
 0xdef   :  { %10605 = vmatpush3.msra.mxu1 %v12299_v43  ;;  %v2477_v23 = vpop.f32.mrf.mxu1 }
 0xdf0   :  { %10606 = vmatprep.subr.mxu1 %v14509_v5  ;;  %v2478_v4 = vadd.f32 %v12274_v29, %v2477_v23 }
 0xdf1   :  { %10607 = vmatpush3.msra.mxu1 %v12308_v44  ;;  %v10574_v24 = vpop.f32.mrf.mxu1 }
 0xdf2   :  { %10608 = vmatprep.subr.mxu1 %v14509_v5  ;;  %v2481_v33 = vmax.f32 %v2478_v4, 0.0  ;;  %v9669_v4 = vld [vmem:[%s14489_s6 + $0x40] sm:$0xff] }
 0xdf3   :  { %10609 = vmatpush3.msra.mxu1 %v12315_v45 }
 0xdf4   :  { %10611 = vmatmul.mubr.msk.f32.vlgmr.msra.gmra.mxu1 %vm229_vm1, %v12751_v8  ;;  %10624 = vmatprep.subr.mxu1 %v14509_v5 }
 0xdf5   :  { %10625 = vmatpush3.msra.mxu1 %v12319_v46  ;;  %10632 = vmatprep.mubr.msk.f32.mxu1 %vm11931_vm0, %v14509_v5 }
 0xdf6   :  { %10626 = vmatprep.subr.mxu1 %v14509_v5 }
 0xdf7   :  { %10627 = vmatpush3.msra.mxu1 %v12325_v47 }
 0xdf8   :  { %10628 = vmatprep.subr.mxu1 %v14509_v5 }
 0xdf9   :  { %10629 = vmatpush3.msra.mxu1 %v12331_v48 }
 0xdfa   :  { %10630 = vmatprep.subr.mxu1 %v14509_v5 }
 0xdfb   :  { %10631 = vmatpush3.msra.mxu1 %v12335_v49  ;;  %v12784_v49 = vld [vmem:[#allocation9 + $0x18] sm:$0xff] }
 0xdfc   :  { %10643 = vmatprep.subr.mxu1 %v14509_v5 }
 0xeac   :  { %v2551_v25 = vpop.f32.mrf.mxu1 }
 0xead   :  { %2556 = vrot.lane.b32.xlu0 %v2551_v25, %s11934_s14 }
 0xeae   :  { %v10585_v42 = vpop.f32.mrf.mxu1 }
 0xeb1   :  { %2880 = vrot.lane.b32.xlu0 %v12751_v8, %s11933_s30 }
 0xeb4   :  { %v2774_v43 = vpop.f32.mrf.mxu1 }
 0xeb5   :  { %v2775_v48 = vadd.f32 %v12367_v59, %v2774_v43  ;;  %v12795_v59 = vld [vmem:[#allocation9 + $0x8] sm:$0xff] }
 0xeb6   :  { %v10612_v44 = vpop.f32.mrf.mxu1 }
 0xf1f   :  { %v2557_v45 = vpop.permute.xlu0 %2556 }
 0xf20   :  { %v2559_v46 = vadd.f32 %v2557_v45, %v12735_v15 }
 0xf22   :  { %2561 = vrot.lane.b32.xlu1 %v2559_v46, %s11933_s30 }
 0xf23   :  { %v2881_v47 = vpop.permute.xlu0 %2880 }
 0xf24   :  { %10633 = vmatmul.mubr.msk.f32.vlgmr.msra.gmra.mxu1 %vm229_vm1, %v2881_v47 }
 0xf25   :  { %10644 = vmatpush3.msra.mxu1 %v12784_v49  ;;  %10651 = vmatprep.mubr.msk.f32.mxu1 %vm11931_vm0, %v14509_v5 }
 0xf26   :  { %2786 = vrot.lane.b32.xlu1 %v2775_v48, %s11935_s22  ;;  %10645 = vmatprep.subr.mxu1 %v14509_v5 }
 0xf27   :  { %10646 = vmatpush3.msra.mxu1 %v12791_v0 }
 0xf28   :  { %10647 = vmatprep.subr.mxu1 %v14509_v5 }
 0xf29   :  { %10648 = vmatpush3.msra.mxu1 %v12795_v59 }
 0xf2a   :  { %10649 = vmatprep.subr.mxu1 %v14509_v5 }
 0xf2b   :  { %10650 = vmatpush3.msra.mxu1 %v12799_v60 }
 0xf2c   :  { %10665 = vmatprep.subr.mxu1 %v14509_v5 }
 0xf94   :  { %v2562_v35 = vpop.permute.xlu1 %2561 }
 0xf95   :  { %10587 = vmatpush3.msra.mxu0 %v2562_v35 }
 0xf96   :  { %10589 = vmatmul.mubr.msk.f32.vlgmr.msra.gmra.mxu0 %vm460_vm2, %v12733_v14  ;;  %10591 = vmatprep.subr.mxu0 %v14509_v5 }
 0xf97   :  { %10592 = vmatpush3.msra.mxu0 %v12207_v18  ;;  %10599 = vmatprep.mubr.msk.f32.mxu0 %vm11931_vm0, %v14509_v5 }
 0xf98   :  { %10593 = vmatprep.subr.mxu0 %v14509_v5  ;;  %v2787_v20 = vpop.permute.xlu1 %2786 }
 0xf99   :  { %10594 = vmatpush3.msra.mxu0 %v12253_v26 }
 0xf9a   :  { %10595 = vmatprep.subr.mxu0 %v14509_v5 }
 0xf9b   :  { %10596 = vmatpush3.msra.mxu0 %v12260_v27 }
 0xf9c   :  { %10597 = vmatprep.subr.mxu0 %v14509_v5 }
 0xf9d   :  { %10598 = vmatpush3.msra.mxu0 %v12267_v28 }
 0xf9e   :  { %10600 = vmatmul.mubr.msk.f32.vlgmr.msra.gmra.mxu0 %vm229_vm1, %v2481_v33  ;;  %10613 = vmatprep.subr.mxu0 %v14509_v5  ;;  %v3090_v33 = vld [vmem:[#allocation6 + $0x18] sm:$0xff] }
 0xf9f   :  { %10614 = vmatpush3.msra.mxu0 %v12283_v38  ;;  %10621 = vmatprep.mubr.msk.f32.mxu0 %vm11931_vm0, %v14509_v5 }
 0xfa0   :  { %10615 = vmatprep.subr.mxu0 %v14509_v5  ;;  %10652 = vmatmul.mubr.msk.f32.vlgmr.msra.gmra.mxu1 %vm229_vm1, %v3090_v33 }
 0xfa1   :  { %10616 = vmatpush3.msra.mxu0 %v12352_v51  ;;  %10666 = vmatpush3.msra.mxu1 %v12408_v30 }
 0xfa2   :  { %10617 = vmatprep.subr.mxu0 %v14509_v5  ;;  %10673 = vmatprep.mubr.msk.f32.mxu1 %vm11931_vm0, %v14509_v5 }
 0xfa3   :  { %10618 = vmatpush3.msra.mxu0 %v12356_v52  ;;  %10667 = vmatprep.subr.mxu1 %v14509_v5 }
 0xfa4   :  { %10619 = vmatprep.subr.mxu0 %v14509_v5  ;;  %10668 = vmatpush3.msra.mxu1 %v12413_v31 }
 0xfa5   :  { %10620 = vmatpush3.msra.mxu0 %v12360_v53  ;;  %10669 = vmatprep.subr.mxu1 %v14509_v5 }
 0xfa6   :  { %10670 = vmatpush3.msra.mxu1 %v12441_v41  ;;  %v9670_v41 = vld [vmem:[%s14489_s6 + $0x48] sm:$0xff] }
 0xfa7   :  { %10671 = vmatprep.subr.mxu1 %v14509_v5 }
 0xfa8   :  { %10672 = vmatpush3.msra.mxu1 %v12448_v57  ;;  %v9671_v57 = vld [vmem:[%s14489_s6 + $0x50] sm:$0xff] }
 0xfa9   :  { %10692 = vmatprep.subr.mxu1 %v14509_v5 }
 0xfe4   :  { %v2950_v18 = vpop.f32.mrf.mxu1 }
 0xfe5   :  { %v2951_v26 = vadd.f32 %v12371_v63, %v2950_v18 }
 0xfe6   :  { %v10634_v27 = vpop.f32.mrf.mxu1 }
 0xfe7   :  { %2962 = vrot.lane.b32.xlu0 %v2951_v26, %s11935_s22 }
0x1056   :  { %v2630_v28 = vpop.f32.mrf.mxu0 }
0x1057   :  { %v2631_v29 = vadd.f32 %v12363_v54, %v2630_v28 }
0x1058   :  { %v10590_v38 = vpop.f32.mrf.mxu0 }
0x1059   :  { %v2634_v9 = vmax.f32 %v2631_v29, 0.0  ;;  %v2963_v25 = vpop.permute.xlu0 %2962 }
0x105b   :  { %10622 = vmatmul.mubr.msk.f32.vlgmr.msra.gmra.mxu0 %vm229_vm1, %v2634_v9 }
0x105c   :  { %10637 = vmatprep.mubr.msk.f32.mxu0 %vm460_vm2, %v9669_v4  ;;  %v14524_v4 = vld [vmem:[#allocation42_spill] sm:$0xff] }
0x105e   :  { %v2704_v51 = vpop.f32.mrf.mxu0 }
0x105f   :  { %v12832_v52 = vadd.f32 %v12378_v12, %v2704_v51 }
0x1060   :  { %v10601_v10 = vpop.f32.mrf.mxu0  ;;  %v3167_v51 = vpop.f32.mrf.mxu1 }
0x1061   :  { %v2778_v53 = vadd.f32 %v2775_v48, %v12832_v52  ;;  %10674 = vmatmul.mubr.msk.f32.vlgmr.msra.gmra.mxu1 %vm229_vm1, %v3167_v51 }
0x1062   :  { %v10653_v10 = vpop.f32.mrf.mxu1  ;;  %10694 = vmatprep.mubr.msk.f32.mxu1 %vm11931_vm0, %v14509_v5 }
0x1063   :  { %v9681_v11 = vmul.f32 -1.442695, %v2778_v53 }
0x1065   :  { %11424 = vpow2.f32 %v9681_v11 }
0x1072   :  { %v11425_v63 = vpop.eup %11424 }
0x1073   :  { %v2782_v50 = vadd.f32 1.0, %v11425_v63 }
0x1075   :  { %11426 = vrcp.f32 %v2782_v50 }
0x1082   :  { %v11427_v22 = vpop.eup %11426 }
0x1083   :  { %v2789_v13 = vmul.f32 %v11427_v22, %v2787_v20  ;;  %v2796_v46 = vsub.f32 1.0, %v11427_v22 }
0x1085   :  { %2791 = vrot.lane.b32.xlu1 %v2789_v13, %s11935_s22 }
0x10f7   :  { %v2792_v54 = vpop.permute.xlu1 %2791 }
0x10f8   :  { %v2794_v6 = vadd.f32 %v2792_v54, %v12832_v52 }
0x10fa   :  { %11428 = vtanh.f32 %v2794_v6 }
0x1107   :  { %v11429_v56 = vpop.eup %11428 }
0x1108   :  { %2798 = vrot.lane.b32.xlu1 %v11429_v56, %s11933_s30 }
0x111b   :  { %v2876_v12 = vpop.f32.mrf.mxu0 }
0x111c   :  { %v2877_v62 = vadd.f32 %v12389_v32, %v2876_v12 }
0x111d   :  { %v10623_v1 = vpop.f32.mrf.mxu0 }
0x111e   :  { %v2954_v14 = vadd.f32 %v2951_v26, %v2877_v62 }
0x1120   :  { %v9684_v17 = vmul.f32 -1.442695, %v2954_v14 }
0x1122   :  { %11430 = vpow2.f32 %v9684_v17 }
0x112f   :  { %v11431_v21 = vpop.eup %11430 }
0x1130   :  { %v2958_v23 = vadd.f32 1.0, %v11431_v21  ;;  %v14515_v21 = vld [vmem:[#allocation33_spill] sm:$0xff] }
0x1132   :  { %11432 = vrcp.f32 %v2958_v23 }
0x113f   :  { %v11433_v24 = vpop.eup %11432 }
0x1140   :  { %v2965_v42 = vmul.f32 %v11433_v24, %v2963_v25  ;;  %v2972_v30 = vsub.f32 1.0, %v11433_v24  ;;  %v2978_v27 = vmul.f32 %v11433_v24, %v12751_v8  ;;  %v14516_v25 = vld [vmem:[#allocation34_spill] sm:$0xff] }
0x1142   :  { %2967 = vrot.lane.b32.xlu0 %v2965_v42, %s11935_s22  ;;  %v14517_v42 = vld [vmem:[#allocation35_spill] sm:$0xff] }
0x1146   :  { %2802 = vrot.lane.b32.xlu0 %v12751_v8, %s11934_s14 }
0x117a   :  { %v2799_v45 = vpop.permute.xlu1 %2798 }
0x117b   :  { %v2801_v47 = vmul.f32 %v2799_v45, %v2796_v46  ;;  %v14519_v45 = vld [vmem:[#allocation37_spill] sm:$0xff] }
0x11b4   :  { %v2968_v43 = vpop.permute.xlu0 %2967 }
0x11b5   :  { %v2970_v44 = vadd.f32 %v2968_v43, %v2877_v62 }
0x11b7   :  { %11434 = vtanh.f32 %v2970_v44  ;;  %v14518_v44 = vld [vmem:[#allocation36_spill] sm:$0xff] }
0x11b8   :  { %v2803_v32 = vpop.permute.xlu0 %2802 }
0x11b9   :  { %v2805_v48 = vmul.f32 %v11427_v22, %v2803_v32  ;;  %v14520_v32 = vld [vmem:[#allocation38_spill] sm:$0xff] }
0x11bb   :  { %v2806_v35 = vadd.f32 %v2805_v48, %v2801_v47  ;;  %v14521_v47 = vld [vmem:[#allocation39_spill] sm:$0xff]  ;;  %v14522_v48 = vld [vmem:[#allocation40_spill] sm:$0xff] }
0x11bd   :  { %2981 = vrot.lane.b32.xlu0 %v2806_v35, %s11933_s30  ;;  %v14523_v35 = vld [vmem:[#allocation41_spill] sm:$0xff] }
0x11c4   :  { %v11435_v18 = vpop.eup %11434 }
0x11c5   :  { %2974 = vrot.lane.b32.xlu1 %v11435_v18, %s11933_s30  ;;  %v14525_v18 = vld [vmem:[#allocation43_spill] sm:$0xff] }
0x122f   :  { %v2982_v38 = vpop.permute.xlu0 %2981 }
0x1237   :  { %v2975_v26 = vpop.permute.xlu1 %2974 }
0x1238   :  { %v2977_v28 = vmul.f32 %v2975_v26, %v2972_v30 }
0x123a   :  { %v2979_v29 = vadd.f32 %v2978_v27, %v2977_v28  ;;  %v14526_v28 = vld [vmem:[#allocation44_spill] sm:$0xff] }
0x123c   :  { %v2984_v9 = vsel %vm229_vm1, %v2982_v38, %v2979_v29 }
0x123d   :  { %v2985_v31 = vsub.f32 %v2984_v9, %v12751_v8  ;;  %v9672_v8 = vld [vmem:[%s14489_s6 + $0x58] sm:$0xff] }
0x123f   :  { %10635 = vmatprep.subr.mxu0 %v2985_v31 }
0x1240   :  { %10636 = vmatpush3.msra.mxu0 %v2985_v31 }
0x1241   :  { %10638 = vmatmul.mubr.msk.f32.vlgmr.msra.gmra.mxu0 %vm460_vm2, %v9670_v41  ;;  %10654 = vmatprep.subr.mxu0 %v14509_v5  ;;  %v14527_v41 = vld [vmem:[#allocation45_spill] sm:$0xff] }
0x1242   :  { %10640 = vmatprep.mubr.msk.f32.mxu0 %vm460_vm2, %v9671_v57 }
0x1245   :  { %10641 = vmatmul.mubr.msk.f32.gmra.mxu0 %vm460_vm2, %v9672_v8 }
0x1246   :  { %10662 = vmatprep.mubr.msk.f32.mxu0 %vm11931_vm0, %v14509_v5 }
0x1301   :  { %v10639_v53 = vpop.f32.mrf.mxu0 }
0x1302   :  { %v12889_v13 = vadd.f32 %v10639_v53, %v12719_v3  ;;  %v12905_v3 = vpop.f32.mrf.mxu1 }
0x1303   :  { %v3064_v11 = vpop.f32.mrf.mxu0  ;;  %14510 = vst [vmem:[#allocation47_spill] sm:$0xff] %v12905_v3 }
0x1304   :  { %v12894_v54 = vadd.f32 %v3064_v11, %v12724_v2  ;;  %v10675_v2 = vpop.f32.mrf.mxu1 }
0x1305   :  { %v10642_v63 = vpop.f32.mrf.mxu0 }
0x1306   :  { %v12881_v50 = vadd.f32 %v10642_v63, %v12711_v61  ;;  %v3092_v61 = vld [vmem:[#allocation8 + $0x18] sm:$0xff] }
0x1307   :  { %v3074_v22 = vpop.f32.mrf.mxu0 }
0x1308   :  { %v12884_v20 = vadd.f32 %v3074_v22, %v12714_v7  ;;  %10655 = vmatpush3.msra.mxu0 %v12881_v50  ;;  %v12903_v7 = vld [vmem:[#allocation4 + $0x18] sm:$0xff] }
0x1309   :  { %10656 = vmatprep.subr.mxu0 %v14509_v5 }
0x130a   :  { %10657 = vmatpush3.msra.mxu0 %v12884_v20 }
0x130b   :  { %10658 = vmatprep.subr.mxu0 %v14509_v5 }
0x130c   :  { %10659 = vmatpush3.msra.mxu0 %v12889_v13 }
0x130d   :  { %10660 = vmatprep.subr.mxu0 %v14509_v5 }
0x130e   :  { %10661 = vmatpush3.msra.mxu0 %v12894_v54 }
0x130f   :  { %10663 = vmatmul.mubr.msk.f32.vlgmr.msra.gmra.mxu0 %vm229_vm1, %v3092_v61  ;;  %10676 = vmatprep.subr.mxu0 %v14509_v5 }
0x1310   :  { %10678 = vmatprep.mubr.msk.f32.mxu0 %vm11931_vm0, %v14509_v5  ;;  %10677 = vmatpush3.msra.mxu0 %v12905_v3 }
0x1311   :  { %10681 = vmatprep.subr.mxu0 %v14509_v5 }
0x1313   :  { %10679 = vmatmul.mubr.msk.f32.vlgmr.msra.gmra.mxu0 %vm460_vm2, %v12903_v7 }
0x1314   :  { %10682 = vmatpush3.msra.mxu0 %v12481_v34  ;;  %10689 = vmatprep.mubr.msk.f32.mxu0 %vm11931_vm0, %v14509_v5 }
0x1315   :  { %10683 = vmatprep.subr.mxu0 %v14509_v5 }
0x1316   :  { %10684 = vmatpush3.msra.mxu0 %v12490_v36  ;;  %v14511_v36 = vld [vmem:[#allocation29_spill] sm:$0xff] }
0x1317   :  { %10685 = vmatprep.subr.mxu0 %v14509_v5 }
0x1318   :  { %10686 = vmatpush3.msra.mxu0 %v12499_v37  ;;  %v14512_v37 = vld [vmem:[#allocation30_spill] sm:$0xff] }
0x1319   :  { %10687 = vmatprep.subr.mxu0 %v14509_v5 }
0x131a   :  { %10688 = vmatpush3.msra.mxu0 %v12506_v39  ;;  %v14513_v39 = vld [vmem:[#allocation31_spill] sm:$0xff] }
0x131b   :  { %10708 = vmatprep.subr.mxu0 %v14509_v5 }
0x13cf   :  { %v12921_v6 = vpop.f32.mrf.mxu0 }
0x13d0   :  { %10690 = vmatmul.mubr.msk.f32.vlgmr.msra.gmra.mxu0 %vm229_vm1, %v12921_v6 }
0x13d1   :  { %10709 = vmatpush3.msra.mxu0 %v12515_v40  ;;  %v10664_v34 = vpop.f32.mrf.mxu0  ;;  %10716 = vmatprep.mubr.msk.f32.mxu0 %vm11931_vm0, %v14509_v5  ;;  %v14514_v40 = vld [vmem:[#allocation32_spill] sm:$0xff] }
0x13d2   :  { %10710 = vmatprep.subr.mxu0 %v14509_v5 }
0x13d3   :  { %10711 = vmatpush3.msra.mxu0 %v12524_v55  ;;  %v3386_v55 = vpop.f32.mrf.mxu0 }
0x13d4   :  { %10712 = vmatprep.subr.mxu0 %v14509_v5  ;;  %v3387_v43 = vadd.f32 %v14517_v42, %v3386_v55  ;;  %v9689_v42 = vld [vmem:[%s14489_s6 + $0x60] sm:$0xff] }
0x13d5   :  { %10713 = vmatpush3.msra.mxu0 %v12533_v16  ;;  %v10680_v16 = vpop.f32.mrf.mxu0 }
0x13d6   :  { %10714 = vmatprep.subr.mxu0 %v14509_v5  ;;  %v3390_v46 = vmax.f32 %v3387_v43, 0.0  ;;  %v3999_v43 = vld [vmem:[#allocation6 + $0x20] sm:$0xff] }
0x13d7   :  { %10715 = vmatpush3.msra.mxu0 %v12540_v58 }
0x13d8   :  { %10717 = vmatmul.mubr.msk.f32.vlgmr.msra.gmra.mxu0 %vm229_vm1, %v12921_v6  ;;  %10730 = vmatprep.subr.mxu0 %v14509_v5 }
0x13d9   :  { %10731 = vmatpush3.msra.mxu0 %v14511_v36  ;;  %10738 = vmatprep.mubr.msk.f32.mxu0 %vm11931_vm0, %v14509_v5 }
0x13da   :  { %10732 = vmatprep.subr.mxu0 %v14509_v5 }
0x13db   :  { %10733 = vmatpush3.msra.mxu0 %v14512_v37 }
0x13dc   :  { %10734 = vmatprep.subr.mxu0 %v14509_v5 }
0x13dd   :  { %10735 = vmatpush3.msra.mxu0 %v14513_v39 }
0x13de   :  { %10736 = vmatprep.subr.mxu0 %v14509_v5 }
0x13df   :  { %10737 = vmatpush3.msra.mxu0 %v14514_v40 }
0x13e0   :  { %10749 = vmatprep.subr.mxu0 %v14509_v5 }
0x1490   :  { %v3460_v58 = vpop.f32.mrf.mxu0 }
0x1491   :  { %3465 = vrot.lane.b32.xlu1 %v3460_v58, %s11934_s14 }
0x1492   :  { %v10691_v56 = vpop.f32.mrf.mxu0 }
0x1495   :  { %3789 = vrot.lane.b32.xlu1 %v12921_v6, %s11933_s30 }
0x1498   :  { %v3683_v12 = vpop.f32.mrf.mxu0 }
0x1499   :  { %v3684_v23 = vadd.f32 %v14515_v21, %v3683_v12 }
0x149a   :  { %v10718_v62 = vpop.f32.mrf.mxu0 }
0x1503   :  { %v3466_v1 = vpop.permute.xlu1 %3465 }
0x1504   :  { %v3468_v14 = vadd.f32 %v3466_v1, %v12905_v3 }
0x1506   :  { %3470 = vrot.lane.b32.xlu0 %v3468_v14, %s11933_s30 }
0x1507   :  { %v3790_v17 = vpop.permute.xlu1 %3789 }
0x1508   :  { %10739 = vmatmul.mubr.msk.f32.vlgmr.msra.gmra.mxu0 %vm229_vm1, %v3790_v17 }
0x1509   :  { %10750 = vmatpush3.msra.mxu0 %v12784_v49  ;;  %10757 = vmatprep.mubr.msk.f32.mxu0 %vm11931_vm0, %v14509_v5 }
0x150a   :  { %3695 = vrot.lane.b32.xlu0 %v3684_v23, %s11935_s22  ;;  %10751 = vmatprep.subr.mxu0 %v14509_v5 }
0x150b   :  { %10752 = vmatpush3.msra.mxu0 %v12791_v0 }
0x150c   :  { %10753 = vmatprep.subr.mxu0 %v14509_v5 }
0x150d   :  { %10754 = vmatpush3.msra.mxu0 %v12795_v59 }
0x150e   :  { %10755 = vmatprep.subr.mxu0 %v14509_v5 }
0x150f   :  { %10756 = vmatpush3.msra.mxu0 %v12799_v60 }
0x1510   :  { %10771 = vmatprep.subr.mxu0 %v14509_v5  ;;  %10758 = vmatmul.mubr.msk.f32.vlgmr.msra.gmra.mxu0 %vm229_vm1, %v3999_v43 }
0x1511   :  { %10779 = vmatprep.mubr.msk.f32.mxu0 %vm11931_vm0, %v14509_v5 }
0x1578   :  { %v3471_v24 = vpop.permute.xlu0 %3470 }
0x1579   :  { %10693 = vmatpush3.msra.mxu1 %v3471_v24 }
0x157a   :  { %10695 = vmatmul.mubr.msk.f32.vlgmr.msra.gmra.mxu1 %vm460_vm2, %v12903_v7  ;;  %10697 = vmatprep.subr.mxu1 %v14509_v5 }
0x157b   :  { %10698 = vmatpush3.msra.mxu1 %v14516_v25  ;;  %10705 = vmatprep.mubr.msk.f32.mxu1 %vm11931_vm0, %v14509_v5 }
0x157c   :  { %10699 = vmatprep.subr.mxu1 %v14509_v5  ;;  %v3696_v22 = vpop.permute.xlu0 %3695 }
0x157d   :  { %10700 = vmatpush3.msra.mxu1 %v14518_v44  ;;  %v11568_v44 = vld [vmem:[%s14483_s19 + $0x18] sm:$0xff] }
0x157e   :  { %10701 = vmatprep.subr.mxu1 %v14509_v5  ;;  %10772 = vmatpush3.msra.mxu0 %v11568_v44  ;;  %v11587_v44 = vld [vmem:[%s14484_s5 + $0x10] sm:$0xff] }
0x157f   :  { %10702 = vmatpush3.msra.mxu1 %v14519_v45  ;;  %10773 = vmatprep.subr.mxu0 %v14509_v5 }
0x1580   :  { %10703 = vmatprep.subr.mxu1 %v14509_v5 }
0x1581   :  { %10704 = vmatpush3.msra.mxu1 %v14520_v32  ;;  %v11570_v32 = vld [vmem:[%s14483_s19 + $0x8] sm:$0xff] }
0x1582   :  { %10706 = vmatmul.mubr.msk.f32.vlgmr.msra.gmra.mxu1 %vm229_vm1, %v3390_v46  ;;  %10719 = vmatprep.subr.mxu1 %v14509_v5  ;;  %v11569_v46 = vld [vmem:[%s14483_s19 + $0x10] sm:$0xff] }
0x1583   :  { %10720 = vmatpush3.msra.mxu1 %v14521_v47  ;;  %10727 = vmatprep.mubr.msk.f32.mxu1 %vm11931_vm0, %v14509_v5  ;;  %v11571_v47 = vld [vmem:[%s14483_s19] sm:$0xff] }
0x1584   :  { %10721 = vmatprep.subr.mxu1 %v14509_v5  ;;  %10774 = vmatpush3.msra.mxu0 %v11569_v46 }
0x1585   :  { %10722 = vmatpush3.msra.mxu1 %v14522_v48  ;;  %10775 = vmatprep.subr.mxu0 %v14509_v5 }
0x1586   :  { %10723 = vmatprep.subr.mxu1 %v14509_v5  ;;  %10776 = vmatpush3.msra.mxu0 %v11570_v32  ;;  %v11589_v32 = vld [vmem:[%s14484_s5] sm:$0xff] }
0x1587   :  { %10724 = vmatpush3.msra.mxu1 %v14523_v35  ;;  %10777 = vmatprep.subr.mxu0 %v14509_v5 }
0x1588   :  { %10725 = vmatprep.subr.mxu1 %v14509_v5  ;;  %10778 = vmatpush3.msra.mxu0 %v11571_v47  ;;  %v13210_v47 = vld [vmem:[#allocation15 + $0x18] sm:$0xff] }
0x1589   :  { %10726 = vmatpush3.msra.mxu1 %v14524_v4  ;;  %10798 = vmatprep.subr.mxu0 %v14509_v5 }
0x15c8   :  { %v3859_v33 = vpop.f32.mrf.mxu0 }
0x15c9   :  { %v3860_v30 = vadd.f32 %v14525_v18, %v3859_v33 }
0x15ca   :  { %v10740_v26 = vpop.f32.mrf.mxu0 }
0x15cb   :  { %3871 = vrot.lane.b32.xlu1 %v3860_v30, %s11935_s22 }
0x163a   :  { %v3539_v27 = vpop.f32.mrf.mxu1 }
0x163b   :  { %v3540_v29 = vadd.f32 %v14526_v28, %v3539_v27  ;;  %v9690_v28 = vld [vmem:[%s14489_s6 + $0x68] sm:$0xff] }
0x163c   :  { %v10696_v38 = vpop.f32.mrf.mxu1 }
0x163d   :  { %v3543_v9 = vmax.f32 %v3540_v29, 0.0  ;;  %v3872_v12 = vpop.permute.xlu1 %3871  ;;  %v9691_v29 = vld [vmem:[%s14489_s6 + $0x70] sm:$0xff]  ;;  %v4076_v38 = vpop.f32.mrf.mxu0 }
0x163e   :  { %10780 = vmatmul.mubr.msk.f32.vlgmr.msra.gmra.mxu0 %vm229_vm1, %v4076_v38 }
0x163f   :  { %10728 = vmatmul.mubr.msk.f32.vlgmr.msra.gmra.mxu1 %vm229_vm1, %v3543_v9  ;;  %v10759_v9 = vpop.f32.mrf.mxu0  ;;  %10800 = vmatprep.mubr.msk.f32.mxu0 %vm11931_vm0, %v14509_v5 }
0x1640   :  { %10743 = vmatprep.mubr.msk.f32.mxu1 %vm460_vm2, %v9689_v42  ;;  %v13170_v42 = vld [vmem:[#allocation14] ss:$0 sm:$0xff] }
0x1642   :  { %v3613_v31 = vpop.f32.mrf.mxu1 }
0x1643   :  { %v12994_v57 = vadd.f32 %v14527_v41, %v3613_v31 }
0x1644   :  { %v10707_v8 = vpop.f32.mrf.mxu1 }
0x1645   :  { %14528 = vst [vmem:[#allocation29_spill] sm:$0xff] %v12994_v57  ;;  %v3687_v51 = vadd.f32 %v3684_v23, %v12994_v57 }
0x1647   :  { %v9701_v10 = vmul.f32 -1.442695, %v3687_v51 }
0x1649   :  { %11436 = vpow2.f32 %v9701_v10 }
0x1656   :  { %v11437_v53 = vpop.eup %11436 }
0x1657   :  { %v3691_v11 = vadd.f32 1.0, %v11437_v53 }
0x1659   :  { %11438 = vrcp.f32 %v3691_v11 }
0x1666   :  { %v11439_v63 = vpop.eup %11438 }
0x1667   :  { %v3698_v61 = vmul.f32 %v11439_v63, %v3696_v22  ;;  %v3705_v21 = vsub.f32 1.0, %v11439_v63  ;;  %v13084_v22 = vld [vmem:[%s14486_s1 + $0x18] sm:$0xff] }
0x1669   :  { %3700 = vrot.lane.b32.xlu0 %v3698_v61, %s11935_s22  ;;  %v13093_v61 = vld [vmem:[%s14486_s1 + $0x10] sm:$0xff] }
0x16db   :  { %v3701_v7 = vpop.permute.xlu0 %3700 }
0x16dc   :  { %v3703_v2 = vadd.f32 %v3701_v7, %v12994_v57  ;;  %v13100_v7 = vld [vmem:[%s14486_s1 + $0x8] sm:$0xff] }
0x16de   :  { %11440 = vtanh.f32 %v3703_v2  ;;  %v13107_v2 = vld [vmem:[%s14486_s1] sm:$0xff] }
0x16eb   :  { %v11441_v34 = vpop.eup %11440 }
0x16ec   :  { %3707 = vrot.lane.b32.xlu0 %v11441_v34, %s11933_s30 }
0x16ff   :  { %v3785_v36 = vpop.f32.mrf.mxu1 }
0x1700   :  { %v3786_v37 = vadd.f32 %v12666_v19, %v3785_v36  ;;  %v13118_v36 = vld [vmem:[%s14411_s11 + $0x18] sm:$0xff] }
0x1701   :  { %v10729_v39 = vpop.f32.mrf.mxu1 }
0x1702   :  { %v3863_v40 = vadd.f32 %v3860_v30, %v3786_v37  ;;  %v13127_v39 = vld [vmem:[%s14411_s11 + $0x10] sm:$0xff] }
0x1704   :  { %v9704_v55 = vmul.f32 -1.442695, %v3863_v40  ;;  %v13134_v40 = vld [vmem:[%s14411_s11 + $0x8] sm:$0xff] }
0x1706   :  { %11442 = vpow2.f32 %v9704_v55  ;;  %v13141_v55 = vld [vmem:[%s14411_s11] sm:$0xff] }
0x1713   :  { %v11443_v16 = vpop.eup %11442 }
0x1714   :  { %v3867_v58 = vadd.f32 1.0, %v11443_v16  ;;  %v13147_v16 = vld [vmem:[#allocation17 + $0x18] sm:$0xff] }
0x1716   :  { %11444 = vrcp.f32 %v3867_v58  ;;  %v13153_v58 = vld [vmem:[#allocation17 + $0x10] sm:$0xff] }
0x1723   :  { %v11445_v56 = vpop.eup %11444 }
0x1724   :  { %v3874_v62 = vmul.f32 %v11445_v56, %v3872_v12  ;;  %v3881_v48 = vsub.f32 1.0, %v11445_v56  ;;  %v3887_v4 = vmul.f32 %v11445_v56, %v12921_v6  ;;  %v13157_v56 = vld [vmem:[#allocation17 + $0x8] sm:$0xff]  ;;  %v13161_v12 = vld [vmem:[#allocation17] sm:$0xff] }
0x1726   :  { %3876 = vrot.lane.b32.xlu1 %v3874_v62, %s11935_s22 }
0x172a   :  { %3711 = vrot.lane.b32.xlu1 %v12921_v6, %s11934_s14 }
0x175e   :  { %v3708_v17 = vpop.permute.xlu0 %3707 }
0x175f   :  { %v3710_v23 = vmul.f32 %v3708_v17, %v3705_v21 }
0x1798   :  { %v3877_v1 = vpop.permute.xlu1 %3876 }
0x1799   :  { %v3879_v14 = vadd.f32 %v3877_v1, %v3786_v37 }
0x179b   :  { %11446 = vtanh.f32 %v3879_v14 }
0x179c   :  { %v3712_v19 = vpop.permute.xlu1 %3711 }
0x179d   :  { %v3714_v24 = vmul.f32 %v11439_v63, %v3712_v19 }
0x179f   :  { %v3715_v25 = vadd.f32 %v3714_v24, %v3710_v23 }
0x17a1   :  { %3890 = vrot.lane.b32.xlu1 %v3715_v25, %s11933_s30 }
0x17a8   :  { %v11447_v45 = vpop.eup %11446 }
0x17a9   :  { %3883 = vrot.lane.b32.xlu0 %v11447_v45, %s11933_s30  ;;  %v11588_v45 = vld [vmem:[%s14484_s5 + $0x8] sm:$0xff] }
0x1813   :  { %v3891_v30 = vpop.permute.xlu1 %3890 }
0x181b   :  { %v3884_v35 = vpop.permute.xlu0 %3883 }
0x181c   :  { %v3886_v33 = vmul.f32 %v3884_v35, %v3881_v48  ;;  %v13216_v48 = vld [vmem:[#allocation15 + $0x10] sm:$0xff]  ;;  %v13220_v35 = vld [vmem:[#allocation15 + $0x8] sm:$0xff] }
0x181e   :  { %v3888_v18 = vadd.f32 %v3887_v4, %v3886_v33  ;;  %v13224_v4 = vld [vmem:[#allocation15] sm:$0xff] }
0x1820   :  { %v3893_v26 = vsel %vm229_vm1, %v3891_v30, %v3888_v18  ;;  %v13227_v18 = vld [vmem:[#allocation18] ss:$0 sm:$0xff] }
0x1821   :  { %v3894_v27 = vsub.f32 %v3893_v26, %v12921_v6  ;;  %v9692_v6 = vld [vmem:[%s14489_s6 + $0x78] sm:$0xff] }
0x1823   :  { %10741 = vmatprep.subr.mxu1 %v3894_v27 }
0x1824   :  { %10742 = vmatpush3.msra.mxu1 %v3894_v27 }
0x1825   :  { %10744 = vmatmul.mubr.msk.f32.vlgmr.msra.gmra.mxu1 %vm460_vm2, %v9690_v28  ;;  %10760 = vmatprep.subr.mxu1 %v14509_v5  ;;  %v13231_v28 = vld [vmem:[#allocation12] ss:$0 sm:$0xff] }
0x1826   :  { %10746 = vmatprep.mubr.msk.f32.mxu1 %vm460_vm2, %v9691_v29 }
0x1829   :  { %10747 = vmatmul.mubr.msk.f32.gmra.mxu1 %vm460_vm2, %v9692_v6 }
0x182a   :  { %10768 = vmatprep.mubr.msk.f32.mxu1 %vm11931_vm0, %v14509_v5 }
0x18e5   :  { %v10745_v31 = vpop.f32.mrf.mxu1 }
0x18e6   :  { %v13059_v11 = vadd.f32 %v10745_v31, %v12889_v13  ;;  %v13075_v13 = vpop.f32.mrf.mxu0  ;;  %v11596_v31 = vld [vmem:[%s14412_s12] ss:$0 sm:$0xff] }
0x18e7   :  { %v3973_v41 = vpop.f32.mrf.mxu1  ;;  %14529 = vst [vmem:[#allocation30_spill] sm:$0xff] %v13075_v13 }
0x18e8   :  { %v13064_v63 = vadd.f32 %v3973_v41, %v12894_v54  ;;  %v10781_v54 = vpop.f32.mrf.mxu0 }
0x18e9   :  { %v10748_v8 = vpop.f32.mrf.mxu1 }
0x18ea   :  { %v13051_v51 = vadd.f32 %v10748_v8, %v12881_v50  ;;  %v4001_v50 = vld [vmem:[#allocation8 + $0x20] sm:$0xff] }
0x18eb   :  { %v3983_v10 = vpop.f32.mrf.mxu1 }
0x18ec   :  { %v13054_v53 = vadd.f32 %v3983_v10, %v12884_v20  ;;  %10761 = vmatpush3.msra.mxu1 %v13051_v51  ;;  %v13073_v20 = vld [vmem:[#allocation4 + $0x20] sm:$0xff] }
0x18ed   :  { %10762 = vmatprep.subr.mxu1 %v14509_v5 }
0x18ee   :  { %10763 = vmatpush3.msra.mxu1 %v13054_v53 }
0x18ef   :  { %10764 = vmatprep.subr.mxu1 %v14509_v5 }
0x18f0   :  { %10765 = vmatpush3.msra.mxu1 %v13059_v11 }
0x18f1   :  { %10766 = vmatprep.subr.mxu1 %v14509_v5 }
0x18f2   :  { %10767 = vmatpush3.msra.mxu1 %v13064_v63 }
0x18f3   :  { %10769 = vmatmul.mubr.msk.f32.vlgmr.msra.gmra.mxu1 %vm229_vm1, %v4001_v50  ;;  %10782 = vmatprep.subr.mxu1 %v14509_v5 }
0x18f4   :  { %10784 = vmatprep.mubr.msk.f32.mxu1 %vm11931_vm0, %v14509_v5  ;;  %10783 = vmatpush3.msra.mxu1 %v13075_v13 }
0x18f5   :  { %10787 = vmatprep.subr.mxu1 %v14509_v5 }
0x18f7   :  { %10785 = vmatmul.mubr.msk.f32.vlgmr.msra.gmra.mxu1 %vm460_vm2, %v13073_v20 }
0x18f8   :  { %10788 = vmatpush3.msra.mxu1 %v13084_v22  ;;  %10795 = vmatprep.mubr.msk.f32.mxu1 %vm11931_vm0, %v14509_v5 }
0x18f9   :  { %10789 = vmatprep.subr.mxu1 %v14509_v5 }
0x18fa   :  { %10790 = vmatpush3.msra.mxu1 %v13093_v61 }
0x18fb   :  { %10791 = vmatprep.subr.mxu1 %v14509_v5 }
0x18fc   :  { %10792 = vmatpush3.msra.mxu1 %v13100_v7 }
0x18fd   :  { %10793 = vmatprep.subr.mxu1 %v14509_v5 }
0x18fe   :  { %10794 = vmatpush3.msra.mxu1 %v13107_v2 }
0x18ff   :  { %10814 = vmatprep.subr.mxu1 %v14509_v5 }
0x19b3   :  { %v13111_v34 = vpop.f32.mrf.mxu1 }
0x19b4   :  { %10796 = vmatmul.mubr.msk.f32.vlgmr.msra.gmra.mxu1 %vm229_vm1, %v13111_v34 }
0x19b5   :  { %10815 = vmatpush3.msra.mxu1 %v13118_v36  ;;  %v10770_v37 = vpop.f32.mrf.mxu1  ;;  %10822 = vmatprep.mubr.msk.f32.mxu1 %vm11931_vm0, %v14509_v5 }
0x19b6   :  { %10816 = vmatprep.subr.mxu1 %v14509_v5 }
0x19b7   :  { %10817 = vmatpush3.msra.mxu1 %v13127_v39  ;;  %v4295_v62 = vpop.f32.mrf.mxu1 }
0x19b8   :  { %10818 = vmatprep.subr.mxu1 %v14509_v5 }
0x19b9   :  { %10819 = vmatpush3.msra.mxu1 %v13134_v40  ;;  %v10786_v1 = vpop.f32.mrf.mxu1 }
0x19ba   :  { %10820 = vmatprep.subr.mxu1 %v14509_v5 }
0x19bb   :  { %10821 = vmatpush3.msra.mxu1 %v13141_v55 }
0x19bc   :  { %10823 = vmatmul.mubr.msk.f32.vlgmr.msra.gmra.mxu1 %vm229_vm1, %v13111_v34  ;;  %10836 = vmatprep.subr.mxu1 %v14509_v5 }
0x19bd   :  { %10837 = vmatpush3.msra.mxu1 %v13147_v16  ;;  %10844 = vmatprep.mubr.msk.f32.mxu1 %vm11931_vm0, %v14509_v5 }
0x19be   :  { %10838 = vmatprep.subr.mxu1 %v14509_v5 }
0x19bf   :  { %10839 = vmatpush3.msra.mxu1 %v13153_v58 }
0x19c0   :  { %10840 = vmatprep.subr.mxu1 %v14509_v5 }
0x19c1   :  { %10841 = vmatpush3.msra.mxu1 %v13157_v56 }
0x19c2   :  { %10842 = vmatprep.subr.mxu1 %v14509_v5 }
0x19c3   :  { %10843 = vmatpush3.msra.mxu1 %v13161_v12 }
0x19c4   :  { %10855 = vmatprep.subr.mxu1 %v14509_v5 }
0x1a74   :  { %v4369_v14 = vpop.f32.mrf.mxu1 }
0x1a75   :  { %4374 = vrot.lane.b32.xlu0 %v4369_v14, %s11934_s14 }
0x1a76   :  { %v10797_v17 = vpop.f32.mrf.mxu1 }
0x1a79   :  { %4698 = vrot.lane.b32.xlu0 %v13111_v34, %s11933_s30 }
0x1a7c   :  { %v4592_v21 = vpop.f32.mrf.mxu1 }
0x1a7d   :  { %v4593_v43 = vadd.f32 %v13170_v42, %v4592_v21 }
0x1a7e   :  { %v10824_v19 = vpop.f32.mrf.mxu1 }
0x1ae7   :  { %v4375_v23 = vpop.permute.xlu0 %4374 }
0x1ae8   :  { %v4377_v24 = vadd.f32 %v4375_v23, %v13075_v13  ;;  %v13247_v23 = vld [vmem:[%s14416_s16] ss:$0 sm:$0xff] }
0x1aea   :  { %4379 = vrot.lane.b32.xlu1 %v4377_v24, %s11933_s30 }
0x1aeb   :  { %v4699_v25 = vpop.permute.xlu0 %4698 }
0x1aec   :  { %10845 = vmatmul.mubr.msk.f32.vlgmr.msra.gmra.mxu1 %vm229_vm1, %v4699_v25 }
0x1aed   :  { %10856 = vmatpush3.msra.mxu1 %v12784_v49  ;;  %10863 = vmatprep.mubr.msk.f32.mxu1 %vm11931_vm0, %v14509_v5 }
0x1aee   :  { %4604 = vrot.lane.b32.xlu1 %v4593_v43, %s11935_s22  ;;  %10857 = vmatprep.subr.mxu1 %v14509_v5 }
0x1aef   :  { %10858 = vmatpush3.msra.mxu1 %v12791_v0  ;;  %v11585_v0 = vld [vmem:[%s14484_s5 + $0x18] sm:$0xff] }
0x1af0   :  { %10859 = vmatprep.subr.mxu1 %v14509_v5 }
0x1af1   :  { %10860 = vmatpush3.msra.mxu1 %v12795_v59  ;;  %v11586_v59 = vld [vmem:[%s14487_s2] ss:$0 sm:$0xff] }
0x1af2   :  { %10861 = vmatprep.subr.mxu1 %v14509_v5 }
0x1af3   :  { %10862 = vmatpush3.msra.mxu1 %v12799_v60  ;;  %v4296_v60 = vadd.f32 %v11586_v59, %v4295_v62 }
0x1af4   :  { %10877 = vmatprep.subr.mxu1 %v14509_v5 }
0x1af5   :  { %v4299_v46 = vmax.f32 %v4296_v60, 0.0 }
0x1b5c   :  { %v4380_v49 = vpop.permute.xlu1 %4379 }
0x1b5d   :  { %10799 = vmatpush3.msra.mxu0 %v4380_v49 }
0x1b5e   :  { %10801 = vmatmul.mubr.msk.f32.vlgmr.msra.gmra.mxu0 %vm460_vm2, %v13073_v20  ;;  %10803 = vmatprep.subr.mxu0 %v14509_v5 }
0x1b5f   :  { %10804 = vmatpush3.msra.mxu0 %v11585_v0  ;;  %10811 = vmatprep.mubr.msk.f32.mxu0 %vm11931_vm0, %v14509_v5 }
0x1b60   :  { %10805 = vmatprep.subr.mxu0 %v14509_v5  ;;  %v4605_v62 = vpop.permute.xlu1 %4604 }
0x1b61   :  { %10806 = vmatpush3.msra.mxu0 %v11587_v44 }
0x1b62   :  { %10807 = vmatprep.subr.mxu0 %v14509_v5 }
0x1b63   :  { %10808 = vmatpush3.msra.mxu0 %v11588_v45 }
0x1b64   :  { %10809 = vmatprep.subr.mxu0 %v14509_v5 }
0x1b65   :  { %10810 = vmatpush3.msra.mxu0 %v11589_v32 }
0x1b66   :  { %10812 = vmatmul.mubr.msk.f32.vlgmr.msra.gmra.mxu0 %vm229_vm1, %v4299_v46  ;;  %10825 = vmatprep.subr.mxu0 %v14509_v5 }
0x1b67   :  { %10826 = vmatpush3.msra.mxu0 %v13210_v47  ;;  %10833 = vmatprep.mubr.msk.f32.mxu0 %vm11931_vm0, %v14509_v5 }
0x1b68   :  { %10827 = vmatprep.subr.mxu0 %v14509_v5 }
0x1b69   :  { %10828 = vmatpush3.msra.mxu0 %v13216_v48 }
0x1b6a   :  { %10829 = vmatprep.subr.mxu0 %v14509_v5 }
0x1b6b   :  { %10830 = vmatpush3.msra.mxu0 %v13220_v35 }
0x1b6c   :  { %10831 = vmatprep.subr.mxu0 %v14509_v5 }
0x1b6d   :  { %10832 = vmatpush3.msra.mxu0 %v13224_v4 }
0x1bac   :  { %v4768_v33 = vpop.f32.mrf.mxu1 }
0x1bad   :  { %v4769_v30 = vadd.f32 %v13227_v18, %v4768_v33 }
0x1bae   :  { %v10846_v26 = vpop.f32.mrf.mxu1 }
0x1baf   :  { %4780 = vrot.lane.b32.xlu0 %v4769_v30, %s11935_s22 }
0x1c1e   :  { %v4448_v27 = vpop.f32.mrf.mxu0 }
0x1c1f   :  { %v4449_v29 = vadd.f32 %v13231_v28, %v4448_v27 }
0x1c20   :  { %v10802_v6 = vpop.f32.mrf.mxu0 }
0x1c21   :  { %v4452_v38 = vmax.f32 %v4449_v29, 0.0  ;;  %v4781_v44 = vpop.permute.xlu0 %4780 }
0x1c23   :  { %10834 = vmatmul.mubr.msk.f32.vlgmr.msra.gmra.mxu0 %vm229_vm1, %v4452_v38  ;;  %v9709_v38 = vld [vmem:[%s14489_s6 + $0x80] sm:$0xff] }
0x1c24   :  { %10849 = vmatprep.mubr.msk.f32.mxu0 %vm460_vm2, %v9709_v38  ;;  %v13367_v38 = vld [vmem:[%s14411_s11 + $0x38] sm:$0xff] }
0x1c26   :  { %v4522_v9 = vpop.f32.mrf.mxu0 }
0x1c27   :  { %v13238_v41 = vadd.f32 %v11596_v31, %v4522_v9  ;;  %v4908_v9 = vld [vmem:[#allocation6 + $0x28] sm:$0xff] }
0x1c28   :  { %v10813_v8 = vpop.f32.mrf.mxu0  ;;  %10864 = vmatmul.mubr.msk.f32.vlgmr.msra.gmra.mxu1 %vm229_vm1, %v4908_v9  ;;  %v11598_v31 = vld [vmem:[%s14483_s19 + $0x38] sm:$0xff] }
0x1c29   :  { %14530 = vst [vmem:[#allocation31_spill] sm:$0xff] %v13238_v41  ;;  %v4596_v10 = vadd.f32 %v4593_v43, %v13238_v41  ;;  %10878 = vmatpush3.msra.mxu1 %v11598_v31  ;;  %10885 = vmatprep.mubr.msk.f32.mxu1 %vm11931_vm0, %v14509_v5  ;;  %v13376_v31 = vld [vmem:[%s14411_s11 + $0x30] sm:$0xff] }
0x1c2a   :  { %10879 = vmatprep.subr.mxu1 %v14509_v5 }
0x1c2b   :  { %v9721_v50 = vmul.f32 -1.442695, %v4596_v10  ;;  %v11599_v10 = vld [vmem:[%s14483_s19 + $0x30] sm:$0xff] }
0x1c2c   :  { %10880 = vmatpush3.msra.mxu1 %v11599_v10  ;;  %v13390_v10 = vld [vmem:[%s14411_s11 + $0x20] sm:$0xff] }
0x1c2d   :  { %11448 = vpow2.f32 %v9721_v50  ;;  %10881 = vmatprep.subr.mxu1 %v14509_v5  ;;  %v11600_v50 = vld [vmem:[%s14483_s19 + $0x28] sm:$0xff] }
0x1c2e   :  { %10882 = vmatpush3.msra.mxu1 %v11600_v50  ;;  %v13396_v50 = vld [vmem:[#allocation17 + $0x38] sm:$0xff] }
0x1c2f   :  { %10883 = vmatprep.subr.mxu1 %v14509_v5 }
0x1c3a   :  { %v11449_v20 = vpop.eup %11448 }
0x1c3b   :  { %v4600_v54 = vadd.f32 1.0, %v11449_v20  ;;  %v11601_v20 = vld [vmem:[%s14483_s19 + $0x20] sm:$0xff] }
0x1c3c   :  { %10884 = vmatpush3.msra.mxu1 %v11601_v20  ;;  %v13402_v20 = vld [vmem:[#allocation17 + $0x30] sm:$0xff] }
0x1c3d   :  { %11450 = vrcp.f32 %v4600_v54  ;;  %10904 = vmatprep.subr.mxu1 %v14509_v5 }
0x1c4a   :  { %v11451_v37 = vpop.eup %11450 }
0x1c4b   :  { %v4607_v1 = vmul.f32 %v11451_v37, %v4605_v62  ;;  %v4614_v26 = vsub.f32 1.0, %v11451_v37 }
0x1c4d   :  { %4609 = vrot.lane.b32.xlu1 %v4607_v1, %s11935_s22 }
0x1cbf   :  { %v4610_v14 = vpop.permute.xlu1 %4609 }
0x1cc0   :  { %v4612_v17 = vadd.f32 %v4610_v14, %v13238_v41 }
0x1cc2   :  { %11452 = vtanh.f32 %v4612_v17 }
0x1ccf   :  { %v11453_v21 = vpop.eup %11452 }
0x1cd0   :  { %4616 = vrot.lane.b32.xlu1 %v11453_v21, %s11933_s30 }
0x1ce3   :  { %v4694_v19 = vpop.f32.mrf.mxu0 }
0x1ce4   :  { %v4695_v24 = vadd.f32 %v13247_v23, %v4694_v19 }
0x1ce5   :  { %v10835_v25 = vpop.f32.mrf.mxu0 }
0x1ce6   :  { %v4772_v43 = vadd.f32 %v4769_v30, %v4695_v24  ;;  %v9711_v25 = vld [vmem:[%s14489_s6 + $0x90] sm:$0xff] }
0x1ce8   :  { %v9724_v49 = vmul.f32 -1.442695, %v4772_v43  ;;  %v4985_v43 = vpop.f32.mrf.mxu1 }
0x1ce9   :  { %10886 = vmatmul.mubr.msk.f32.vlgmr.msra.gmra.mxu1 %vm229_vm1, %v4985_v43  ;;  %v13419_v43 = vld [vmem:[#allocation14 + $0x1] ss:$0 sm:$0xff] }
0x1cea   :  { %11454 = vpow2.f32 %v9724_v49  ;;  %v10865_v49 = vpop.f32.mrf.mxu1  ;;  %10906 = vmatprep.mubr.msk.f32.mxu1 %vm11931_vm0, %v14509_v5 }
0x1cf7   :  { %v11455_v0 = vpop.eup %11454 }
0x1cf8   :  { %v4776_v59 = vadd.f32 1.0, %v11455_v0 }
0x1cfa   :  { %11456 = vrcp.f32 %v4776_v59 }
0x1d07   :  { %v11457_v60 = vpop.eup %11456 }
0x1d08   :  { %v4783_v45 = vmul.f32 %v11457_v60, %v4781_v44  ;;  %v4790_v54 = vsub.f32 1.0, %v11457_v60  ;;  %v4796_v62 = vmul.f32 %v11457_v60, %v13111_v34 }
0x1d0a   :  { %4785 = vrot.lane.b32.xlu0 %v4783_v45, %s11935_s22 }
0x1d0e   :  { %4620 = vrot.lane.b32.xlu0 %v13111_v34, %s11934_s14 }
0x1d42   :  { %v4617_v33 = vpop.permute.xlu1 %4616 }
0x1d43   :  { %v4619_v30 = vmul.f32 %v4617_v33, %v4614_v26  ;;  %v13333_v26 = vld [vmem:[%s14486_s1 + $0x38] sm:$0xff] }
0x1d7c   :  { %v4786_v46 = vpop.permute.xlu0 %4785 }
0x1d7d   :  { %v4788_v32 = vadd.f32 %v4786_v46, %v4695_v24  ;;  %v9710_v24 = vld [vmem:[%s14489_s6 + $0x88] sm:$0xff] }
0x1d7f   :  { %11458 = vtanh.f32 %v4788_v32 }
0x1d80   :  { %v4621_v27 = vpop.permute.xlu0 %4620 }
0x1d81   :  { %v4623_v29 = vmul.f32 %v11451_v37, %v4621_v27  ;;  %v13342_v27 = vld [vmem:[%s14486_s1 + $0x30] sm:$0xff] }
0x1d83   :  { %v4624_v6 = vadd.f32 %v4623_v29, %v4619_v30  ;;  %v13349_v30 = vld [vmem:[%s14486_s1 + $0x28] sm:$0xff]  ;;  %v13356_v29 = vld [vmem:[%s14486_s1 + $0x20] sm:$0xff] }
0x1d85   :  { %4799 = vrot.lane.b32.xlu0 %v4624_v6, %s11933_s30 }
0x1d8c   :  { %v11459_v8 = vpop.eup %11458 }
0x1d8d   :  { %4792 = vrot.lane.b32.xlu1 %v11459_v8, %s11933_s30  ;;  %v13383_v8 = vld [vmem:[%s14411_s11 + $0x28] sm:$0xff] }
0x1df7   :  { %v4800_v17 = vpop.permute.xlu0 %4799 }
0x1dff   :  { %v4793_v37 = vpop.permute.xlu1 %4792 }
0x1e00   :  { %v4795_v1 = vmul.f32 %v4793_v37, %v4790_v54  ;;  %v13406_v54 = vld [vmem:[#allocation17 + $0x28] sm:$0xff]  ;;  %v13410_v37 = vld [vmem:[#allocation17 + $0x20] sm:$0xff] }
0x1e02   :  { %v4797_v14 = vadd.f32 %v4796_v62, %v4795_v1 }
0x1e04   :  { %v4802_v21 = vsel %vm229_vm1, %v4800_v17, %v4797_v14 }
0x1e05   :  { %v4803_v19 = vsub.f32 %v4802_v21, %v13111_v34  ;;  %v9712_v34 = vld [vmem:[%s14489_s6 + $0x98] sm:$0xff] }
0x1e07   :  { %10847 = vmatprep.subr.mxu0 %v4803_v19 }
0x1e08   :  { %10848 = vmatpush3.msra.mxu0 %v4803_v19 }
0x1e09   :  { %10850 = vmatmul.mubr.msk.f32.vlgmr.msra.gmra.mxu0 %vm460_vm2, %v9710_v24  ;;  %10866 = vmatprep.subr.mxu0 %v14509_v5 }
0x1e0a   :  { %10852 = vmatprep.mubr.msk.f32.mxu0 %vm460_vm2, %v9711_v25 }
0x1e0d   :  { %10853 = vmatmul.mubr.msk.f32.gmra.mxu0 %vm460_vm2, %v9712_v34 }
0x1e0e   :  { %10874 = vmatprep.mubr.msk.f32.mxu0 %vm11931_vm0, %v14509_v5 }
0x1ec9   :  { %v10851_v0 = vpop.f32.mrf.mxu0 }
0x1eca   :  { %v13308_v32 = vadd.f32 %v10851_v0, %v13059_v11  ;;  %v13324_v11 = vpop.f32.mrf.mxu1 }
0x1ecb   :  { %v4882_v59 = vpop.f32.mrf.mxu0  ;;  %14531 = vst [vmem:[#allocation32_spill] sm:$0xff] %v13324_v11 }
0x1ecc   :  { %v13313_v33 = vadd.f32 %v4882_v59, %v13064_v63  ;;  %v10887_v63 = vpop.f32.mrf.mxu1  ;;  %v11615_v59 = vld [vmem:[%s14484_s5 + $0x38] sm:$0xff] }
0x1ecd   :  { %v10854_v60 = vpop.f32.mrf.mxu0 }
0x1ece   :  { %v13300_v44 = vadd.f32 %v10854_v60, %v13051_v51  ;;  %v4910_v51 = vld [vmem:[#allocation8 + $0x28] sm:$0xff]  ;;  %v11616_v60 = vld [vmem:[%s14487_s2 + $0x1] ss:$0 sm:$0xff] }
0x1ecf   :  { %v4892_v45 = vpop.f32.mrf.mxu0 }
0x1ed0   :  { %v13303_v46 = vadd.f32 %v4892_v45, %v13054_v53  ;;  %10867 = vmatpush3.msra.mxu0 %v13300_v44  ;;  %v13322_v53 = vld [vmem:[#allocation4 + $0x28] sm:$0xff] }
0x1ed1   :  { %10868 = vmatprep.subr.mxu0 %v14509_v5 }
0x1ed2   :  { %10869 = vmatpush3.msra.mxu0 %v13303_v46 }
0x1ed3   :  { %10870 = vmatprep.subr.mxu0 %v14509_v5 }
0x1ed4   :  { %10871 = vmatpush3.msra.mxu0 %v13308_v32 }
0x1ed5   :  { %10872 = vmatprep.subr.mxu0 %v14509_v5 }
0x1ed6   :  { %10873 = vmatpush3.msra.mxu0 %v13313_v33 }
0x1ed7   :  { %10875 = vmatmul.mubr.msk.f32.vlgmr.msra.gmra.mxu0 %vm229_vm1, %v4910_v51  ;;  %10888 = vmatprep.subr.mxu0 %v14509_v5  ;;  %v11617_v51 = vld [vmem:[%s14484_s5 + $0x30] sm:$0xff] }
0x1ed8   :  { %10890 = vmatprep.mubr.msk.f32.mxu0 %vm11931_vm0, %v14509_v5  ;;  %10889 = vmatpush3.msra.mxu0 %v13324_v11 }
0x1ed9   :  { %10893 = vmatprep.subr.mxu0 %v14509_v5 }
0x1edb   :  { %10891 = vmatmul.mubr.msk.f32.vlgmr.msra.gmra.mxu0 %vm460_vm2, %v13322_v53 }
0x1edc   :  { %10894 = vmatpush3.msra.mxu0 %v13333_v26  ;;  %10901 = vmatprep.mubr.msk.f32.mxu0 %vm11931_vm0, %v14509_v5 }
0x1edd   :  { %10895 = vmatprep.subr.mxu0 %v14509_v5 }
0x1ede   :  { %10896 = vmatpush3.msra.mxu0 %v13342_v27 }
0x1edf   :  { %10897 = vmatprep.subr.mxu0 %v14509_v5 }
0x1ee0   :  { %10898 = vmatpush3.msra.mxu0 %v13349_v30 }
0x1ee1   :  { %10899 = vmatprep.subr.mxu0 %v14509_v5 }
0x1ee2   :  { %10900 = vmatpush3.msra.mxu0 %v13356_v29 }
0x1ee3   :  { %10920 = vmatprep.subr.mxu0 %v14509_v5 }
0x1f97   :  { %v13360_v6 = vpop.f32.mrf.mxu0 }
0x1f98   :  { %10902 = vmatmul.mubr.msk.f32.vlgmr.msra.gmra.mxu0 %vm229_vm1, %v13360_v6 }
0x1f99   :  { %10921 = vmatpush3.msra.mxu0 %v13367_v38  ;;  %v10876_v9 = vpop.f32.mrf.mxu0  ;;  %10928 = vmatprep.mubr.msk.f32.mxu0 %vm11931_vm0, %v14509_v5 }
0x1f9a   :  { %10922 = vmatprep.subr.mxu0 %v14509_v5  ;;  %v11619_v9 = vld [vmem:[%s14484_s5 + $0x20] sm:$0xff] }
0x1f9b   :  { %10923 = vmatpush3.msra.mxu0 %v13376_v31  ;;  %v5204_v62 = vpop.f32.mrf.mxu0 }
0x1f9c   :  { %10924 = vmatprep.subr.mxu0 %v14509_v5  ;;  %v5205_v45 = vadd.f32 %v11616_v60, %v5204_v62  ;;  %v13451_v62 = vld [vmem:[#allocation15 + $0x38] sm:$0xff] }
0x1f9d   :  { %10925 = vmatpush3.msra.mxu0 %v13383_v8  ;;  %v10892_v1 = vpop.f32.mrf.mxu0 }
0x1f9e   :  { %10926 = vmatprep.subr.mxu0 %v14509_v5  ;;  %v5208_v63 = vmax.f32 %v5205_v45, 0.0  ;;  %v13457_v1 = vld [vmem:[#allocation15 + $0x30] sm:$0xff] }
0x1f9f   :  { %10927 = vmatpush3.msra.mxu0 %v13390_v10 }
0x1fa0   :  { %10929 = vmatmul.mubr.msk.f32.vlgmr.msra.gmra.mxu0 %vm229_vm1, %v13360_v6  ;;  %10942 = vmatprep.subr.mxu0 %v14509_v5 }
0x1fa1   :  { %10943 = vmatpush3.msra.mxu0 %v13396_v50  ;;  %10950 = vmatprep.mubr.msk.f32.mxu0 %vm11931_vm0, %v14509_v5 }
0x1fa2   :  { %10944 = vmatprep.subr.mxu0 %v14509_v5 }
0x1fa3   :  { %10945 = vmatpush3.msra.mxu0 %v13402_v20 }
0x1fa4   :  { %10946 = vmatprep.subr.mxu0 %v14509_v5 }
0x1fa5   :  { %10947 = vmatpush3.msra.mxu0 %v13406_v54 }
0x1fa6   :  { %10948 = vmatprep.subr.mxu0 %v14509_v5 }
0x1fa7   :  { %10949 = vmatpush3.msra.mxu0 %v13410_v37 }
0x1fa8   :  { %10961 = vmatprep.subr.mxu0 %v14509_v5 }
0x2058   :  { %v5278_v14 = vpop.f32.mrf.mxu0 }
0x2059   :  { %5283 = vrot.lane.b32.xlu1 %v5278_v14, %s11934_s14  ;;  %v13461_v14 = vld [vmem:[#allocation15 + $0x28] sm:$0xff] }
0x205a   :  { %v10903_v17 = vpop.f32.mrf.mxu0 }
0x205b   :  { %v13465_v17 = vld [vmem:[#allocation15 + $0x20] sm:$0xff] }
0x205d   :  { %5607 = vrot.lane.b32.xlu1 %v13360_v6, %s11933_s30 }
0x2060   :  { %v5501_v21 = vpop.f32.mrf.mxu0 }
0x2061   :  { %v5502_v49 = vadd.f32 %v13419_v43, %v5501_v21 }
0x2062   :  { %v10930_v19 = vpop.f32.mrf.mxu0 }
0x2063   :  { %v13468_v19 = vld [vmem:[#allocation18 + $0x1] ss:$0 sm:$0xff] }
0x20cb   :  { %v5284_v24 = vpop.permute.xlu1 %5283 }
0x20cc   :  { %v5286_v25 = vadd.f32 %v5284_v24, %v13324_v11 }
0x20ce   :  { %5288 = vrot.lane.b32.xlu0 %v5286_v25, %s11933_s30 }
0x20cf   :  { %v5608_v34 = vpop.permute.xlu1 %5607 }
0x20d0   :  { %10951 = vmatmul.mubr.msk.f32.vlgmr.msra.gmra.mxu0 %vm229_vm1, %v5608_v34 }
0x20d1   :  { %10969 = vmatprep.mubr.msk.f32.mxu0 %vm11931_vm0, %v14509_v5 }
0x20d2   :  { %5513 = vrot.lane.b32.xlu0 %v5502_v49, %s11935_s22 }
0x2140   :  { %v5289_v0 = vpop.permute.xlu0 %5288 }
0x2141   :  { %10905 = vmatpush3.msra.mxu1 %v5289_v0  ;;  %v13472_v0 = vld [vmem:[#allocation12 + $0x1] ss:$0 sm:$0xff] }
0x2142   :  { %10907 = vmatmul.mubr.msk.f32.vlgmr.msra.gmra.mxu1 %vm460_vm2, %v13322_v53  ;;  %10909 = vmatprep.subr.mxu1 %v14509_v5  ;;  %v11618_v53 = vld [vmem:[%s14484_s5 + $0x28] sm:$0xff] }
0x2143   :  { %10910 = vmatpush3.msra.mxu1 %v11615_v59  ;;  %10917 = vmatprep.mubr.msk.f32.mxu1 %vm11931_vm0, %v14509_v5 }
0x2144   :  { %10911 = vmatprep.subr.mxu1 %v14509_v5 }
0x2145   :  { %10912 = vmatpush3.msra.mxu1 %v11617_v51 }
0x2146   :  { %10913 = vmatprep.subr.mxu1 %v14509_v5 }
0x2147   :  { %10914 = vmatpush3.msra.mxu1 %v11618_v53  ;;  %v11626_v53 = vld [vmem:[%s14412_s12 + $0x1] ss:$0 sm:$0xff] }
0x2148   :  { %10915 = vmatprep.subr.mxu1 %v14509_v5 }
0x2149   :  { %10916 = vmatpush3.msra.mxu1 %v11619_v9 }
0x214a   :  { %10918 = vmatmul.mubr.msk.f32.vlgmr.msra.gmra.mxu1 %vm229_vm1, %v5208_v63  ;;  %10931 = vmatprep.subr.mxu1 %v14509_v5 }
0x214b   :  { %10932 = vmatpush3.msra.mxu1 %v13451_v62  ;;  %10939 = vmatprep.mubr.msk.f32.mxu1 %vm11931_vm0, %v14509_v5 }
0x214c   :  { %10933 = vmatprep.subr.mxu1 %v14509_v5 }
0x214d   :  { %10934 = vmatpush3.msra.mxu1 %v13457_v1 }
0x214e   :  { %10935 = vmatprep.subr.mxu1 %v14509_v5 }
0x214f   :  { %10936 = vmatpush3.msra.mxu1 %v13461_v14 }
0x2150   :  { %10937 = vmatprep.subr.mxu1 %v14509_v5 }
0x2151   :  { %10938 = vmatpush3.msra.mxu1 %v13465_v17 }
0x2190   :  { %v5677_v21 = vpop.f32.mrf.mxu0 }
0x2191   :  { %v5678_v24 = vadd.f32 %v13468_v19, %v5677_v21 }
0x2192   :  { %v10952_v25 = vpop.f32.mrf.mxu0 }
0x2193   :  { %5689 = vrot.lane.b32.xlu1 %v5678_v24, %s11935_s22 }
0x2202   :  { %v5357_v34 = vpop.f32.mrf.mxu1 }
0x2203   :  { %v5358_v59 = vadd.f32 %v13472_v0, %v5357_v34 }
0x2204   :  { %v10908_v60 = vpop.f32.mrf.mxu1 }
0x2205   :  { %v5361_v45 = vmax.f32 %v5358_v59, 0.0  ;;  %v5514_v60 = vpop.permute.xlu0 %5513 }
0x2207   :  { %10940 = vmatmul.mubr.msk.f32.vlgmr.msra.gmra.mxu1 %vm229_vm1, %v5361_v45 }
0x220a   :  { %v5431_v51 = vpop.f32.mrf.mxu1 }
0x220b   :  { %v13479_v63 = vadd.f32 %v11626_v53, %v5431_v51 }
0x220c   :  { %v10919_v9 = vpop.f32.mrf.mxu1 }
0x220d   :  { %14532 = vst [vmem:[#allocation33_spill] sm:$0xff] %v13479_v63  ;;  %v5505_v21 = vadd.f32 %v5502_v49, %v13479_v63  ;;  %v13488_v49 = vld [vmem:[%s14416_s16 + $0x1] ss:$0 sm:$0xff] }
0x220f   :  { %v9741_v25 = vmul.f32 -1.442695, %v5505_v21 }
0x2211   :  { %11460 = vpow2.f32 %v9741_v25 }
0x221e   :  { %v11461_v11 = vpop.eup %11460 }
0x221f   :  { %v5509_v41 = vadd.f32 1.0, %v11461_v11 }
0x2221   :  { %11462 = vrcp.f32 %v5509_v41 }
0x222e   :  { %v11463_v34 = vpop.eup %11462 }
0x222f   :  { %v5516_v59 = vmul.f32 %v11463_v34, %v5514_v60  ;;  %v5523_v3 = vsub.f32 1.0, %v11463_v34 }
0x2231   :  { %5518 = vrot.lane.b32.xlu0 %v5516_v59, %s11935_s22 }
0x22a3   :  { %v5519_v45 = vpop.permute.xlu0 %5518 }
0x22a4   :  { %v5521_v13 = vadd.f32 %v5519_v45, %v13479_v63 }
0x22a6   :  { %11464 = vtanh.f32 %v5521_v13  ;;  %v5690_v13 = vpop.permute.xlu1 %5689 }
0x22b3   :  { %v11465_v57 = vpop.eup %11464 }
0x22b4   :  { %5525 = vrot.lane.b32.xlu0 %v11465_v57, %s11933_s30 }
0x22c7   :  { %v5603_v51 = vpop.f32.mrf.mxu1 }
0x22c8   :  { %v5604_v41 = vadd.f32 %v13488_v49, %v5603_v51 }
0x22c9   :  { %v10941_v11 = vpop.f32.mrf.mxu1 }
0x22ca   :  { %v5681_v53 = vadd.f32 %v5678_v24, %v5604_v41 }
0x22cc   :  { %v9744_v9 = vmul.f32 -1.442695, %v5681_v53 }
0x22ce   :  { %11466 = vpow2.f32 %v9744_v9  ;;  %v9729_v9 = vld [vmem:[%s14489_s6 + $0xa0] sm:$0xff] }
0x22cf   :  { %10955 = vmatprep.mubr.msk.f32.mxu1 %vm460_vm2, %v9729_v9 }
0x22db   :  { %v11467_v21 = vpop.eup %11466 }
0x22dc   :  { %v5685_v25 = vadd.f32 1.0, %v11467_v21 }
0x22de   :  { %11468 = vrcp.f32 %v5685_v25 }
0x22eb   :  { %v11469_v60 = vpop.eup %11468 }
0x22ec   :  { %v5692_v59 = vmul.f32 %v11469_v60, %v5690_v13  ;;  %v5699_v25 = vsub.f32 1.0, %v11469_v60  ;;  %v5705_v13 = vmul.f32 %v11469_v60, %v13360_v6 }
0x22ee   :  { %5694 = vrot.lane.b32.xlu1 %v5692_v59, %s11935_s22 }
0x22f2   :  { %5529 = vrot.lane.b32.xlu1 %v13360_v6, %s11934_s14 }
0x2326   :  { %v5526_v63 = vpop.permute.xlu0 %5525 }
0x2327   :  { %v5528_v24 = vmul.f32 %v5526_v63, %v5523_v3 }
0x2360   :  { %v5695_v57 = vpop.permute.xlu1 %5694 }
0x2361   :  { %v5697_v45 = vadd.f32 %v5695_v57, %v5604_v41 }
0x2363   :  { %11470 = vtanh.f32 %v5697_v45  ;;  %v9730_v45 = vld [vmem:[%s14489_s6 + $0xa8] sm:$0xff] }
0x2364   :  { %v5530_v51 = vpop.permute.xlu1 %5529 }
0x2365   :  { %v5532_v11 = vmul.f32 %v11463_v34, %v5530_v51  ;;  %v9731_v51 = vld [vmem:[%s14489_s6 + $0xb0] sm:$0xff] }
0x2367   :  { %v5533_v53 = vadd.f32 %v5532_v11, %v5528_v24 }
0x2369   :  { %5708 = vrot.lane.b32.xlu1 %v5533_v53, %s11933_s30 }
0x2370   :  { %v11471_v21 = vpop.eup %11470 }
0x2371   :  { %5701 = vrot.lane.b32.xlu0 %v11471_v21, %s11933_s30 }
0x23db   :  { %v5709_v3 = vpop.permute.xlu1 %5708 }
0x23e3   :  { %v5702_v41 = vpop.permute.xlu0 %5701 }
0x23e4   :  { %v5704_v59 = vmul.f32 %v5702_v41, %v5699_v25 }
0x23e6   :  { %v5706_v57 = vadd.f32 %v5705_v13, %v5704_v59  ;;  %v11629_v59 = vld [vmem:[#allocation4] sm:$0xff] }
0x23e8   :  { %v5711_v63 = vsel %vm229_vm1, %v5709_v3, %v5706_v57 }
0x23e9   :  { %v5712_v34 = vsub.f32 %v5711_v63, %v13360_v6  ;;  %v9732_v6 = vld [vmem:[%s14489_s6 + $0xb8] sm:$0xff] }
0x23eb   :  { %10953 = vmatprep.subr.mxu1 %v5712_v34 }
0x23ec   :  { %10954 = vmatpush3.msra.mxu1 %v5712_v34 }
0x23ed   :  { %10956 = vmatmul.mubr.msk.f32.vlgmr.msra.gmra.mxu1 %vm460_vm2, %v9730_v45  ;;  %10972 = vmatprep.subr.mxu1 %v14509_v5 }
0x23ee   :  { %10958 = vmatprep.mubr.msk.f32.mxu1 %vm460_vm2, %v9731_v51  ;;  %10973 = vmatpush3.msra.mxu1 %v13084_v22 }
0x23ef   :  { %10974 = vmatprep.subr.mxu1 %v14509_v5 }
0x23f0   :  { %10975 = vmatpush3.msra.mxu1 %v13093_v61 }
0x23f1   :  { %10959 = vmatmul.mubr.msk.f32.gmra.mxu1 %vm460_vm2, %v9732_v6  ;;  %10976 = vmatprep.subr.mxu1 %v14509_v5 }
0x23f2   :  { %10977 = vmatpush3.msra.mxu1 %v13100_v7  ;;  %10980 = vmatprep.mubr.msk.f32.mxu1 %vm11931_vm0, %v14509_v5 }
0x23f3   :  { %10978 = vmatprep.subr.mxu1 %v14509_v5 }
0x23f4   :  { %10979 = vmatpush3.msra.mxu1 %v13107_v2 }
0x23f5   :  { %10988 = vmatprep.subr.mxu1 %v14509_v5 }
0x24ad   :  { %v10957_v22 = vpop.f32.mrf.mxu1 }
0x24ae   :  { %v13535_v7 = vadd.f32 %v10957_v22, %v13308_v32 }
0x24af   :  { %v5791_v60 = vpop.f32.mrf.mxu1 }
0x24b0   :  { %v13540_v2 = vadd.f32 %v5791_v60, %v13313_v33 }
0x24b1   :  { %v10960_v24 = vpop.f32.mrf.mxu1 }
0x24b2   :  { %v13527_v61 = vadd.f32 %v10960_v24, %v13300_v44  ;;  %v11628_v44 = vld [vmem:[#allocation8] sm:$0xff] }
0x24b3   :  { %v5801_v11 = vpop.f32.mrf.mxu1 }
0x24b4   :  { %v13530_v53 = vadd.f32 %v5801_v11, %v13303_v46  ;;  %10962 = vmatpush3.msra.mxu0 %v13527_v61 }
0x24b5   :  { %10963 = vmatprep.subr.mxu0 %v14509_v5 }
0x24b6   :  { %10964 = vmatpush3.msra.mxu0 %v13530_v53 }
0x24b7   :  { %10965 = vmatprep.subr.mxu0 %v14509_v5 }
0x24b8   :  { %10966 = vmatpush3.msra.mxu0 %v13535_v7 }
0x24b9   :  { %10967 = vmatprep.subr.mxu0 %v14509_v5 }
0x24ba   :  { %10968 = vmatpush3.msra.mxu0 %v13540_v2 }
0x24bb   :  { %10970 = vmatmul.mubr.msk.f32.vlgmr.msra.gmra.mxu0 %vm229_vm1, %v11628_v44  ;;  %10983 = vmatprep.subr.mxu0 %v14509_v5 }
0x24bc   :  { %10985 = vmatprep.mubr.msk.f32.mxu0 %vm11931_vm0, %v14509_v5 }
0x257b   :  { %v13549_v46 = vpop.f32.mrf.mxu0 }
0x257c   :  { %10981 = vmatmul.mubr.msk.f32.vlgmr.msra.gmra.mxu1 %vm229_vm1, %v13549_v46 }
0x257d   :  { %10989 = vmatpush3.msra.mxu1 %v13118_v36  ;;  %v10971_v32 = vpop.f32.mrf.mxu0  ;;  %10996 = vmatprep.mubr.msk.f32.mxu1 %vm11931_vm0, %v14509_v5 }
0x257e   :  { %10990 = vmatprep.subr.mxu1 %v14509_v5 }
0x257f   :  { %10991 = vmatpush3.msra.mxu1 %v13127_v39 }
0x2580   :  { %10992 = vmatprep.subr.mxu1 %v14509_v5 }
0x2581   :  { %10993 = vmatpush3.msra.mxu1 %v13134_v40 }
0x2582   :  { %10994 = vmatprep.subr.mxu1 %v14509_v5 }
0x2583   :  { %10995 = vmatpush3.msra.mxu1 %v13141_v55 }
0x2584   :  { %10997 = vmatmul.mubr.msk.f32.vlgmr.msra.gmra.mxu1 %vm229_vm1, %v13549_v46  ;;  %11010 = vmatprep.subr.mxu1 %v14509_v5 }
0x2585   :  { %11011 = vmatpush3.msra.mxu1 %v13147_v16  ;;  %11018 = vmatprep.mubr.msk.f32.mxu1 %vm11931_vm0, %v14509_v5 }
0x2586   :  { %11012 = vmatprep.subr.mxu1 %v14509_v5 }
0x2587   :  { %11013 = vmatpush3.msra.mxu1 %v13153_v58  ;;  %v14533_v58 = vld [vmem:[#allocation26_spill] sm:$0xff] }
0x2588   :  { %11014 = vmatprep.subr.mxu1 %v14509_v5 }
0x2589   :  { %11015 = vmatpush3.msra.mxu1 %v13157_v56 }
0x258a   :  { %11016 = vmatprep.subr.mxu1 %v14509_v5 }
0x258b   :  { %11017 = vmatpush3.msra.mxu1 %v13161_v12  ;;  %v14534_v12 = vld [vmem:[#allocation27_spill] sm:$0xff] }
0x258c   :  { %11040 = vmatprep.subr.mxu1 %v14509_v5 }
0x263c   :  { %v5953_v36 = vpop.f32.mrf.mxu1 }
0x263d   :  { %5958 = vrot.lane.b32.xlu0 %v5953_v36, %s11934_s14 }
0x263e   :  { %v10982_v39 = vpop.f32.mrf.mxu1 }
0x2641   :  { %6209 = vrot.lane.b32.xlu0 %v13549_v46, %s11933_s30 }
0x2644   :  { %v6103_v40 = vpop.f32.mrf.mxu1 }
0x2645   :  { %v6104_v9 = vadd.f32 %v13170_v42, %v6103_v40 }
0x2646   :  { %v10998_v55 = vpop.f32.mrf.mxu1 }
0x2647   :  { %v6107_v42 = vadd.f32 %v6104_v9, %v14534_v12 }
0x2649   :  { %v9753_v21 = vmul.f32 -1.442695, %v6107_v42 }
0x264b   :  { %11472 = vpow2.f32 %v9753_v21 }
0x2658   :  { %v11473_v25 = vpop.eup %11472 }
0x2659   :  { %v6111_v41 = vadd.f32 1.0, %v11473_v25 }
0x265b   :  { %11474 = vrcp.f32 %v6111_v41 }
0x2668   :  { %v11475_v57 = vpop.eup %11474 }
0x26af   :  { %v5959_v16 = vpop.permute.xlu0 %5958 }
0x26b0   :  { %v5961_v33 = vadd.f32 %v5959_v16, %v14533_v58 }
0x26b2   :  { %5963 = vrot.lane.b32.xlu1 %v5961_v33, %s11933_s30 }
0x26b3   :  { %v6210_v56 = vpop.permute.xlu0 %6209 }
0x26b4   :  { %11019 = vmatmul.mubr.msk.f32.vlgmr.msra.gmra.mxu1 %vm229_vm1, %v6210_v56 }
0x26b5   :  { %11041 = vmatpush3.msra.mxu1 %v13333_v26  ;;  %11048 = vmatprep.mubr.msk.f32.mxu1 %vm11931_vm0, %v14509_v5 }
0x26b6   :  { %6115 = vrot.lane.b32.xlu1 %v6104_v9, %s11935_s22  ;;  %11042 = vmatprep.subr.mxu1 %v14509_v5  ;;  %v6125_v9 = vsub.f32 1.0, %v11475_v57 }
0x26b7   :  { %11043 = vmatpush3.msra.mxu1 %v13342_v27 }
0x26b8   :  { %11044 = vmatprep.subr.mxu1 %v14509_v5 }
0x26b9   :  { %11045 = vmatpush3.msra.mxu1 %v13349_v30 }
0x26ba   :  { %11046 = vmatprep.subr.mxu1 %v14509_v5 }
0x26bb   :  { %11047 = vmatpush3.msra.mxu1 %v13356_v29 }
0x26bc   :  { %11056 = vmatprep.subr.mxu1 %v14509_v5 }
0x2724   :  { %v5964_v13 = vpop.permute.xlu1 %5963 }
0x2725   :  { %10984 = vmatpush3.msra.mxu0 %v5964_v13 }
0x2726   :  { %10986 = vmatmul.mubr.msk.f32.vlgmr.msra.gmra.mxu0 %vm460_vm2, %v11629_v59  ;;  %10999 = vmatprep.subr.mxu0 %v14509_v5 }
0x2727   :  { %11000 = vmatpush3.msra.mxu0 %v13210_v47  ;;  %11007 = vmatprep.mubr.msk.f32.mxu0 %vm11931_vm0, %v14509_v5 }
0x2728   :  { %v6116_v3 = vpop.permute.xlu1 %6115  ;;  %11001 = vmatprep.subr.mxu0 %v14509_v5 }
0x2729   :  { %v6118_v63 = vmul.f32 %v11475_v57, %v6116_v3  ;;  %11002 = vmatpush3.msra.mxu0 %v13216_v48 }
0x272a   :  { %11003 = vmatprep.subr.mxu0 %v14509_v5 }
0x272b   :  { %6120 = vrot.lane.b32.xlu1 %v6118_v63, %s11935_s22  ;;  %11004 = vmatpush3.msra.mxu0 %v13220_v35 }
0x272c   :  { %11005 = vmatprep.subr.mxu0 %v14509_v5 }
0x272d   :  { %11006 = vmatpush3.msra.mxu0 %v13224_v4  ;;  %v11630_v4 = vld [vmem:[%s14489_s6] sm:$0xff] }
0x2774   :  { %v6279_v47 = vpop.f32.mrf.mxu1 }
0x2775   :  { %v6280_v34 = vadd.f32 %v13227_v18, %v6279_v47 }
0x2776   :  { %v11020_v45 = vpop.f32.mrf.mxu1 }
0x2777   :  { %6291 = vrot.lane.b32.xlu0 %v6280_v34, %s11935_s22 }
0x279d   :  { %v6121_v51 = vpop.permute.xlu1 %6120 }
0x279e   :  { %v6123_v6 = vadd.f32 %v6121_v51, %v14534_v12  ;;  %v11632_v51 = vld [vmem:[%s14489_s6 + $0x10] sm:$0xff] }
0x27a0   :  { %11476 = vtanh.f32 %v6123_v6 }
0x27ad   :  { %v11477_v48 = vpop.eup %11476 }
0x27ae   :  { %6127 = vrot.lane.b32.xlu1 %v11477_v48, %s11933_s30 }
0x27e6   :  { %v6032_v22 = vpop.f32.mrf.mxu0 }
0x27e7   :  { %v6033_v35 = vadd.f32 %v13231_v28, %v6032_v22 }
0x27e8   :  { %v10987_v60 = vpop.f32.mrf.mxu0 }
0x27e9   :  { %v6036_v24 = vmax.f32 %v6033_v35, 0.0  ;;  %v6292_v55 = vpop.permute.xlu0 %6291 }
0x27eb   :  { %11008 = vmatmul.mubr.msk.f32.vlgmr.msra.gmra.mxu0 %vm229_vm1, %v6036_v24 }
0x27ec   :  { %11023 = vmatprep.mubr.msk.f32.mxu0 %vm460_vm2, %v11630_v4 }
0x2820   :  { %v6128_v56 = vpop.permute.xlu1 %6127 }
0x2821   :  { %v6130_v12 = vmul.f32 %v6128_v56, %v6125_v9 }
0x28ab   :  { %v6205_v18 = vpop.f32.mrf.mxu0 }
0x28ac   :  { %v6206_v11 = vadd.f32 %v13247_v23, %v6205_v18 }
0x28ad   :  { %v11009_v44 = vpop.f32.mrf.mxu0 }
0x28ae   :  { %v6283_v32 = vadd.f32 %v6280_v34, %v6206_v11  ;;  %v13716_v44 = vld [vmem:[%s14486_s1 + $0x8] sm:$0xff] }
0x28b0   :  { %v9756_v36 = vmul.f32 -1.442695, %v6283_v32  ;;  %v13723_v32 = vld [vmem:[%s14486_s1] sm:$0xff] }
0x28b2   :  { %11478 = vpow2.f32 %v9756_v36  ;;  %v14536_v36 = vld [vmem:[#allocation46_spill] sm:$0xff] }
0x28bf   :  { %v11479_v39 = vpop.eup %11478 }
0x28c0   :  { %v6287_v40 = vadd.f32 1.0, %v11479_v39 }
0x28c2   :  { %11480 = vrcp.f32 %v6287_v40 }
0x28cf   :  { %v11481_v28 = vpop.eup %11480 }
0x28d0   :  { %v6294_v16 = vmul.f32 %v11481_v28, %v6292_v55  ;;  %v6301_v41 = vsub.f32 1.0, %v11481_v28  ;;  %v6307_v59 = vmul.f32 %v11481_v28, %v13549_v46 }
0x28d2   :  { %6296 = vrot.lane.b32.xlu0 %v6294_v16, %s11935_s22 }
0x28d6   :  { %6131 = vrot.lane.b32.xlu0 %v13549_v46, %s11934_s14 }
0x2944   :  { %v6297_v58 = vpop.permute.xlu0 %6296 }
0x2945   :  { %v6299_v33 = vadd.f32 %v6297_v58, %v6206_v11  ;;  %v11639_v58 = vld [vmem:[#allocation4 + $0x8] sm:$0xff] }
0x2947   :  { %11482 = vtanh.f32 %v6299_v33 }
0x2948   :  { %v6132_v23 = vpop.permute.xlu0 %6131 }
0x2949   :  { %v6134_v42 = vmul.f32 %v11475_v57, %v6132_v23  ;;  %v11631_v57 = vld [vmem:[%s14489_s6 + $0x8] sm:$0xff] }
0x294b   :  { %v6135_v21 = vadd.f32 %v6134_v42, %v6130_v12 }
0x294d   :  { %6310 = vrot.lane.b32.xlu0 %v6135_v21, %s11933_s30 }
0x2954   :  { %v11483_v25 = vpop.eup %11482 }
0x2955   :  { %6303 = vrot.lane.b32.xlu1 %v11483_v25, %s11933_s30 }
0x29bf   :  { %v6311_v47 = vpop.permute.xlu0 %6310 }
0x29c7   :  { %v6304_v13 = vpop.permute.xlu1 %6303 }
0x29c8   :  { %v6306_v3 = vmul.f32 %v6304_v13, %v6301_v41 }
0x29ca   :  { %v6308_v63 = vadd.f32 %v6307_v59, %v6306_v3 }
0x29cc   :  { %v6313_v34 = vsel %vm229_vm1, %v6311_v47, %v6308_v63 }
0x29cd   :  { %v6314_v45 = vsub.f32 %v6313_v34, %v13549_v46  ;;  %v11633_v46 = vld [vmem:[%s14489_s6 + $0x18] sm:$0xff] }
0x29cf   :  { %11021 = vmatprep.subr.mxu0 %v6314_v45 }
0x29d0   :  { %11022 = vmatpush3.msra.mxu0 %v6314_v45 }
0x29d1   :  { %11024 = vmatmul.mubr.msk.f32.vlgmr.msra.gmra.mxu0 %vm460_vm2, %v11631_v57  ;;  %11029 = vmatprep.subr.mxu0 %v14509_v5 }
0x29d2   :  { %11026 = vmatprep.mubr.msk.f32.mxu0 %vm460_vm2, %v11632_v51 }
0x29d5   :  { %11027 = vmatmul.mubr.msk.f32.gmra.mxu0 %vm460_vm2, %v11633_v46 }
0x29d6   :  { %11037 = vmatprep.mubr.msk.f32.mxu0 %vm11931_vm0, %v14509_v5 }
0x2a91   :  { %v11025_v6 = vpop.f32.mrf.mxu0 }
0x2a92   :  { %v13649_v4 = vadd.f32 %v11025_v6, %v13535_v7 }
0x2a93   :  { %v6381_v48 = vpop.f32.mrf.mxu0 }
0x2a94   :  { %v13654_v18 = vadd.f32 %v6381_v48, %v13540_v2 }
0x2a95   :  { %v11028_v22 = vpop.f32.mrf.mxu0 }
0x2a96   :  { %v13641_v35 = vadd.f32 %v11028_v22, %v13527_v61  ;;  %v11634_v61 = vld [vmem:[#allocation8 + $0x8] sm:$0xff] }
0x2a97   :  { %v6391_v60 = vpop.f32.mrf.mxu0 }
0x2a98   :  { %v13644_v24 = vadd.f32 %v6391_v60, %v13530_v53  ;;  %11030 = vmatpush3.msra.mxu0 %v13641_v35 }
0x2a99   :  { %11031 = vmatprep.subr.mxu0 %v14509_v5 }
0x2a9a   :  { %11032 = vmatpush3.msra.mxu0 %v13644_v24 }
0x2a9b   :  { %11033 = vmatprep.subr.mxu0 %v14509_v5 }
0x2a9c   :  { %11034 = vmatpush3.msra.mxu0 %v13649_v4 }
0x2a9d   :  { %11035 = vmatprep.subr.mxu0 %v14509_v5 }
0x2a9e   :  { %11036 = vmatpush3.msra.mxu0 %v13654_v18 }
0x2a9f   :  { %11038 = vmatmul.mubr.msk.f32.vlgmr.msra.gmra.mxu0 %vm229_vm1, %v11634_v61  ;;  %11051 = vmatprep.subr.mxu0 %v14509_v5 }
0x2aa0   :  { %11053 = vmatprep.mubr.msk.f32.mxu0 %vm11931_vm0, %v14509_v5 }
0x2b5f   :  { %v13663_v53 = vpop.f32.mrf.mxu0 }
0x2b60   :  { %11049 = vmatmul.mubr.msk.f32.vlgmr.msra.gmra.mxu1 %vm229_vm1, %v13663_v53 }
0x2b61   :  { %11057 = vmatpush3.msra.mxu1 %v13367_v38  ;;  %v11039_v7 = vpop.f32.mrf.mxu0  ;;  %11064 = vmatprep.mubr.msk.f32.mxu1 %vm11931_vm0, %v14509_v5 }
0x2b62   :  { %11058 = vmatprep.subr.mxu1 %v14509_v5 }
0x2b63   :  { %11059 = vmatpush3.msra.mxu1 %v13376_v31 }
0x2b64   :  { %11060 = vmatprep.subr.mxu1 %v14509_v5 }
0x2b65   :  { %11061 = vmatpush3.msra.mxu1 %v13383_v8 }
0x2b66   :  { %11062 = vmatprep.subr.mxu1 %v14509_v5 }
0x2b67   :  { %11063 = vmatpush3.msra.mxu1 %v13390_v10 }
0x2b68   :  { %11065 = vmatmul.mubr.msk.f32.vlgmr.msra.gmra.mxu1 %vm229_vm1, %v13663_v53  ;;  %11078 = vmatprep.subr.mxu1 %v14509_v5 }
0x2b69   :  { %11079 = vmatpush3.msra.mxu1 %v13396_v50  ;;  %11086 = vmatprep.mubr.msk.f32.mxu1 %vm11931_vm0, %v14509_v5 }
0x2b6a   :  { %11080 = vmatprep.subr.mxu1 %v14509_v5 }
0x2b6b   :  { %11081 = vmatpush3.msra.mxu1 %v13402_v20  ;;  %v14535_v20 = vld [vmem:[#allocation28_spill] sm:$0xff] }
0x2b6c   :  { %11082 = vmatprep.subr.mxu1 %v14509_v5 }
0x2b6d   :  { %11083 = vmatpush3.msra.mxu1 %v13406_v54 }
0x2b6e   :  { %11084 = vmatprep.subr.mxu1 %v14509_v5 }
0x2b6f   :  { %11085 = vmatpush3.msra.mxu1 %v13410_v37  ;;  %v13699_v37 = vld [vmem:[%s14486_s1 + $0x18] sm:$0xff] }
0x2b70   :  { %11108 = vmatprep.subr.mxu1 %v14509_v5 }
0x2c20   :  { %v6543_v38 = vpop.f32.mrf.mxu1 }
0x2c21   :  { %6548 = vrot.lane.b32.xlu1 %v6543_v38, %s11934_s14 }
0x2c22   :  { %v11050_v31 = vpop.f32.mrf.mxu1 }
0x2c25   :  { %6799 = vrot.lane.b32.xlu1 %v13663_v53, %s11933_s30 }
0x2c28   :  { %v6693_v8 = vpop.f32.mrf.mxu1 }
0x2c29   :  { %v6694_v11 = vadd.f32 %v13419_v43, %v6693_v8  ;;  %v13709_v43 = vld [vmem:[%s14486_s1 + $0x10] sm:$0xff] }
0x2c2a   :  { %v11066_v10 = vpop.f32.mrf.mxu1 }
0x2c2b   :  { %v6697_v39 = vadd.f32 %v6694_v11, %v14536_v36 }
0x2c2d   :  { %v9765_v40 = vmul.f32 -1.442695, %v6697_v39  ;;  %v11642_v39 = vld [vmem:[%s14489_s6 + $0x30] sm:$0xff] }
0x2c2f   :  { %11484 = vpow2.f32 %v9765_v40 }
0x2c3c   :  { %v11485_v28 = vpop.eup %11484 }
0x2c3d   :  { %v6701_v55 = vadd.f32 1.0, %v11485_v28 }
0x2c3f   :  { %11486 = vrcp.f32 %v6701_v55 }
0x2c4c   :  { %v11487_v33 = vpop.eup %11486 }
0x2c4d   :  { %v6715_v22 = vsub.f32 1.0, %v11487_v33 }
0x2c93   :  { %v6549_v50 = vpop.permute.xlu1 %6548 }
0x2c94   :  { %v6551_v2 = vadd.f32 %v6549_v50, %v14535_v20 }
0x2c96   :  { %6553 = vrot.lane.b32.xlu0 %v6551_v2, %s11933_s30 }
0x2c97   :  { %v6800_v54 = vpop.permute.xlu1 %6799 }
0x2c98   :  { %11087 = vmatmul.mubr.msk.f32.vlgmr.msra.gmra.mxu1 %vm229_vm1, %v6800_v54 }
0x2c99   :  { %11109 = vmatpush3.msra.mxu1 %v13699_v37  ;;  %11116 = vmatprep.mubr.msk.f32.mxu1 %vm11931_vm0, %v14509_v5 }
0x2c9a   :  { %6705 = vrot.lane.b32.xlu0 %v6694_v11, %s11935_s22  ;;  %11110 = vmatprep.subr.mxu1 %v14509_v5 }
0x2c9b   :  { %11111 = vmatpush3.msra.mxu1 %v13709_v43 }
0x2c9c   :  { %11112 = vmatprep.subr.mxu1 %v14509_v5 }
0x2c9d   :  { %11113 = vmatpush3.msra.mxu1 %v13716_v44 }
0x2c9e   :  { %11114 = vmatprep.subr.mxu1 %v14509_v5 }
0x2c9f   :  { %11115 = vmatpush3.msra.mxu1 %v13723_v32 }
0x2ca0   :  { %11124 = vmatprep.subr.mxu1 %v14509_v5 }
0x2d08   :  { %v6554_v16 = vpop.permute.xlu0 %6553 }
0x2d09   :  { %11052 = vmatpush3.msra.mxu0 %v6554_v16 }
0x2d0a   :  { %11054 = vmatmul.mubr.msk.f32.vlgmr.msra.gmra.mxu0 %vm460_vm2, %v11639_v58  ;;  %11067 = vmatprep.subr.mxu0 %v14509_v5 }
0x2d0b   :  { %11068 = vmatpush3.msra.mxu0 %v13451_v62  ;;  %11075 = vmatprep.mubr.msk.f32.mxu0 %vm11931_vm0, %v14509_v5 }
0x2d0c   :  { %v6706_v56 = vpop.permute.xlu0 %6705  ;;  %11069 = vmatprep.subr.mxu0 %v14509_v5 }
0x2d0d   :  { %v6708_v9 = vmul.f32 %v11487_v33, %v6706_v56  ;;  %11070 = vmatpush3.msra.mxu0 %v13457_v1 }
0x2d0e   :  { %11071 = vmatprep.subr.mxu0 %v14509_v5 }
0x2d0f   :  { %6710 = vrot.lane.b32.xlu0 %v6708_v9, %s11935_s22  ;;  %11072 = vmatpush3.msra.mxu0 %v13461_v14 }
0x2d10   :  { %11073 = vmatprep.subr.mxu0 %v14509_v5 }
0x2d11   :  { %11074 = vmatpush3.msra.mxu0 %v13465_v17  ;;  %v11640_v17 = vld [vmem:[%s14489_s6 + $0x20] sm:$0xff] }
0x2d58   :  { %v6869_v62 = vpop.f32.mrf.mxu1 }
0x2d59   :  { %v6870_v23 = vadd.f32 %v13468_v19, %v6869_v62  ;;  %v13813_v62 = vld [vmem:[%s14411_s11 + $0x10] sm:$0xff] }
0x2d5a   :  { %v11088_v12 = vpop.f32.mrf.mxu1 }
0x2d5b   :  { %6881 = vrot.lane.b32.xlu1 %v6870_v23, %s11935_s22  ;;  %v13827_v12 = vld [vmem:[%s14411_s11] sm:$0xff] }
0x2d81   :  { %v6711_v42 = vpop.permute.xlu0 %6710 }
0x2d82   :  { %v6713_v21 = vadd.f32 %v6711_v42, %v14536_v36  ;;  %v11641_v36 = vld [vmem:[%s14489_s6 + $0x28] sm:$0xff]  ;;  %v13833_v42 = vld [vmem:[#allocation17 + $0x18] sm:$0xff] }
0x2d84   :  { %11488 = vtanh.f32 %v6713_v21  ;;  %v13839_v21 = vld [vmem:[#allocation17 + $0x10] sm:$0xff] }
0x2d91   :  { %v11489_v1 = vpop.eup %11488 }
0x2d92   :  { %6717 = vrot.lane.b32.xlu0 %v11489_v1, %s11933_s30  ;;  %v13843_v1 = vld [vmem:[#allocation17 + $0x8] sm:$0xff] }
0x2dca   :  { %v6622_v25 = vpop.f32.mrf.mxu0 }
0x2dcb   :  { %v6623_v14 = vadd.f32 %v13472_v0, %v6622_v25  ;;  %v13847_v25 = vld [vmem:[#allocation17] sm:$0xff] }
0x2dcc   :  { %v11055_v41 = vpop.f32.mrf.mxu0 }
0x2dcd   :  { %v6626_v13 = vmax.f32 %v6623_v14, 0.0  ;;  %v6882_v57 = vpop.permute.xlu1 %6881 }
0x2dcf   :  { %11076 = vmatmul.mubr.msk.f32.vlgmr.msra.gmra.mxu0 %vm229_vm1, %v6626_v13 }
0x2dd0   :  { %11091 = vmatprep.mubr.msk.f32.mxu0 %vm460_vm2, %v11640_v17 }
0x2e04   :  { %v6718_v48 = vpop.permute.xlu0 %6717 }
0x2e05   :  { %v6720_v60 = vmul.f32 %v6718_v48, %v6715_v22  ;;  %v13889_v48 = vld [vmem:[#allocation15] sm:$0xff] }
0x2e8f   :  { %v6795_v19 = vpop.f32.mrf.mxu0 }
0x2e90   :  { %v6796_v59 = vadd.f32 %v13488_v49, %v6795_v19 }
0x2e91   :  { %v11077_v3 = vpop.f32.mrf.mxu0 }
0x2e92   :  { %v6873_v63 = vadd.f32 %v6870_v23, %v6796_v59  ;;  %v13820_v23 = vld [vmem:[%s14411_s11 + $0x8] sm:$0xff] }
0x2e94   :  { %v9768_v47 = vmul.f32 -1.442695, %v6873_v63  ;;  %v13856_v63 = vld [vmem:[#allocation14] ss:$0 sm:$0xff] }
0x2e96   :  { %11490 = vpow2.f32 %v9768_v47 }
0x2ea3   :  { %v11491_v34 = vpop.eup %11490 }
0x2ea4   :  { %v6877_v45 = vadd.f32 1.0, %v11491_v34 }
0x2ea6   :  { %11492 = vrcp.f32 %v6877_v45 }
0x2eb3   :  { %v11493_v0 = vpop.eup %11492 }
0x2eb4   :  { %v6884_v51 = vmul.f32 %v11493_v0, %v6882_v57  ;;  %v6891_v31 = vsub.f32 1.0, %v11493_v0  ;;  %v6897_v10 = vmul.f32 %v11493_v0, %v13663_v53 }
0x2eb6   :  { %6886 = vrot.lane.b32.xlu1 %v6884_v51, %s11935_s22 }
0x2eba   :  { %6721 = vrot.lane.b32.xlu1 %v13663_v53, %s11934_s14 }
0x2f28   :  { %v6887_v46 = vpop.permute.xlu1 %6886 }
0x2f29   :  { %v6889_v6 = vadd.f32 %v6887_v46, %v6796_v59  ;;  %v13880_v46 = vld [vmem:[#allocation15 + $0x10] sm:$0xff] }
0x2f2b   :  { %11494 = vtanh.f32 %v6889_v6  ;;  %v13885_v6 = vld [vmem:[#allocation15 + $0x8] sm:$0xff] }
0x2f2c   :  { %v6722_v49 = vpop.permute.xlu1 %6721 }
0x2f2d   :  { %v6724_v61 = vmul.f32 %v11487_v33, %v6722_v49  ;;  %v13892_v49 = vld [vmem:[#allocation18] ss:$0 sm:$0xff] }
0x2f2f   :  { %v6725_v7 = vadd.f32 %v6724_v61, %v6720_v60 }
0x2f31   :  { %6900 = vrot.lane.b32.xlu1 %v6725_v7, %s11933_s30 }
0x2f38   :  { %v11495_v38 = vpop.eup %11494 }
0x2f39   :  { %6893 = vrot.lane.b32.xlu0 %v11495_v38, %s11933_s30 }
0x2fa3   :  { %v6901_v2 = vpop.permute.xlu1 %6900 }
0x2fab   :  { %v6894_v8 = vpop.permute.xlu0 %6893 }
0x2fac   :  { %v6896_v50 = vmul.f32 %v6894_v8, %v6891_v31 }
0x2fae   :  { %v6898_v20 = vadd.f32 %v6897_v10, %v6896_v50  ;;  %v13898_v10 = vld [vmem:[#allocation12] ss:$0 sm:$0xff] }
0x2fb0   :  { %v6903_v54 = vsel %vm229_vm1, %v6901_v2, %v6898_v20 }
0x2fb1   :  { %v6904_v11 = vsub.f32 %v6903_v54, %v13663_v53  ;;  %v11643_v53 = vld [vmem:[%s14489_s6 + $0x38] sm:$0xff]  ;;  %v11661_v54 = vld [vmem:[%s14489_s6 + $0x40] sm:$0xff] }
0x2fb3   :  { %11089 = vmatprep.subr.mxu0 %v6904_v11 }
0x2fb4   :  { %11090 = vmatpush3.msra.mxu0 %v6904_v11  ;;  %v13909_v11 = vld [vmem:[%s14416_s16] ss:$0 sm:$0xff] }
0x2fb5   :  { %11092 = vmatmul.mubr.msk.f32.vlgmr.msra.gmra.mxu0 %vm460_vm2, %v11641_v36  ;;  %11097 = vmatprep.subr.mxu0 %v14509_v5 }
0x2fb6   :  { %11094 = vmatprep.mubr.msk.f32.mxu0 %vm460_vm2, %v11642_v39 }
0x2fb9   :  { %11095 = vmatmul.mubr.msk.f32.gmra.mxu0 %vm460_vm2, %v11643_v53 }
0x2fba   :  { %11105 = vmatprep.mubr.msk.f32.mxu0 %vm11931_vm0, %v14509_v5 }
0x3075   :  { %v11093_v40 = vpop.f32.mrf.mxu0 }
0x3076   :  { %v13783_v56 = vadd.f32 %v11093_v40, %v13649_v4  ;;  %v13804_v4 = vld [vmem:[%s14411_s11 + $0x18] sm:$0xff] }
0x3077   :  { %v6971_v28 = vpop.f32.mrf.mxu0 }
0x3078   :  { %v13788_v9 = vadd.f32 %v6971_v28, %v13654_v18 }
0x3079   :  { %v11096_v55 = vpop.f32.mrf.mxu0 }
0x307a   :  { %v13775_v16 = vadd.f32 %v11096_v55, %v13641_v35  ;;  %v11644_v35 = vld [vmem:[#allocation8 + $0x10] sm:$0xff] }
0x307b   :  { %v6981_v58 = vpop.f32.mrf.mxu0 }
0x307c   :  { %v13778_v33 = vadd.f32 %v6981_v58, %v13644_v24  ;;  %11098 = vmatpush3.msra.mxu0 %v13775_v16 }
0x307d   :  { %11099 = vmatprep.subr.mxu0 %v14509_v5 }
0x307e   :  { %11100 = vmatpush3.msra.mxu0 %v13778_v33 }
0x307f   :  { %11101 = vmatprep.subr.mxu0 %v14509_v5 }
0x3080   :  { %11102 = vmatpush3.msra.mxu0 %v13783_v56 }
0x3081   :  { %11103 = vmatprep.subr.mxu0 %v14509_v5 }
0x3082   :  { %11104 = vmatpush3.msra.mxu0 %v13788_v9 }
0x3083   :  { %11106 = vmatmul.mubr.msk.f32.vlgmr.msra.gmra.mxu0 %vm229_vm1, %v11644_v35  ;;  %11119 = vmatprep.subr.mxu0 %v14509_v5 }
0x3084   :  { %11121 = vmatprep.mubr.msk.f32.mxu0 %vm11931_vm0, %v14509_v5 }
0x3143   :  { %v13797_v24 = vpop.f32.mrf.mxu0 }
0x3144   :  { %11117 = vmatmul.mubr.msk.f32.vlgmr.msra.gmra.mxu1 %vm229_vm1, %v13797_v24 }
0x3145   :  { %11125 = vmatpush3.msra.mxu1 %v13804_v4  ;;  %v11107_v18 = vpop.f32.mrf.mxu0  ;;  %11132 = vmatprep.mubr.msk.f32.mxu1 %vm11931_vm0, %v14509_v5 }
0x3146   :  { %11126 = vmatprep.subr.mxu1 %v14509_v5 }
0x3147   :  { %11127 = vmatpush3.msra.mxu1 %v13813_v62 }
0x3148   :  { %11128 = vmatprep.subr.mxu1 %v14509_v5 }
0x3149   :  { %11129 = vmatpush3.msra.mxu1 %v13820_v23 }
0x314a   :  { %11130 = vmatprep.subr.mxu1 %v14509_v5 }
0x314b   :  { %11131 = vmatpush3.msra.mxu1 %v13827_v12 }
0x314c   :  { %11133 = vmatmul.mubr.msk.f32.vlgmr.msra.gmra.mxu1 %vm229_vm1, %v13797_v24  ;;  %11146 = vmatprep.subr.mxu1 %v14509_v5 }
0x314d   :  { %11147 = vmatpush3.msra.mxu1 %v13833_v42  ;;  %11154 = vmatprep.mubr.msk.f32.mxu1 %vm11931_vm0, %v14509_v5 }
0x314e   :  { %11148 = vmatprep.subr.mxu1 %v14509_v5 }
0x314f   :  { %11149 = vmatpush3.msra.mxu1 %v13839_v21 }
0x3150   :  { %11150 = vmatprep.subr.mxu1 %v14509_v5 }
0x3151   :  { %11151 = vmatpush3.msra.mxu1 %v13843_v1 }
0x3152   :  { %11152 = vmatprep.subr.mxu1 %v14509_v5 }
0x3153   :  { %11153 = vmatpush3.msra.mxu1 %v13847_v25 }
0x3154   :  { %11176 = vmatprep.subr.mxu1 %v14509_v5 }
0x3204   :  { %v7133_v14 = vpop.f32.mrf.mxu1 }
0x3205   :  { %7138 = vrot.lane.b32.xlu0 %v7133_v14, %s11934_s14 }
0x3206   :  { %v11118_v41 = vpop.f32.mrf.mxu1 }
0x3209   :  { %7389 = vrot.lane.b32.xlu0 %v13797_v24, %s11933_s30 }
0x320c   :  { %v7283_v13 = vpop.f32.mrf.mxu1 }
0x320d   :  { %v7284_v47 = vadd.f32 %v13856_v63, %v7283_v13 }
0x320e   :  { %v11134_v17 = vpop.f32.mrf.mxu1 }
0x3277   :  { %v7139_v19 = vpop.permute.xlu0 %7138 }
0x3278   :  { %v7141_v59 = vadd.f32 %v7139_v19, %v12735_v15  ;;  %v7287_v15 = vadd.f32 %v7284_v47, %v12832_v52 }
0x327a   :  { %7143 = vrot.lane.b32.xlu1 %v7141_v59, %s11933_s30 }
0x327b   :  { %v7390_v3 = vpop.permute.xlu0 %7389 }
0x327c   :  { %11155 = vmatmul.mubr.msk.f32.vlgmr.msra.gmra.mxu1 %vm229_vm1, %v7390_v3 }
0x327d   :  { %11177 = vmatpush3.msra.mxu1 %v13333_v26  ;;  %11184 = vmatprep.mubr.msk.f32.mxu1 %vm11931_vm0, %v14509_v5  ;;  %v9777_v26 = vmul.f32 -1.442695, %v7287_v15 }
0x327e   :  { %7295 = vrot.lane.b32.xlu1 %v7284_v47, %s11935_s22  ;;  %11178 = vmatprep.subr.mxu1 %v14509_v5 }
0x327f   :  { %11179 = vmatpush3.msra.mxu1 %v13342_v27  ;;  %11496 = vpow2.f32 %v9777_v26  ;;  %v11654_v27 = vld [vmem:[#allocation4 + $0x10] sm:$0xff] }
0x3280   :  { %11180 = vmatprep.subr.mxu1 %v14509_v5 }
0x3281   :  { %11181 = vmatpush3.msra.mxu1 %v13349_v30  ;;  %v13874_v30 = vld [vmem:[#allocation15 + $0x18] sm:$0xff] }
0x3282   :  { %11182 = vmatprep.subr.mxu1 %v14509_v5 }
0x3283   :  { %11183 = vmatpush3.msra.mxu1 %v13356_v29 }
0x3284   :  { %11192 = vmatprep.subr.mxu1 %v14509_v5 }
0x328c   :  { %v11497_v34 = vpop.eup %11496 }
0x328d   :  { %v7291_v45 = vadd.f32 1.0, %v11497_v34 }
0x328f   :  { %11498 = vrcp.f32 %v7291_v45 }
0x329c   :  { %v11499_v29 = vpop.eup %11498 }
0x329d   :  { %v7305_v17 = vsub.f32 1.0, %v11499_v29 }
0x32ec   :  { %v7144_v0 = vpop.permute.xlu1 %7143 }
0x32ed   :  { %11120 = vmatpush3.msra.mxu0 %v7144_v0 }
0x32ee   :  { %11122 = vmatmul.mubr.msk.f32.vlgmr.msra.gmra.mxu0 %vm460_vm2, %v11654_v27  ;;  %11135 = vmatprep.subr.mxu0 %v14509_v5 }
0x32ef   :  { %11136 = vmatpush3.msra.mxu0 %v13874_v30  ;;  %11143 = vmatprep.mubr.msk.f32.mxu0 %vm11931_vm0, %v14509_v5 }
0x32f0   :  { %v7296_v57 = vpop.permute.xlu1 %7295  ;;  %11137 = vmatprep.subr.mxu0 %v14509_v5 }
0x32f1   :  { %v7298_v51 = vmul.f32 %v11499_v29, %v7296_v57  ;;  %11138 = vmatpush3.msra.mxu0 %v13880_v46 }
0x32f2   :  { %11139 = vmatprep.subr.mxu0 %v14509_v5 }
0x32f3   :  { %7300 = vrot.lane.b32.xlu1 %v7298_v51, %s11935_s22  ;;  %11140 = vmatpush3.msra.mxu0 %v13885_v6 }
0x32f4   :  { %11141 = vmatprep.subr.mxu0 %v14509_v5 }
0x32f5   :  { %11142 = vmatpush3.msra.mxu0 %v13889_v48 }
0x333c   :  { %v7459_v22 = vpop.f32.mrf.mxu1 }
0x333d   :  { %v7460_v60 = vadd.f32 %v13892_v49, %v7459_v22 }
0x333e   :  { %v11156_v61 = vpop.f32.mrf.mxu1 }
0x333f   :  { %7471 = vrot.lane.b32.xlu0 %v7460_v60, %s11935_s22 }
0x3365   :  { %v7301_v7 = vpop.permute.xlu1 %7300 }
0x3366   :  { %v7303_v38 = vadd.f32 %v7301_v7, %v12832_v52 }
0x3368   :  { %11500 = vtanh.f32 %v7303_v38 }
0x3375   :  { %v11501_v31 = vpop.eup %11500 }
0x3376   :  { %7307 = vrot.lane.b32.xlu1 %v11501_v31, %s11933_s30 }
0x33ae   :  { %v7212_v8 = vpop.f32.mrf.mxu0 }
0x33af   :  { %v7213_v50 = vadd.f32 %v13898_v10, %v7212_v8 }
0x33b0   :  { %v11123_v20 = vpop.f32.mrf.mxu0 }
0x33b1   :  { %v7216_v2 = vmax.f32 %v7213_v50, 0.0  ;;  %v7472_v35 = vpop.permute.xlu0 %7471 }
0x33b3   :  { %11144 = vmatmul.mubr.msk.f32.vlgmr.msra.gmra.mxu0 %vm229_vm1, %v7216_v2 }
0x33b4   :  { %11159 = vmatprep.mubr.msk.f32.mxu0 %vm460_vm2, %v11661_v54  ;;  %v13974_v54 = vld [vmem:[%s14411_s11 + $0x30] sm:$0xff] }
0x33e8   :  { %v7308_v13 = vpop.permute.xlu1 %7307 }
0x33e9   :  { %v7310_v59 = vmul.f32 %v7308_v13, %v7305_v17 }
0x3473   :  { %v7385_v52 = vpop.f32.mrf.mxu0 }
0x3474   :  { %v7386_v36 = vadd.f32 %v13909_v11, %v7385_v52  ;;  %v13981_v52 = vld [vmem:[%s14411_s11 + $0x28] sm:$0xff] }
0x3475   :  { %v11145_v39 = vpop.f32.mrf.mxu0 }
0x3476   :  { %v7463_v53 = vadd.f32 %v7460_v60, %v7386_v36  ;;  %v11664_v60 = vld [vmem:[%s14489_s6 + $0x50] sm:$0xff]  ;;  %v13994_v39 = vld [vmem:[#allocation17 + $0x38] sm:$0xff] }
0x3478   :  { %v9780_v40 = vmul.f32 -1.442695, %v7463_v53  ;;  %v14000_v53 = vld [vmem:[#allocation17 + $0x30] sm:$0xff] }
0x347a   :  { %11502 = vpow2.f32 %v9780_v40  ;;  %v14004_v40 = vld [vmem:[#allocation17 + $0x28] sm:$0xff] }
0x3487   :  { %v11503_v28 = vpop.eup %11502 }
0x3488   :  { %v7467_v55 = vadd.f32 1.0, %v11503_v28  ;;  %v14008_v28 = vld [vmem:[#allocation17 + $0x20] sm:$0xff] }
0x348a   :  { %11504 = vrcp.f32 %v7467_v55 }
0x3497   :  { %v11505_v58 = vpop.eup %11504 }
0x3498   :  { %v7474_v18 = vmul.f32 %v11505_v58, %v7472_v35  ;;  %v7481_v26 = vsub.f32 1.0, %v11505_v58  ;;  %v7487_v45 = vmul.f32 %v11505_v58, %v13797_v24 }
0x349a   :  { %7476 = vrot.lane.b32.xlu0 %v7474_v18, %s11935_s22 }
0x349e   :  { %7311 = vrot.lane.b32.xlu0 %v13797_v24, %s11934_s14 }
0x350c   :  { %v7477_v14 = vpop.permute.xlu0 %7476 }
0x350d   :  { %v7479_v41 = vadd.f32 %v7477_v14, %v7386_v36  ;;  %v13988_v36 = vld [vmem:[%s14411_s11 + $0x20] sm:$0xff] }
0x350f   :  { %11506 = vtanh.f32 %v7479_v41  ;;  %v14537_v41 = vld [vmem:[#allocation47_spill] sm:$0xff] }
0x3510   :  { %v7312_v19 = vpop.permute.xlu0 %7311 }
0x3511   :  { %v7314_v3 = vmul.f32 %v11499_v29, %v7312_v19  ;;  %v11663_v29 = vld [vmem:[%s14489_s6 + $0x48] sm:$0xff]  ;;  %v14017_v19 = vld [vmem:[#allocation14 + $0x1] ss:$0 sm:$0xff] }
0x3513   :  { %v7315_v47 = vadd.f32 %v7314_v3, %v7310_v59 }
0x3515   :  { %7490 = vrot.lane.b32.xlu0 %v7315_v47, %s11933_s30 }
0x351c   :  { %v11507_v15 = vpop.eup %11506 }
0x351d   :  { %7483 = vrot.lane.b32.xlu1 %v11507_v15, %s11933_s30 }
0x3587   :  { %v7491_v57 = vpop.permute.xlu0 %7490 }
0x358f   :  { %v7484_v34 = vpop.permute.xlu1 %7483 }
0x3590   :  { %v7486_v0 = vmul.f32 %v7484_v34, %v7481_v26 }
0x3592   :  { %v7488_v27 = vadd.f32 %v7487_v45, %v7486_v0 }
0x3594   :  { %v7493_v51 = vsel %vm229_vm1, %v7491_v57, %v7488_v27  ;;  %v14041_v27 = vld [vmem:[#allocation15 + $0x30] sm:$0xff]  ;;  %v14046_v57 = vld [vmem:[#allocation15 + $0x28] sm:$0xff] }
0x3595   :  { %v7494_v22 = vsub.f32 %v7493_v51, %v13797_v24  ;;  %v11665_v24 = vld [vmem:[%s14489_s6 + $0x58] sm:$0xff]  ;;  %v14050_v51 = vld [vmem:[#allocation15 + $0x20] sm:$0xff] }
0x3597   :  { %11157 = vmatprep.subr.mxu0 %v7494_v22 }
0x3598   :  { %11158 = vmatpush3.msra.mxu0 %v7494_v22 }
0x3599   :  { %11160 = vmatmul.mubr.msk.f32.vlgmr.msra.gmra.mxu0 %vm460_vm2, %v11663_v29  ;;  %11165 = vmatprep.subr.mxu0 %v14509_v5  ;;  %v14053_v29 = vld [vmem:[#allocation18 + $0x1] ss:$0 sm:$0xff] }
0x359a   :  { %11162 = vmatprep.mubr.msk.f32.mxu0 %vm460_vm2, %v11664_v60 }
0x359d   :  { %11163 = vmatmul.mubr.msk.f32.gmra.mxu0 %vm460_vm2, %v11665_v24 }
0x359e   :  { %11173 = vmatprep.mubr.msk.f32.mxu0 %vm11931_vm0, %v14509_v5 }
0x3659   :  { %v11161_v61 = vpop.f32.mrf.mxu0 }
0x365a   :  { %v13944_v20 = vadd.f32 %v11161_v61, %v13783_v56  ;;  %v13965_v56 = vld [vmem:[%s14411_s11 + $0x38] sm:$0xff] }
0x365b   :  { %v7561_v7 = vpop.f32.mrf.mxu0 }
0x365c   :  { %v13949_v2 = vadd.f32 %v7561_v7, %v13788_v9 }
0x365d   :  { %v11164_v38 = vpop.f32.mrf.mxu0 }
0x365e   :  { %v13936_v31 = vadd.f32 %v11164_v38, %v13775_v16  ;;  %v11666_v16 = vld [vmem:[#allocation8 + $0x18] sm:$0xff] }
0x365f   :  { %v7571_v8 = vpop.f32.mrf.mxu0 }
0x3660   :  { %v13939_v50 = vadd.f32 %v7571_v8, %v13778_v33  ;;  %11166 = vmatpush3.msra.mxu0 %v13936_v31 }
0x3661   :  { %11167 = vmatprep.subr.mxu0 %v14509_v5 }
0x3662   :  { %11168 = vmatpush3.msra.mxu0 %v13939_v50 }
0x3663   :  { %11169 = vmatprep.subr.mxu0 %v14509_v5 }
0x3664   :  { %11170 = vmatpush3.msra.mxu0 %v13944_v20 }
0x3665   :  { %11171 = vmatprep.subr.mxu0 %v14509_v5 }
0x3666   :  { %11172 = vmatpush3.msra.mxu0 %v13949_v2 }
0x3667   :  { %11174 = vmatmul.mubr.msk.f32.vlgmr.msra.gmra.mxu0 %vm229_vm1, %v11666_v16  ;;  %11187 = vmatprep.subr.mxu0 %v14509_v5  ;;  %v14059_v16 = vld [vmem:[#allocation12 + $0x1] ss:$0 sm:$0xff] }
0x3668   :  { %11189 = vmatprep.mubr.msk.f32.mxu0 %vm11931_vm0, %v14509_v5 }
0x3727   :  { %v13958_v33 = vpop.f32.mrf.mxu0 }
0x3728   :  { %11185 = vmatmul.mubr.msk.f32.vlgmr.msra.gmra.mxu1 %vm229_vm1, %v13958_v33 }
0x3729   :  { %11193 = vmatpush3.msra.mxu1 %v13965_v56  ;;  %v11175_v9 = vpop.f32.mrf.mxu0  ;;  %11200 = vmatprep.mubr.msk.f32.mxu1 %vm11931_vm0, %v14509_v5 }
0x372a   :  { %11194 = vmatprep.subr.mxu1 %v14509_v5 }
0x372b   :  { %11195 = vmatpush3.msra.mxu1 %v13974_v54 }
0x372c   :  { %11196 = vmatprep.subr.mxu1 %v14509_v5 }
0x372d   :  { %11197 = vmatpush3.msra.mxu1 %v13981_v52 }
0x372e   :  { %11198 = vmatprep.subr.mxu1 %v14509_v5 }
0x372f   :  { %11199 = vmatpush3.msra.mxu1 %v13988_v36 }
0x3730   :  { %11201 = vmatmul.mubr.msk.f32.vlgmr.msra.gmra.mxu1 %vm229_vm1, %v13958_v33  ;;  %11214 = vmatprep.subr.mxu1 %v14509_v5 }
0x3731   :  { %11215 = vmatpush3.msra.mxu1 %v13994_v39  ;;  %11222 = vmatprep.mubr.msk.f32.mxu1 %vm11931_vm0, %v14509_v5 }
0x3732   :  { %11216 = vmatprep.subr.mxu1 %v14509_v5 }
0x3733   :  { %11217 = vmatpush3.msra.mxu1 %v14000_v53 }
0x3734   :  { %11218 = vmatprep.subr.mxu1 %v14509_v5 }
0x3735   :  { %11219 = vmatpush3.msra.mxu1 %v14004_v40 }
0x3736   :  { %11220 = vmatprep.subr.mxu1 %v14509_v5 }
0x3737   :  { %11221 = vmatpush3.msra.mxu1 %v14008_v28 }
0x3738   :  { %11244 = vmatprep.subr.mxu1 %v14509_v5 }
0x37e8   :  { %v7723_v55 = vpop.f32.mrf.mxu1 }
0x37e9   :  { %7728 = vrot.lane.b32.xlu1 %v7723_v55, %s11934_s14 }
0x37ea   :  { %v11186_v58 = vpop.f32.mrf.mxu1 }
0x37ed   :  { %7979 = vrot.lane.b32.xlu1 %v13958_v33, %s11933_s30 }
0x37f0   :  { %v7873_v35 = vpop.f32.mrf.mxu1 }
0x37f1   :  { %v7874_v59 = vadd.f32 %v14017_v19, %v7873_v35  ;;  %v11683_v35 = vld [vmem:[%s14489_s6 + $0x60] sm:$0xff] }
0x37f2   :  { %v11202_v18 = vpop.f32.mrf.mxu1 }
0x385b   :  { %v7729_v14 = vpop.permute.xlu1 %7728 }
0x385c   :  { %v7731_v13 = vadd.f32 %v7729_v14, %v14537_v41  ;;  %v14070_v14 = vld [vmem:[%s14416_s16 + $0x1] ss:$0 sm:$0xff] }
0x385e   :  { %7733 = vrot.lane.b32.xlu0 %v7731_v13, %s11933_s30 }
0x385f   :  { %v7980_v17 = vpop.permute.xlu1 %7979 }
0x3860   :  { %11223 = vmatmul.mubr.msk.f32.vlgmr.msra.gmra.mxu1 %vm229_vm1, %v7980_v17 }
0x3861   :  { %11245 = vmatpush3.msra.mxu1 %v13699_v37  ;;  %11252 = vmatprep.mubr.msk.f32.mxu1 %vm11931_vm0, %v14509_v5  ;;  %v14538_v37 = vld [vmem:[#allocation29_spill] sm:$0xff] }
0x3862   :  { %7885 = vrot.lane.b32.xlu0 %v7874_v59, %s11935_s22  ;;  %11246 = vmatprep.subr.mxu1 %v14509_v5  ;;  %v7877_v3 = vadd.f32 %v7874_v59, %v14538_v37 }
0x3863   :  { %11247 = vmatpush3.msra.mxu1 %v13709_v43  ;;  %v11676_v43 = vld [vmem:[#allocation4 + $0x18] sm:$0xff] }
0x3864   :  { %11248 = vmatprep.subr.mxu1 %v14509_v5  ;;  %v9789_v47 = vmul.f32 -1.442695, %v7877_v3 }
0x3865   :  { %11249 = vmatpush3.msra.mxu1 %v13716_v44  ;;  %v14035_v44 = vld [vmem:[#allocation15 + $0x38] sm:$0xff] }
0x3866   :  { %11250 = vmatprep.subr.mxu1 %v14509_v5  ;;  %11508 = vpow2.f32 %v9789_v47 }
0x3867   :  { %11251 = vmatpush3.msra.mxu1 %v13723_v32 }
0x3868   :  { %11260 = vmatprep.subr.mxu1 %v14509_v5 }
0x3873   :  { %v11509_v15 = vpop.eup %11508 }
0x3874   :  { %v7881_v26 = vadd.f32 1.0, %v11509_v15 }
0x3876   :  { %11510 = vrcp.f32 %v7881_v26 }
0x3883   :  { %v11511_v32 = vpop.eup %11510 }
0x38d0   :  { %v7734_v34 = vpop.permute.xlu0 %7733 }
0x38d1   :  { %11188 = vmatpush3.msra.mxu0 %v7734_v34 }
0x38d2   :  { %11190 = vmatmul.mubr.msk.f32.vlgmr.msra.gmra.mxu0 %vm460_vm2, %v11676_v43  ;;  %11203 = vmatprep.subr.mxu0 %v14509_v5 }
0x38d3   :  { %11204 = vmatpush3.msra.mxu0 %v14035_v44  ;;  %11211 = vmatprep.mubr.msk.f32.mxu0 %vm11931_vm0, %v14509_v5 }
0x38d4   :  { %v7886_v45 = vpop.permute.xlu0 %7885  ;;  %11205 = vmatprep.subr.mxu0 %v14509_v5 }
0x38d5   :  { %v7888_v0 = vmul.f32 %v11511_v32, %v7886_v45  ;;  %11206 = vmatpush3.msra.mxu0 %v14041_v27 }
0x38d6   :  { %11207 = vmatprep.subr.mxu0 %v14509_v5 }
0x38d7   :  { %7890 = vrot.lane.b32.xlu0 %v7888_v0, %s11935_s22  ;;  %11208 = vmatpush3.msra.mxu0 %v14046_v57  ;;  %v7895_v0 = vsub.f32 1.0, %v11511_v32 }
0x38d8   :  { %11209 = vmatprep.subr.mxu0 %v14509_v5 }
0x38d9   :  { %11210 = vmatpush3.msra.mxu0 %v14050_v51 }
0x3920   :  { %v8049_v22 = vpop.f32.mrf.mxu1 }
0x3921   :  { %v8050_v60 = vadd.f32 %v14053_v29, %v8049_v22 }
0x3922   :  { %v11224_v24 = vpop.f32.mrf.mxu1 }
0x3923   :  { %8061 = vrot.lane.b32.xlu1 %v8050_v60, %s11935_s22 }
0x3949   :  { %v7891_v61 = vpop.permute.xlu0 %7890 }
0x394a   :  { %v7893_v7 = vadd.f32 %v7891_v61, %v14538_v37 }
0x394c   :  { %11512 = vtanh.f32 %v7893_v7 }
0x3959   :  { %v11513_v38 = vpop.eup %11512 }
0x395a   :  { %7897 = vrot.lane.b32.xlu0 %v11513_v38, %s11933_s30 }
0x3992   :  { %v7802_v8 = vpop.f32.mrf.mxu0 }
0x3993   :  { %v7803_v9 = vadd.f32 %v14059_v16, %v7802_v8 }
0x3994   :  { %v11191_v55 = vpop.f32.mrf.mxu0 }
0x3995   :  { %v7806_v58 = vmax.f32 %v7803_v9, 0.0  ;;  %v8062_v15 = vpop.permute.xlu1 %8061 }
0x3997   :  { %11212 = vmatmul.mubr.msk.f32.vlgmr.msra.gmra.mxu0 %vm229_vm1, %v7806_v58 }
0x3998   :  { %11227 = vmatprep.mubr.msk.f32.mxu0 %vm460_vm2, %v11683_v35 }
0x39cc   :  { %v7898_v45 = vpop.permute.xlu0 %7897 }
0x3a57   :  { %v7975_v18 = vpop.f32.mrf.mxu0 }
0x3a58   :  { %v7976_v41 = vadd.f32 %v14070_v14, %v7975_v18 }
0x3a59   :  { %v11213_v13 = vpop.f32.mrf.mxu0 }
0x3a5a   :  { %v8053_v17 = vadd.f32 %v8050_v60, %v7976_v41  ;;  %v7900_v60 = vmul.f32 %v7898_v45, %v7895_v0  ;;  %v11686_v13 = vld [vmem:[%s14489_s6 + $0x70] sm:$0xff]  ;;  %v11692_v0 = vld [vmem:[%s14486_s1 + $0x20] sm:$0xff] }
0x3a5b   :  { %v11690_v45 = vld [vmem:[%s14486_s1 + $0x30] sm:$0xff] }
0x3a5c   :  { %v9792_v59 = vmul.f32 -1.442695, %v8053_v17 }
0x3a5e   :  { %11514 = vpow2.f32 %v9792_v59 }
0x3a6b   :  { %v11515_v37 = vpop.eup %11514 }
0x3a6c   :  { %v8057_v3 = vadd.f32 1.0, %v11515_v37 }
0x3a6e   :  { %11516 = vrcp.f32 %v8057_v3 }
0x3a7b   :  { %v11517_v47 = vpop.eup %11516 }
0x3a7c   :  { %v8064_v26 = vmul.f32 %v11517_v47, %v8062_v15  ;;  %v8071_v38 = vsub.f32 1.0, %v11517_v47  ;;  %v8077_v9 = vmul.f32 %v11517_v47, %v13958_v33 }
0x3a7e   :  { %8066 = vrot.lane.b32.xlu1 %v8064_v26, %s11935_s22 }
0x3a82   :  { %7901 = vrot.lane.b32.xlu1 %v13958_v33, %s11934_s14 }
0x3af0   :  { %v8067_v34 = vpop.permute.xlu1 %8066 }
0x3af1   :  { %v8069_v43 = vadd.f32 %v8067_v34, %v7976_v41 }
0x3af3   :  { %11518 = vtanh.f32 %v8069_v43 }
0x3af4   :  { %v7902_v22 = vpop.permute.xlu1 %7901 }
0x3af5   :  { %v7904_v24 = vmul.f32 %v11511_v32, %v7902_v22  ;;  %v11685_v32 = vld [vmem:[%s14489_s6 + $0x68] sm:$0xff]  ;;  %v14540_v22 = vld [vmem:[#allocation31_spill] sm:$0xff] }
0x3af7   :  { %v7905_v61 = vadd.f32 %v7904_v24, %v7900_v60 }
0x3af9   :  { %8080 = vrot.lane.b32.xlu1 %v7905_v61, %s11933_s30 }
0x3b00   :  { %v11519_v7 = vpop.eup %11518 }
0x3b01   :  { %8073 = vrot.lane.b32.xlu0 %v11519_v7, %s11933_s30 }
0x3b6b   :  { %v8081_v35 = vpop.permute.xlu1 %8080 }
0x3b73   :  { %v8074_v8 = vpop.permute.xlu0 %8073 }
0x3b74   :  { %v8076_v55 = vmul.f32 %v8074_v8, %v8071_v38  ;;  %v11693_v8 = vld [vmem:[#allocation4 + $0x20] sm:$0xff] }
0x3b76   :  { %v8078_v58 = vadd.f32 %v8077_v9, %v8076_v55 }
0x3b78   :  { %v8083_v18 = vsel %vm229_vm1, %v8081_v35, %v8078_v58 }
0x3b79   :  { %v8084_v41 = vsub.f32 %v8083_v18, %v13958_v33  ;;  %v11687_v33 = vld [vmem:[%s14489_s6 + $0x78] sm:$0xff] }
0x3b7b   :  { %11225 = vmatprep.subr.mxu0 %v8084_v41 }
0x3b7c   :  { %11226 = vmatpush3.msra.mxu0 %v8084_v41 }
0x3b7d   :  { %11228 = vmatmul.mubr.msk.f32.vlgmr.msra.gmra.mxu0 %vm460_vm2, %v11685_v32  ;;  %11233 = vmatprep.subr.mxu0 %v14509_v5 }
0x3b7e   :  { %11230 = vmatprep.mubr.msk.f32.mxu0 %vm460_vm2, %v11686_v13 }
0x3b81   :  { %11231 = vmatmul.mubr.msk.f32.gmra.mxu0 %vm460_vm2, %v11687_v33 }
0x3b82   :  { %11241 = vmatprep.mubr.msk.f32.mxu0 %vm11931_vm0, %v14509_v5 }
0x3c3d   :  { %v11229_v17 = vpop.f32.mrf.mxu0 }
0x3c3e   :  { %v14105_v26 = vadd.f32 %v11229_v17, %v13944_v20 }
0x3c3f   :  { %v8151_v59 = vpop.f32.mrf.mxu0 }
0x3c40   :  { %v14110_v34 = vadd.f32 %v8151_v59, %v13949_v2 }
0x3c41   :  { %v11232_v37 = vpop.f32.mrf.mxu0 }
0x3c42   :  { %v14097_v3 = vadd.f32 %v11232_v37, %v13936_v31  ;;  %v11688_v31 = vld [vmem:[#allocation8 + $0x20] sm:$0xff] }
0x3c43   :  { %v8161_v47 = vpop.f32.mrf.mxu0 }
0x3c44   :  { %v14100_v15 = vadd.f32 %v8161_v47, %v13939_v50  ;;  %11234 = vmatpush3.msra.mxu0 %v14097_v3 }
0x3c45   :  { %11235 = vmatprep.subr.mxu0 %v14509_v5 }
0x3c46   :  { %11236 = vmatpush3.msra.mxu0 %v14100_v15 }
0x3c47   :  { %11237 = vmatprep.subr.mxu0 %v14509_v5 }
0x3c48   :  { %11238 = vmatpush3.msra.mxu0 %v14105_v26 }
0x3c49   :  { %11239 = vmatprep.subr.mxu0 %v14509_v5 }
0x3c4a   :  { %11240 = vmatpush3.msra.mxu0 %v14110_v34 }
0x3c4b   :  { %11242 = vmatmul.mubr.msk.f32.vlgmr.msra.gmra.mxu0 %vm229_vm1, %v11688_v31  ;;  %11255 = vmatprep.subr.mxu0 %v14509_v5 }
0x3c4c   :  { %11257 = vmatprep.mubr.msk.f32.mxu0 %vm11931_vm0, %v14509_v5 }
0x3d0b   :  { %v14119_v50 = vpop.f32.mrf.mxu0 }
0x3d0c   :  { %11253 = vmatmul.mubr.msk.f32.vlgmr.msra.gmra.mxu1 %vm229_vm1, %v14119_v50 }
0x3d0d   :  { %11261 = vmatpush3.msra.mxu1 %v13804_v4  ;;  %v11243_v20 = vpop.f32.mrf.mxu0  ;;  %11268 = vmatprep.mubr.msk.f32.mxu1 %vm11931_vm0, %v14509_v5 }
0x3d0e   :  { %11262 = vmatprep.subr.mxu1 %v14509_v5 }
0x3d0f   :  { %11263 = vmatpush3.msra.mxu1 %v13813_v62 }
0x3d10   :  { %11264 = vmatprep.subr.mxu1 %v14509_v5 }
0x3d11   :  { %11265 = vmatpush3.msra.mxu1 %v13820_v23 }
0x3d12   :  { %11266 = vmatprep.subr.mxu1 %v14509_v5 }
0x3d13   :  { %11267 = vmatpush3.msra.mxu1 %v13827_v12 }
0x3d14   :  { %11269 = vmatmul.mubr.msk.f32.vlgmr.msra.gmra.mxu1 %vm229_vm1, %v14119_v50  ;;  %11282 = vmatprep.subr.mxu1 %v14509_v5 }
0x3d15   :  { %11283 = vmatpush3.msra.mxu1 %v13833_v42  ;;  %11290 = vmatprep.mubr.msk.f32.mxu1 %vm11931_vm0, %v14509_v5 }
0x3d16   :  { %11284 = vmatprep.subr.mxu1 %v14509_v5 }
0x3d17   :  { %11285 = vmatpush3.msra.mxu1 %v13839_v21  ;;  %v14539_v21 = vld [vmem:[#allocation30_spill] sm:$0xff] }
0x3d18   :  { %11286 = vmatprep.subr.mxu1 %v14509_v5 }
0x3d19   :  { %11287 = vmatpush3.msra.mxu1 %v13843_v1 }
0x3d1a   :  { %11288 = vmatprep.subr.mxu1 %v14509_v5 }
0x3d1b   :  { %11289 = vmatpush3.msra.mxu1 %v13847_v25  ;;  %v11689_v25 = vld [vmem:[%s14486_s1 + $0x38] sm:$0xff] }
0x3d1c   :  { %11312 = vmatprep.subr.mxu1 %v14509_v5 }
0x3dcc   :  { %v8313_v4 = vpop.f32.mrf.mxu1 }
0x3dcd   :  { %8318 = vrot.lane.b32.xlu0 %v8313_v4, %s11934_s14 }
0x3dce   :  { %v11254_v62 = vpop.f32.mrf.mxu1 }
0x3dd1   :  { %8569 = vrot.lane.b32.xlu0 %v14119_v50, %s11933_s30 }
0x3dd4   :  { %v8463_v23 = vpop.f32.mrf.mxu1 }
0x3dd5   :  { %v8464_v43 = vadd.f32 %v13856_v63, %v8463_v23  ;;  %v11691_v63 = vld [vmem:[%s14486_s1 + $0x28] sm:$0xff] }
0x3dd6   :  { %v11270_v12 = vpop.f32.mrf.mxu1 }
0x3dd7   :  { %v8467_v60 = vadd.f32 %v8464_v43, %v14540_v22 }
0x3dd9   :  { %v9801_v24 = vmul.f32 -1.442695, %v8467_v60 }
0x3ddb   :  { %11520 = vpow2.f32 %v9801_v24 }
0x3de8   :  { %v11521_v61 = vpop.eup %11520 }
0x3de9   :  { %v8471_v7 = vadd.f32 1.0, %v11521_v61 }
0x3deb   :  { %11522 = vrcp.f32 %v8471_v7 }
0x3df8   :  { %v11523_v9 = vpop.eup %11522 }
0x3e3f   :  { %v8319_v42 = vpop.permute.xlu0 %8318 }
0x3e40   :  { %v8321_v2 = vadd.f32 %v8319_v42, %v14539_v21 }
0x3e42   :  { %8323 = vrot.lane.b32.xlu1 %v8321_v2, %s11933_s30  ;;  %v8485_v2 = vsub.f32 1.0, %v11523_v9 }
0x3e43   :  { %v8570_v1 = vpop.permute.xlu0 %8569 }
0x3e44   :  { %11291 = vmatmul.mubr.msk.f32.vlgmr.msra.gmra.mxu1 %vm229_vm1, %v8570_v1 }
0x3e45   :  { %11313 = vmatpush3.msra.mxu1 %v11689_v25  ;;  %11320 = vmatprep.mubr.msk.f32.mxu1 %vm11931_vm0, %v14509_v5 }
0x3e46   :  { %8475 = vrot.lane.b32.xlu1 %v8464_v43, %s11935_s22  ;;  %11314 = vmatprep.subr.mxu1 %v14509_v5 }
0x3e47   :  { %11315 = vmatpush3.msra.mxu1 %v11690_v45 }
0x3e48   :  { %11316 = vmatprep.subr.mxu1 %v14509_v5 }
0x3e49   :  { %11317 = vmatpush3.msra.mxu1 %v11691_v63 }
0x3e4a   :  { %11318 = vmatprep.subr.mxu1 %v14509_v5 }
0x3e4b   :  { %11319 = vmatpush3.msra.mxu1 %v11692_v0 }
0x3e4c   :  { %11328 = vmatprep.subr.mxu1 %v14509_v5 }
0x3eb4   :  { %v8324_v38 = vpop.permute.xlu1 %8323 }
0x3eb5   :  { %11256 = vmatpush3.msra.mxu0 %v8324_v38 }
0x3eb6   :  { %11258 = vmatmul.mubr.msk.f32.vlgmr.msra.gmra.mxu0 %vm460_vm2, %v11693_v8  ;;  %11271 = vmatprep.subr.mxu0 %v14509_v5  ;;  %v11695_v8 = vld [vmem:[%s14489_s6 + $0x88] sm:$0xff] }
0x3eb7   :  { %11272 = vmatpush3.msra.mxu0 %v13874_v30  ;;  %11279 = vmatprep.mubr.msk.f32.mxu0 %vm11931_vm0, %v14509_v5 }
0x3eb8   :  { %v8476_v55 = vpop.permute.xlu1 %8475  ;;  %11273 = vmatprep.subr.mxu0 %v14509_v5 }
0x3eb9   :  { %v8478_v58 = vmul.f32 %v11523_v9, %v8476_v55  ;;  %11274 = vmatpush3.msra.mxu0 %v13880_v46 }
0x3eba   :  { %11275 = vmatprep.subr.mxu0 %v14509_v5 }
0x3ebb   :  { %8480 = vrot.lane.b32.xlu1 %v8478_v58, %s11935_s22  ;;  %11276 = vmatpush3.msra.mxu0 %v13885_v6 }
0x3ebc   :  { %11277 = vmatprep.subr.mxu0 %v14509_v5 }
0x3ebd   :  { %11278 = vmatpush3.msra.mxu0 %v13889_v48  ;;  %v11694_v48 = vld [vmem:[%s14489_s6 + $0x80] sm:$0xff] }
0x3f04   :  { %v8639_v30 = vpop.f32.mrf.mxu1 }
0x3f05   :  { %v8640_v35 = vadd.f32 %v13892_v49, %v8639_v30 }
0x3f06   :  { %v11292_v18 = vpop.f32.mrf.mxu1 }
0x3f07   :  { %8651 = vrot.lane.b32.xlu0 %v8640_v35, %s11935_s22 }
0x3f2d   :  { %v8481_v41 = vpop.permute.xlu1 %8480 }
0x3f2e   :  { %v8483_v32 = vadd.f32 %v8481_v41, %v14540_v22 }
0x3f30   :  { %11524 = vtanh.f32 %v8483_v32 }
0x3f3d   :  { %v11525_v46 = vpop.eup %11524 }
0x3f3e   :  { %8487 = vrot.lane.b32.xlu1 %v11525_v46, %s11933_s30 }
0x3f76   :  { %v8392_v13 = vpop.f32.mrf.mxu0 }
0x3f77   :  { %v8393_v6 = vadd.f32 %v13898_v10, %v8392_v13 }
0x3f78   :  { %v11259_v33 = vpop.f32.mrf.mxu0 }
0x3f79   :  { %v8396_v17 = vmax.f32 %v8393_v6, 0.0  ;;  %v8652_v62 = vpop.permute.xlu0 %8651 }
0x3f7b   :  { %11280 = vmatmul.mubr.msk.f32.vlgmr.msra.gmra.mxu0 %vm229_vm1, %v8396_v17 }
0x3f7c   :  { %11295 = vmatprep.mubr.msk.f32.mxu0 %vm460_vm2, %v11694_v48 }
0x3fb0   :  { %v8488_v21 = vpop.permute.xlu1 %8487 }
0x3fb1   :  { %v8490_v1 = vmul.f32 %v8488_v21, %v8485_v2 }
0x403b   :  { %v8565_v49 = vpop.f32.mrf.mxu0 }
0x403c   :  { %v8566_v59 = vadd.f32 %v13909_v11, %v8565_v49 }
0x403d   :  { %v11281_v37 = vpop.f32.mrf.mxu0 }
0x403e   :  { %v8643_v47 = vadd.f32 %v8640_v35, %v8566_v59 }
0x4040   :  { %v9804_v31 = vmul.f32 -1.442695, %v8643_v47 }
0x4042   :  { %11526 = vpow2.f32 %v9804_v31 }
0x404f   :  { %v11527_v20 = vpop.eup %11526 }
0x4050   :  { %v8647_v4 = vadd.f32 1.0, %v11527_v20 }
0x4052   :  { %11528 = vrcp.f32 %v8647_v4 }
0x405f   :  { %v11529_v10 = vpop.eup %11528 }
0x4060   :  { %v8654_v23 = vmul.f32 %v11529_v10, %v8652_v62  ;;  %v8661_v63 = vsub.f32 1.0, %v11529_v10  ;;  %v8667_v22 = vmul.f32 %v11529_v10, %v14119_v50 }
0x4062   :  { %8656 = vrot.lane.b32.xlu0 %v8654_v23, %s11935_s22 }
0x4066   :  { %8491 = vrot.lane.b32.xlu0 %v14119_v50, %s11934_s14 }
0x40d4   :  { %v8657_v12 = vpop.permute.xlu0 %8656 }
0x40d5   :  { %v8659_v42 = vadd.f32 %v8657_v12, %v8566_v59  ;;  %v11699_v59 = vld [vmem:[#allocation4 + $0x28] sm:$0xff] }
0x40d7   :  { %11530 = vtanh.f32 %v8659_v42 }
0x40d8   :  { %v8492_v11 = vpop.permute.xlu0 %8491 }
0x40d9   :  { %v8494_v43 = vmul.f32 %v11523_v9, %v8492_v11  ;;  %v11696_v9 = vld [vmem:[%s14489_s6 + $0x90] sm:$0xff] }
0x40db   :  { %v8495_v25 = vadd.f32 %v8494_v43, %v8490_v1 }
0x40dd   :  { %8670 = vrot.lane.b32.xlu0 %v8495_v25, %s11933_s30 }
0x40e4   :  { %v11531_v45 = vpop.eup %11530 }
0x40e5   :  { %8663 = vrot.lane.b32.xlu1 %v11531_v45, %s11933_s30 }
0x414f   :  { %v8671_v61 = vpop.permute.xlu0 %8670 }
0x4157   :  { %v8664_v0 = vpop.permute.xlu1 %8663 }
0x4158   :  { %v8666_v60 = vmul.f32 %v8664_v0, %v8661_v63 }
0x415a   :  { %v8668_v24 = vadd.f32 %v8667_v22, %v8666_v60 }
0x415c   :  { %v8673_v7 = vsel %vm229_vm1, %v8671_v61, %v8668_v24 }
0x415d   :  { %v8674_v38 = vsub.f32 %v8673_v7, %v14119_v50  ;;  %v11697_v50 = vld [vmem:[%s14489_s6 + $0x98] sm:$0xff] }
0x415f   :  { %11293 = vmatprep.subr.mxu0 %v8674_v38 }
0x4160   :  { %11294 = vmatpush3.msra.mxu0 %v8674_v38  ;;  %v9821_v38 = vld [vmem:[%s14418_s18] ss:$0 sm:$0xff] }
0x4161   :  { %11296 = vmatmul.mubr.msk.f32.vlgmr.msra.gmra.mxu0 %vm460_vm2, %v11695_v8  ;;  %11301 = vmatprep.subr.mxu0 %v14509_v5 }
0x4162   :  { %11298 = vmatprep.mubr.msk.f32.mxu0 %vm460_vm2, %v11696_v9 }
0x4165   :  { %11299 = vmatmul.mubr.msk.f32.gmra.mxu0 %vm460_vm2, %v11697_v50 }
0x4166   :  { %11309 = vmatprep.mubr.msk.f32.mxu0 %vm11931_vm0, %v14509_v5 }
0x4221   :  { %v11297_v55 = vpop.f32.mrf.mxu0 }
0x4222   :  { %v14227_v32 = vadd.f32 %v11297_v55, %v14105_v26 }
0x4223   :  { %v8741_v58 = vpop.f32.mrf.mxu0 }
0x4224   :  { %v14232_v46 = vadd.f32 %v8741_v58, %v14110_v34  ;;  %v14541_v34 = vld [vmem:[#allocation32_spill] sm:$0xff] }
0x4225   :  { %v11300_v30 = vpop.f32.mrf.mxu0 }
0x4226   :  { %v14219_v35 = vadd.f32 %v11300_v30, %v14097_v3  ;;  %v11698_v3 = vld [vmem:[#allocation8 + $0x28] sm:$0xff] }
0x4227   :  { %v8751_v18 = vpop.f32.mrf.mxu0 }
0x4228   :  { %v14222_v41 = vadd.f32 %v8751_v18, %v14100_v15  ;;  %11302 = vmatpush3.msra.mxu0 %v14219_v35 }
0x4229   :  { %11303 = vmatprep.subr.mxu0 %v14509_v5 }
0x422a   :  { %11304 = vmatpush3.msra.mxu0 %v14222_v41 }
0x422b   :  { %11305 = vmatprep.subr.mxu0 %v14509_v5 }
0x422c   :  { %11306 = vmatpush3.msra.mxu0 %v14227_v32 }
0x422d   :  { %11307 = vmatprep.subr.mxu0 %v14509_v5 }
0x422e   :  { %11308 = vmatpush3.msra.mxu0 %v14232_v46 }
0x422f   :  { %11310 = vmatmul.mubr.msk.f32.vlgmr.msra.gmra.mxu0 %vm229_vm1, %v11698_v3  ;;  %11323 = vmatprep.subr.mxu0 %v14509_v5 }
0x4230   :  { %11325 = vmatprep.mubr.msk.f32.mxu0 %vm11931_vm0, %v14509_v5 }
0x42ef   :  { %v14241_v15 = vpop.f32.mrf.mxu0 }
0x42f0   :  { %11321 = vmatmul.mubr.msk.f32.vlgmr.msra.gmra.mxu1 %vm229_vm1, %v14241_v15 }
0x42f1   :  { %11329 = vmatpush3.msra.mxu1 %v13965_v56  ;;  %v11311_v26 = vpop.f32.mrf.mxu0  ;;  %11336 = vmatprep.mubr.msk.f32.mxu1 %vm11931_vm0, %v14509_v5 }
0x42f2   :  { %11330 = vmatprep.subr.mxu1 %v14509_v5  ;;  %v11701_v26 = vld [vmem:[%s14489_s6 + $0xa8] sm:$0xff] }
0x42f3   :  { %11331 = vmatpush3.msra.mxu1 %v13974_v54 }
0x42f4   :  { %11332 = vmatprep.subr.mxu1 %v14509_v5 }
0x42f5   :  { %11333 = vmatpush3.msra.mxu1 %v13981_v52 }
0x42f6   :  { %11334 = vmatprep.subr.mxu1 %v14509_v5 }
0x42f7   :  { %11335 = vmatpush3.msra.mxu1 %v13988_v36 }
0x42f8   :  { %11337 = vmatmul.mubr.msk.f32.vlgmr.msra.gmra.mxu1 %vm229_vm1, %v14241_v15  ;;  %11350 = vmatprep.subr.mxu1 %v14509_v5 }
0x42f9   :  { %11351 = vmatpush3.msra.mxu1 %v13994_v39  ;;  %11358 = vmatprep.mubr.msk.f32.mxu1 %vm11931_vm0, %v14509_v5 }
0x42fa   :  { %11352 = vmatprep.subr.mxu1 %v14509_v5 }
0x42fb   :  { %11353 = vmatpush3.msra.mxu1 %v14000_v53 }
0x42fc   :  { %11354 = vmatprep.subr.mxu1 %v14509_v5 }
0x42fd   :  { %11355 = vmatpush3.msra.mxu1 %v14004_v40 }
0x42fe   :  { %11356 = vmatprep.subr.mxu1 %v14509_v5 }
0x42ff   :  { %11357 = vmatpush3.msra.mxu1 %v14008_v28  ;;  %v14542_v28 = vld [vmem:[#allocation33_spill] sm:$0xff] }
0x43b0   :  { %v8903_v56 = vpop.f32.mrf.mxu1 }
0x43b1   :  { %8908 = vrot.lane.b32.xlu1 %v8903_v56, %s11934_s14  ;;  %v11702_v56 = vld [vmem:[%s14489_s6 + $0xb0] sm:$0xff] }
0x43b2   :  { %v11322_v54 = vpop.f32.mrf.mxu1 }
0x43b3   :  { %v11703_v54 = vld [vmem:[%s14489_s6 + $0xb8] sm:$0xff] }
0x43b5   :  { %9159 = vrot.lane.b32.xlu1 %v14241_v15, %s11933_s30 }
0x43b8   :  { %v9053_v52 = vpop.f32.mrf.mxu1 }
0x43b9   :  { %v9054_v40 = vadd.f32 %v14017_v19, %v9053_v52 }
0x43ba   :  { %v11338_v36 = vpop.f32.mrf.mxu1 }
0x43bb   :  { %v9057_v6 = vadd.f32 %v9054_v40, %v14542_v28 }
0x43bd   :  { %v9813_v33 = vmul.f32 -1.442695, %v9057_v6 }
0x43bf   :  { %11532 = vpow2.f32 %v9813_v33 }
0x43cc   :  { %v11533_v17 = vpop.eup %11532 }
0x43cd   :  { %v9061_v48 = vadd.f32 1.0, %v11533_v17 }
0x43cf   :  { %11534 = vrcp.f32 %v9061_v48 }
0x43dc   :  { %v11535_v19 = vpop.eup %11534 }
0x43dd   :  { %v9075_v22 = vsub.f32 1.0, %v11535_v19 }
0x4423   :  { %v8909_v39 = vpop.permute.xlu1 %8908 }
0x4424   :  { %v8911_v53 = vadd.f32 %v8909_v39, %v14541_v34 }
0x4426   :  { %8913 = vrot.lane.b32.xlu0 %v8911_v53, %s11933_s30 }
0x4427   :  { %v9160_v13 = vpop.permute.xlu1 %9159 }
0x4428   :  { %11359 = vmatmul.mubr.msk.f32.vlgmr.msra.gmra.mxu1 %vm229_vm1, %v9160_v13 }
0x442a   :  { %9065 = vrot.lane.b32.xlu0 %v9054_v40, %s11935_s22 }
0x4498   :  { %v8914_v49 = vpop.permute.xlu0 %8913 }
0x4499   :  { %11324 = vmatpush3.msra.mxu0 %v8914_v49 }
0x449a   :  { %11326 = vmatmul.mubr.msk.f32.vlgmr.msra.gmra.mxu0 %vm460_vm2, %v11699_v59  ;;  %11339 = vmatprep.subr.mxu0 %v14509_v5 }
0x449b   :  { %11340 = vmatpush3.msra.mxu0 %v14035_v44  ;;  %11347 = vmatprep.mubr.msk.f32.mxu0 %vm11931_vm0, %v14509_v5 }
0x449c   :  { %v9066_v37 = vpop.permute.xlu0 %9065  ;;  %11341 = vmatprep.subr.mxu0 %v14509_v5 }
0x449d   :  { %v9068_v47 = vmul.f32 %v11535_v19, %v9066_v37  ;;  %11342 = vmatpush3.msra.mxu0 %v14041_v27 }
0x449e   :  { %11343 = vmatprep.subr.mxu0 %v14509_v5 }
0x449f   :  { %9070 = vrot.lane.b32.xlu0 %v9068_v47, %s11935_s22  ;;  %11344 = vmatpush3.msra.mxu0 %v14046_v57  ;;  %v9829_v47 = vld [vmem:[%s14420_s20] ss:$0 sm:$0xff] }
0x44a0   :  { %11345 = vmatprep.subr.mxu0 %v14509_v5 }
0x44a1   :  { %11346 = vmatpush3.msra.mxu0 %v14050_v51  ;;  %v11700_v51 = vld [vmem:[%s14489_s6 + $0xa0] sm:$0xff] }
0x44e8   :  { %v9229_v44 = vpop.f32.mrf.mxu1 }
0x44e9   :  { %v9230_v31 = vadd.f32 %v14053_v29, %v9229_v44 }
0x44ea   :  { %v11360_v20 = vpop.f32.mrf.mxu1 }
0x44eb   :  { %9241 = vrot.lane.b32.xlu1 %v9230_v31, %s11935_s22 }
0x4511   :  { %v9071_v4 = vpop.permute.xlu0 %9070 }
0x4512   :  { %v9073_v10 = vadd.f32 %v9071_v4, %v14542_v28 }
0x4514   :  { %11536 = vtanh.f32 %v9073_v10 }
0x4521   :  { %v11537_v27 = vpop.eup %11536 }
0x4522   :  { %9077 = vrot.lane.b32.xlu0 %v11537_v27, %s11933_s30 }
0x455a   :  { %v8982_v62 = vpop.f32.mrf.mxu0 }
0x455b   :  { %v8983_v57 = vadd.f32 %v14059_v16, %v8982_v62 }
0x455c   :  { %v11327_v23 = vpop.f32.mrf.mxu0 }
0x455d   :  { %v8986_v5 = vmax.f32 %v8983_v57, 0.0  ;;  %v9242_v43 = vpop.permute.xlu1 %9241 }
0x455f   :  { %11348 = vmatmul.mubr.msk.f32.vlgmr.msra.gmra.mxu0 %vm229_vm1, %v8986_v5  ;;  %v9822_v5 = vld [vmem:[#allocation2] ss:$0 sm:$0xff] }
0x4560   :  { %11363 = vmatprep.mubr.msk.f32.mxu0 %vm460_vm2, %v11700_v51 }
0x4594   :  { %v9078_v0 = vpop.permute.xlu0 %9077 }
0x4595   :  { %v9080_v60 = vmul.f32 %v9078_v0, %v9075_v22  ;;  %v9831_v0 = vld [vmem:[#allocation3] ss:$0 sm:$0xff] }
0x461f   :  { %v9155_v29 = vpop.f32.mrf.mxu0 }
0x4620   :  { %v9156_v12 = vadd.f32 %v14070_v14, %v9155_v29 }
0x4621   :  { %v11349_v42 = vpop.f32.mrf.mxu0 }
0x4622   :  { %v9233_v21 = vadd.f32 %v9230_v31, %v9156_v12 }
0x4624   :  { %v9816_v2 = vmul.f32 -1.442695, %v9233_v21 }
0x4626   :  { %11538 = vpow2.f32 %v9816_v2 }
0x4633   :  { %v11539_v11 = vpop.eup %11538 }
0x4634   :  { %v9237_v1 = vadd.f32 1.0, %v11539_v11 }
0x4636   :  { %11540 = vrcp.f32 %v9237_v1 }
0x4643   :  { %v11541_v16 = vpop.eup %11540 }
0x4644   :  { %v9244_v25 = vmul.f32 %v11541_v16, %v9242_v43  ;;  %v9251_v8 = vsub.f32 1.0, %v11541_v16  ;;  %v9257_v50 = vmul.f32 %v11541_v16, %v14241_v15 }
0x4646   :  { %9246 = vrot.lane.b32.xlu1 %v9244_v25, %s11935_s22 }
0x464a   :  { %9081 = vrot.lane.b32.xlu1 %v14241_v15, %s11934_s14 }
0x46b8   :  { %v9247_v45 = vpop.permute.xlu1 %9246 }
0x46b9   :  { %v9249_v63 = vadd.f32 %v9247_v45, %v9156_v12 }
0x46bb   :  { %11542 = vtanh.f32 %v9249_v63 }
0x46bc   :  { %v9082_v14 = vpop.permute.xlu1 %9081 }
0x46bd   :  { %v9084_v24 = vmul.f32 %v11535_v19, %v9082_v14  ;;  %v9830_v19 = vld [vmem:[%s14421_s21] ss:$0 sm:$0xff] }
0x46bf   :  { %v9085_v61 = vadd.f32 %v9084_v24, %v9080_v60 }
0x46c1   :  { %9260 = vrot.lane.b32.xlu1 %v9085_v61, %s11933_s30 }
0x46c8   :  { %v11543_v7 = vpop.eup %11542 }
0x46c9   :  { %9253 = vrot.lane.b32.xlu0 %v11543_v7, %s11933_s30 }
0x46cd   :  { %9384 = vrot.lane.b32.xlu0 %v9821_v38, %s11934_s14 }
0x4733   :  { %v9261_v30 = vpop.permute.xlu1 %9260 }
0x473b   :  { %v9254_v9 = vpop.permute.xlu0 %9253 }
0x473c   :  { %v9256_v55 = vmul.f32 %v9254_v9, %v9251_v8 }
0x473e   :  { %v9258_v58 = vadd.f32 %v9257_v50, %v9256_v55 }
0x473f   :  { %v9385_v36 = vpop.permute.xlu0 %9384 }
0x4740   :  { %v9263_v18 = vsel %vm229_vm1, %v9261_v30, %v9258_v58 }
0x4741   :  { %v9264_v3 = vsub.f32 %v9263_v18, %v14241_v15  ;;  %v9459_v15 = vld [vmem:[#allocation11] sm:$0xff] }
0x4743   :  { %11361 = vmatprep.subr.mxu0 %v9264_v3 }
0x4744   :  { %11362 = vmatpush3.msra.mxu0 %v9264_v3 }
0x4745   :  { %11364 = vmatmul.mubr.msk.f32.vlgmr.msra.gmra.mxu0 %vm460_vm2, %v11701_v26 }
0x4746   :  { %11366 = vmatprep.mubr.msk.f32.mxu0 %vm460_vm2, %v11702_v56 }
0x4749   :  { %11367 = vmatmul.mubr.msk.f32.gmra.mxu0 %vm460_vm2, %v11703_v54 }
0x474a   :  { %11377 = vmatprep.mubr.msk.f32.mxu0 %vm229_vm1, %v9459_v15 }
0x4805   :  { %v11365_v52 = vpop.f32.mrf.mxu0 }
0x4806   :  { %v9351_v39 = vadd.f32 %v11365_v52, %v14227_v32 }
0x4807   :  { %v9331_v34 = vpop.f32.mrf.mxu0 }
0x4808   :  { %9355 = vst.msk [vmem:[%s14422_s23 + $0x8] sm:$0xff] %vm229_vm1, %v9351_v39  ;;  %v9388_v53 = vmul.f32 %v9385_v36, %v9351_v39  ;;  %v9350_v13 = vadd.f32 %v9331_v34, %v14232_v46 }
0x4809   :  { %v11368_v40 = vpop.f32.mrf.mxu0 }
0x480a   :  { %9354 = vst.msk [vmem:[%s14422_s23] sm:$0xff] %vm229_vm1, %v9350_v13  ;;  %v9353_v28 = vadd.f32 %v11368_v40, %v14219_v35  ;;  %9397 = vrot.lane.b32.xlu0 %v9388_v53, %s11933_s30  ;;  %v9387_v32 = vmul.f32 %v9385_v36, %v9350_v13 }
0x480b   :  { %v9341_v6 = vpop.f32.mrf.mxu0 }
0x480c   :  { %9357 = vst.msk [vmem:[%s14422_s23 + $0x18] sm:$0xff] %vm229_vm1, %v9353_v28  ;;  %v9352_v33 = vadd.f32 %v9341_v6, %v14222_v41  ;;  %9395 = vrot.lane.b32.xlu1 %v9387_v32, %s11933_s30  ;;  %11369 = vmatprep.subr.mxu0 %v9353_v28  ;;  %v9390_v46 = vmul.f32 %v9385_v36, %v9353_v28  ;;  %v9460_v41 = vld [vmem:[#allocation11 + $0x8] sm:$0xff] }
0x480d   :  { %11370 = vmatpush3.msra.mxu0 %v9353_v28 }
0x480e   :  { %9356 = vst.msk [vmem:[%s14422_s23 + $0x10] sm:$0xff] %vm229_vm1, %v9352_v33  ;;  %9401 = vrot.lane.b32.xlu0 %v9390_v46, %s11933_s30  ;;  %11371 = vmatprep.subr.mxu0 %v9352_v33  ;;  %v9389_v35 = vmul.f32 %v9385_v36, %v9352_v33 }
0x480f   :  { %11372 = vmatpush3.msra.mxu0 %v9352_v33 }
0x4810   :  { %11373 = vmatprep.subr.mxu0 %v9351_v39  ;;  %9399 = vrot.lane.b32.xlu1 %v9389_v35, %s11933_s30 }
0x4811   :  { %11374 = vmatpush3.msra.mxu0 %v9351_v39 }
0x4812   :  { %11375 = vmatprep.subr.mxu0 %v9350_v13 }
0x4813   :  { %11376 = vmatpush3.msra.mxu0 %v9350_v13 }
0x4814   :  { %11378 = vmatmul.mubr.msk.f32.vlgmr.msra.gmra.mxu0 %vm229_vm1, %v9460_v41 }
0x487c   :  { %v9398_v17 = vpop.permute.xlu0 %9397 }
0x487d   :  { %v9410_v48 = vsel %vm229_vm1, %v9398_v17, 0.0 }
0x487e   :  { %v9396_v49 = vpop.permute.xlu1 %9395  ;;  %9411 = vadd.xlane.f32.xlu1 %v9410_v48 }
0x487f   :  { %v9407_v59 = vsel %vm229_vm1, %v9396_v49, 0.0 }
0x4880   :  { %9408 = vadd.xlane.f32.xlu0 %v9407_v59  ;;  %v9402_v62 = vpop.permute.xlu0 %9401 }
0x4881   :  { %v9416_v23 = vsel %vm229_vm1, %v9402_v62, 0.0 }
0x4882   :  { %v9400_v10 = vpop.permute.xlu1 %9399 }
0x4883   :  { %v9413_v57 = vsel %vm229_vm1, %v9400_v10, 0.0 }
0x48d4   :  { %v11379_v37 = vpop.f32.mrf.mxu0 }
0x48d5   :  { %v9560_v44 = vmul.f32 %v11379_v37, %v9830_v19 }
0x48d6   :  { %v9533_v31 = vpop.f32.mrf.mxu0 }
0x48d7   :  { %v9549_v20 = vmul.f32 %v9829_v47, %v9533_v31  ;;  %v9561_v4 = vsel %vm229_vm1, %v9560_v44, 0.0 }
0x48d8   :  { %9562 = vadd.xlane.f32.xlu0 %v9561_v4 }
0x48d9   :  { %v9550_v27 = vsel %vm229_vm1, %v9549_v20, 0.0 }
0x48da   :  { %9551 = vadd.xlane.f32.xlu1 %v9550_v27 }
0x48dc   :  { %9414 = vadd.xlane.f32.xlu0 %v9413_v57 }
0x48de   :  { %9417 = vadd.xlane.f32.xlu1 %v9416_v23 }
0x48ef   :  { %9364 = vrot.lane.b32.xlu1 %v9351_v39, %s11933_s30 }
0x48f2   :  { %9362 = vrot.lane.b32.xlu0 %v9350_v13, %s11933_s30 }
0x48f3   :  { %9366 = vrot.lane.b32.xlu1 %v9352_v33, %s11933_s30 }
0x48f6   :  { %9368 = vrot.lane.b32.xlu0 %v9353_v28, %s11933_s30 }
0x4907   :  { %v9412_v51 = vpop.xlane.xlu1 %9411 }
0x4908   :  { %v9427_v29 = vadd.f32 %v9822_v5, %v9412_v51 }
0x4909   :  { %v9409_v12 = vpop.xlane.xlu0 %9408 }
0x490a   :  { %v9824_v42 = vmul.f32 -1.442695, %v9427_v29  ;;  %v9426_v21 = vadd.f32 %v9822_v5, %v9409_v12 }
0x490c   :  { %11544 = vpow2.f32 %v9824_v42  ;;  %v9823_v2 = vmul.f32 -1.442695, %v9426_v21 }
0x490e   :  { %11546 = vpow2.f32 %v9823_v2 }
0x4919   :  { %v11545_v11 = vpop.eup %11544 }
0x491a   :  { %v9443_v1 = vadd.f32 1.0, %v11545_v11 }
0x491b   :  { %v11547_v16 = vpop.eup %11546 }
0x491c   :  { %11548 = vrcp.f32 %v9443_v1  ;;  %v9442_v43 = vadd.f32 1.0, %v11547_v16 }
0x491e   :  { %11550 = vrcp.f32 %v9442_v43 }
0x4929   :  { %v11549_v25 = vpop.eup %11548 }
0x492a   :  { %9456 = vst.msk [vmem:[%s14424_s25 + $0x8] sm:$0xff] %vm9454_vm3, %v11549_v25 }
0x492b   :  { %v11551_v45 = vpop.eup %11550 }
0x492c   :  { %9455 = vst.msk [vmem:[%s14424_s25] sm:$0xff] %vm9454_vm3, %v11551_v45 }
0x4961   :  { %v9563_v63 = vpop.xlane.xlu0 %9562 }
0x4963   :  { %v9552_v22 = vpop.xlane.xlu1 %9551 }
0x4964   :  { %v9564_v14 = vadd.f32 %v9563_v63, %v9552_v22 }
0x4965   :  { %v9415_v60 = vpop.xlane.xlu0 %9414 }
0x4966   :  { %v9572_v24 = vadd.f32 %v9831_v0, %v9564_v14  ;;  %v9428_v61 = vadd.f32 %v9822_v5, %v9415_v60 }
0x4967   :  { %v9418_v7 = vpop.xlane.xlu1 %9417 }
0x4968   :  { %v9832_v38 = vmul.f32 -1.442695, %v9572_v24  ;;  %v9825_v8 = vmul.f32 -1.442695, %v9428_v61  ;;  %v9429_v9 = vadd.f32 %v9822_v5, %v9418_v7 }
0x4969   :  { %v9363_v50 = vpop.permute.xlu0 %9362 }
0x496a   :  { %11552 = vpow2.f32 %v9832_v38  ;;  %v9826_v55 = vmul.f32 -1.442695, %v9429_v9  ;;  %9374 = vst.msk [vmem:[%s14423_s24] sm:$0xff] %vm229_vm1, %v9363_v50 }
0x496b   :  { %11554 = vpow2.f32 %v9825_v8  ;;  %v9365_v58 = vpop.permute.xlu1 %9364 }
0x496c   :  { %11556 = vpow2.f32 %v9826_v55  ;;  %9375 = vst.msk [vmem:[%s14423_s24 + $0x8] sm:$0xff] %vm229_vm1, %v9365_v58 }
0x496d   :  { %v9369_v30 = vpop.permute.xlu0 %9368 }
0x496e   :  { %9377 = vst.msk [vmem:[%s14423_s24 + $0x18] sm:$0xff] %vm229_vm1, %v9369_v30 }
0x496f   :  { %v9367_v18 = vpop.permute.xlu1 %9366 }
0x4970   :  { %9376 = vst.msk [vmem:[%s14423_s24 + $0x10] sm:$0xff] %vm229_vm1, %v9367_v18 }
0x4977   :  { %v11553_v3 = vpop.eup %11552 }
0x4978   :  { %v11555_v26 = vpop.eup %11554  ;;  %v9576_v56 = vadd.f32 1.0, %v11553_v3 }
0x4979   :  { %v11557_v54 = vpop.eup %11556  ;;  %v9444_v15 = vadd.f32 1.0, %v11555_v26 }
0x497a   :  { %11558 = vrcp.f32 %v9576_v56  ;;  %v9445_v52 = vadd.f32 1.0, %v11557_v54 }
0x497b   :  { %11560 = vrcp.f32 %v9444_v15 }
0x497c   :  { %11562 = vrcp.f32 %v9445_v52 }
0x4987   :  { %v11559_v36 = vpop.eup %11558 }
0x4988   :  { %v11561_v39 = vpop.eup %11560  ;;  %9579 = vst.msk [vmem:[%s14425_s26] sm:$0xff] %vm9454_vm3, %v11559_v36 }
0x4989   :  { %v11563_v34 = vpop.eup %11562  ;;  %9457 = vst.msk [vmem:[%s14424_s25 + $0x10] sm:$0xff] %vm9454_vm3, %v11561_v39 }
0x498a   :  { %9458 = vst.msk [vmem:[%s14424_s25 + $0x18] sm:$0xff] %vm9454_vm3, %v11563_v34 }
0x498b   :  { %9596 = vsyncpa [#allocation5], 1 }
0x498c   :  { %9597 = vsyncpa [#allocation7], 1 }
0x498d   :  { %9598 = vsyncpa [#allocation10], 1 }
0x498e   :  { %9599 = vsyncpa [#allocation13], 1 }
0x498f   :  { %9600 = vsyncpa [#allocation16], 1 }
0x4990   :  { %9601 = vsyncpa [#allocation19], 1 }

</bundles_post_ra>
